<compile_context>
chip_gen: v7x
topology: tpu7x:2x2x1
jax: 0.10.0
libtpu: 0.0.40
codegen_flags: <defaults>
</compile_context>

<pallas_src>
import jax
import jax.numpy as jnp
from jax.experimental import pallas as pl
from jax.experimental.pallas import tpu as pltpu


# ----------------------------------------------------------------------------
# In-kernel helpers (operate on VMEM values)
# ----------------------------------------------------------------------------
def _pad_hw(x, ph_lo, ph_hi, pw_lo, pw_hi):
    """Zero-pad an (N, H, W, C) value along H and W via concatenation."""
    n, h, w, c = x.shape
    dt = x.dtype
    parts = [jnp.zeros((n, h, pw_lo, c), dt), x, jnp.zeros((n, h, pw_hi, c), dt)]
    xw = jnp.concatenate(parts, axis=2)
    wp = w + pw_lo + pw_hi
    parts = [jnp.zeros((n, ph_lo, wp, c), dt), xw, jnp.zeros((n, ph_hi, wp, c), dt)]
    return jnp.concatenate(parts, axis=1)


def _im2col(xp, kh, kw, ho, wo):
    """xp: (N, Hp, Wp, C) zero-padded input -> (N*ho*wo, kh*kw*C) im2col.

    Columns are ordered (ki, kj, c), matching HWIO-flattened conv weights.
    Built with kw + kh window slices and two lane-dim concatenations; the final
    reshape only merges leading dims into an 8-aligned second-minor dim.
    """
    n, _, _, c = xp.shape
    xw = jnp.concatenate([xp[:, :, kj:kj + wo, :] for kj in range(kw)], axis=3)
    xh = jnp.concatenate([xw[:, ki:ki + ho, :, :] for ki in range(kh)], axis=3)
    return xh.reshape(n * ho * wo, kh * kw * c)


def _maxpool_2x2(act, wo_valid=None):
    """2x2/2 max pool of (N, H, W, C); only the first `wo_valid` output columns
    are produced (defaults to W//2)."""
    n, h, w, c = act.shape
    wo = (w // 2) if wo_valid is None else wo_valid
    a = act.reshape(n, h // 2, 2, w, c)              # leading-dim split: free
    hm = jnp.maximum(a[:, :, 0], a[:, :, 1])         # (N, H/2, W, C) one VPU max
    cols = [jnp.maximum(hm[:, :, 2 * j:2 * j + 1, :],
                        hm[:, :, 2 * j + 1:2 * j + 2, :]) for j in range(wo)]
    return jnp.concatenate(cols, axis=2) if wo > 1 else cols[0]


# ----------------------------------------------------------------------------
# Fused forward-pass kernel
# ----------------------------------------------------------------------------
def _cnn_kernel(x_ref,
                w1_ref, b1_ref, w2_ref, b2_ref, w3_ref, b3_ref,
                f1w_ref, f1b_ref, f2w_ref, f2b_ref, f3w_ref, f3b_ref,
                out_ref):
    f32, bf16 = jnp.float32, jnp.bfloat16
    n = x_ref.shape[0]

    def mm(a, w_ref):  # bf16 MXU operands, f32 accumulation
        return jnp.dot(a.astype(bf16), w_ref[...], preferred_element_type=f32)

    # ---- conv1: 5x5 / pad 2, 1 -> 32, + ReLU  (one K=25 matmul) -------------
    xp1 = _pad_hw(x_ref[...], 2, 2, 2, 2)                       # (N,20,20,1)
    col1 = _im2col(xp1, 5, 5, 16, 16)                           # (N*256, 25)
    act1 = jnp.maximum(mm(col1, w1_ref) + b1_ref[...], 0.0)     # (N*256, 32)
    act1 = act1.reshape(n, 16, 16, 32)

    # ---- pool1 -> (N,8,8,32) -------------------------------------------------
    p1 = _maxpool_2x2(act1)

    # ---- conv2: 5x5 / pad 2, 32 -> 64, + ReLU  (one K=800 matmul) -----------
    xp2 = _pad_hw(p1, 2, 2, 2, 2)                               # (N,12,12,32)
    col2 = _im2col(xp2, 5, 5, 8, 8)                             # (N*64, 800)
    act2 = jnp.maximum(mm(col2, w2_ref) + b2_ref[...], 0.0)     # (N*64, 64)
    act2 = act2.reshape(n, 8, 8, 64)

    # ---- pool2 -> (N,4,4,64) -------------------------------------------------
    p2 = _maxpool_2x2(act2)

    # ---- conv3: 3x3 / pad 1, 64 -> 128, + ReLU  (one K=576 matmul) ----------
    # Output W is padded 4 -> 8 (extra right-side zeros) so every reshape stays
    # sublane-aligned; columns 4..7 are garbage and are never read by pool3.
    xp3 = _pad_hw(p2, 1, 1, 1, 5)                               # (N,6,10,64)
    col3 = _im2col(xp3, 3, 3, 4, 8)                             # (N*32, 576)
    act3 = jnp.maximum(mm(col3, w3_ref) + b3_ref[...], 0.0)     # (N*32, 128)
    act3 = act3.reshape(n, 4, 8, 128)

    # ---- pool3 -> (N,2,2,128)  (only valid columns 0..3 are read) -----------
    p3 = _maxpool_2x2(act3, wo_valid=2)

    # ---- flatten (h, w, c) + batched fc1/fc2/fc3 -----------------------------
    feat = jnp.concatenate([p3[:, 0, 0, :], p3[:, 0, 1, :],
                            p3[:, 1, 0, :], p3[:, 1, 1, :]], axis=1)  # (N, 512)
    h1 = jnp.maximum(mm(feat, f1w_ref) + f1b_ref[...], 0.0)           # (N, 128)
    h2 = jnp.maximum(mm(h1, f2w_ref) + f2b_ref[...], 0.0)             # (N, 64)
    out_ref[...] = mm(h2, f3w_ref) + f3b_ref[...]                     # (N, 10)


# ----------------------------------------------------------------------------
# Wrapper: PyTorch-layout params -> kernel layout, one pallas_call
# ----------------------------------------------------------------------------
def _to_kernel_params(params):
    bf16 = jnp.bfloat16

    def conv_w(w):       # (O, I, KH, KW) -> (KH*KW*I, O), rows = (ki, kj, cin)
        o, i, kh, kw = w.shape
        return w.transpose(2, 3, 1, 0).reshape(kh * kw * i, o).astype(bf16)

    def lin_w(w):        # (out, in) -> (in, out)
        return w.T.astype(bf16)

    def row(b):
        return b.reshape(1, -1).astype(jnp.float32)

    # fc1: PyTorch flattens CHW; the kernel flattens HWC -> permute rows.
    f1 = (params["fc1_w"].reshape(128, 128, 2, 2)   # (out, c, h, w)
          .transpose(2, 3, 1, 0)                    # (h, w, c, out)
          .reshape(512, 128).astype(bf16))

    return (conv_w(params["conv1_w"]), row(params["conv1_b"]),
            conv_w(params["conv2_w"]), row(params["conv2_b"]),
            conv_w(params["conv3_w"]), row(params["conv3_b"]),
            f1, row(params["fc1_b"]),
            lin_w(params["fc2_w"]), row(params["fc2_b"]),
            lin_w(params["fc3_w"]), row(params["fc3_b"]))


def cnn_forward(params, x_nchw):
    n = x_nchw.shape[0]
    x = jnp.transpose(x_nchw, (0, 2, 3, 1)).astype(jnp.float32)   # NCHW -> NHWC
    inputs = (x,) + _to_kernel_params(params)

    def full_spec(a):
        nd = a.ndim
        return pl.BlockSpec(a.shape, lambda *_: (0,) * nd)

    return pl.pallas_call(
        _cnn_kernel,
        out_shape=jax.ShapeDtypeStruct((n, 10), jnp.float32),
        grid=(1,),
        in_specs=[full_spec(a) for a in inputs],
        out_specs=pl.BlockSpec((n, 10), lambda *_: (0, 0)),
        compiler_params=pltpu.CompilerParams(
            dimension_semantics=("arbitrary",)),
    )(*inputs)


# ----------------------------------------------------------------------------
# Parameters (deterministic, synthetic, native PyTorch layouts)
# ----------------------------------------------------------------------------
def init_params(key):
    def uinit(k, shape, fan_in):
        bound = 1.0 / jnp.sqrt(jnp.float32(fan_in))
        return jax.random.uniform(k, shape, jnp.float32, -bound, bound)

    ks = jax.random.split(key, 12)
    return {
        "conv1_w": uinit(ks[0], (32, 1, 5, 5), 1 * 25),
        "conv1_b": uinit(ks[1], (32,), 1 * 25),
        "conv2_w": uinit(ks[2], (64, 32, 5, 5), 32 * 25),
        "conv2_b": uinit(ks[3], (64,), 32 * 25),
        "conv3_w": uinit(ks[4], (128, 64, 3, 3), 64 * 9),
        "conv3_b": uinit(ks[5], (128,), 64 * 9),
        "fc1_w": uinit(ks[6], (128, 512), 512),
        "fc1_b": uinit(ks[7], (128,), 512),
        "fc2_w": uinit(ks[8], (64, 128), 128),
        "fc2_b": uinit(ks[9], (64,), 128),
        "fc3_w": uinit(ks[10], (10, 64), 64),
        "fc3_b": uinit(ks[11], (10,), 64),
    }


if __name__ == "__main__":
    key = jax.random.PRNGKey(0)
    kp, kx = jax.random.split(key)
    params = init_params(kp)

    # Input: batch=2, channels=1, spatial=16 (16 -> 8 -> 4 -> 2, so fc1 in = 128*2*2)
    x = jax.random.normal(kx, (2, 1, 16, 16), dtype=jnp.float32)

    logits = jax.jit(cnn_forward)(params, x)
    jax.block_until_ready(logits)
    assert logits.shape == (2, 10)
    assert bool(jnp.all(jnp.isfinite(logits)))
    print("KERNEL_OK")
</pallas_src>

<mosaic_0001>
module attributes {stable_mosaic.version = 11 : i64} {
  func.func @_cnn_kernel(%arg0: i32, %arg1: memref<2x16x16x1xf32, #tpu.memory_space<vmem>>, %arg2: memref<25x32xbf16, #tpu.memory_space<vmem>>, %arg3: memref<1x32xf32, #tpu.memory_space<vmem>>, %arg4: memref<800x64xbf16, #tpu.memory_space<vmem>>, %arg5: memref<1x64xf32, #tpu.memory_space<vmem>>, %arg6: memref<576x128xbf16, #tpu.memory_space<vmem>>, %arg7: memref<1x128xf32, #tpu.memory_space<vmem>>, %arg8: memref<512x128xbf16, #tpu.memory_space<vmem>>, %arg9: memref<1x128xf32, #tpu.memory_space<vmem>>, %arg10: memref<128x64xbf16, #tpu.memory_space<vmem>>, %arg11: memref<1x64xf32, #tpu.memory_space<vmem>>, %arg12: memref<64x10xbf16, #tpu.memory_space<vmem>>, %arg13: memref<1x10xf32, #tpu.memory_space<vmem>>, %arg14: memref<2x10xf32, #tpu.memory_space<vmem>>) attributes {dimension_semantics = [#tpu.dimension_semantics<arbitrary>], iteration_bounds = array<i64: 1>, scalar_prefetch = 0 : i64, scratch_operands = 0 : i64, tpu.core_type = #tpu.core_type<tc>, window_params = [{pipeline_mode = #tpu.pipeline_mode<synchronous>, transform_indices = @transform_0, window_bounds = array<i64: 2, 16, 16, 1>}, {pipeline_mode = #tpu.pipeline_mode<synchronous>, transform_indices = @transform_1, window_bounds = array<i64: 25, 32>}, {pipeline_mode = #tpu.pipeline_mode<synchronous>, transform_indices = @transform_2, window_bounds = array<i64: 1, 32>}, {pipeline_mode = #tpu.pipeline_mode<synchronous>, transform_indices = @transform_3, window_bounds = array<i64: 800, 64>}, {pipeline_mode = #tpu.pipeline_mode<synchronous>, transform_indices = @transform_4, window_bounds = array<i64: 1, 64>}, {pipeline_mode = #tpu.pipeline_mode<synchronous>, transform_indices = @transform_5, window_bounds = array<i64: 576, 128>}, {pipeline_mode = #tpu.pipeline_mode<synchronous>, transform_indices = @transform_6, window_bounds = array<i64: 1, 128>}, {pipeline_mode = #tpu.pipeline_mode<synchronous>, transform_indices = @transform_7, window_bounds = array<i64: 512, 128>}, {pipeline_mode = #tpu.pipeline_mode<synchronous>, transform_indices = @transform_8, window_bounds = array<i64: 1, 128>}, {pipeline_mode = #tpu.pipeline_mode<synchronous>, transform_indices = @transform_9, window_bounds = array<i64: 128, 64>}, {pipeline_mode = #tpu.pipeline_mode<synchronous>, transform_indices = @transform_10, window_bounds = array<i64: 1, 64>}, {pipeline_mode = #tpu.pipeline_mode<synchronous>, transform_indices = @transform_11, window_bounds = array<i64: 64, 10>}, {pipeline_mode = #tpu.pipeline_mode<synchronous>, transform_indices = @transform_12, window_bounds = array<i64: 1, 10>}, {pipeline_mode = #tpu.pipeline_mode<synchronous>, transform_indices = @transform_13, window_bounds = array<i64: 2, 10>}]} {
    %c0 = arith.constant 0 : index
    %c0_0 = arith.constant 0 : index
    %c0_1 = arith.constant 0 : index
    %c0_2 = arith.constant 0 : index
    %0 = vector.load %arg1[%c0, %c0_0, %c0_1, %c0_2] : memref<2x16x16x1xf32, #tpu.memory_space<vmem>>, vector<2x16x16x1xf32>
    %cst = arith.constant 0.000000e+00 : f32
    %1 = vector.broadcast %cst : f32 to vector<2x16x2x1xf32>
    %cst_3 = arith.constant 0.000000e+00 : f32
    %2 = vector.broadcast %cst_3 : f32 to vector<2x16x2x1xf32>
    %3 = tpu.concatenate %1, %0, %2 in 2 : vector<2x16x2x1xf32>, vector<2x16x16x1xf32>, vector<2x16x2x1xf32> -> vector<2x16x20x1xf32>
    %cst_4 = arith.constant 0.000000e+00 : f32
    %4 = vector.broadcast %cst_4 : f32 to vector<2x2x20x1xf32>
    %cst_5 = arith.constant 0.000000e+00 : f32
    %5 = vector.broadcast %cst_5 : f32 to vector<2x2x20x1xf32>
    %6 = tpu.concatenate %4, %3, %5 in 1 : vector<2x2x20x1xf32>, vector<2x16x20x1xf32>, vector<2x2x20x1xf32> -> vector<2x20x20x1xf32>
    %7 = vector.extract_strided_slice %6 {offsets = [0, 0, 0, 0], sizes = [2, 20, 16, 1], strides = [1, 1, 1, 1]} : vector<2x20x20x1xf32> to vector<2x20x16x1xf32>
    %8 = vector.extract_strided_slice %6 {offsets = [0, 0, 1, 0], sizes = [2, 20, 16, 1], strides = [1, 1, 1, 1]} : vector<2x20x20x1xf32> to vector<2x20x16x1xf32>
    %9 = vector.extract_strided_slice %6 {offsets = [0, 0, 2, 0], sizes = [2, 20, 16, 1], strides = [1, 1, 1, 1]} : vector<2x20x20x1xf32> to vector<2x20x16x1xf32>
    %10 = vector.extract_strided_slice %6 {offsets = [0, 0, 3, 0], sizes = [2, 20, 16, 1], strides = [1, 1, 1, 1]} : vector<2x20x20x1xf32> to vector<2x20x16x1xf32>
    %11 = vector.extract_strided_slice %6 {offsets = [0, 0, 4, 0], sizes = [2, 20, 16, 1], strides = [1, 1, 1, 1]} : vector<2x20x20x1xf32> to vector<2x20x16x1xf32>
    %12 = tpu.concatenate %7, %8, %9, %10, %11 in 3 : vector<2x20x16x1xf32>, vector<2x20x16x1xf32>, vector<2x20x16x1xf32>, vector<2x20x16x1xf32>, vector<2x20x16x1xf32> -> vector<2x20x16x5xf32>
    %13 = vector.extract_strided_slice %12 {offsets = [0, 0, 0, 0], sizes = [2, 16, 16, 5], strides = [1, 1, 1, 1]} : vector<2x20x16x5xf32> to vector<2x16x16x5xf32>
    %14 = vector.extract_strided_slice %12 {offsets = [0, 1, 0, 0], sizes = [2, 16, 16, 5], strides = [1, 1, 1, 1]} : vector<2x20x16x5xf32> to vector<2x16x16x5xf32>
    %15 = vector.extract_strided_slice %12 {offsets = [0, 2, 0, 0], sizes = [2, 16, 16, 5], strides = [1, 1, 1, 1]} : vector<2x20x16x5xf32> to vector<2x16x16x5xf32>
    %16 = vector.extract_strided_slice %12 {offsets = [0, 3, 0, 0], sizes = [2, 16, 16, 5], strides = [1, 1, 1, 1]} : vector<2x20x16x5xf32> to vector<2x16x16x5xf32>
    %17 = vector.extract_strided_slice %12 {offsets = [0, 4, 0, 0], sizes = [2, 16, 16, 5], strides = [1, 1, 1, 1]} : vector<2x20x16x5xf32> to vector<2x16x16x5xf32>
    %18 = tpu.concatenate %13, %14, %15, %16, %17 in 3 : vector<2x16x16x5xf32>, vector<2x16x16x5xf32>, vector<2x16x16x5xf32>, vector<2x16x16x5xf32>, vector<2x16x16x5xf32> -> vector<2x16x16x25xf32>
    %19 = vector.shape_cast %18 : vector<2x16x16x25xf32> to vector<512x25xf32>
    %20 = arith.truncf %19 : vector<512x25xf32> to vector<512x25xbf16>
    %c0_6 = arith.constant 0 : index
    %c0_7 = arith.constant 0 : index
    %21 = vector.load %arg2[%c0_6, %c0_7] : memref<25x32xbf16, #tpu.memory_space<vmem>>, vector<25x32xbf16>
    %cst_8 = arith.constant dense<0.000000e+00> : vector<512x32xf32>
    %22 = tpu.matmul %20, %21, %cst_8 {dimension_numbers = #tpu.dot_dimension_numbers<[1], [0], [0], [1], [0, 0, 1, 1], [], []>} : vector<512x25xbf16>, vector<25x32xbf16>, vector<512x32xf32> -> vector<512x32xf32>
    %c0_9 = arith.constant 0 : index
    %c0_10 = arith.constant 0 : index
    %23 = vector.load %arg3[%c0_9, %c0_10] : memref<1x32xf32, #tpu.memory_space<vmem>>, vector<1x32xf32>
    %24 = vector.broadcast %23 : vector<1x32xf32> to vector<512x32xf32>
    %25 = arith.addf %22, %24 : vector<512x32xf32>
    %cst_11 = arith.constant 0.000000e+00 : f32
    %26 = vector.broadcast %cst_11 : f32 to vector<512x32xf32>
    %27 = arith.maximumf %25, %26 : vector<512x32xf32>
    %28 = vector.shape_cast %27 : vector<512x32xf32> to vector<2x16x16x32xf32>
    %29 = vector.shape_cast %28 : vector<2x16x16x32xf32> to vector<2x8x2x16x32xf32>
    %30 = vector.extract_strided_slice %29 {offsets = [0, 0, 0, 0, 0], sizes = [2, 8, 1, 16, 32], strides = [1, 1, 1, 1, 1]} : vector<2x8x2x16x32xf32> to vector<2x8x1x16x32xf32>
    %31 = vector.shape_cast %30 : vector<2x8x1x16x32xf32> to vector<2x8x16x32xf32>
    %32 = vector.extract_strided_slice %29 {offsets = [0, 0, 1, 0, 0], sizes = [2, 8, 1, 16, 32], strides = [1, 1, 1, 1, 1]} : vector<2x8x2x16x32xf32> to vector<2x8x1x16x32xf32>
    %33 = vector.shape_cast %32 : vector<2x8x1x16x32xf32> to vector<2x8x16x32xf32>
    %34 = arith.maximumf %31, %33 : vector<2x8x16x32xf32>
    %35 = vector.extract_strided_slice %34 {offsets = [0, 0, 0, 0], sizes = [2, 8, 1, 32], strides = [1, 1, 1, 1]} : vector<2x8x16x32xf32> to vector<2x8x1x32xf32>
    %36 = vector.extract_strided_slice %34 {offsets = [0, 0, 1, 0], sizes = [2, 8, 1, 32], strides = [1, 1, 1, 1]} : vector<2x8x16x32xf32> to vector<2x8x1x32xf32>
    %37 = arith.maximumf %35, %36 : vector<2x8x1x32xf32>
    %38 = vector.extract_strided_slice %34 {offsets = [0, 0, 2, 0], sizes = [2, 8, 1, 32], strides = [1, 1, 1, 1]} : vector<2x8x16x32xf32> to vector<2x8x1x32xf32>
    %39 = vector.extract_strided_slice %34 {offsets = [0, 0, 3, 0], sizes = [2, 8, 1, 32], strides = [1, 1, 1, 1]} : vector<2x8x16x32xf32> to vector<2x8x1x32xf32>
    %40 = arith.maximumf %38, %39 : vector<2x8x1x32xf32>
    %41 = vector.extract_strided_slice %34 {offsets = [0, 0, 4, 0], sizes = [2, 8, 1, 32], strides = [1, 1, 1, 1]} : vector<2x8x16x32xf32> to vector<2x8x1x32xf32>
    %42 = vector.extract_strided_slice %34 {offsets = [0, 0, 5, 0], sizes = [2, 8, 1, 32], strides = [1, 1, 1, 1]} : vector<2x8x16x32xf32> to vector<2x8x1x32xf32>
    %43 = arith.maximumf %41, %42 : vector<2x8x1x32xf32>
    %44 = vector.extract_strided_slice %34 {offsets = [0, 0, 6, 0], sizes = [2, 8, 1, 32], strides = [1, 1, 1, 1]} : vector<2x8x16x32xf32> to vector<2x8x1x32xf32>
    %45 = vector.extract_strided_slice %34 {offsets = [0, 0, 7, 0], sizes = [2, 8, 1, 32], strides = [1, 1, 1, 1]} : vector<2x8x16x32xf32> to vector<2x8x1x32xf32>
    %46 = arith.maximumf %44, %45 : vector<2x8x1x32xf32>
    %47 = vector.extract_strided_slice %34 {offsets = [0, 0, 8, 0], sizes = [2, 8, 1, 32], strides = [1, 1, 1, 1]} : vector<2x8x16x32xf32> to vector<2x8x1x32xf32>
    %48 = vector.extract_strided_slice %34 {offsets = [0, 0, 9, 0], sizes = [2, 8, 1, 32], strides = [1, 1, 1, 1]} : vector<2x8x16x32xf32> to vector<2x8x1x32xf32>
    %49 = arith.maximumf %47, %48 : vector<2x8x1x32xf32>
    %50 = vector.extract_strided_slice %34 {offsets = [0, 0, 10, 0], sizes = [2, 8, 1, 32], strides = [1, 1, 1, 1]} : vector<2x8x16x32xf32> to vector<2x8x1x32xf32>
    %51 = vector.extract_strided_slice %34 {offsets = [0, 0, 11, 0], sizes = [2, 8, 1, 32], strides = [1, 1, 1, 1]} : vector<2x8x16x32xf32> to vector<2x8x1x32xf32>
    %52 = arith.maximumf %50, %51 : vector<2x8x1x32xf32>
    %53 = vector.extract_strided_slice %34 {offsets = [0, 0, 12, 0], sizes = [2, 8, 1, 32], strides = [1, 1, 1, 1]} : vector<2x8x16x32xf32> to vector<2x8x1x32xf32>
    %54 = vector.extract_strided_slice %34 {offsets = [0, 0, 13, 0], sizes = [2, 8, 1, 32], strides = [1, 1, 1, 1]} : vector<2x8x16x32xf32> to vector<2x8x1x32xf32>
    %55 = arith.maximumf %53, %54 : vector<2x8x1x32xf32>
    %56 = vector.extract_strided_slice %34 {offsets = [0, 0, 14, 0], sizes = [2, 8, 1, 32], strides = [1, 1, 1, 1]} : vector<2x8x16x32xf32> to vector<2x8x1x32xf32>
    %57 = vector.extract_strided_slice %34 {offsets = [0, 0, 15, 0], sizes = [2, 8, 1, 32], strides = [1, 1, 1, 1]} : vector<2x8x16x32xf32> to vector<2x8x1x32xf32>
    %58 = arith.maximumf %56, %57 : vector<2x8x1x32xf32>
    %59 = tpu.concatenate %37, %40, %43, %46, %49, %52, %55, %58 in 2 : vector<2x8x1x32xf32>, vector<2x8x1x32xf32>, vector<2x8x1x32xf32>, vector<2x8x1x32xf32>, vector<2x8x1x32xf32>, vector<2x8x1x32xf32>, vector<2x8x1x32xf32>, vector<2x8x1x32xf32> -> vector<2x8x8x32xf32>
    %cst_12 = arith.constant 0.000000e+00 : f32
    %60 = vector.broadcast %cst_12 : f32 to vector<2x8x2x32xf32>
    %cst_13 = arith.constant 0.000000e+00 : f32
    %61 = vector.broadcast %cst_13 : f32 to vector<2x8x2x32xf32>
    %62 = tpu.concatenate %60, %59, %61 in 2 : vector<2x8x2x32xf32>, vector<2x8x8x32xf32>, vector<2x8x2x32xf32> -> vector<2x8x12x32xf32>
    %cst_14 = arith.constant 0.000000e+00 : f32
    %63 = vector.broadcast %cst_14 : f32 to vector<2x2x12x32xf32>
    %cst_15 = arith.constant 0.000000e+00 : f32
    %64 = vector.broadcast %cst_15 : f32 to vector<2x2x12x32xf32>
    %65 = tpu.concatenate %63, %62, %64 in 1 : vector<2x2x12x32xf32>, vector<2x8x12x32xf32>, vector<2x2x12x32xf32> -> vector<2x12x12x32xf32>
    %66 = vector.extract_strided_slice %65 {offsets = [0, 0, 0, 0], sizes = [2, 12, 8, 32], strides = [1, 1, 1, 1]} : vector<2x12x12x32xf32> to vector<2x12x8x32xf32>
    %67 = vector.extract_strided_slice %65 {offsets = [0, 0, 1, 0], sizes = [2, 12, 8, 32], strides = [1, 1, 1, 1]} : vector<2x12x12x32xf32> to vector<2x12x8x32xf32>
    %68 = vector.extract_strided_slice %65 {offsets = [0, 0, 2, 0], sizes = [2, 12, 8, 32], strides = [1, 1, 1, 1]} : vector<2x12x12x32xf32> to vector<2x12x8x32xf32>
    %69 = vector.extract_strided_slice %65 {offsets = [0, 0, 3, 0], sizes = [2, 12, 8, 32], strides = [1, 1, 1, 1]} : vector<2x12x12x32xf32> to vector<2x12x8x32xf32>
    %70 = vector.extract_strided_slice %65 {offsets = [0, 0, 4, 0], sizes = [2, 12, 8, 32], strides = [1, 1, 1, 1]} : vector<2x12x12x32xf32> to vector<2x12x8x32xf32>
    %71 = tpu.concatenate %66, %67, %68, %69, %70 in 3 : vector<2x12x8x32xf32>, vector<2x12x8x32xf32>, vector<2x12x8x32xf32>, vector<2x12x8x32xf32>, vector<2x12x8x32xf32> -> vector<2x12x8x160xf32>
    %72 = vector.extract_strided_slice %71 {offsets = [0, 0, 0, 0], sizes = [2, 8, 8, 160], strides = [1, 1, 1, 1]} : vector<2x12x8x160xf32> to vector<2x8x8x160xf32>
    %73 = vector.extract_strided_slice %71 {offsets = [0, 1, 0, 0], sizes = [2, 8, 8, 160], strides = [1, 1, 1, 1]} : vector<2x12x8x160xf32> to vector<2x8x8x160xf32>
    %74 = vector.extract_strided_slice %71 {offsets = [0, 2, 0, 0], sizes = [2, 8, 8, 160], strides = [1, 1, 1, 1]} : vector<2x12x8x160xf32> to vector<2x8x8x160xf32>
    %75 = vector.extract_strided_slice %71 {offsets = [0, 3, 0, 0], sizes = [2, 8, 8, 160], strides = [1, 1, 1, 1]} : vector<2x12x8x160xf32> to vector<2x8x8x160xf32>
    %76 = vector.extract_strided_slice %71 {offsets = [0, 4, 0, 0], sizes = [2, 8, 8, 160], strides = [1, 1, 1, 1]} : vector<2x12x8x160xf32> to vector<2x8x8x160xf32>
    %77 = tpu.concatenate %72, %73, %74, %75, %76 in 3 : vector<2x8x8x160xf32>, vector<2x8x8x160xf32>, vector<2x8x8x160xf32>, vector<2x8x8x160xf32>, vector<2x8x8x160xf32> -> vector<2x8x8x800xf32>
    %78 = vector.shape_cast %77 : vector<2x8x8x800xf32> to vector<128x800xf32>
    %79 = arith.truncf %78 : vector<128x800xf32> to vector<128x800xbf16>
    %c0_16 = arith.constant 0 : index
    %c0_17 = arith.constant 0 : index
    %80 = vector.load %arg4[%c0_16, %c0_17] : memref<800x64xbf16, #tpu.memory_space<vmem>>, vector<800x64xbf16>
    %cst_18 = arith.constant dense<0.000000e+00> : vector<128x64xf32>
    %81 = tpu.matmul %79, %80, %cst_18 {dimension_numbers = #tpu.dot_dimension_numbers<[1], [0], [0], [1], [0, 0, 1, 1], [], []>} : vector<128x800xbf16>, vector<800x64xbf16>, vector<128x64xf32> -> vector<128x64xf32>
    %c0_19 = arith.constant 0 : index
    %c0_20 = arith.constant 0 : index
    %82 = vector.load %arg5[%c0_19, %c0_20] : memref<1x64xf32, #tpu.memory_space<vmem>>, vector<1x64xf32>
    %83 = vector.broadcast %82 : vector<1x64xf32> to vector<128x64xf32>
    %84 = arith.addf %81, %83 : vector<128x64xf32>
    %cst_21 = arith.constant 0.000000e+00 : f32
    %85 = vector.broadcast %cst_21 : f32 to vector<128x64xf32>
    %86 = arith.maximumf %84, %85 : vector<128x64xf32>
    %87 = vector.shape_cast %86 : vector<128x64xf32> to vector<2x8x8x64xf32>
    %88 = vector.shape_cast %87 : vector<2x8x8x64xf32> to vector<2x4x2x8x64xf32>
    %89 = vector.extract_strided_slice %88 {offsets = [0, 0, 0, 0, 0], sizes = [2, 4, 1, 8, 64], strides = [1, 1, 1, 1, 1]} : vector<2x4x2x8x64xf32> to vector<2x4x1x8x64xf32>
    %90 = vector.shape_cast %89 : vector<2x4x1x8x64xf32> to vector<2x4x8x64xf32>
    %91 = vector.extract_strided_slice %88 {offsets = [0, 0, 1, 0, 0], sizes = [2, 4, 1, 8, 64], strides = [1, 1, 1, 1, 1]} : vector<2x4x2x8x64xf32> to vector<2x4x1x8x64xf32>
    %92 = vector.shape_cast %91 : vector<2x4x1x8x64xf32> to vector<2x4x8x64xf32>
    %93 = arith.maximumf %90, %92 : vector<2x4x8x64xf32>
    %94 = vector.extract_strided_slice %93 {offsets = [0, 0, 0, 0], sizes = [2, 4, 1, 64], strides = [1, 1, 1, 1]} : vector<2x4x8x64xf32> to vector<2x4x1x64xf32>
    %95 = vector.extract_strided_slice %93 {offsets = [0, 0, 1, 0], sizes = [2, 4, 1, 64], strides = [1, 1, 1, 1]} : vector<2x4x8x64xf32> to vector<2x4x1x64xf32>
    %96 = arith.maximumf %94, %95 : vector<2x4x1x64xf32>
    %97 = vector.extract_strided_slice %93 {offsets = [0, 0, 2, 0], sizes = [2, 4, 1, 64], strides = [1, 1, 1, 1]} : vector<2x4x8x64xf32> to vector<2x4x1x64xf32>
    %98 = vector.extract_strided_slice %93 {offsets = [0, 0, 3, 0], sizes = [2, 4, 1, 64], strides = [1, 1, 1, 1]} : vector<2x4x8x64xf32> to vector<2x4x1x64xf32>
    %99 = arith.maximumf %97, %98 : vector<2x4x1x64xf32>
    %100 = vector.extract_strided_slice %93 {offsets = [0, 0, 4, 0], sizes = [2, 4, 1, 64], strides = [1, 1, 1, 1]} : vector<2x4x8x64xf32> to vector<2x4x1x64xf32>
    %101 = vector.extract_strided_slice %93 {offsets = [0, 0, 5, 0], sizes = [2, 4, 1, 64], strides = [1, 1, 1, 1]} : vector<2x4x8x64xf32> to vector<2x4x1x64xf32>
    %102 = arith.maximumf %100, %101 : vector<2x4x1x64xf32>
    %103 = vector.extract_strided_slice %93 {offsets = [0, 0, 6, 0], sizes = [2, 4, 1, 64], strides = [1, 1, 1, 1]} : vector<2x4x8x64xf32> to vector<2x4x1x64xf32>
    %104 = vector.extract_strided_slice %93 {offsets = [0, 0, 7, 0], sizes = [2, 4, 1, 64], strides = [1, 1, 1, 1]} : vector<2x4x8x64xf32> to vector<2x4x1x64xf32>
    %105 = arith.maximumf %103, %104 : vector<2x4x1x64xf32>
    %106 = tpu.concatenate %96, %99, %102, %105 in 2 : vector<2x4x1x64xf32>, vector<2x4x1x64xf32>, vector<2x4x1x64xf32>, vector<2x4x1x64xf32> -> vector<2x4x4x64xf32>
    %cst_22 = arith.constant 0.000000e+00 : f32
    %107 = vector.broadcast %cst_22 : f32 to vector<2x4x1x64xf32>
    %cst_23 = arith.constant 0.000000e+00 : f32
    %108 = vector.broadcast %cst_23 : f32 to vector<2x4x5x64xf32>
    %109 = tpu.concatenate %107, %106, %108 in 2 : vector<2x4x1x64xf32>, vector<2x4x4x64xf32>, vector<2x4x5x64xf32> -> vector<2x4x10x64xf32>
    %cst_24 = arith.constant 0.000000e+00 : f32
    %110 = vector.broadcast %cst_24 : f32 to vector<2x1x10x64xf32>
    %cst_25 = arith.constant 0.000000e+00 : f32
    %111 = vector.broadcast %cst_25 : f32 to vector<2x1x10x64xf32>
    %112 = tpu.concatenate %110, %109, %111 in 1 : vector<2x1x10x64xf32>, vector<2x4x10x64xf32>, vector<2x1x10x64xf32> -> vector<2x6x10x64xf32>
    %113 = vector.extract_strided_slice %112 {offsets = [0, 0, 0, 0], sizes = [2, 6, 8, 64], strides = [1, 1, 1, 1]} : vector<2x6x10x64xf32> to vector<2x6x8x64xf32>
    %114 = vector.extract_strided_slice %112 {offsets = [0, 0, 1, 0], sizes = [2, 6, 8, 64], strides = [1, 1, 1, 1]} : vector<2x6x10x64xf32> to vector<2x6x8x64xf32>
    %115 = vector.extract_strided_slice %112 {offsets = [0, 0, 2, 0], sizes = [2, 6, 8, 64], strides = [1, 1, 1, 1]} : vector<2x6x10x64xf32> to vector<2x6x8x64xf32>
    %116 = tpu.concatenate %113, %114, %115 in 3 : vector<2x6x8x64xf32>, vector<2x6x8x64xf32>, vector<2x6x8x64xf32> -> vector<2x6x8x192xf32>
    %117 = vector.extract_strided_slice %116 {offsets = [0, 0, 0, 0], sizes = [2, 4, 8, 192], strides = [1, 1, 1, 1]} : vector<2x6x8x192xf32> to vector<2x4x8x192xf32>
    %118 = vector.extract_strided_slice %116 {offsets = [0, 1, 0, 0], sizes = [2, 4, 8, 192], strides = [1, 1, 1, 1]} : vector<2x6x8x192xf32> to vector<2x4x8x192xf32>
    %119 = vector.extract_strided_slice %116 {offsets = [0, 2, 0, 0], sizes = [2, 4, 8, 192], strides = [1, 1, 1, 1]} : vector<2x6x8x192xf32> to vector<2x4x8x192xf32>
    %120 = tpu.concatenate %117, %118, %119 in 3 : vector<2x4x8x192xf32>, vector<2x4x8x192xf32>, vector<2x4x8x192xf32> -> vector<2x4x8x576xf32>
    %121 = vector.shape_cast %120 : vector<2x4x8x576xf32> to vector<64x576xf32>
    %122 = arith.truncf %121 : vector<64x576xf32> to vector<64x576xbf16>
    %c0_26 = arith.constant 0 : index
    %c0_27 = arith.constant 0 : index
    %123 = vector.load %arg6[%c0_26, %c0_27] : memref<576x128xbf16, #tpu.memory_space<vmem>>, vector<576x128xbf16>
    %cst_28 = arith.constant dense<0.000000e+00> : vector<64x128xf32>
    %124 = tpu.matmul %122, %123, %cst_28 {dimension_numbers = #tpu.dot_dimension_numbers<[1], [0], [0], [1], [0, 0, 1, 1], [], []>} : vector<64x576xbf16>, vector<576x128xbf16>, vector<64x128xf32> -> vector<64x128xf32>
    %c0_29 = arith.constant 0 : index
    %c0_30 = arith.constant 0 : index
    %125 = vector.load %arg7[%c0_29, %c0_30] : memref<1x128xf32, #tpu.memory_space<vmem>>, vector<1x128xf32>
    %126 = vector.broadcast %125 : vector<1x128xf32> to vector<64x128xf32>
    %127 = arith.addf %124, %126 : vector<64x128xf32>
    %cst_31 = arith.constant 0.000000e+00 : f32
    %128 = vector.broadcast %cst_31 : f32 to vector<64x128xf32>
    %129 = arith.maximumf %127, %128 : vector<64x128xf32>
    %130 = vector.shape_cast %129 : vector<64x128xf32> to vector<2x4x8x128xf32>
    %131 = vector.shape_cast %130 : vector<2x4x8x128xf32> to vector<2x2x2x8x128xf32>
    %132 = vector.extract_strided_slice %131 {offsets = [0, 0, 0, 0, 0], sizes = [2, 2, 1, 8, 128], strides = [1, 1, 1, 1, 1]} : vector<2x2x2x8x128xf32> to vector<2x2x1x8x128xf32>
    %133 = vector.shape_cast %132 : vector<2x2x1x8x128xf32> to vector<2x2x8x128xf32>
    %134 = vector.extract_strided_slice %131 {offsets = [0, 0, 1, 0, 0], sizes = [2, 2, 1, 8, 128], strides = [1, 1, 1, 1, 1]} : vector<2x2x2x8x128xf32> to vector<2x2x1x8x128xf32>
    %135 = vector.shape_cast %134 : vector<2x2x1x8x128xf32> to vector<2x2x8x128xf32>
    %136 = arith.maximumf %133, %135 : vector<2x2x8x128xf32>
    %137 = vector.extract_strided_slice %136 {offsets = [0, 0, 0, 0], sizes = [2, 2, 1, 128], strides = [1, 1, 1, 1]} : vector<2x2x8x128xf32> to vector<2x2x1x128xf32>
    %138 = vector.extract_strided_slice %136 {offsets = [0, 0, 1, 0], sizes = [2, 2, 1, 128], strides = [1, 1, 1, 1]} : vector<2x2x8x128xf32> to vector<2x2x1x128xf32>
    %139 = arith.maximumf %137, %138 : vector<2x2x1x128xf32>
    %140 = vector.extract_strided_slice %136 {offsets = [0, 0, 2, 0], sizes = [2, 2, 1, 128], strides = [1, 1, 1, 1]} : vector<2x2x8x128xf32> to vector<2x2x1x128xf32>
    %141 = vector.extract_strided_slice %136 {offsets = [0, 0, 3, 0], sizes = [2, 2, 1, 128], strides = [1, 1, 1, 1]} : vector<2x2x8x128xf32> to vector<2x2x1x128xf32>
    %142 = arith.maximumf %140, %141 : vector<2x2x1x128xf32>
    %143 = tpu.concatenate %139, %142 in 2 : vector<2x2x1x128xf32>, vector<2x2x1x128xf32> -> vector<2x2x2x128xf32>
    %144 = vector.extract_strided_slice %143 {offsets = [0, 0, 0, 0], sizes = [2, 1, 1, 128], strides = [1, 1, 1, 1]} : vector<2x2x2x128xf32> to vector<2x1x1x128xf32>
    %145 = vector.shape_cast %144 : vector<2x1x1x128xf32> to vector<2x128xf32>
    %146 = vector.extract_strided_slice %143 {offsets = [0, 0, 1, 0], sizes = [2, 1, 1, 128], strides = [1, 1, 1, 1]} : vector<2x2x2x128xf32> to vector<2x1x1x128xf32>
    %147 = vector.shape_cast %146 : vector<2x1x1x128xf32> to vector<2x128xf32>
    %148 = vector.extract_strided_slice %143 {offsets = [0, 1, 0, 0], sizes = [2, 1, 1, 128], strides = [1, 1, 1, 1]} : vector<2x2x2x128xf32> to vector<2x1x1x128xf32>
    %149 = vector.shape_cast %148 : vector<2x1x1x128xf32> to vector<2x128xf32>
    %150 = vector.extract_strided_slice %143 {offsets = [0, 1, 1, 0], sizes = [2, 1, 1, 128], strides = [1, 1, 1, 1]} : vector<2x2x2x128xf32> to vector<2x1x1x128xf32>
    %151 = vector.shape_cast %150 : vector<2x1x1x128xf32> to vector<2x128xf32>
    %152 = tpu.concatenate %145, %147, %149, %151 in 1 : vector<2x128xf32>, vector<2x128xf32>, vector<2x128xf32>, vector<2x128xf32> -> vector<2x512xf32>
    %153 = arith.truncf %152 : vector<2x512xf32> to vector<2x512xbf16>
    %c0_32 = arith.constant 0 : index
    %c0_33 = arith.constant 0 : index
    %154 = vector.load %arg8[%c0_32, %c0_33] : memref<512x128xbf16, #tpu.memory_space<vmem>>, vector<512x128xbf16>
    %cst_34 = arith.constant dense<0.000000e+00> : vector<2x128xf32>
    %155 = tpu.matmul %153, %154, %cst_34 {dimension_numbers = #tpu.dot_dimension_numbers<[1], [0], [0], [1], [0, 0, 1, 1], [], []>} : vector<2x512xbf16>, vector<512x128xbf16>, vector<2x128xf32> -> vector<2x128xf32>
    %c0_35 = arith.constant 0 : index
    %c0_36 = arith.constant 0 : index
    %156 = vector.load %arg9[%c0_35, %c0_36] : memref<1x128xf32, #tpu.memory_space<vmem>>, vector<1x128xf32>
    %157 = vector.broadcast %156 : vector<1x128xf32> to vector<2x128xf32>
    %158 = arith.addf %155, %157 : vector<2x128xf32>
    %cst_37 = arith.constant 0.000000e+00 : f32
    %159 = vector.broadcast %cst_37 : f32 to vector<2x128xf32>
    %160 = arith.maximumf %158, %159 : vector<2x128xf32>
    %161 = arith.truncf %160 : vector<2x128xf32> to vector<2x128xbf16>
    %c0_38 = arith.constant 0 : index
    %c0_39 = arith.constant 0 : index
    %162 = vector.load %arg10[%c0_38, %c0_39] : memref<128x64xbf16, #tpu.memory_space<vmem>>, vector<128x64xbf16>
    %cst_40 = arith.constant dense<0.000000e+00> : vector<2x64xf32>
    %163 = tpu.matmul %161, %162, %cst_40 {dimension_numbers = #tpu.dot_dimension_numbers<[1], [0], [0], [1], [0, 0, 1, 1], [], []>} : vector<2x128xbf16>, vector<128x64xbf16>, vector<2x64xf32> -> vector<2x64xf32>
    %c0_41 = arith.constant 0 : index
    %c0_42 = arith.constant 0 : index
    %164 = vector.load %arg11[%c0_41, %c0_42] : memref<1x64xf32, #tpu.memory_space<vmem>>, vector<1x64xf32>
    %165 = vector.broadcast %164 : vector<1x64xf32> to vector<2x64xf32>
    %166 = arith.addf %163, %165 : vector<2x64xf32>
    %cst_43 = arith.constant 0.000000e+00 : f32
    %167 = vector.broadcast %cst_43 : f32 to vector<2x64xf32>
    %168 = arith.maximumf %166, %167 : vector<2x64xf32>
    %169 = arith.truncf %168 : vector<2x64xf32> to vector<2x64xbf16>
    %c0_44 = arith.constant 0 : index
    %c0_45 = arith.constant 0 : index
    %170 = vector.load %arg12[%c0_44, %c0_45] : memref<64x10xbf16, #tpu.memory_space<vmem>>, vector<64x10xbf16>
    %cst_46 = arith.constant dense<0.000000e+00> : vector<2x10xf32>
    %171 = tpu.matmul %169, %170, %cst_46 {dimension_numbers = #tpu.dot_dimension_numbers<[1], [0], [0], [1], [0, 0, 1, 1], [], []>} : vector<2x64xbf16>, vector<64x10xbf16>, vector<2x10xf32> -> vector<2x10xf32>
    %c0_47 = arith.constant 0 : index
    %c0_48 = arith.constant 0 : index
    %172 = vector.load %arg13[%c0_47, %c0_48] : memref<1x10xf32, #tpu.memory_space<vmem>>, vector<1x10xf32>
    %173 = vector.broadcast %172 : vector<1x10xf32> to vector<2x10xf32>
    %174 = arith.addf %171, %173 : vector<2x10xf32>
    %c0_49 = arith.constant 0 : index
    %c0_50 = arith.constant 0 : index
    %175 = vector.load %arg14[%c0_49, %c0_50] : memref<2x10xf32, #tpu.memory_space<vmem>>, vector<2x10xf32>
    tpu.vector_store %arg14[%c0_49, %c0_50], %174 {strides = array<i32>} : memref<2x10xf32, #tpu.memory_space<vmem>>, vector<2x10xf32>,
    return
  }
  func.func @transform_0(%arg0: i32) -> (i32, i32, i32, i32) {
    %c0_i32 = arith.constant 0 : i32
    %c0_i32_0 = arith.constant 0 : i32
    %c0_i32_1 = arith.constant 0 : i32
    %c0_i32_2 = arith.constant 0 : i32
    %c0_i32_3 = arith.constant 0 : i32
    return %c0_i32, %c0_i32_0, %c0_i32_1, %c0_i32_2 : i32, i32, i32, i32
  }
  func.func @transform_1(%arg0: i32) -> (i32, i32) {
    %c0_i32 = arith.constant 0 : i32
    %c0_i32_0 = arith.constant 0 : i32
    %c0_i32_1 = arith.constant 0 : i32
    return %c0_i32, %c0_i32_0 : i32, i32
  }
  func.func @transform_2(%arg0: i32) -> (i32, i32) {
    %c0_i32 = arith.constant 0 : i32
    %c0_i32_0 = arith.constant 0 : i32
    %c0_i32_1 = arith.constant 0 : i32
    return %c0_i32, %c0_i32_0 : i32, i32
  }
  func.func @transform_3(%arg0: i32) -> (i32, i32) {
    %c0_i32 = arith.constant 0 : i32
    %c0_i32_0 = arith.constant 0 : i32
    %c0_i32_1 = arith.constant 0 : i32
    return %c0_i32, %c0_i32_0 : i32, i32
  }
  func.func @transform_4(%arg0: i32) -> (i32, i32) {
    %c0_i32 = arith.constant 0 : i32
    %c0_i32_0 = arith.constant 0 : i32
    %c0_i32_1 = arith.constant 0 : i32
    return %c0_i32, %c0_i32_0 : i32, i32
  }
  func.func @transform_5(%arg0: i32) -> (i32, i32) {
    %c0_i32 = arith.constant 0 : i32
    %c0_i32_0 = arith.constant 0 : i32
    %c0_i32_1 = arith.constant 0 : i32
    return %c0_i32, %c0_i32_0 : i32, i32
  }
  func.func @transform_6(%arg0: i32) -> (i32, i32) {
    %c0_i32 = arith.constant 0 : i32
    %c0_i32_0 = arith.constant 0 : i32
    %c0_i32_1 = arith.constant 0 : i32
    return %c0_i32, %c0_i32_0 : i32, i32
  }
  func.func @transform_7(%arg0: i32) -> (i32, i32) {
    %c0_i32 = arith.constant 0 : i32
    %c0_i32_0 = arith.constant 0 : i32
    %c0_i32_1 = arith.constant 0 : i32
    return %c0_i32, %c0_i32_0 : i32, i32
  }
  func.func @transform_8(%arg0: i32) -> (i32, i32) {
    %c0_i32 = arith.constant 0 : i32
    %c0_i32_0 = arith.constant 0 : i32
    %c0_i32_1 = arith.constant 0 : i32
    return %c0_i32, %c0_i32_0 : i32, i32
  }
  func.func @transform_9(%arg0: i32) -> (i32, i32) {
    %c0_i32 = arith.constant 0 : i32
    %c0_i32_0 = arith.constant 0 : i32
    %c0_i32_1 = arith.constant 0 : i32
    return %c0_i32, %c0_i32_0 : i32, i32
  }
  func.func @transform_10(%arg0: i32) -> (i32, i32) {
    %c0_i32 = arith.constant 0 : i32
    %c0_i32_0 = arith.constant 0 : i32
    %c0_i32_1 = arith.constant 0 : i32
    return %c0_i32, %c0_i32_0 : i32, i32
  }
  func.func @transform_11(%arg0: i32) -> (i32, i32) {
    %c0_i32 = arith.constant 0 : i32
    %c0_i32_0 = arith.constant 0 : i32
    %c0_i32_1 = arith.constant 0 : i32
    return %c0_i32, %c0_i32_0 : i32, i32
  }
  func.func @transform_12(%arg0: i32) -> (i32, i32) {
    %c0_i32 = arith.constant 0 : i32
    %c0_i32_0 = arith.constant 0 : i32
    %c0_i32_1 = arith.constant 0 : i32
    return %c0_i32, %c0_i32_0 : i32, i32
  }
  func.func @transform_13(%arg0: i32) -> (i32, i32) {
    %c0_i32 = arith.constant 0 : i32
    %c0_i32_0 = arith.constant 0 : i32
    %c0_i32_1 = arith.constant 0 : i32
    return %c0_i32, %c0_i32_0 : i32, i32
  }
}

</mosaic_0001>

<bundles_post_ra>
// kernel: cnn_forward.1
= control target key start
LH: loop header
LB: loop body
LE: loop exit
PB: predicated region body
PF: predicated region fallthrough
CT: control target
= control target key end

     0   :  { %vm174_vm0 = vcmask 1041408   ;;  %vm854_vm1 = vcmask 1045504   ;;  %v15653_v4 = vmov 0.0   ;;  %vm496_vm2 = vcmask 1046528   ;;  %s10071_s20 = smov 2   ;;  %s10072_s21 = smov 1   ;;  %s15639_s0 = inlined_call_operand.vmem [shape: f32[2,16,16,1], index: 0, kind: input, shape index: {}]   ;;  %s15640_s1 = inlined_call_operand.vmem [shape: bf16[25,32], index: 1, kind: input, shape index: {}]   ;;  %s15641_s2 = inlined_call_operand.vmem [shape: f32[1,32], index: 2, kind: input, shape index: {}]   ;;  %s15642_s3 = inlined_call_operand.vmem [shape: bf16[800,64], index: 3, kind: input, shape index: {}]   ;;  %s15643_s4 = inlined_call_operand.vmem [shape: f32[1,64], index: 4, kind: input, shape index: {}]   ;;  %s15644_s5 = inlined_call_operand.vmem [shape: bf16[576,128], index: 5, kind: input, shape index: {}]   ;;  %s15645_s6 = inlined_call_operand.vmem [shape: f32[1,128], index: 6, kind: input, shape index: {}]   ;;  %s15646_s7 = inlined_call_operand.vmem [shape: bf16[512,128], index: 7, kind: input, shape index: {}]   ;;  %s15647_s8 = inlined_call_operand.vmem [shape: f32[1,128], index: 8, kind: input, shape index: {}]   ;;  %s15648_s9 = inlined_call_operand.vmem [shape: bf16[128,64], index: 9, kind: input, shape index: {}]   ;;  %s15649_s10 = inlined_call_operand.vmem [shape: f32[1,64], index: 10, kind: input, shape index: {}]   ;;  %s15650_s11 = inlined_call_operand.vmem [shape: bf16[64,10], index: 11, kind: input, shape index: {}]   ;;  %s15651_s12 = inlined_call_operand.vmem [shape: f32[1,10], index: 12, kind: input, shape index: {}]   ;;  %s15652_s13 = inlined_call_operand.hbm [shape: f32[2,10], index: 13, kind: output, shape index: {}]  }
   0x1   :  { %v46_v0 = vld [vmem:[%s15639_s0] sm:$0xff]  ;;  %v47_v1 = vld [vmem:[%s15639_s0 + $0x8] sm:$0xff]  ;;  %v10163_v5 = vrot.slane %v15653_v4, 2  ;;  %v48_v6 = vld [vmem:[%s15639_s0 + $0x10] sm:$0xff]  ;;  %v10169_v7 = vrot.slane %v15653_v4, 1  ;;  %vm1212_vm3 = vcmask 1044480  }
   0x2   :  { %v175_v2 = vrot.slane %v46_v0, 6  ;;  %v176_v3 = vrot.slane %v47_v1, 6  ;;  %v49_v8 = vld [vmem:[%s15639_s0 + $0x18] sm:$0xff]  ;;  %v50_v9 = vld [vmem:[%s15639_s0 + $0x20] sm:$0xff]  ;;  %v51_v10 = vld [vmem:[%s15639_s0 + $0x28] sm:$0xff]  ;;  %v178_v11 = vrot.slane %v48_v6, 6 }
   0x3   :  { %15807 = vst [vmem:[#allocation5_spill] sm:$0xff] %v10163_v5  ;;  %15808 = vst [vmem:[#allocation6_spill] sm:$0xff] %v10169_v7  ;;  %v179_v14 = vrot.slane %v49_v8, 6  ;;  %v181_v15 = vrot.slane %v50_v9, 6  ;;  %v182_v21 = vrot.slane %v51_v10, 6  ;;  %v10222_v38 = vrot.slane %v15653_v4, 3 }
   0x4   :  { %v10181_v12 = vsel %vm174_vm0, %v175_v2, %v176_v3  ;;  %v10184_v13 = vsel %vm174_vm0, 0.0, %v175_v2  ;;  %v10212_v34 = vsel %vm174_vm0, 0.0, %v178_v11  ;;  %v10215_v35 = vsel %vm174_vm0, %v176_v3, 0.0  ;;  %v52_v48 = vld [vmem:[%s15639_s0 + $0x30] sm:$0xff]  ;;  %v53_v49 = vld [vmem:[%s15639_s0 + $0x38] sm:$0xff]  ;;  %s10073_s26 = smov 3  }
   0x5   :  { %v857_v16 = vrot.slane %v10184_v13, 2  ;;  %v858_v17 = vrot.slane %v10181_v12, 2  ;;  %v499_v18 = vrot.slane %v10184_v13, 1  ;;  %v500_v19 = vrot.slane %v10181_v12, 1  ;;  %15809 = vst [vmem:[#allocation7_spill] sm:$0xff] %v10222_v38  ;;  %s10074_s14 = smov 4  }
   0x6   :  { %v10191_v20 = vsel %vm174_vm0, %v178_v11, %v179_v14  ;;  %v10194_v22 = vsel %vm174_vm0, 0.0, %v181_v15  ;;  %v10197_v23 = vsel %vm174_vm0, %v179_v14, 0.0  ;;  %v10206_v30 = vsel %vm174_vm0, %v181_v15, %v182_v21  ;;  %v54_v14 = vld [vmem:[%s15639_s0 + $0x40] sm:$0xff]  ;;  %s10075_s23 = smov 5   ;;  %s10076_s27 = smov 10  }
   0x7   :  { %v859_v24 = vsel %vm854_vm1, %v857_v16, %v858_v17  ;;  %v501_v25 = vsel %vm496_vm2, %v499_v18, %v500_v19  ;;  %v505_v26 = vrot.slane %v10191_v20, 1  ;;  %v507_v27 = vrot.slane %v10197_v23, 1  ;;  %s10077_s18 = smov 15  }
   0x8   :  { %v8277_v28 = vpack.i.bf16 %v859_v24, %v10163_v5  ;;  %v8267_v29 = vpack.i.bf16 %v501_v25, %v10169_v7  ;;  %v509_v31 = vrot.slane %v10194_v22, 1  ;;  %v510_v33 = vrot.slane %v10206_v30, 1 }
   0x9   :  { %v508_v32 = vsel %vm496_vm2, %v505_v26, %v507_v27  ;;  %v502_v36 = vrot.slane %v10215_v35, 1  ;;  %v504_v37 = vrot.slane %v10212_v34, 1  ;;  %v1215_v39 = vrot.slane %v10184_v13, 3 }
   0xa   :  { %8278 = vrot.lane.b32.xlu1 %v8277_v28, %s10071_s20  ;;  %8268 = vrot.lane.b32.xlu0 %v8267_v29, %s10072_s21  ;;  %v511_v40 = vsel %vm496_vm2, %v509_v31, %v510_v33  ;;  %v1216_v41 = vrot.slane %v10181_v12, 3  ;;  %v860_v42 = vrot.slane %v10215_v35, 2  ;;  %v862_v43 = vrot.slane %v10212_v34, 2 }
   0xb   :  { %v8282_v44 = vpack.i.bf16 %v511_v40, %v508_v32  ;;  %v503_v45 = vsel %vm496_vm2, %v500_v19, %v502_v36  ;;  %v506_v46 = vsel %vm496_vm2, %v504_v37, %v505_v26  ;;  %v863_v47 = vrot.slane %v10191_v20, 2  ;;  %v10278_v19 = vld [vmem:[%s15639_s0 + $0x48] sm:$0xff] }
   0xc   :  { %v8272_v50 = vpack.i.bf16 %v506_v46, %v503_v45  ;;  %v1217_v51 = vsel %vm1212_vm3, %v1215_v39, %v1216_v41  ;;  %v861_v52 = vsel %vm854_vm1, %v858_v17, %v860_v42  ;;  %v865_v53 = vrot.slane %v10197_v23, 2 }
   0xd   :  { %v8292_v54 = vpack.i.bf16 %v1217_v51, %v10222_v38  ;;  %v864_v55 = vsel %vm854_vm1, %v862_v43, %v863_v47  ;;  %v867_v56 = vrot.slane %v10194_v22, 2  ;;  %v868_v57 = vrot.slane %v10206_v30, 2 }
   0xe   :  { %8283 = vrot.lane.b32.xlu1 %v8282_v44, %s10072_s21  ;;  %8273 = vrot.lane.b32.xlu0 %v8272_v50, %s10072_s21  ;;  %v8287_v58 = vpack.i.bf16 %v864_v55, %v861_v52  ;;  %v866_v59 = vsel %vm854_vm1, %v863_v47, %v865_v53  ;;  %v184_v60 = vrot.slane %v52_v48, 6  ;;  %v185_v61 = vrot.slane %v53_v49, 6 }
   0xf   :  { %v869_v62 = vsel %vm854_vm1, %v867_v56, %v868_v57  ;;  %v10250_v63 = vsel %vm174_vm0, %v182_v21, 0.0  ;;  %vm1570_vm4 = vcmask 1043456   ;;  %v10253_v0 = vrot.slane %v15653_v4, 4 }
  0x10   :  { %v8302_v1 = vpack.i.bf16 %v869_v62, %v866_v59  ;;  %v10256_v2 = vsel %vm174_vm0, %v184_v60, %v185_v61  ;;  %v10259_v3 = vsel %vm174_vm0, 0.0, %v184_v60  ;;  %v512_v6 = vrot.slane %v10250_v63, 1 }
  0x11   :  { %15810 = vst [vmem:[#allocation8_spill] sm:$0xff] %v10253_v0  ;;  %v514_v8 = vrot.slane %v10259_v3, 1  ;;  %v515_v9 = vrot.slane %v10256_v2, 1  ;;  %v1573_v10 = vrot.slane %v10184_v13, 4  ;;  %v1574_v11 = vrot.slane %v10181_v12, 4 }
  0x12   :  { %8293 = vrot.lane.b32.xlu1 %v8292_v54, %s10073_s26  ;;  %8288 = vrot.lane.b32.xlu0 %v8287_v58, %s10071_s20  ;;  %v513_v15 = vsel %vm496_vm2, %v510_v33, %v512_v6  ;;  %v1218_v16 = vrot.slane %v10215_v35, 3  ;;  %v1220_v17 = vrot.slane %v10212_v34, 3  ;;  %v1221_v18 = vrot.slane %v10191_v20, 3 }
  0x13   :  { %v516_v21 = vsel %vm496_vm2, %v514_v8, %v515_v9  ;;  %v1575_v24 = vsel %vm1570_vm4, %v1573_v10, %v1574_v11  ;;  %v870_v25 = vrot.slane %v10250_v63, 2  ;;  %v872_v26 = vrot.slane %v10259_v3, 2 }
  0x14   :  { %v8297_v27 = vpack.i.bf16 %v516_v21, %v513_v15  ;;  %v8312_v28 = vpack.i.bf16 %v1575_v24, %v10253_v0  ;;  %v1219_v29 = vsel %vm1212_vm3, %v1216_v41, %v1218_v16  ;;  %v1222_v31 = vsel %vm1212_vm3, %v1220_v17, %v1221_v18 }
  0x15   :  { %v8307_v32 = vpack.i.bf16 %v1222_v31, %v1219_v29  ;;  %v871_v33 = vsel %vm854_vm1, %v868_v57, %v870_v25  ;;  %v873_v36 = vrot.slane %v10256_v2, 2  ;;  %v187_v37 = vrot.slane %v54_v14, 6 }
  0x16   :  { %8303 = vrot.lane.b32.xlu1 %v8302_v1, %s10071_s20  ;;  %8298 = vrot.lane.b32.xlu0 %v8297_v27, %s10072_s21  ;;  %v188_v39 = vrot.slane %v10278_v19, 6  ;;  %v10293_v40 = vsel %vm174_vm0, %v185_v61, 0.0  ;;  %v1576_v42 = vrot.slane %v10215_v35, 4  ;;  %v1578_v41 = vrot.slane %v10212_v34, 4 }
  0x17   :  { %v874_v43 = vsel %vm854_vm1, %v872_v26, %v873_v36  ;;  %v10299_v44 = vsel %vm174_vm0, 0.0, %v187_v37  ;;  %v517_v45 = vrot.slane %v10293_v40, 1  ;;  %v1579_v46 = vrot.slane %v10191_v20, 4  ;;  %v56_v26 = vld [vmem:[%s15639_s0 + $0x50] sm:$0xff] }
  0x18   :  { %v8322_v47 = vpack.i.bf16 %v874_v43, %v871_v33  ;;  %v10306_v48 = vsel %vm174_vm0, %v187_v37, %v188_v39  ;;  %v519_v49 = vrot.slane %v10299_v44, 1  ;;  %v1577_v35 = vsel %vm1570_vm4, %v1574_v11, %v1576_v42  ;;  %v57_v37 = vld [vmem:[%s15639_s0 + $0x58] sm:$0xff]  ;;  %v58_v42 = vld [vmem:[%s15639_s0 + $0x60] sm:$0xff] }
  0x19   :  { %v518_v50 = vsel %vm496_vm2, %v515_v9, %v517_v45  ;;  %v520_v51 = vrot.slane %v10306_v48, 1  ;;  %v1580_v52 = vsel %vm1570_vm4, %v1578_v41, %v1579_v46  ;;  %v1223_v53 = vrot.slane %v10197_v23, 3 }
  0x1a   :  { %8313 = vrot.lane.b32.xlu1 %v8312_v28, %s10074_s14  ;;  %8308 = vrot.lane.b32.xlu0 %v8307_v32, %s10073_s26  ;;  %v1225_v54 = vrot.slane %v10194_v22, 3  ;;  %v1226_v55 = vrot.slane %v10206_v30, 3  ;;  %v1228_v56 = vrot.slane %v10250_v63, 3  ;;  %v1230_v59 = vrot.slane %v10259_v3, 3 }
  0x1b   :  { %v521_v57 = vsel %vm496_vm2, %v519_v49, %v520_v51  ;;  %v1224_v58 = vsel %vm1212_vm3, %v1221_v18, %v1223_v53  ;;  %v1231_v60 = vrot.slane %v10256_v2, 3  ;;  %v8332_v62 = vpack.i.bf16 %v1580_v52, %v1577_v35 }
  0x1c   :  { %v8317_v61 = vpack.i.bf16 %v521_v57, %v518_v50  ;;  %v1227_v1 = vsel %vm1212_vm3, %v1225_v54, %v1226_v55  ;;  %v875_v6 = vrot.slane %v10293_v40, 2  ;;  %v1229_v8 = vsel %vm1212_vm3, %v1226_v55, %v1228_v56 }
  0x1d   :  { %v1232_v9 = vsel %vm1212_vm3, %v1230_v59, %v1231_v60  ;;  %v877_v10 = vrot.slane %v10299_v44, 2  ;;  %v878_v11 = vrot.slane %v10306_v48, 2  ;;  %v8327_v14 = vpack.i.bf16 %v1227_v1, %v1224_v58 }
  0x1e   :  { %8323 = vrot.lane.b32.xlu1 %v8322_v47, %s10071_s20  ;;  %8318 = vrot.lane.b32.xlu0 %v8317_v61, %s10072_s21  ;;  %v876_v15 = vsel %vm854_vm1, %v873_v36, %v875_v6  ;;  %v1233_v16 = vrot.slane %v10293_v40, 3  ;;  %v1235_v17 = vrot.slane %v10299_v44, 3  ;;  %v1236_v21 = vrot.slane %v10306_v48, 3 }
  0x1f   :  { %v879_v18 = vsel %vm854_vm1, %v877_v10, %v878_v11  ;;  %v1581_v24 = vrot.slane %v10197_v23, 4  ;;  %v1583_v25 = vrot.slane %v10194_v22, 4  ;;  %v8342_v27 = vpack.i.bf16 %v1232_v9, %v1229_v8 }
  0x20   :  { %v1234_v28 = vsel %vm1212_vm3, %v1231_v60, %v1233_v16  ;;  %v1584_v29 = vrot.slane %v10206_v30, 4  ;;  %v1589_v31 = vrot.slane %v10256_v2, 4  ;;  %v1237_v32 = vsel %vm1212_vm3, %v1235_v17, %v1236_v21 }
  0x21   :  { %v1582_v23 = vsel %vm1570_vm4, %v1579_v46, %v1581_v24  ;;  %v1591_v33 = vrot.slane %v10293_v40, 4  ;;  %v1593_v36 = vrot.slane %v10299_v44, 4  ;;  %v8337_v41 = vpack.i.bf16 %v879_v18, %v876_v15  ;;  %v10368_v40 = vld [vmem:[%s15639_s0 + $0x68] sm:$0xff] }
  0x22   :  { %8333 = vrot.lane.b32.xlu1 %v8332_v62, %s10074_s14  ;;  %8328 = vrot.lane.b32.xlu0 %v8327_v14, %s10073_s26  ;;  %v1585_v43 = vsel %vm1570_vm4, %v1583_v25, %v1584_v29  ;;  %v1594_v45 = vrot.slane %v10306_v48, 4  ;;  %v1586_v46 = vrot.slane %v10250_v63, 4  ;;  %v8352_v47 = vpack.i.bf16 %v1237_v32, %v1234_v28 }
  0x23   :  { %v1592_v49 = vsel %vm1570_vm4, %v1589_v31, %v1591_v33  ;;  %v1588_v35 = vrot.slane %v10259_v3, 4  ;;  %v190_v50 = vrot.slane %v56_v26, 6  ;;  %v8347_v52 = vpack.i.bf16 %v1585_v43, %v1582_v23 }
  0x24   :  { %v1595_v53 = vsel %vm1570_vm4, %v1593_v36, %v1594_v45  ;;  %v191_v54 = vrot.slane %v57_v37, 6  ;;  %v10378_v63 = vsel %vm174_vm0, %v188_v39, 0.0  ;;  %v1587_v56 = vsel %vm1570_vm4, %v1584_v29, %v1586_v46 }
  0x25   :  { %v8362_v55 = vpack.i.bf16 %v1595_v53, %v1592_v49  ;;  %v10383_v57 = vsel %vm174_vm0, 0.0, %v190_v50  ;;  %v522_v58 = vrot.slane %v10378_v63, 1  ;;  %v1590_v59 = vsel %vm1570_vm4, %v1588_v35, %v1589_v31  ;;  %v61_v49 = vld [vmem:[%s15639_s0 + $0x78] sm:$0xff] }
  0x26   :  { %8343 = vrot.lane.b32.xlu1 %v8342_v27, %s10073_s26  ;;  %8338 = vrot.lane.b32.xlu0 %v8337_v41, %s10071_s20  ;;  %v10389_v60 = vsel %vm174_vm0, %v190_v50, %v191_v54  ;;  %v524_v19 = vrot.slane %v10383_v57, 1  ;;  %v193_v39 = vrot.slane %v58_v42, 6  ;;  %v194_v1 = vrot.slane %v10368_v40, 6 }
  0x27   :  { %v523_v61 = vsel %vm496_vm2, %v520_v51, %v522_v58  ;;  %v525_v62 = vrot.slane %v10389_v60, 1  ;;  %v404_v6 = vsel %vm174_vm0, %v191_v54, 0.0  ;;  %v880_v10 = vrot.slane %v10378_v63, 2 }
  0x28   :  { %v10399_v8 = vsel %vm174_vm0, 0.0, %v193_v39  ;;  %v527_v9 = vrot.slane %v404_v6, 1  ;;  %v882_v14 = vrot.slane %v10383_v57, 2  ;;  %v10406_v51 = vsel %vm174_vm0, %v193_v39, %v194_v1 }
  0x29   :  { %v526_v15 = vsel %vm496_vm2, %v524_v19, %v525_v62  ;;  %v529_v16 = vrot.slane %v10399_v8, 1  ;;  %v883_v17 = vrot.slane %v10389_v60, 2  ;;  %v8357_v18 = vpack.i.bf16 %v1590_v59, %v1587_v56 }
  0x2a   :  { %8353 = vrot.lane.b32.xlu1 %v8352_v47, %s10073_s26  ;;  %8348 = vrot.lane.b32.xlu0 %v8347_v52, %s10074_s14  ;;  %v528_v24 = vsel %vm496_vm2, %v525_v62, %v527_v9  ;;  %v530_v25 = vrot.slane %v10406_v51, 1  ;;  %v8367_v26 = vpack.i.bf16 %v526_v15, %v523_v61  ;;  %v885_v27 = vrot.slane %v404_v6, 2  ;;  %v60_v47 = vld [vmem:[%s15639_s0 + $0x70] sm:$0xff]  ;;  %v10463_v9 = vld [vmem:[%s15639_s0 + $0x88] sm:$0xff] }
  0x2b   :  { %v887_v28 = vrot.slane %v10399_v8, 2  ;;  %v888_v29 = vrot.slane %v10406_v51, 2  ;;  %v881_v32 = vsel %vm854_vm1, %v878_v11, %v880_v10  ;;  %v1238_v23 = vrot.slane %v10378_v63, 3 }
  0x2c   :  { %v531_v31 = vsel %vm496_vm2, %v529_v16, %v530_v25  ;;  %v1240_v33 = vrot.slane %v10383_v57, 3  ;;  %v884_v37 = vsel %vm854_vm1, %v882_v14, %v883_v17  ;;  %v886_v42 = vsel %vm854_vm1, %v883_v17, %v885_v27 }
  0x2d   :  { %v8372_v36 = vpack.i.bf16 %v531_v31, %v528_v24  ;;  %v1241_v41 = vrot.slane %v10389_v60, 3  ;;  %v889_v43 = vsel %vm854_vm1, %v887_v28, %v888_v29  ;;  %v1239_v11 = vsel %vm1212_vm3, %v1236_v21, %v1238_v23  ;;  %v62_v21 = vld [vmem:[%s15639_s0 + $0x80] sm:$0xff] }
  0x2e   :  { %8363 = vrot.lane.b32.xlu1 %v8362_v55, %s10074_s14  ;;  %8358 = vrot.lane.b32.xlu0 %v8357_v18, %s10074_s14  ;;  %v1243_v46 = vrot.slane %v404_v6, 3  ;;  %v1245_v40 = vrot.slane %v10399_v8, 3  ;;  %v1246_v50 = vrot.slane %v10406_v51, 3  ;;  %v1596_v52 = vrot.slane %v10378_v63, 4 }
  0x2f   :  { %v1242_v35 = vsel %vm1212_vm3, %v1240_v33, %v1241_v41  ;;  %v1598_v53 = vrot.slane %v10383_v57, 4  ;;  %v1599_v55 = vrot.slane %v10389_v60, 4  ;;  %v1601_v56 = vrot.slane %v404_v6, 4 }
  0x30   :  { %v1244_v54 = vsel %vm1212_vm3, %v1241_v41, %v1243_v46  ;;  %v8382_v58 = vpack.i.bf16 %v889_v43, %v886_v42  ;;  %v1247_v59 = vsel %vm1212_vm3, %v1245_v40, %v1246_v50  ;;  %v1603_v63 = vrot.slane %v10399_v8, 4 }
  0x31   :  { %v1604_v19 = vrot.slane %v10406_v51, 4  ;;  %v8377_v39 = vpack.i.bf16 %v884_v37, %v881_v32  ;;  %v8387_v61 = vpack.i.bf16 %v1242_v35, %v1239_v11  ;;  %v1597_v62 = vsel %vm1570_vm4, %v1594_v45, %v1596_v52 }
  0x32   :  { %8373 = vrot.lane.b32.xlu1 %v8372_v36, %s10072_s21  ;;  %8368 = vrot.lane.b32.xlu0 %v8367_v26, %s10072_s21  ;;  %v196_v6 = vrot.slane %v60_v47, 6  ;;  %v8392_v10 = vpack.i.bf16 %v1247_v59, %v1244_v54  ;;  %v1600_v14 = vsel %vm1570_vm4, %v1598_v53, %v1599_v55  ;;  %v197_v15 = vrot.slane %v61_v49, 6 }
  0x33   :  { %v10467_v16 = vsel %vm174_vm0, %v194_v1, 0.0  ;;  %v1602_v17 = vsel %vm1570_vm4, %v1599_v55, %v1601_v56  ;;  %v1605_v18 = vsel %vm1570_vm4, %v1603_v63, %v1604_v19  ;;  %v199_v24 = vrot.slane %v62_v21, 6 }
  0x34   :  { %v10474_v45 = vsel %vm174_vm0, 0.0, %v196_v6  ;;  %v10478_v26 = vsel %vm174_vm0, %v196_v6, %v197_v15  ;;  %v532_v27 = vrot.slane %v10467_v16, 1  ;;  %v200_v1 = vrot.slane %v10463_v9, 6 }
  0x35   :  { %v10483_v28 = vsel %vm174_vm0, %v197_v15, 0.0  ;;  %v534_v31 = vrot.slane %v10474_v45, 1  ;;  %v535_v32 = vrot.slane %v10478_v26, 1  ;;  %v10489_v23 = vsel %vm174_vm0, 0.0, %v199_v24  ;;  %v66_v15 = vld [vmem:[%s15639_s0 + $0xa0] sm:$0xff] }
  0x36   :  { %8383 = vrot.lane.b32.xlu1 %v8382_v58, %s10071_s20  ;;  %8378 = vrot.lane.b32.xlu0 %v8377_v39, %s10071_s20  ;;  %15811 = vst [vmem:[#allocation9_spill] sm:$0xff] %v10489_v23  ;;  %v537_v33 = vrot.slane %v10483_v28, 1  ;;  %v10493_v36 = vsel %vm174_vm0, %v199_v24, %v200_v1  ;;  %v539_v37 = vrot.slane %v10489_v23, 1  ;;  %v890_v42 = vrot.slane %v10467_v16, 2 }
  0x37   :  { %15812 = vst [vmem:[#allocation10_spill] sm:$0xff] %v10493_v36  ;;  %v892_v41 = vrot.slane %v10474_v45, 2  ;;  %v8397_v43 = vpack.i.bf16 %v1600_v14, %v1597_v62  ;;  %v540_v11 = vrot.slane %v10493_v36, 1  ;;  %v893_v46 = vrot.slane %v10478_v26, 2  ;;  %v64_v62 = vld [vmem:[%s15639_s0 + $0x90] sm:$0xff] }
  0x38   :  { %v8402_v40 = vpack.i.bf16 %v1605_v18, %v1602_v17  ;;  %v538_v47 = vsel %vm496_vm2, %v535_v32, %v537_v33  ;;  %v895_v49 = vrot.slane %v10483_v28, 2  ;;  %v897_v35 = vrot.slane %v10489_v23, 2 }
  0x39   :  { %v533_v52 = vsel %vm496_vm2, %v530_v25, %v532_v27  ;;  %v536_v53 = vsel %vm496_vm2, %v534_v31, %v535_v32  ;;  %v541_v21 = vsel %vm496_vm2, %v539_v37, %v540_v11  ;;  %v898_v54 = vrot.slane %v10493_v36, 2  ;;  %v10552_v37 = vld [vmem:[%s15639_s0 + $0xa8] sm:$0xff] }
  0x3a   :  { %8393 = vrot.lane.b32.xlu1 %v8392_v10, %s10073_s26  ;;  %8388 = vrot.lane.b32.xlu0 %v8387_v61, %s10073_s26  ;;  %v891_v55 = vsel %vm854_vm1, %v888_v29, %v890_v42  ;;  %v894_v56 = vsel %vm854_vm1, %v892_v41, %v893_v46  ;;  %v1248_v58 = vrot.slane %v10467_v16, 3  ;;  %v1250_v59 = vrot.slane %v10474_v45, 3  ;;  %v65_v29 = vld [vmem:[%s15639_s0 + $0x98] sm:$0xff] }
  0x3b   :  { %v8412_v63 = vpack.i.bf16 %v541_v21, %v538_v47  ;;  %v896_v25 = vsel %vm854_vm1, %v893_v46, %v895_v49  ;;  %v1251_v39 = vrot.slane %v10478_v26, 3  ;;  %v1253_v61 = vrot.slane %v10483_v28, 3 }
  0x3c   :  { %v899_v6 = vsel %vm854_vm1, %v897_v35, %v898_v54  ;;  %v1255_v9 = vrot.slane %v10489_v23, 3  ;;  %v1256_v10 = vrot.slane %v10493_v36, 3  ;;  %v1606_v14 = vrot.slane %v10467_v16, 4 }
  0x3d   :  { %v8407_v17 = vpack.i.bf16 %v536_v53, %v533_v52  ;;  %v1254_v18 = vsel %vm1212_vm3, %v1251_v39, %v1253_v61  ;;  %v1608_v24 = vrot.slane %v10474_v45, 4  ;;  %v1609_v27 = vrot.slane %v10478_v26, 4 }
  0x3e   :  { %8403 = vrot.lane.b32.xlu1 %v8402_v40, %s10074_s14  ;;  %8398 = vrot.lane.b32.xlu0 %v8397_v43, %s10074_s14  ;;  %v8417_v31 = vpack.i.bf16 %v894_v56, %v891_v55  ;;  %v1249_v32 = vsel %vm1212_vm3, %v1246_v50, %v1248_v58  ;;  %v1257_v16 = vsel %vm1212_vm3, %v1255_v9, %v1256_v10  ;;  %v1611_v33 = vrot.slane %v10483_v28, 4 }
  0x3f   :  { %v8422_v42 = vpack.i.bf16 %v899_v6, %v896_v25  ;;  %v1252_v41 = vsel %vm1212_vm3, %v1250_v59, %v1251_v39  ;;  %v1613_v43 = vrot.slane %v10489_v23, 4  ;;  %v1614_v46 = vrot.slane %v10493_v36, 4 }
  0x40   :  { %v8432_v50 = vpack.i.bf16 %v1257_v16, %v1254_v18  ;;  %v1607_v40 = vsel %vm1570_vm4, %v1604_v19, %v1606_v14  ;;  %v202_v28 = vrot.slane %v64_v62, 6  ;;  %v203_v47 = vrot.slane %v65_v29, 6 }
  0x41   :  { %v1610_v49 = vsel %vm1570_vm4, %v1608_v24, %v1609_v27  ;;  %v10564_v35 = vsel %vm174_vm0, %v200_v1, 0.0  ;;  %v205_v52 = vrot.slane %v66_v15, 6  ;;  %v206_v53 = vrot.slane %v10552_v37, 6 }
  0x42   :  { %8413 = vrot.lane.b32.xlu1 %v8412_v63, %s10072_s21  ;;  %8408 = vrot.lane.b32.xlu0 %v8407_v17, %s10072_s21  ;;  %v1612_v21 = vsel %vm1570_vm4, %v1609_v27, %v1611_v33  ;;  %v1615_v55 = vsel %vm1570_vm4, %v1613_v43, %v1614_v46  ;;  %v10572_v19 = vsel %vm174_vm0, %v202_v28, %v203_v47  ;;  %v10575_v56 = vsel %vm174_vm0, 0.0, %v202_v28 }
  0x43   :  { %15813 = vst [vmem:[#allocation11_spill] sm:$0xff] %v10572_v19  ;;  %15814 = vst [vmem:[#allocation12_spill] sm:$0xff] %v10575_v56  ;;  %v542_v58 = vrot.slane %v10564_v35, 1  ;;  %v544_v1 = vrot.slane %v10575_v56, 1  ;;  %v10580_v59 = vsel %vm174_vm0, %v205_v52, %v206_v53  ;;  %v10583_v63 = vsel %vm174_vm0, 0.0, %v205_v52 }
  0x44   :  { %15815 = vst [vmem:[#allocation13_spill] sm:$0xff] %v10580_v59  ;;  %15816 = vst [vmem:[#allocation14_spill] sm:$0xff] %v10583_v63  ;;  %v545_v25 = vrot.slane %v10572_v19, 1  ;;  %v10588_v39 = vsel %vm174_vm0, %v203_v47, 0.0  ;;  %v549_v61 = vrot.slane %v10583_v63, 1  ;;  %v550_v62 = vrot.slane %v10580_v59, 1 }
  0x45   :  { %v8427_v29 = vpack.i.bf16 %v1252_v41, %v1249_v32  ;;  %v547_v6 = vrot.slane %v10588_v39, 1  ;;  %v900_v9 = vrot.slane %v10564_v35, 2  ;;  %v902_v14 = vrot.slane %v10575_v56, 2 }
  0x46   :  { %8423 = vrot.lane.b32.xlu1 %v8422_v42, %s10071_s20  ;;  %8418 = vrot.lane.b32.xlu0 %v8417_v31, %s10071_s20  ;;  %v903_v15 = vrot.slane %v10572_v19, 2  ;;  %v905_v17 = vrot.slane %v10588_v39, 2  ;;  %v8437_v18 = vpack.i.bf16 %v1610_v49, %v1607_v40  ;;  %v8442_v24 = vpack.i.bf16 %v1615_v55, %v1612_v21  ;;  %v69_v49 = vld [vmem:[%s15639_s0 + $0xb8] sm:$0xff] }
  0x47   :  { %v907_v27 = vrot.slane %v10583_v63, 2  ;;  %v908_v16 = vrot.slane %v10580_v59, 2  ;;  %v543_v31 = vsel %vm496_vm2, %v540_v11, %v542_v58  ;;  %v546_v32 = vsel %vm496_vm2, %v544_v1, %v545_v25  ;;  %v70_v1 = vld [vmem:[%s15639_s0 + $0xc0] sm:$0xff] }
  0x48   :  { %v551_v33 = vsel %vm496_vm2, %v549_v61, %v550_v62  ;;  %v1258_v37 = vrot.slane %v10564_v35, 3  ;;  %v548_v42 = vsel %vm496_vm2, %v545_v25, %v547_v6  ;;  %v901_v41 = vsel %vm854_vm1, %v898_v54, %v900_v9  ;;  %v10642_v61 = vld [vmem:[%s15639_s0 + $0xc8] sm:$0xff] }
  0x49   :  { %v1260_v43 = vrot.slane %v10575_v56, 3  ;;  %v1261_v11 = vrot.slane %v10572_v19, 3  ;;  %v904_v40 = vsel %vm854_vm1, %v902_v14, %v903_v15  ;;  %v906_v28 = vsel %vm854_vm1, %v903_v15, %v905_v17 }
  0x4a   :  { %8433 = vrot.lane.b32.xlu1 %v8432_v50, %s10073_s26  ;;  %8428 = vrot.lane.b32.xlu0 %v8427_v29, %s10073_s26  ;;  %v68_v50 = vld [vmem:[%s15639_s0 + $0xb0] sm:$0xff]  ;;  %v909_v47 = vsel %vm854_vm1, %v907_v27, %v908_v16  ;;  %v1259_v54 = vsel %vm1212_vm3, %v1256_v10, %v1258_v37  ;;  %v1263_v21 = vrot.slane %v10588_v39, 3  ;;  %v1265_v55 = vrot.slane %v10583_v63, 3 }
  0x4b   :  { %v1262_v52 = vsel %vm1212_vm3, %v1260_v43, %v1261_v11  ;;  %v1266_v58 = vrot.slane %v10580_v59, 3  ;;  %v8452_v25 = vpack.i.bf16 %v551_v33, %v548_v42  ;;  %v1616_v10 = vrot.slane %v10564_v35, 4 }
  0x4c   :  { %v8447_v29 = vpack.i.bf16 %v546_v32, %v543_v31  ;;  %v8457_v6 = vpack.i.bf16 %v904_v40, %v901_v41  ;;  %v1618_v9 = vrot.slane %v10575_v56, 4  ;;  %v1619_v14 = vrot.slane %v10572_v19, 4 }
  0x4d   :  { %v8462_v15 = vpack.i.bf16 %v909_v47, %v906_v28  ;;  %v8467_v17 = vpack.i.bf16 %v1262_v52, %v1259_v54  ;;  %v208_v27 = vrot.slane %v68_v50, 6  ;;  %v1264_v35 = vsel %vm1212_vm3, %v1261_v11, %v1263_v21 }
  0x4e   :  { %8443 = vrot.lane.b32.xlu1 %v8442_v24, %s10074_s14  ;;  %8438 = vrot.lane.b32.xlu0 %v8437_v18, %s10074_s14  ;;  %v1621_v24 = vrot.slane %v10588_v39, 4  ;;  %v1267_v33 = vsel %vm1212_vm3, %v1265_v55, %v1266_v58  ;;  %v209_v37 = vrot.slane %v69_v49, 6  ;;  %v10653_v18 = vsel %vm174_vm0, %v206_v53, 0.0 }
  0x4f   :  { %v1617_v31 = vsel %vm1570_vm4, %v1614_v46, %v1616_v10  ;;  %v1623_v32 = vrot.slane %v10583_v63, 4  ;;  %v10661_v39 = vsel %vm174_vm0, 0.0, %v208_v27  ;;  %v211_v42 = vrot.slane %v70_v1, 6 }
  0x50   :  { %15817 = vst [vmem:[#allocation15_spill] sm:$0xff] %v10661_v39  ;;  %v1624_v41 = vrot.slane %v10580_v59, 4  ;;  %v10666_v43 = vsel %vm174_vm0, %v208_v27, %v209_v37  ;;  %v212_v53 = vrot.slane %v10642_v61, 6  ;;  %v10670_v11 = vsel %vm174_vm0, %v209_v37, 0.0 }
  0x51   :  { %15818 = vst [vmem:[#allocation16_spill] sm:$0xff] %v10666_v43  ;;  %v552_v46 = vrot.slane %v10653_v18, 1  ;;  %v554_v50 = vrot.slane %v10661_v39, 1  ;;  %v555_v40 = vrot.slane %v10666_v43, 1  ;;  %v10676_v28 = vsel %vm174_vm0, 0.0, %v211_v42 }
  0x52   :  { %8453 = vrot.lane.b32.xlu1 %v8452_v25, %s10072_s21  ;;  %8448 = vrot.lane.b32.xlu0 %v8447_v29, %s10072_s21  ;;  %15819 = vst [vmem:[#allocation17_spill] sm:$0xff] %v10676_v28  ;;  %v10679_v47 = vsel %vm174_vm0, %v211_v42, %v212_v53  ;;  %v557_v54 = vrot.slane %v10670_v11, 1  ;;  %v559_v49 = vrot.slane %v10676_v28, 1  ;;  %v910_v52 = vrot.slane %v10653_v18, 2 }
  0x53   :  { %15820 = vst [vmem:[#allocation18_spill] sm:$0xff] %v10679_v47  ;;  %v8472_v21 = vpack.i.bf16 %v1267_v33, %v1264_v35  ;;  %v1620_v55 = vsel %vm1570_vm4, %v1618_v9, %v1619_v14  ;;  %v560_v1 = vrot.slane %v10679_v47, 1  ;;  %v912_v25 = vrot.slane %v10661_v39, 2 }
  0x54   :  { %v1622_v10 = vsel %vm1570_vm4, %v1619_v14, %v1621_v24  ;;  %v1625_v61 = vsel %vm1570_vm4, %v1623_v32, %v1624_v41  ;;  %v913_v29 = vrot.slane %v10666_v43, 2  ;;  %v915_v27 = vrot.slane %v10670_v11, 2 }
  0x55   :  { %v15655_v9 = vrot.slane %v10679_v47, 2  ;;  %v8477_v35 = vpack.i.bf16 %v1620_v55, %v1617_v31  ;;  %v8482_v33 = vpack.i.bf16 %v1625_v61, %v1622_v10  ;;  %v556_v14 = vsel %vm496_vm2, %v554_v50, %v555_v40 }
  0x56   :  { %8463 = vrot.lane.b32.xlu1 %v8462_v15, %s10071_s20  ;;  %8458 = vrot.lane.b32.xlu0 %v8457_v6, %s10071_s20  ;;  %v917_v15 = vrot.slane %v10676_v28, 2  ;;  %v553_v6 = vsel %vm496_vm2, %v550_v62, %v552_v46  ;;  %v558_v24 = vsel %vm496_vm2, %v555_v40, %v557_v54  ;;  %v561_v37 = vsel %vm496_vm2, %v559_v49, %v560_v1  ;;  %v72_v62 = vld [vmem:[%s15639_s0 + $0xd0] sm:$0xff]  ;;  %v74_v54 = vld [vmem:[%s15639_s0 + $0xe0] sm:$0xff] }
  0x57   :  { %v911_v31 = vsel %vm854_vm1, %v908_v16, %v910_v52  ;;  %v914_v32 = vsel %vm854_vm1, %v912_v25, %v913_v29  ;;  %v1268_v42 = vrot.slane %v10653_v18, 3  ;;  %v916_v46 = vsel %vm854_vm1, %v913_v29, %v915_v27  ;;  %v10730_v49 = vld [vmem:[%s15639_s0 + $0xe8] sm:$0xff] }
  0x58   :  { %v919_v50 = vsel %vm854_vm1, %v917_v15, %v15655_v9  ;;  %v1270_v16 = vrot.slane %v10661_v39, 3  ;;  %v1271_v40 = vrot.slane %v10666_v43, 3  ;;  %v8487_v52 = vpack.i.bf16 %v556_v14, %v553_v6 }
  0x59   :  { %v1275_v55 = vrot.slane %v10676_v28, 3  ;;  %v8492_v25 = vpack.i.bf16 %v561_v37, %v558_v24  ;;  %v8497_v10 = vpack.i.bf16 %v914_v32, %v911_v31  ;;  %v15660_v61 = vrot.slane %v10679_v47, 3 }
  0x5a   :  { %8473 = vrot.lane.b32.xlu1 %v8472_v21, %s10073_s26  ;;  %8468 = vrot.lane.b32.xlu0 %v8467_v17, %s10073_s26  ;;  %v73_v17 = vld [vmem:[%s15639_s0 + $0xd8] sm:$0xff]  ;;  %v1273_v21 = vrot.slane %v10670_v11, 3  ;;  %v1626_v29 = vrot.slane %v10653_v18, 4  ;;  %v8502_v27 = vpack.i.bf16 %v919_v50, %v916_v46  ;;  %v1269_v15 = vsel %vm1212_vm3, %v1266_v58, %v1268_v42 }
  0x5b   :  { %v214_v6 = vrot.slane %v72_v62, 6  ;;  %v215_v14 = vrot.slane %v73_v17, 6  ;;  %v1628_v4 = vrot.slane %v10661_v39, 4  ;;  %v1629_v9 = vrot.slane %v10666_v43, 4 }
  0x5c   :  { %v15658_v24 = vrot.slane %v10730_v49, 6  ;;  %v1272_v37 = vsel %vm1212_vm3, %v1270_v16, %v1271_v40  ;;  %v1274_v18 = vsel %vm1212_vm3, %v1271_v40, %v1273_v21  ;;  %v10750_v31 = vsel %vm174_vm0, %v212_v53, 0.0 }
  0x5d   :  { %v1277_v58 = vsel %vm1212_vm3, %v1275_v55, %v15660_v61  ;;  %v1631_v32 = vrot.slane %v10670_v11, 4  ;;  %v10758_v42 = vsel %vm174_vm0, %v214_v6, %v215_v14  ;;  %v1633_v17 = vrot.slane %v10676_v28, 4 }
  0x5e   :  { %8483 = vrot.lane.b32.xlu1 %v8482_v33, %s10074_s14  ;;  %8478 = vrot.lane.b32.xlu0 %v8477_v35, %s10074_s14  ;;  %v217_v33 = vrot.slane %v74_v54, 6  ;;  %v10747_v35 = vsel %vm174_vm0, 0.0, %v214_v6  ;;  %15822 = vst [vmem:[#allocation20_spill] sm:$0xff] %v10758_v42  ;;  %v15656_v53 = vrot.slane %v10679_v47, 4  ;;  %v10772_v50 = vsel %vm174_vm0, %v215_v14, 0.0 }
  0x5f   :  { %15821 = vst [vmem:[#allocation19_spill] sm:$0xff] %v10747_v35  ;;  %v562_v11 = vrot.slane %v10750_v31, 1  ;;  %v564_v16 = vrot.slane %v10747_v35, 1  ;;  %v8507_v40 = vpack.i.bf16 %v1272_v37, %v1269_v15  ;;  %v1627_v54 = vsel %vm1570_vm4, %v1624_v41, %v1626_v29 }
  0x60   :  { %v10761_v62 = vsel %vm174_vm0, 0.0, %v217_v33  ;;  %v10769_v46 = vsel %vm174_vm0, %v217_v33, %v15658_v24  ;;  %v8512_v55 = vpack.i.bf16 %v1277_v58, %v1274_v18  ;;  %v567_v6 = vrot.slane %v10772_v50, 1 }
  0x61   :  { %15823 = vst [vmem:[#allocation21_spill] sm:$0xff] %v10761_v62  ;;  %15824 = vst [vmem:[#allocation22_spill] sm:$0xff] %v10769_v46  ;;  %v569_v21 = vrot.slane %v10761_v62, 1  ;;  %v15657_v14 = vrot.slane %v10769_v46, 1  ;;  %v1632_v15 = vsel %vm1570_vm4, %v1629_v9, %v1631_v32  ;;  %v1635_v41 = vsel %vm1570_vm4, %v1633_v17, %v15656_v53  ;;  %v76_v32 = vld [vmem:[%s15639_s0 + $0xf0] sm:$0xff] }
  0x62   :  { %8493 = vrot.lane.b32.xlu1 %v8492_v25, %s10072_s21  ;;  %8488 = vrot.lane.b32.xlu0 %v8487_v52, %s10072_s21  ;;  %v565_v52 = vrot.slane %v10758_v42, 1  ;;  %v1630_v25 = vsel %vm1570_vm4, %v1628_v4, %v1629_v9  ;;  %v920_v29 = vrot.slane %v10750_v31, 2  ;;  %v922_v33 = vrot.slane %v10747_v35, 2 }
  0x63   :  { %v925_v4 = vrot.slane %v10772_v50, 2  ;;  %v927_v37 = vrot.slane %v10761_v62, 2  ;;  %v15659_v18 = vrot.slane %v10769_v46, 2  ;;  %v8522_v9 = vpack.i.bf16 %v1635_v41, %v1632_v15 }
  0x64   :  { %v563_v58 = vsel %vm496_vm2, %v560_v1, %v562_v11  ;;  %v566_v17 = vsel %vm496_vm2, %v564_v16, %v565_v52  ;;  %v568_v53 = vsel %vm496_vm2, %v565_v52, %v567_v6  ;;  %v77_v1 = vld [vmem:[%s15639_s0 + $0xf8] sm:$0xff]  ;;  %v1285_v16 = vrot.slane %v10761_v62, 3 }
  0x65   :  { %v15667_v52 = vrot.slane %v10769_v46, 3  ;;  %v929_v15 = vsel %vm854_vm1, %v927_v37, %v15659_v18  ;;  %v1278_v41 = vrot.slane %v10750_v31, 3  ;;  %v220_v24 = vrot.slane %v76_v32, 6 }
  0x66   :  { %8503 = vrot.lane.b32.xlu1 %v8502_v27, %s10071_s20  ;;  %8498 = vrot.lane.b32.xlu0 %v8497_v10, %s10071_s20  ;;  %v923_v27 = vrot.slane %v10758_v42, 2  ;;  %v8517_v10 = vpack.i.bf16 %v1630_v25, %v1627_v54  ;;  %v15825_v54 = vrot.slane %v10679_v47, 2  ;;  %v221_v37 = vrot.slane %v77_v1, 6 }
  0x67   :  { %v1287_v0 = vsel %vm1212_vm3, %v1285_v16, %v15667_v52  ;;  %vm1928_vm5 = vcmask 7168   ;;  %vm1994_vm6 = vcmask 15360   ;;  %vm2060_vm7 = vcmask 23552  }
  0x68   :  { %v921_v25 = vsel %vm854_vm1, %v15825_v54, %v920_v29  ;;  %v924_v11 = vsel %vm854_vm1, %v922_v33, %v923_v27  ;;  %v926_v6 = vsel %vm854_vm1, %v923_v27, %v925_v4  ;;  %v10830_v29 = vld [vmem:[%s15639_s0 + $0x108] sm:$0xff]  ;;  %v1280_v54 = vrot.slane %v10747_v35, 3 }
  0x69   :  { %v8527_v27 = vpack.i.bf16 %v566_v17, %v563_v58  ;;  %v8537_v4 = vpack.i.bf16 %v924_v11, %v921_v25  ;;  %v8542_v18 = vpack.i.bf16 %v929_v15, %v926_v6  ;;  %v15826_v58 = vrot.slane %v10679_v47, 3 }
  0x6a   :  { %8513 = vrot.lane.b32.xlu1 %v8512_v55, %s10073_s26  ;;  %8508 = vrot.lane.b32.xlu0 %v8507_v40, %s10073_s26  ;;  %v571_v55 = vsel %vm496_vm2, %v569_v21, %v15657_v14  ;;  %v1283_v40 = vrot.slane %v10772_v50, 3  ;;  %v78_v21 = vld [vmem:[%s15639_s0 + $0x100] sm:$0xff]  ;;  %v1281_v14 = vrot.slane %v10758_v42, 3  ;;  %v1639_v17 = vrot.slane %v10758_v42, 4 }
  0x6b   :  { %v8532_v33 = vpack.i.bf16 %v571_v55, %v568_v53  ;;  %v223_v38 = vrot.slane %v78_v21, 6  ;;  %v1641_v53 = vrot.slane %v10772_v50, 4  ;;  %v15665_v55 = vrot.slane %v10769_v46, 4 }
  0x6c   :  { %v1284_v61 = vsel %vm1212_vm3, %v1281_v14, %v1283_v40  ;;  %v1279_v32 = vsel %vm1212_vm3, %v15826_v58, %v1278_v41  ;;  %v15827_v25 = vrot.slane %v10730_v49, 6  ;;  %v10855_v50 = vsel %vm174_vm0, %v221_v37, 0.0 }
  0x6d   :  { %v10859_v11 = vsel %vm174_vm0, %v220_v24, %v221_v37  ;;  %v10862_v40 = vsel %vm174_vm0, 0.0, %v220_v24  ;;  %v10870_v49 = vsel %vm174_vm0, 0.0, %v223_v38  ;;  %v1282_v21 = vsel %vm1212_vm3, %v1280_v54, %v1281_v14 }
  0x6e   :  { %8523 = vrot.lane.b32.xlu1 %v8522_v9, %s10074_s14  ;;  %8518 = vrot.lane.b32.xlu0 %v8517_v10, %s10074_s14  ;;  %v1643_v9 = vrot.slane %v10761_v62, 4  ;;  %v15664_v10 = vrot.slane %v10830_v29, 6  ;;  %v10852_v1 = vsel %vm174_vm0, %v15827_v25, 0.0  ;;  %15828 = vst [vmem:[#allocation23_spill] sm:$0xff] %v10859_v11  ;;  %15829 = vst [vmem:[#allocation24_spill] sm:$0xff] %v10862_v40  ;;  %v8552_v6 = vpack.i.bf16 %v1287_v0, %v1284_v61 }
  0x6f   :  { %15831 = vst [vmem:[#allocation26_spill] sm:$0xff] %v10870_v49  ;;  %v1636_v15 = vrot.slane %v10750_v31, 4  ;;  %v1638_v41 = vrot.slane %v10747_v35, 4  ;;  %v577_v37 = vrot.slane %v10855_v50, 1  ;;  %v575_v0 = vrot.slane %v10859_v11, 1 }
  0x70   :  { %v10867_v16 = vsel %vm174_vm0, %v223_v38, %v15664_v10  ;;  %v1645_v24 = vsel %vm1570_vm4, %v1643_v9, %v15665_v55  ;;  %v574_v38 = vrot.slane %v10862_v40, 1  ;;  %v579_v61 = vrot.slane %v10870_v49, 1 }
  0x71   :  { %15830 = vst [vmem:[#allocation25_spill] sm:$0xff] %v10867_v16  ;;  %v15666_v31 = vrot.slane %v10867_v16, 1  ;;  %v8547_v14 = vpack.i.bf16 %v1282_v21, %v1279_v32  ;;  %v15832_v54 = vrot.slane %v10679_v47, 4  ;;  %v1640_v9 = vsel %vm1570_vm4, %v1638_v41, %v1639_v17 }
  0x72   :  { %8533 = vrot.lane.b32.xlu1 %v8532_v33, %s10072_s21  ;;  %8528 = vrot.lane.b32.xlu0 %v8527_v27, %s10072_s21  ;;  %v1642_v33 = vsel %vm1570_vm4, %v1639_v17, %v1641_v53  ;;  %v572_v27 = vrot.slane %v10852_v1, 1  ;;  %v930_v25 = vrot.slane %v10852_v1, 2  ;;  %v932_v10 = vrot.slane %v10862_v40, 2 }
  0x73   :  { %v1637_v53 = vsel %vm1570_vm4, %v15832_v54, %v1636_v15  ;;  %v8562_v58 = vpack.i.bf16 %v1645_v24, %v1642_v33  ;;  %v933_v55 = vrot.slane %v10859_v11, 2  ;;  %v935_v32 = vrot.slane %v10855_v50, 2 }
  0x74   :  { %v937_v21 = vrot.slane %v10870_v49, 2  ;;  %v8557_v15 = vpack.i.bf16 %v1640_v9, %v1637_v53  ;;  %v15833_v41 = vrot.slane %v10769_v46, 1  ;;  %v1290_v54 = vrot.slane %v10862_v40, 3 }
  0x75   :  { %v15834_v17 = vrot.slane %v10769_v46, 2  ;;  %v936_v53 = vsel %vm854_vm1, %v933_v55, %v935_v32  ;;  %v15835_v9 = vrot.slane %v10867_v16, 2  ;;  %vm2126_vm8 = vcmask 31744  }
  0x76   :  { %8543 = vrot.lane.b32.xlu1 %v8542_v18, %s10071_s20  ;;  %8538 = vrot.lane.b32.xlu0 %v8537_v4, %s10071_s20  ;;  %v578_v18 = vsel %vm496_vm2, %v575_v0, %v577_v37  ;;  %v581_v4 = vsel %vm496_vm2, %v579_v61, %v15666_v31  ;;  %v573_v33 = vsel %vm496_vm2, %v15833_v41, %v572_v27  ;;  %v1288_v61 = vrot.slane %v10852_v1, 3 }
  0x77   :  { %v576_v37 = vsel %vm496_vm2, %v574_v38, %v575_v0  ;;  %v1291_v31 = vrot.slane %v10859_v11, 3  ;;  %v8572_v52 = vpack.i.bf16 %v581_v4, %v578_v18  ;;  %v934_v27 = vsel %vm854_vm1, %v932_v10, %v933_v55 }
  0x78   :  { %v939_v38 = vsel %vm854_vm1, %v937_v21, %v15835_v9  ;;  %v1293_v0 = vrot.slane %v10855_v50, 3  ;;  %v8567_v41 = vpack.i.bf16 %v576_v37, %v573_v33  ;;  %v1295_v18 = vrot.slane %v10870_v49, 3  ;;  %v80_v37 = vld [vmem:[%s15639_s0 + $0x110] sm:$0xff] }
  0x79   :  { %v15668_v4 = vrot.slane %v10867_v16, 3  ;;  %v15836_v55 = vrot.slane %v10769_v46, 3  ;;  %v1292_v21 = vsel %vm1212_vm3, %v1290_v54, %v1291_v31  ;;  %v1651_v33 = vrot.slane %v10855_v50, 4 }
  0x7a   :  { %8553 = vrot.lane.b32.xlu1 %v8552_v6, %s10073_s26  ;;  %8548 = vrot.lane.b32.xlu0 %v8547_v14, %s10073_s26  ;;  %v931_v14 = vsel %vm854_vm1, %v15834_v17, %v930_v25  ;;  %v8582_v17 = vpack.i.bf16 %v939_v38, %v936_v53  ;;  %v15673_v54 = vrot.slane %v10867_v16, 4  ;;  %v1648_v50 = vrot.slane %v10862_v40, 4 }
  0x7b   :  { %v8577_v10 = vpack.i.bf16 %v934_v27, %v931_v14  ;;  %v1289_v32 = vsel %vm1212_vm3, %v15836_v55, %v1288_v61  ;;  %v1294_v14 = vsel %vm1212_vm3, %v1291_v31, %v1293_v0  ;;  %v1653_v61 = vrot.slane %v10870_v49, 4  ;;  %v81_v31 = vld [vmem:[%s15639_s0 + $0x118] sm:$0xff] }
  0x7c   :  { %v10906_v24 = vpop.permute.xlu1 %8278  ;;  %v8269_v6 = vpop.permute.xlu0 %8268  ;;  %v1649_v53 = vrot.slane %v10859_v11, 4  ;;  %v8587_v0 = vpack.i.bf16 %v1292_v21, %v1289_v32  ;;  %v226_v5 = vrot.slane %v80_v37, 6  ;;  %v15838_v37 = vrot.slane %v10830_v29, 6 }
  0x7d   :  { %v8270_v27 = vunpack.i.l.bf16 %v8269_v6  ;;  %v8271_v9 = vunpack.i.h.bf16 %v8269_v6  ;;  %v1655_v7 = vsel %vm1570_vm4, %v1653_v61, %v15673_v54  ;;  %v8281_v32 = vunpack.i.h.bf16 %v10906_v24 }
  0x7e   :  { %8563 = vrot.lane.b32.xlu1 %v8562_v58, %s10074_s14  ;;  %8558 = vrot.lane.b32.xlu0 %v8557_v15, %s10074_s14  ;;  %v1646_v15 = vrot.slane %v10852_v1, 4  ;;  %v1652_v6 = vsel %vm1570_vm4, %v1649_v53, %v1651_v33  ;;  %v10978_v61 = vsel %vm174_vm0, %v15838_v37, 0.0  ;;  %v10993_v37 = vsel %vm174_vm0, 0.0, %v226_v5 }
  0x7f   :  { %v1929_v21 = vsel %vm1928_vm5, 0.0, %v8270_v27  ;;  %v1930_v33 = vsel %vm1928_vm5, %v10184_v13, %v8271_v9  ;;  %15840 = vst [vmem:[#allocation28_spill] sm:$0xff] %v10993_v37  ;;  %v15845_v11 = vrot.slane %v10867_v16, 1 }
  0x80   :  { %v10925_v25 = vpop.permute.xlu1 %8283  ;;  %v10927_v58 = vpop.permute.xlu0 %8273  ;;  %v1996_v29 = vsel %vm1994_vm6, %v1930_v33, %v8281_v32 }
  0x82   :  { %8573 = vrot.lane.b32.xlu1 %v8572_v52, %s10072_s21  ;;  %8568 = vrot.lane.b32.xlu0 %v8567_v41, %s10072_s21  ;;  %v1297_v52 = vsel %vm1212_vm3, %v1295_v18, %v15668_v4  ;;  %v15837_v18 = vrot.slane %v10769_v46, 4  ;;  %v8280_v4 = vunpack.i.l.bf16 %v10906_v24  ;;  %v10983_v24 = vld [vmem:[%s15639_s0 + $0x128] sm:$0xff] }
  0x83   :  { %v8592_v41 = vpack.i.bf16 %v1297_v52, %v1294_v14  ;;  %v1650_v14 = vsel %vm1570_vm4, %v1648_v50, %v1649_v53  ;;  %v8602_v50 = vpack.i.bf16 %v1655_v7, %v1652_v6  ;;  %v15675_v6 = vrot.slane %v10983_v24, 6 }
  0x84   :  { %v8294_v1 = vpop.permute.xlu1 %8293  ;;  %v10948_v38 = vpop.permute.xlu0 %8288  ;;  %v1647_v55 = vsel %vm1570_vm4, %v15837_v18, %v1646_v15  ;;  %v1995_v53 = vsel %vm1994_vm6, %v1929_v21, %v8280_v4  ;;  %v582_v4 = vrot.slane %v10978_v61, 1 }
  0x85   :  { %v8296_v27 = vunpack.i.h.bf16 %v8294_v1  ;;  %v8295_v18 = vunpack.i.l.bf16 %v8294_v1  ;;  %v8597_v13 = vpack.i.bf16 %v1650_v14, %v1647_v55  ;;  %v8275_v55 = vunpack.i.l.bf16 %v10927_v58 }
  0x86   :  { %8583 = vrot.lane.b32.xlu1 %v8582_v17, %s10071_s20  ;;  %8578 = vrot.lane.b32.xlu0 %v8577_v10, %s10071_s20  ;;  %v82_v17 = vld [vmem:[%s15639_s0 + $0x120] sm:$0xff]  ;;  %v227_v10 = vrot.slane %v81_v31, 6  ;;  %v584_v14 = vrot.slane %v10993_v37, 1 }
  0x87   :  { %v229_v1 = vrot.slane %v82_v17, 6  ;;  %v2061_v32 = vsel %vm2060_vm7, %v1995_v53, %v8295_v18  ;;  %v2062_v21 = vsel %vm2060_vm7, %v1996_v29, %v8296_v27 }
  0x88   :  { %v10968_v15 = vpop.permute.xlu1 %8303  ;;  %v10973_v52 = vpop.permute.xlu0 %8298  ;;  %v10990_v31 = vsel %vm174_vm0, %v226_v5, %v227_v10 }
  0x89   :  { %15839 = vst [vmem:[#allocation27_spill] sm:$0xff] %v10990_v31  ;;  %v585_v33 = vrot.slane %v10990_v31, 1  ;;  %v11017_v18 = vsel %vm174_vm0, 0.0, %v229_v1 }
  0x8a   :  { %8593 = vrot.lane.b32.xlu1 %v8592_v41, %s10073_s26  ;;  %8588 = vrot.lane.b32.xlu0 %v8587_v0, %s10073_s26  ;;  %v8276_v0 = vunpack.i.h.bf16 %v10927_v58  ;;  %v8290_v58 = vunpack.i.l.bf16 %v10948_v38  ;;  %15843 = vst [vmem:[#allocation31_spill] sm:$0xff] %v11017_v18  ;;  %v947_v42 = vrot.slane %v11017_v18, 2 }
  0x8c   :  { %v8314_v9 = vpop.permute.xlu1 %8313  ;;  %v8309_v7 = vpop.permute.xlu0 %8308 }
  0x8d   :  { %v8316_v54 = vunpack.i.h.bf16 %v8314_v9  ;;  %v8315_v41 = vunpack.i.l.bf16 %v8314_v9  ;;  %v8311_v29 = vunpack.i.h.bf16 %v8309_v7 }
  0x8e   :  { %8603 = vrot.lane.b32.xlu1 %v8602_v50, %s10074_s14  ;;  %8598 = vrot.lane.b32.xlu0 %v8597_v13, %s10074_s14  ;;  %v11020_v50 = vsel %vm174_vm0, %v227_v10, 0.0  ;;  %v8286_v13 = vunpack.i.h.bf16 %v10925_v25  ;;  %v8285_v10 = vunpack.i.l.bf16 %v10925_v25  ;;  %v11046_v25 = vsel %vm496_vm2, %v15845_v11, %v582_v4  ;;  %v11062_v4 = vld [vmem:[%s15639_s0 + $0x138] sm:$0xff] }
  0x8f   :  { %v11003_v5 = vsel %vm2126_vm8, %v2061_v32, %v8315_v41  ;;  %v11007_v17 = vsel %vm2126_vm8, %v2062_v21, %v8316_v54  ;;  %v8291_v54 = vunpack.i.h.bf16 %v10948_v38  ;;  %v8310_v41 = vunpack.i.l.bf16 %v8309_v7  ;;  %v84_v21 = vld [vmem:[%s15639_s0 + $0x130] sm:$0xff] }
  0x90   :  { %15841 = vst [vmem:[#allocation29_spill] sm:$0xff] %v11003_v5  ;;  %15842 = vst [vmem:[#allocation30_spill] sm:$0xff] %v11007_v17  ;;  %v11012_v9 = vpop.permute.xlu1 %8323  ;;  %v8607_v27 = vpack.i.bf16 %v11007_v17, %v11003_v5  ;;  %v11023_v53 = vpop.permute.xlu0 %8318  ;;  %v11029_v32 = vsel %vm174_vm0, %v229_v1, %v15675_v6  ;;  %v1931_v38 = vsel %vm1928_vm5, %v10181_v12, %v8275_v55  ;;  %v587_v49 = vrot.slane %v11020_v50, 1 }
  0x91   :  { %15844 = vst [vmem:[#allocation32_spill] sm:$0xff] %v11029_v32  ;;  %v589_v7 = vrot.slane %v11017_v18, 1  ;;  %v1932_v1 = vsel %vm1928_vm5, %v10212_v34, %v8276_v0  ;;  %v1997_v6 = vsel %vm1994_vm6, %v1931_v38, %v8290_v58  ;;  %v11049_v12 = vsel %vm496_vm2, %v584_v14, %v585_v33 }
  0x92   :  { %8608 = vrot.lane.b32.xlu0 %v8607_v27, %s10075_s23  ;;  %v1998_v55 = vsel %vm1994_vm6, %v1932_v1, %v8291_v54  ;;  %v590_v47 = vrot.slane %v11029_v32, 1  ;;  %v8306_v34 = vunpack.i.h.bf16 %v10968_v15  ;;  %v2063_v0 = vsel %vm2060_vm7, %v1997_v6, %v8310_v41 }
  0x93   :  { %v2064_v58 = vsel %vm2060_vm7, %v1998_v55, %v8311_v29  ;;  %v940_v11 = vrot.slane %v10978_v61, 2  ;;  %v942_v54 = vrot.slane %v10993_v37, 2  ;;  %v232_v38 = vrot.slane %v84_v21, 6 }
  0x94   :  { %v8334_v40 = vpop.permute.xlu1 %8333  ;;  %v11052_v62 = vpop.permute.xlu0 %8328  ;;  %v8305_v6 = vunpack.i.l.bf16 %v10968_v15  ;;  %v11079_v55 = vsel %vm496_vm2, %v585_v33, %v587_v49  ;;  %v11086_v21 = vsel %vm496_vm2, %v589_v7, %v590_v47  ;;  %v233_v15 = vrot.slane %v11062_v4, 6 }
  0x95   :  { %v8336_v27 = vunpack.i.h.bf16 %v8334_v40  ;;  %v8335_v46 = vunpack.i.l.bf16 %v8334_v40  ;;  %v15848_v33 = vrot.slane %v10983_v24, 6  ;;  %v1933_v7 = vsel %vm1928_vm5, %v10191_v20, %v8285_v10 }
  0x96   :  { %v8330_v4 = vunpack.i.l.bf16 %v11052_v62  ;;  %v15852_v24 = vrot.slane %v10990_v31, 2 }
  0x97   :  { %v11065_v14 = vsel %vm2126_vm8, %v2063_v0, %v8335_v46  ;;  %v11068_v40 = vsel %vm2126_vm8, %v2064_v58, %v8336_v27  ;;  %v8301_v46 = vunpack.i.h.bf16 %v10973_v52  ;;  %v8300_v27 = vunpack.i.l.bf16 %v10973_v52 }
  0x98   :  { %15846 = vst [vmem:[#allocation33_spill] sm:$0xff] %v11065_v14  ;;  %15847 = vst [vmem:[#allocation34_spill] sm:$0xff] %v11068_v40  ;;  %v11072_v41 = vpop.permute.xlu1 %8343  ;;  %v8612_v29 = vpack.i.bf16 %v11068_v40, %v11065_v14  ;;  %v8617_v1 = vpack.i.bf16 %v11065_v14, %v11007_v17  ;;  %v11083_v0 = vpop.permute.xlu0 %8338  ;;  %v1934_v58 = vsel %vm1928_vm5, %v10194_v22, %v8286_v13  ;;  %v11097_v52 = vsel %vm174_vm0, %v15848_v33, 0.0 }
  0x99   :  { %v8632_v22 = vpack.i.bf16 %v11049_v12, %v11046_v25  ;;  %v11105_v13 = vsel %vm174_vm0, 0.0, %v232_v38  ;;  %v15850_v33 = vrot.slane %v10867_v16, 2  ;;  %v1936_v10 = vsel %vm1928_vm5, %v10259_v3, %v8301_v46 }
  0x9a   :  { %8613 = vrot.lane.b32.xlu1 %v8612_v29, %s10075_s23  ;;  %8618 = vrot.lane.b32.xlu0 %v8617_v1, %s10076_s27  ;;  %15849 = vst [vmem:[#allocation35_spill] sm:$0xff] %v11105_v13  ;;  %v1999_v29 = vsel %vm1994_vm6, %v1933_v7, %v8305_v6  ;;  %v2000_v1 = vsel %vm1994_vm6, %v1934_v58, %v8306_v34  ;;  %v592_v34 = vrot.slane %v11097_v52, 1  ;;  %v8325_v58 = vunpack.i.l.bf16 %v11012_v9 }
  0x9b   :  { %v11116_v20 = vsel %vm854_vm1, %v15850_v33, %v940_v11  ;;  %v1935_v25 = vsel %vm1928_vm5, %v10206_v30, %v8300_v27  ;;  %v11123_v6 = vsel %vm174_vm0, %v232_v38, %v233_v15  ;;  %v11130_v11 = vsel %vm854_vm1, %v942_v54, %v15852_v24 }
  0x9c   :  { %v11109_v49 = vpop.permute.xlu1 %8353  ;;  %v8349_v12 = vpop.permute.xlu0 %8348  ;;  %15851 = vst [vmem:[#allocation36_spill] sm:$0xff] %v11123_v6  ;;  %v594_v33 = vrot.slane %v11105_v13, 1  ;;  %v8326_v3 = vunpack.i.h.bf16 %v11012_v9  ;;  %v8331_v30 = vunpack.i.h.bf16 %v11052_v62  ;;  %v2065_v46 = vsel %vm2060_vm7, %v1999_v29, %v8330_v4  ;;  %v86_v9 = vld [vmem:[%s15639_s0 + $0x140] sm:$0xff]  ;;  %v11150_v62 = vld [vmem:[%s15639_s0 + $0x148] sm:$0xff] }
  0x9d   :  { %v8350_v7 = vunpack.i.l.bf16 %v8349_v12  ;;  %v8345_v38 = vunpack.i.l.bf16 %v11072_v41  ;;  %v8351_v27 = vunpack.i.h.bf16 %v8349_v12  ;;  %v945_v54 = vrot.slane %v11020_v50, 2  ;;  %v9912_v4 = vld [vmem:[%s15640_s1] sm:$0xff]  }
  0x9e   :  { %v8320_v29 = vunpack.i.l.bf16 %v11023_v53  ;;  %8115 = vmatprep.subr.bf16.mxu0 %v9912_v4  ;;  %v2066_v43 = vsel %vm2060_vm7, %v2000_v1, %v8331_v30  ;;  %v11179_v1 = vsel %vm174_vm0, %v233_v15, 0.0  ;;  %v2002_v30 = vsel %vm1994_vm6, %v1936_v10, %v8326_v3 }
  0x9f   :  { %v11140_v17 = vsel %vm2126_vm8, %v2065_v46, %v8350_v7  ;;  %v11159_v7 = vsel %vm496_vm2, %v590_v47, %v592_v34  ;;  %v2001_v46 = vsel %vm1994_vm6, %v1935_v25, %v8325_v58  ;;  %v15689_v47 = vrot.slane %v11150_v62, 6  ;;  %8116 = vmatpush3.bf16.msra.mxu0 %v9912_v4 }
  0xa0   :  { %v11137_v14 = vpop.permute.xlu1 %8363  ;;  %15853 = vst [vmem:[#allocation37_spill] sm:$0xff] %v11140_v17  ;;  %v8359_v24 = vpop.permute.xlu0 %8358  ;;  %v8622_v12 = vpack.i.bf16 %v11140_v17, %v11068_v40  ;;  %v2067_v39 = vsel %vm2060_vm7, %v2001_v46, %v8345_v38  ;;  %v235_v40 = vrot.slane %v86_v9, 6  ;;  %v8340_v25 = vunpack.i.l.bf16 %v11083_v0 }
  0xa1   :  { %v8360_v35 = vunpack.i.l.bf16 %v8359_v24  ;;  %v11171_v34 = vsel %vm2126_vm8, %v2066_v43, %v8351_v27  ;;  %v8346_v38 = vunpack.i.h.bf16 %v11072_v41  ;;  %v8355_v9 = vunpack.i.l.bf16 %v11109_v49 }
  0xa2   :  { %8623 = vrot.lane.b32.xlu1 %v8622_v12, %s10076_s27  ;;  %8628 = vrot.lane.b32.xlu0 %v8622_v12, %s10077_s18  ;;  %15854 = vst [vmem:[#allocation38_spill] sm:$0xff] %v11171_v34  ;;  %v8361_v15 = vunpack.i.h.bf16 %v8359_v24  ;;  %v15856_v27 = vrot.slane %v11123_v6, 1  ;;  %v15857_v41 = vrot.slane %v10990_v31, 2  ;;  %v15858_v4 = vrot.slane %v11029_v32, 2 }
  0xa3   :  { %v11174_v58 = vsel %vm2126_vm8, %v2067_v39, %v8360_v35  ;;  %v1937_v39 = vsel %vm1928_vm5, %v10256_v2, %v8320_v29  ;;  %v8365_v35 = vunpack.i.l.bf16 %v11137_v14  ;;  %v11208_v29 = vsel %vm174_vm0, %v235_v40, %v15689_v47 }
  0xa4   :  { %15855 = vst [vmem:[#allocation39_spill] sm:$0xff] %v11174_v58  ;;  %v11176_v28 = vpop.permute.xlu1 %8373  ;;  %v11184_v12 = vpop.permute.xlu0 %8368  ;;  %v11188_v43 = vpack.i.bf16 %v11174_v58, %v11171_v34  ;;  %v596_v10 = vsel %vm496_vm2, %v594_v33, %v15856_v27  ;;  %v946_v3 = vsel %vm854_vm1, %v15857_v41, %v945_v54  ;;  %v949_v2 = vsel %vm854_vm1, %v947_v42, %v15858_v4 }
  0xa5   :  { %15859 = vst [vmem:[#allocation40_spill] sm:$0xff] %v11208_v29  ;;  %v11211_v33 = vsel %vm174_vm0, 0.0, %v235_v40 }
  0xa6   :  { %8633 = vrot.lane.b32.xlu1 %v8632_v22, %s10072_s21  ;;  %8638 = vrot.lane.b32.xlu0 %v11188_v43, %s10077_s18  ;;  %15860 = vst [vmem:[#allocation41_spill] sm:$0xff] %v11211_v33 }
  0xa7   :  { %18 = vsyncpa [#allocation3], 0  ;;  %v2003_v22 = vsel %vm1994_vm6, %v1937_v39, %v8340_v25  ;;  %v1298_v46 = vrot.slane %v10978_v61, 3  ;;  %v1300_v54 = vrot.slane %v10993_v37, 3  ;;  %v1301_v27 = vrot.slane %v10990_v31, 3  ;;  %s10078_s19 = smov 20  }
  0xa8   :  { %v11214_v24 = vpop.permute.xlu1 %8383  ;;  %v2068_v42 = vsel %vm2060_vm7, %v2002_v30, %v8346_v38  ;;  %v2069_v41 = vsel %vm2060_vm7, %v2003_v22, %v8355_v9  ;;  %v11221_v4 = vpop.permute.xlu0 %8378  ;;  %v597_v40 = vrot.slane %v11179_v1, 1  ;;  %v599_v39 = vrot.slane %v11211_v33, 1 }
  0xa9   :  { %v11225_v47 = vsel %vm2126_vm8, %v2069_v41, %v8365_v35  ;;  %v11228_v25 = vsel %vm2126_vm8, %v2068_v42, %v8361_v15  ;;  %v15863_v30 = vpack.i.bf16 %v11086_v21, %v11079_v55  ;;  %v8652_v38 = vpack.i.bf16 %v11130_v11, %v11116_v20 }
  0xaa   :  { %15861 = vst [vmem:[#allocation42_spill] sm:$0xff] %v11225_v47  ;;  %15862 = vst [vmem:[#allocation43_spill] sm:$0xff] %v11228_v25  ;;  %8643 = vrot.lane.b32.xlu1 %v11188_v43, %s10078_s19  ;;  %v11246_v15 = vpack.i.bf16 %v11225_v47, %v11228_v25  ;;  %v8662_v22 = vpack.i.bf16 %v596_v10, %v11159_v7  ;;  %v8667_v42 = vpack.i.bf16 %v949_v2, %v946_v3  ;;  %vm2986_vm9 = vcmask 39936  }
  0xab   :  { %8648 = vrot.lane.b32.xlu0 %v15863_v30, %s10072_s21  ;;  %v15864_v41 = vrot.slane %v10867_v16, 3  ;;  %v1302_v55 = vsel %vm1212_vm3, %v1300_v54, %v1301_v27  ;;  %v15865_v21 = vrot.slane %v11123_v6, 1  ;;  %v15866_v11 = vrot.slane %v11208_v29, 1 }
  0xac   :  { %v11240_v9 = vpop.permute.xlu1 %8393  ;;  %v11242_v35 = vpop.permute.xlu0 %8388  ;;  %v950_v5 = vrot.slane %v11097_v52, 2  ;;  %v952_v7 = vrot.slane %v11105_v13, 2  ;;  %v953_v10 = vrot.slane %v11123_v6, 2  ;;  %v1303_v3 = vrot.slane %v11020_v50, 3 }
  0xad   :  { %v1299_v59 = vsel %vm1212_vm3, %v15864_v41, %v1298_v46  ;;  %v598_v20 = vsel %vm496_vm2, %v15865_v21, %v597_v40  ;;  %v601_v30 = vsel %vm496_vm2, %v599_v39, %v15866_v11  ;;  %v1305_v2 = vrot.slane %v11017_v18, 3 }
  0xae   :  { %8653 = vrot.lane.b32.xlu1 %v8652_v38, %s10071_s20  ;;  %v1306_v54 = vrot.slane %v11029_v32, 3  ;;  %v1656_v40 = vrot.slane %v10978_v61, 4  ;;  %v1658_v39 = vrot.slane %v10993_v37, 4  ;;  %v1659_v38 = vrot.slane %v10990_v31, 4 }
  0xaf   :  { %8658 = vrot.lane.b32.xlu0 %v11246_v15, %s10078_s19  ;;  %v955_v21 = vrot.slane %v11179_v1, 2  ;;  %v957_v11 = vrot.slane %v11211_v33, 2  ;;  %v8672_v56 = vpack.i.bf16 %v1302_v55, %v1299_v59  ;;  %v8677_v19 = vpack.i.bf16 %v601_v30, %v598_v20 }
  0xb0   :  { %v11267_v46 = vpop.permute.xlu1 %8403  ;;  %v11273_v41 = vpop.permute.xlu0 %8398  ;;  %v15867_v61 = vrot.slane %v11029_v32, 2  ;;  %v954_v31 = vsel %vm854_vm1, %v952_v7, %v953_v10  ;;  %v1304_v23 = vsel %vm1212_vm3, %v1301_v27, %v1303_v3  ;;  %v1307_v47 = vsel %vm1212_vm3, %v1305_v2, %v1306_v54 }
  0xb1   :  { %v15868_v63 = vrot.slane %v10867_v16, 4  ;;  %v956_v55 = vsel %vm854_vm1, %v953_v10, %v955_v21  ;;  %v1308_v30 = vrot.slane %v11097_v52, 3  ;;  %v1310_v27 = vrot.slane %v11105_v13, 3 }
  0xb2   :  { %8663 = vrot.lane.b32.xlu1 %v8662_v22, %s10072_s21  ;;  %v951_v37 = vsel %vm854_vm1, %v15867_v61, %v950_v5  ;;  %v1660_v22 = vsel %vm1570_vm4, %v1658_v39, %v1659_v38  ;;  %v15869_v5 = vrot.slane %v11208_v29, 2  ;;  %v1311_v7 = vrot.slane %v11123_v6, 3 }
  0xb3   :  { %8668 = vrot.lane.b32.xlu0 %v8667_v42, %s10071_s20  ;;  %v1657_v59 = vsel %vm1570_vm4, %v15868_v63, %v1656_v40  ;;  %v1661_v3 = vrot.slane %v11020_v50, 4  ;;  %v1663_v63 = vrot.slane %v11017_v18, 4  ;;  %v1664_v2 = vrot.slane %v11029_v32, 4 }
  0xb4   :  { %v11284_v36 = vpop.permute.xlu1 %8413  ;;  %v11292_v42 = vpop.permute.xlu0 %8408  ;;  %v959_v20 = vsel %vm854_vm1, %v957_v11, %v15869_v5  ;;  %v8682_v10 = vpack.i.bf16 %v954_v31, %v951_v37  ;;  %v8687_v40 = vpack.i.bf16 %v1307_v47, %v1304_v23  ;;  %v8692_v11 = vpack.i.bf16 %v1660_v22, %v1657_v59 }
  0xb5   :  { %v8697_v61 = vpack.i.bf16 %v959_v20, %v956_v55  ;;  %v1309_v5 = vsel %vm1212_vm3, %v1306_v54, %v1308_v30  ;;  %v1312_v50 = vsel %vm1212_vm3, %v1310_v27, %v1311_v7  ;;  %v1662_v18 = vsel %vm1570_vm4, %v1659_v38, %v1661_v3 }
  0xb6   :  { %8673 = vrot.lane.b32.xlu1 %v8672_v56, %s10073_s26  ;;  %v1665_v32 = vsel %vm1570_vm4, %v1663_v63, %v1664_v2  ;;  %v1313_v23 = vrot.slane %v11179_v1, 3  ;;  %v15706_v56 = vrot.slane %v11208_v29, 3  ;;  %v1666_v31 = vrot.slane %v11097_v52, 4 }
  0xb7   :  { %8678 = vrot.lane.b32.xlu0 %v8677_v19, %s10072_s21  ;;  %v1315_v19 = vrot.slane %v11211_v33, 3  ;;  %v1668_v47 = vrot.slane %v11105_v13, 4  ;;  %v1669_v54 = vrot.slane %v11123_v6, 4  ;;  %v8702_v59 = vpack.i.bf16 %v1312_v50, %v1309_v5 }
  0xb8   :  { %v11306_v39 = vpop.permute.xlu1 %8423  ;;  %v11308_v21 = vpop.permute.xlu0 %8418  ;;  %v8707_v22 = vpack.i.bf16 %v1665_v32, %v1662_v18  ;;  %v1314_v55 = vsel %vm1212_vm3, %v1311_v7, %v1313_v23  ;;  %v1667_v20 = vsel %vm1570_vm4, %v1664_v2, %v1666_v31  ;;  %v1671_v3 = vrot.slane %v11179_v1, 4 }
  0xb9   :  { %v1317_v52 = vsel %vm1212_vm3, %v1315_v19, %v15706_v56  ;;  %v1670_v27 = vsel %vm1570_vm4, %v1668_v47, %v1669_v54  ;;  %v1673_v18 = vrot.slane %v11211_v33, 4  ;;  %v15705_v32 = vrot.slane %v11208_v29, 4 }
  0xba   :  { %8683 = vrot.lane.b32.xlu1 %v8682_v10, %s10071_s20  ;;  %v8375_v63 = vunpack.i.l.bf16 %v11176_v28  ;;  %v8370_v7 = vunpack.i.l.bf16 %v11184_v12  ;;  %v8712_v2 = vpack.i.bf16 %v1317_v52, %v1314_v55  ;;  %v8385_v1 = vunpack.i.l.bf16 %v11214_v24  ;;  %v11377_v55 = vld [vmem:[%s15639_s0 + $0x168] sm:$0xff] }
  0xbb   :  { %8688 = vrot.lane.b32.xlu0 %v8687_v40, %s10073_s26  ;;  %v8717_v40 = vpack.i.bf16 %v1670_v27, %v1667_v20  ;;  %v1672_v5 = vsel %vm1570_vm4, %v1669_v54, %v1671_v3  ;;  %v1675_v50 = vsel %vm1570_vm4, %v1673_v18, %v15705_v32  ;;  %v8380_v19 = vunpack.i.l.bf16 %v11221_v4  ;;  %v88_v54 = vld [vmem:[%s15639_s0 + $0x150] sm:$0xff] }
  0xbc   :  { %v11320_v37 = vpop.permute.xlu1 %8433  ;;  %v11324_v38 = vpop.permute.xlu0 %8428  ;;  %v1941_v23 = vsel %vm1928_vm5, %v10389_v60, %v8375_v63  ;;  %v8321_v47 = vunpack.i.h.bf16 %v11023_v53  ;;  %v8381_v60 = vunpack.i.h.bf16 %v11221_v4  ;;  %v8727_v53 = vpack.i.bf16 %v1675_v50, %v1672_v5 }
  0xbd   :  { %v8390_v4 = vunpack.i.l.bf16 %v11242_v35  ;;  %v8395_v20 = vunpack.i.l.bf16 %v11240_v9  ;;  %v8722_v63 = vpack.i.bf16 %v11171_v34, %v11140_v17  ;;  %v8356_v50 = vunpack.i.h.bf16 %v11109_v49 }
  0xbe   :  { %8693 = vrot.lane.b32.xlu1 %v8692_v11, %s10074_s14  ;;  %v8371_v11 = vunpack.i.h.bf16 %v11184_v12  ;;  %v1939_v12 = vsel %vm1928_vm5, %v10306_v48, %v8370_v7  ;;  %v90_v48 = vld [vmem:[%s15639_s0 + $0x160] sm:$0xff]  ;;  %v238_v7 = vrot.slane %v88_v54, 6  ;;  %v8732_v54 = vpack.i.bf16 %v11228_v25, %v11174_v58 }
  0xbf   :  { %8698 = vrot.lane.b32.xlu0 %v8697_v61, %s10071_s20  ;;  %v2005_v3 = vsel %vm1994_vm6, %v1939_v12, %v8380_v19  ;;  %v8400_v19 = vunpack.i.l.bf16 %v11273_v41  ;;  %v8366_v12 = vunpack.i.h.bf16 %v11137_v14  ;;  %vm3048_vm10 = vcmask 80896  }
  0xc0   :  { %v11333_v30 = vpop.permute.xlu1 %8443  ;;  %v11340_v10 = vpop.permute.xlu0 %8438  ;;  %v1940_v52 = vsel %vm1928_vm5, %v10383_v57, %v8371_v11  ;;  %v1938_v57 = vsel %vm1928_vm5, %v10299_v44, %v8321_v47  ;;  %v241_v11 = vrot.slane %v90_v48, 6  ;;  %v2071_v44 = vsel %vm2060_vm7, %v2005_v3, %v8390_v4 }
  0xc1   :  { %v8401_v4 = vunpack.i.h.bf16 %v11273_v41  ;;  %vm3113_vm11 = vcmask 121856   ;;  %vm3178_vm12 = vcmask 162816   ;;  %vm3297_vm13 = vcmask 203776  }
  0xc2   :  { %8703 = vrot.lane.b32.xlu1 %v8702_v59, %s10073_s26  ;;  %v89_v59 = vld [vmem:[%s15639_s0 + $0x158] sm:$0xff]  ;;  %vm4168_vm14 = vcmask 1040384   ;;  %vm4201_vm15 = vcmask 1042432  }
  0xc3   :  { %8708 = vrot.lane.b32.xlu0 %v8707_v22, %s10074_s14  ;;  %v8341_v22 = vunpack.i.h.bf16 %v11083_v0  ;;  %v2007_v0 = vsel %vm1994_vm6, %v1941_v23, %v8385_v1  ;;  %v15704_v1 = vrot.slane %v11377_v55, 6  ;;  %v2006_v23 = vsel %vm1994_vm6, %v1940_v52, %v8381_v60 }
  0xc4   :  { %v11347_v61 = vpop.permute.xlu1 %8453  ;;  %v11356_v31 = vpop.permute.xlu0 %8448  ;;  %v15872_v60 = vrot.slane %v11150_v62, 6  ;;  %v11428_v52 = vsel %vm174_vm0, 0.0, %v241_v11  ;;  %v11435_v62 = vsel %vm2126_vm8, %v2071_v44, %v8400_v19 }
  0xc5   :  { %v2004_v5 = vsel %vm1994_vm6, %v1938_v57, %v8341_v22  ;;  %v11414_v22 = vsel %vm174_vm0, 0.0, %v238_v7  ;;  %v11425_v48 = vsel %vm174_vm0, %v241_v11, %v15704_v1  ;;  %15874 = vst [vmem:[#allocation47_spill] sm:$0xff] %v11428_v52  ;;  %15875 = vst [vmem:[#allocation48_spill] sm:$0xff] %v11435_v62 }
  0xc6   :  { %8713 = vrot.lane.b32.xlu1 %v8712_v2, %s10073_s26  ;;  %v239_v2 = vrot.slane %v89_v59, 6  ;;  %15871 = vst [vmem:[#allocation45_spill] sm:$0xff] %v11414_v22  ;;  %v11419_v14 = vsel %vm174_vm0, %v15872_v60, 0.0  ;;  %15873 = vst [vmem:[#allocation46_spill] sm:$0xff] %v11425_v48  ;;  %v15708_v11 = vrot.slane %v11425_v48, 1  ;;  %v962_v19 = vrot.slane %v11414_v22, 2 }
  0xc7   :  { %8718 = vrot.lane.b32.xlu0 %v8717_v40, %s10074_s14  ;;  %v8391_v40 = vunpack.i.h.bf16 %v11242_v35  ;;  %v2073_v35 = vsel %vm2060_vm7, %v2007_v0, %v8395_v20  ;;  %v8405_v20 = vunpack.i.l.bf16 %v11267_v46  ;;  %v15881_v13 = vrot.slane %v11425_v48, 2 }
  0xc8   :  { %v11384_v27 = vpop.permute.xlu1 %8463  ;;  %v11387_v18 = vpop.permute.xlu0 %8458  ;;  %v11411_v59 = vsel %vm174_vm0, %v238_v7, %v239_v2  ;;  %v11431_v0 = vsel %vm174_vm0, %v239_v2, 0.0  ;;  %v604_v7 = vrot.slane %v11414_v22, 1 }
  0xc9   :  { %15870 = vst [vmem:[#allocation44_spill] sm:$0xff] %v11411_v59  ;;  %v605_v2 = vrot.slane %v11411_v59, 1  ;;  %v607_v41 = vrot.slane %v11431_v0, 1  ;;  %v963_v44 = vrot.slane %v11411_v59, 2  ;;  %v11462_v1 = vsel %vm2126_vm8, %v2073_v35, %v8405_v20 }
  0xca   :  { %8723 = vrot.lane.b32.xlu1 %v8722_v63, %s10075_s23  ;;  %v602_v63 = vrot.slane %v11419_v14, 1  ;;  %15878 = vst [vmem:[#allocation51_spill] sm:$0xff] %v11462_v1  ;;  %v965_v56 = vrot.slane %v11431_v0, 2  ;;  %v1323_v25 = vrot.slane %v11431_v0, 3 }
  0xcb   :  { %8728 = vrot.lane.b32.xlu0 %v8727_v53, %s10074_s14  ;;  %v2072_v53 = vsel %vm2060_vm7, %v2006_v23, %v8391_v40  ;;  %v609_v40 = vrot.slane %v11428_v52, 1  ;;  %v960_v23 = vrot.slane %v11419_v14, 2  ;;  %v608_v20 = vsel %vm496_vm2, %v605_v2, %v607_v41 }
  0xcc   :  { %v11404_v47 = vpop.permute.xlu1 %8473  ;;  %v11408_v49 = vpop.permute.xlu0 %8468  ;;  %v11459_v60 = vsel %vm2126_vm8, %v2072_v53, %v8401_v4  ;;  %v606_v4 = vsel %vm496_vm2, %v604_v7, %v605_v2  ;;  %v964_v6 = vsel %vm854_vm1, %v962_v19, %v963_v44  ;;  %v1320_v41 = vrot.slane %v11414_v22, 3 }
  0xcd   :  { %15877 = vst [vmem:[#allocation50_spill] sm:$0xff] %v11459_v60  ;;  %v966_v33 = vsel %vm854_vm1, %v963_v44, %v965_v56  ;;  %v15716_v56 = vrot.slane %v11425_v48, 3  ;;  %v1678_v44 = vrot.slane %v11414_v22, 4  ;;  %v15883_v22 = vrot.slane %v11208_v29, 4 }
  0xce   :  { %8733 = vrot.lane.b32.xlu1 %v8732_v54, %s10075_s23 }
  0xcf   :  { %8738 = vrot.lane.b32.xlu0 %v11188_v43, %s10076_s27  ;;  %v2070_v43 = vsel %vm2060_vm7, %v2004_v5, %v8356_v50 }
  0xd0   :  { %v11441_v3 = vpop.permute.xlu1 %8483  ;;  %v11446_v57 = vpop.permute.xlu0 %8478  ;;  %v11456_v54 = vsel %vm2126_vm8, %v2070_v43, %v8366_v12  ;;  %v15879_v12 = vrot.slane %v11208_v29, 1  ;;  %v15880_v43 = vrot.slane %v11208_v29, 2 }
  0xd1   :  { %15876 = vst [vmem:[#allocation49_spill] sm:$0xff] %v11456_v54  ;;  %v11472_v50 = vpack.i.bf16 %v11435_v62, %v11456_v54 }
  0xd2   :  { %8743 = vrot.lane.b32.xlu1 %v11246_v15, %s10076_s27  ;;  %v603_v53 = vsel %vm496_vm2, %v15879_v12, %v602_v63  ;;  %v961_v32 = vsel %vm854_vm1, %v15880_v43, %v960_v23  ;;  %v967_v63 = vrot.slane %v11428_v52, 2  ;;  %v1318_v12 = vrot.slane %v11419_v14, 3 }
  0xd3   :  { %8748 = vrot.lane.b32.xlu0 %v11246_v15, %s10077_s18  ;;  %v611_v15 = vsel %vm496_vm2, %v609_v40, %v15708_v11  ;;  %v8767_v2 = vpack.i.bf16 %v606_v4, %v603_v53  ;;  %v1321_v40 = vrot.slane %v11411_v59, 3  ;;  %v11504_v43 = vpack.i.bf16 %v11462_v1, %v11459_v60 }
  0xd4   :  { %v11468_v5 = vpop.permute.xlu1 %8493  ;;  %v11478_v35 = vpop.permute.xlu0 %8488  ;;  %v8772_v11 = vpack.i.bf16 %v611_v15, %v608_v20  ;;  %v8777_v7 = vpack.i.bf16 %v964_v6, %v961_v32  ;;  %v969_v53 = vsel %vm854_vm1, %v967_v63, %v15881_v13  ;;  %v15882_v4 = vrot.slane %v11208_v29, 3 }
  0xd5   :  { %v1322_v20 = vsel %vm1212_vm3, %v1320_v41, %v1321_v40  ;;  %v1325_v6 = vrot.slane %v11428_v52, 3  ;;  %v1676_v32 = vrot.slane %v11419_v14, 4  ;;  %v1679_v15 = vrot.slane %v11411_v59, 4 }
  0xd6   :  { %8753 = vrot.lane.b32.xlu1 %v11472_v50, %s10077_s18  ;;  %v1319_v16 = vsel %vm1212_vm3, %v15882_v4, %v1318_v12  ;;  %v8782_v12 = vpack.i.bf16 %v969_v53, %v966_v33  ;;  %v1324_v41 = vsel %vm1212_vm3, %v1321_v40, %v1323_v25  ;;  %v1683_v33 = vrot.slane %v11428_v52, 4 }
  0xd7   :  { %8758 = vrot.lane.b32.xlu0 %v11472_v50, %s10078_s19  ;;  %v8787_v4 = vpack.i.bf16 %v1322_v20, %v1319_v16  ;;  %v1327_v14 = vsel %vm1212_vm3, %v1325_v6, %v15716_v56  ;;  %v1677_v59 = vsel %vm1570_vm4, %v15883_v22, %v1676_v32  ;;  %v1680_v16 = vsel %vm1570_vm4, %v1678_v44, %v1679_v15 }
  0xd8   :  { %v11498_v23 = vpop.permute.xlu1 %8503  ;;  %v11500_v19 = vpop.permute.xlu0 %8498  ;;  %v8415_v25 = vunpack.i.l.bf16 %v11284_v36  ;;  %v8410_v40 = vunpack.i.l.bf16 %v11292_v42  ;;  %v8386_v22 = vunpack.i.h.bf16 %v11214_v24  ;;  %v8797_v20 = vpack.i.bf16 %v1680_v16, %v1677_v59  ;;  %v92_v59 = vld [vmem:[%s15639_s0 + $0x170] sm:$0xff]  ;;  %v11584_v16 = vld [vmem:[%s15639_s0 + $0x188] sm:$0xff] }
  0xd9   :  { %v8411_v6 = vunpack.i.h.bf16 %v11292_v42  ;;  %v8425_v32 = vunpack.i.l.bf16 %v11306_v39  ;;  %v15894_v52 = vrot.slane %v11425_v48, 1  ;;  %v15898_v29 = vrot.slane %v11425_v48, 2 }
  0xda   :  { %8763 = vrot.lane.b32.xlu1 %v11504_v43, %s10078_s19  ;;  %v1945_v24 = vsel %vm1928_vm5, %v10478_v26, %v8415_v25  ;;  %v1943_v42 = vsel %vm1928_vm5, %v10406_v51, %v8410_v40  ;;  %v8421_v26 = vunpack.i.h.bf16 %v11308_v21  ;;  %v94_v51 = vld [vmem:[%s15639_s0 + $0x180] sm:$0xff] }
  0xdb   :  { %8768 = vrot.lane.b32.xlu0 %v8767_v2, %s10072_s21  ;;  %v8376_v2 = vunpack.i.h.bf16 %v11176_v28  ;;  %v1681_v28 = vrot.slane %v11431_v0, 4  ;;  %v8792_v0 = vpack.i.bf16 %v1327_v14, %v1324_v41  ;;  %v8396_v41 = vunpack.i.h.bf16 %v11240_v9 }
  0xdc   :  { %v11521_v13 = vpop.permute.xlu1 %8513  ;;  %v11525_v63 = vpop.permute.xlu0 %8508  ;;  %v2011_v9 = vsel %vm1994_vm6, %v1945_v24, %v8425_v32 }
  0xdd   :  { %v1942_v53 = vsel %vm1928_vm5, %v10399_v8, %v8376_v2  ;;  %v1682_v56 = vsel %vm1570_vm4, %v1679_v15, %v1681_v28  ;;  %v93_v15 = vld [vmem:[%s15639_s0 + $0x178] sm:$0xff]  ;;  %v1944_v28 = vsel %vm1928_vm5, %v10474_v45, %v8411_v6  ;;  %v247_v45 = vrot.slane %v94_v51, 6 }
  0xde   :  { %8773 = vrot.lane.b32.xlu1 %v8772_v11, %s10072_s21  ;;  %v15718_v11 = vrot.slane %v11425_v48, 4  ;;  %v2008_v2 = vsel %vm1994_vm6, %v1942_v53, %v8386_v22  ;;  %v15884_v53 = vld [vmem:[#allocation42_spill] sm:$0xff]  ;;  %v15717_v6 = vrot.slane %v11584_v16, 6  ;;  %v2010_v24 = vsel %vm1994_vm6, %v1944_v28, %v8421_v26 }
  0xdf   :  { %8778 = vrot.lane.b32.xlu0 %v8777_v7, %s10071_s20  ;;  %v8802_v22 = vpack.i.bf16 %v11456_v54, %v15884_v53  ;;  %v2074_v32 = vsel %vm2060_vm7, %v2008_v2, %v8396_v41  ;;  %v15887_v26 = vrot.slane %v11377_v55, 6 }
  0xe0   :  { %v11537_v58 = vpop.permute.xlu1 %8523  ;;  %v11544_v7 = vpop.permute.xlu0 %8518  ;;  %v1685_v8 = vsel %vm1570_vm4, %v1683_v33, %v15718_v11  ;;  %v8435_v33 = vunpack.i.l.bf16 %v11320_v37  ;;  %v11627_v28 = vsel %vm174_vm0, %v247_v45, %v15717_v6 }
  0xe1   :  { %v8807_v14 = vpack.i.bf16 %v1685_v8, %v1682_v56  ;;  %v8431_v8 = vunpack.i.h.bf16 %v11324_v38  ;;  %15888 = vst [vmem:[#allocation54_spill] sm:$0xff] %v11627_v28  ;;  %v15899_v53 = vrot.slane %v11627_v28, 2 }
  0xe2   :  { %8783 = vrot.lane.b32.xlu1 %v8782_v12, %s10071_s20  ;;  %v8420_v12 = vunpack.i.l.bf16 %v11308_v21  ;;  %v8430_v21 = vunpack.i.l.bf16 %v11324_v38  ;;  %v8812_v38 = vpack.i.bf16 %v11459_v60, %v11435_v62 }
  0xe3   :  { %8788 = vrot.lane.b32.xlu0 %v8787_v4, %s10073_s26 }
  0xe4   :  { %v11554_v44 = vpop.permute.xlu1 %8533  ;;  %v11563_v4 = vpop.permute.xlu0 %8528  ;;  %v2009_v56 = vsel %vm1994_vm6, %v1943_v42, %v8420_v12  ;;  %v8440_v12 = vunpack.i.l.bf16 %v11340_v10  ;;  %v8406_v42 = vunpack.i.h.bf16 %v11267_v46  ;;  %v2076_v46 = vsel %vm2060_vm7, %v2010_v24, %v8431_v8 }
  0xe6   :  { %8793 = vrot.lane.b32.xlu1 %v8792_v0, %s10073_s26  ;;  %v244_v0 = vrot.slane %v92_v59, 6  ;;  %v2075_v59 = vsel %vm2060_vm7, %v2009_v56, %v8430_v21  ;;  %v8445_v56 = vunpack.i.l.bf16 %v11333_v30 }
  0xe7   :  { %8798 = vrot.lane.b32.xlu0 %v8797_v20, %s10074_s14  ;;  %v245_v20 = vrot.slane %v93_v15, 6  ;;  %v2077_v15 = vsel %vm2060_vm7, %v2011_v9, %v8435_v33  ;;  %v11630_v9 = vsel %vm174_vm0, 0.0, %v247_v45  ;;  %v8441_v33 = vunpack.i.h.bf16 %v11340_v10 }
  0xe8   :  { %v11592_v25 = vpop.permute.xlu0 %8538  ;;  %v11594_v40 = vpop.permute.xlu1 %8543  ;;  %v11616_v41 = vsel %vm174_vm0, 0.0, %v244_v0  ;;  %15889 = vst [vmem:[#allocation55_spill] sm:$0xff] %v11630_v9  ;;  %v11637_v55 = vsel %vm2126_vm8, %v2075_v59, %v8440_v12  ;;  %v619_v24 = vrot.slane %v11630_v9, 1  ;;  %v11663_v11 = vsel %vm2126_vm8, %v2077_v15, %v8445_v56 }
  0xe9   :  { %v11613_v2 = vsel %vm174_vm0, %v244_v0, %v245_v20  ;;  %15886 = vst [vmem:[#allocation53_spill] sm:$0xff] %v11616_v41  ;;  %v11633_v21 = vsel %vm174_vm0, %v245_v20, 0.0  ;;  %15890 = vst [vmem:[#allocation56_spill] sm:$0xff] %v11637_v55  ;;  %v614_v8 = vrot.slane %v11616_v41, 1  ;;  %v11660_v6 = vsel %vm2126_vm8, %v2076_v46, %v8441_v33 }
  0xea   :  { %8803 = vrot.lane.b32.xlu1 %v8802_v22, %s10075_s23  ;;  %15885 = vst [vmem:[#allocation52_spill] sm:$0xff] %v11613_v2  ;;  %v615_v20 = vrot.slane %v11613_v2, 1  ;;  %v617_v10 = vrot.slane %v11633_v21, 1  ;;  %15892 = vst [vmem:[#allocation58_spill] sm:$0xff] %v11660_v6  ;;  %v15897_v56 = vrot.slane %v11627_v28, 1  ;;  %v975_v62 = vrot.slane %v11633_v21, 2 }
  0xeb   :  { %8808 = vrot.lane.b32.xlu0 %v8807_v14, %s10074_s14  ;;  %v11621_v14 = vsel %vm174_vm0, %v15887_v26, 0.0  ;;  %v11657_v26 = vsel %vm2126_vm8, %v2074_v32, %v8406_v42  ;;  %15893 = vst [vmem:[#allocation59_spill] sm:$0xff] %v11663_v11 }
  0xec   :  { %v11610_v51 = vpop.permute.xlu0 %8548  ;;  %v11640_v22 = vpop.permute.xlu1 %8553  ;;  %v612_v0 = vrot.slane %v11621_v14, 1  ;;  %v970_v59 = vrot.slane %v11621_v14, 2  ;;  %15891 = vst [vmem:[#allocation57_spill] sm:$0xff] %v11657_v26  ;;  %v11671_v12 = vpack.i.bf16 %v11637_v55, %v11657_v26  ;;  %v616_v42 = vsel %vm496_vm2, %v614_v8, %v615_v20 }
  0xed   :  { %v618_v33 = vsel %vm496_vm2, %v615_v20, %v617_v10  ;;  %v1328_v54 = vrot.slane %v11621_v14, 3  ;;  %v1330_v10 = vrot.slane %v11616_v41, 3 }
  0xee   :  { %8813 = vrot.lane.b32.xlu1 %v8812_v38, %s10075_s23  ;;  %v972_v38 = vrot.slane %v11616_v41, 2  ;;  %v613_v32 = vsel %vm496_vm2, %v15894_v52, %v612_v0  ;;  %v971_v60 = vsel %vm854_vm1, %v15898_v29, %v970_v59  ;;  %v977_v0 = vrot.slane %v11630_v9, 2 }
  0xef   :  { %8818 = vrot.lane.b32.xlu0 %v11472_v50, %s10076_s27  ;;  %v973_v50 = vrot.slane %v11613_v2, 2  ;;  %v8847_v20 = vpack.i.bf16 %v616_v42, %v613_v32  ;;  %v1331_v29 = vrot.slane %v11613_v2, 3  ;;  %v11702_v59 = vpack.i.bf16 %v11663_v11, %v11660_v6 }
  0xf0   :  { %v11648_v45 = vpop.permute.xlu0 %8558  ;;  %v11677_v46 = vpop.permute.xlu1 %8563  ;;  %v979_v34 = vsel %vm854_vm1, %v977_v0, %v15899_v53  ;;  %v15900_v32 = vrot.slane %v11425_v48, 3  ;;  %v8426_v0 = vunpack.i.h.bf16 %v11306_v39  ;;  %v15904_v39 = vrot.slane %v11627_v28, 3 }
  0xf1   :  { %15895 = vst [vmem:[#allocation60_spill] sm:$0xff] %v11677_v46  ;;  %v974_v52 = vsel %vm854_vm1, %v972_v38, %v973_v50  ;;  %v976_v8 = vsel %vm854_vm1, %v973_v50, %v975_v62  ;;  %v1332_v62 = vsel %vm1212_vm3, %v1330_v10, %v1331_v29  ;;  %v1686_v50 = vrot.slane %v11621_v14, 4 }
  0xf2   :  { %8823 = vrot.lane.b32.xlu1 %v11504_v43, %s10076_s27  ;;  %v1329_v42 = vsel %vm1212_vm3, %v15900_v32, %v1328_v54  ;;  %v1688_v54 = vrot.slane %v11616_v41, 4  ;;  %v8450_v32 = vunpack.i.l.bf16 %v11356_v31  ;;  %v8451_v10 = vunpack.i.h.bf16 %v11356_v31 }
  0xf3   :  { %8828 = vrot.lane.b32.xlu0 %v11504_v43, %s10077_s18  ;;  %v621_v43 = vsel %vm496_vm2, %v619_v24, %v15897_v56  ;;  %v8416_v24 = vunpack.i.h.bf16 %v11284_v36  ;;  %v8857_v56 = vpack.i.bf16 %v974_v52, %v971_v60  ;;  %v1335_v60 = vrot.slane %v11630_v9, 3 }
  0xf4   :  { %v11679_v15 = vpop.permute.xlu0 %8568  ;;  %v8852_v38 = vpack.i.bf16 %v621_v43, %v618_v33  ;;  %v11712_v46 = vpop.permute.xlu1 %8573  ;;  %v1689_v33 = vrot.slane %v11613_v2, 4  ;;  %v15903_v43 = vld [vmem:[#allocation9_spill] sm:$0xff]  ;;  %v8862_v53 = vpack.i.bf16 %v979_v34, %v976_v8  ;;  %v8460_v14 = vunpack.i.l.bf16 %v11387_v18 }
  0xf5   :  { %15896 = vst [vmem:[#allocation61_spill] sm:$0xff] %v11679_v15  ;;  %v1333_v15 = vrot.slane %v11633_v21, 3  ;;  %15901 = vst [vmem:[#allocation62_spill] sm:$0xff] %v11712_v46  ;;  %v1946_v52 = vsel %vm1928_vm5, %v15903_v43, %v8416_v24  ;;  %v8867_v46 = vpack.i.bf16 %v1332_v62, %v1329_v42  ;;  %v1337_v43 = vsel %vm1212_vm3, %v1335_v60, %v15904_v39  ;;  %v15906_v42 = vld [vmem:[#allocation10_spill] sm:$0xff]  ;;  %v15907_v62 = vld [vmem:[#allocation11_spill] sm:$0xff] }
  0xf6   :  { %8833 = vrot.lane.b32.xlu1 %v11671_v12, %s10077_s18  ;;  %v15905_v2 = vrot.slane %v11425_v48, 4  ;;  %v1690_v41 = vsel %vm1570_vm4, %v1688_v54, %v1689_v33  ;;  %v1691_v34 = vrot.slane %v11633_v21, 4  ;;  %v1693_v8 = vrot.slane %v11630_v9, 4  ;;  %v15926_v9 = vld [vmem:[#allocation29_spill] sm:$0xff] }
  0xf7   :  { %8838 = vrot.lane.b32.xlu0 %v11671_v12, %s10078_s19  ;;  %v1334_v24 = vsel %vm1212_vm3, %v1331_v29, %v1333_v15  ;;  %v1947_v15 = vsel %vm1928_vm5, %v15906_v42, %v8450_v32  ;;  %v8456_v29 = vunpack.i.h.bf16 %v11347_v61  ;;  %v2012_v21 = vsel %vm1994_vm6, %v1946_v52, %v8426_v0 }
  0xf8   :  { %v11714_v36 = vpop.permute.xlu0 %8578  ;;  %v1687_v31 = vsel %vm1570_vm4, %v15905_v2, %v1686_v50  ;;  %v11752_v39 = vpop.permute.xlu1 %8583  ;;  %v15910_v50 = vld [vmem:[#allocation12_spill] sm:$0xff]  ;;  %v8475_v32 = vunpack.i.l.bf16 %v11404_v47  ;;  %v2013_v42 = vsel %vm1994_vm6, %v1947_v15, %v8460_v14  ;;  %v1692_v52 = vsel %vm1570_vm4, %v1689_v33, %v1691_v34 }
  0xf9   :  { %15902 = vst [vmem:[#allocation63_spill] sm:$0xff] %v11714_v36  ;;  %v8465_v36 = vunpack.i.l.bf16 %v11384_v27  ;;  %15908 = vst [vmem:[#allocation9_spill] sm:$0xff] %v11752_v39  ;;  %v1948_v54 = vsel %vm1928_vm5, %v15910_v50, %v8451_v10  ;;  %v15911_v0 = vrot.slane %v11627_v28, 4  ;;  %v96_v10 = vld [vmem:[%s15639_s0 + $0x190] sm:$0xff]  ;;  %v8471_v14 = vunpack.i.h.bf16 %v11408_v49 }
  0xfa   :  { %8843 = vrot.lane.b32.xlu1 %v11702_v59, %s10078_s19  ;;  %v8485_v34 = vunpack.i.l.bf16 %v11441_v3 }
  0xfb   :  { %8848 = vrot.lane.b32.xlu0 %v8847_v20, %s10072_s21  ;;  %v8455_v20 = vunpack.i.l.bf16 %v11347_v61  ;;  %v8872_v61 = vpack.i.bf16 %v1337_v43, %v1334_v24  ;;  %v15912_v24 = vld [vmem:[#allocation14_spill] sm:$0xff]  ;;  %v8466_v43 = vunpack.i.h.bf16 %v11384_v27  ;;  %v8481_v27 = vunpack.i.h.bf16 %v11446_v57 }
  0xfc   :  { %v11754_v2 = vpop.permute.xlu0 %8588 }
  0xfd   :  { %v1949_v60 = vsel %vm1928_vm5, %v15907_v62, %v8455_v20  ;;  %15909 = vst [vmem:[#allocation10_spill] sm:$0xff] %v11754_v2  ;;  %v8877_v20 = vpack.i.bf16 %v1690_v41, %v1687_v31  ;;  %v1950_v41 = vsel %vm1928_vm5, %v15912_v24, %v8456_v29  ;;  %v8480_v31 = vunpack.i.l.bf16 %v11446_v57  ;;  %v9913_v24 = vld [vmem:[%s15640_s1 + $0x8] sm:$0x1f]  }
  0xfe   :  { %8853 = vrot.lane.b32.xlu1 %v8852_v38, %s10072_s21  ;;  %v8461_v38 = vunpack.i.h.bf16 %v11387_v18  ;;  %v2015_v62 = vsel %vm1994_vm6, %v1949_v60, %v8465_v36  ;;  %v1695_v18 = vsel %vm1570_vm4, %v1693_v8, %v15911_v0  ;;  %v97_v36 = vld [vmem:[%s15639_s0 + $0x198] sm:$0xff]  ;;  %v98_v60 = vld [vmem:[%s15639_s0 + $0x1a0] sm:$0xff]  ;;  %v11809_v57 = vsel %vm1994_vm6, %v1950_v41, %v8466_v43 }
  0xff   :  { %8858 = vrot.lane.b32.xlu0 %v8857_v56, %s10071_s20  ;;  %v8436_v56 = vunpack.i.h.bf16 %v11320_v37  ;;  %v8470_v37 = vunpack.i.l.bf16 %v11408_v49  ;;  %v8887_v49 = vpack.i.bf16 %v1695_v18, %v1692_v52  ;;  %v251_v29 = vrot.slane %v97_v36, 6 }
 0x100   :  { %v2014_v33 = vsel %vm1994_vm6, %v1948_v54, %v8461_v38  ;;  %v11789_v15 = vpop.permute.xlu0 %8598  ;;  %v250_v38 = vrot.slane %v96_v10, 6  ;;  %v253_v0 = vrot.slane %v98_v60, 6  ;;  %v8892_v36 = vpack.i.bf16 %v11660_v6, %v11637_v55 }
 0x101   :  { %v2079_v8 = vsel %vm2060_vm7, %v2013_v42, %v8470_v37  ;;  %15914 = vst [vmem:[#allocation12_spill] sm:$0xff] %v11789_v15  ;;  %v2080_v54 = vsel %vm2060_vm7, %v2014_v33, %v8471_v14  ;;  %v8882_v37 = vpack.i.bf16 %v11657_v26, %v11462_v1  ;;  %v11865_v60 = vsel %vm174_vm0, %v251_v29, 0.0 }
 0x102   :  { %8863 = vrot.lane.b32.xlu1 %v8862_v53, %s10071_s20  ;;  %v2078_v53 = vsel %vm2060_vm7, %v2012_v21, %v8436_v56  ;;  %v11787_v56 = vpop.permute.xlu1 %8593  ;;  %v11800_v21 = vld [vmem:[%s15639_s0 + $0x1a8] sm:$0xff]  ;;  %v11821_v42 = vsel %vm174_vm0, 0.0, %v250_v38  ;;  %v11830_v10 = vsel %vm2126_vm8, %v2080_v54, %v8481_v27 }
 0x103   :  { %8868 = vrot.lane.b32.xlu0 %v8867_v46, %s10073_s26  ;;  %v8446_v46 = vunpack.i.h.bf16 %v11333_v30  ;;  %v2081_v30 = vsel %vm2060_vm7, %v2015_v62, %v8475_v32  ;;  %15913 = vst [vmem:[#allocation11_spill] sm:$0xff] %v11787_v56  ;;  %15918 = vst [vmem:[#allocation66_spill] sm:$0xff] %v11821_v42  ;;  %v15919_v62 = vrot.slane %v11584_v16, 6  ;;  %v15731_v18 = vrot.slane %v11800_v21, 6 }
 0x104   :  { %15920 = vst [vmem:[#allocation67_spill] sm:$0xff] %v11830_v10  ;;  %v8609_v14 = vpop.permute.xlu0 %8608  ;;  %v624_v43 = vrot.slane %v11821_v42, 1  ;;  %v1340_v55 = vrot.slane %v11821_v42, 3 }
 0x105   :  { %v11803_v50 = vsel %vm2126_vm8, %v2078_v53, %v8446_v46  ;;  %v11826_v52 = vsel %vm174_vm0, %v15919_v62, 0.0  ;;  %v11834_v46 = vsel %vm174_vm0, %v250_v38, %v251_v29  ;;  %v8611_v54 = vunpack.i.h.bf16 %v8609_v14 }
 0x106   :  { %8873 = vrot.lane.b32.xlu1 %v8872_v61, %s10073_s26  ;;  %15915 = vst [vmem:[#allocation14_spill] sm:$0xff] %v11803_v50  ;;  %v11813_v61 = vsel %vm2126_vm8, %v2079_v8, %v8480_v31  ;;  %15921 = vst [vmem:[#allocation68_spill] sm:$0xff] %v11834_v46  ;;  %v11840_v41 = vpop.permute.xlu1 %8603  ;;  %v622_v33 = vrot.slane %v11826_v52, 1  ;;  %v10079_v31 = vmov 65535   ;;  %v625_v8 = vrot.slane %v11834_v46, 1 }
 0x107   :  { %8878 = vrot.lane.b32.xlu0 %v8877_v20, %s10074_s14  ;;  %15916 = vst [vmem:[#allocation64_spill] sm:$0xff] %v11813_v61  ;;  %v11816_v20 = vsel %vm2126_vm8, %v2081_v30, %v8485_v34  ;;  %15922 = vst [vmem:[#allocation69_spill] sm:$0xff] %v11840_v41  ;;  %v3394_v34 = vsel %vm1570_vm4, 4294967295, %v10079_v31  ;;  %v11854_v30 = vsel %vm174_vm0, %v253_v0, %v15731_v18  ;;  %v15925_v31 = vrot.slane %v11627_v28, 1 }
 0x108   :  { %15917 = vst [vmem:[#allocation65_spill] sm:$0xff] %v11816_v20  ;;  %15923 = vst [vmem:[#allocation70_spill] sm:$0xff] %v11854_v30  ;;  %v3395_v38 = vsel %vm1212_vm3, %v3394_v34, 0  ;;  %v11862_v27 = vpack.i.bf16 %v11813_v61, %v11803_v50  ;;  %v980_v29 = vrot.slane %v11826_v52, 2  ;;  %v1338_v53 = vrot.slane %v11826_v52, 3 }
 0x109   :  { %v623_v34 = vsel %vm496_vm2, %v15925_v31, %v622_v33  ;;  %v983_v33 = vrot.slane %v11834_v46, 2  ;;  %v985_v31 = vrot.slane %v11865_v60, 2  ;;  %v1341_v26 = vrot.slane %v11834_v46, 3 }
 0x10a   :  { %8883 = vrot.lane.b32.xlu1 %v8882_v37, %s10075_s23  ;;  %v8610_v37 = vunpack.i.l.bf16 %v8609_v14  ;;  %v627_v14 = vrot.slane %v11865_v60, 1  ;;  %v15928_v16 = vrot.slane %v11854_v30, 1  ;;  %v15929_v41 = vrot.slane %v11627_v28, 2 }
 0x10b   :  { %8888 = vrot.lane.b32.xlu0 %v8887_v49, %s10074_s14  ;;  %v11857_v49 = vsel %vm174_vm0, 0.0, %v253_v0  ;;  %v11871_v0 = vpack.i.bf16 %v11816_v20, %v11830_v10  ;;  %v1342_v17 = vsel %vm1212_vm3, %v1340_v55, %v1341_v26  ;;  %v15933_v20 = vrot.slane %v11854_v30, 3 }
 0x10c   :  { %15924 = vst [vmem:[#allocation71_spill] sm:$0xff] %v11857_v49  ;;  %v11867_v62 = vpop.permute.xlu1 %8613  ;;  %v629_v18 = vrot.slane %v11857_v49, 1  ;;  %v987_v32 = vrot.slane %v11857_v49, 2  ;;  %v628_v56 = vsel %vm496_vm2, %v625_v8, %v627_v14 }
 0x10e   :  { %8893 = vrot.lane.b32.xlu1 %v8892_v36, %s10075_s23  ;;  %v8619_v36 = vpop.permute.xlu0 %8618 }
 0x10f   :  { %8898 = vrot.lane.b32.xlu0 %v11671_v12, %s10076_s27  ;;  %v3397_v12 = vand.u32 %v9913_v24, %v3395_v38  ;;  %v626_v24 = vsel %vm496_vm2, %v624_v43, %v625_v8  ;;  %v982_v38 = vrot.slane %v11821_v42, 2  ;;  %v11897_v43 = vsel %vm2986_vm9, %v15926_v9, %v8610_v37 }
 0x110   :  { %15927 = vst [vmem:[#allocation29_spill] sm:$0xff] %v11897_v43  ;;  %v8927_v1 = vpack.i.bf16 %v626_v24, %v623_v34  ;;  %v8621_v15 = vunpack.i.h.bf16 %v8619_v36  ;;  %v8620_v37 = vunpack.i.l.bf16 %v8619_v36  ;;  %v986_v24 = vsel %vm854_vm1, %v983_v33, %v985_v31 }
 0x111   :  { %8117 = vmatprep.subr.bf16.mxu0 %v3397_v12  ;;  %v984_v34 = vsel %vm854_vm1, %v982_v38, %v983_v33  ;;  %v1345_v8 = vrot.slane %v11857_v49, 3  ;;  %v1696_v38 = vrot.slane %v11826_v52, 4  ;;  %v8615_v33 = vunpack.i.l.bf16 %v11867_v62 }
 0x112   :  { %8903 = vrot.lane.b32.xlu1 %v11702_v59, %s10076_s27  ;;  %8118 = vmatpush3.bf16.msra.mxu0 %v3397_v12  ;;  %v631_v12 = vsel %vm496_vm2, %v629_v18, %v15928_v16  ;;  %v15930_v18 = vrot.slane %v11854_v30, 2  ;;  %v1698_v31 = vrot.slane %v11821_v42, 4  ;;  %v3049_v14 = vsel %vm3048_vm10, %v11897_v43, %v8620_v37 }
 0x113   :  { %8908 = vrot.lane.b32.xlu0 %v11702_v59, %s10077_s18  ;;  %v11893_v59 = vsel %vm2986_vm9, %v15926_v9, %v8611_v54  ;;  %v981_v54 = vsel %vm854_vm1, %v15929_v41, %v980_v29  ;;  %v15931_v41 = vrot.slane %v11627_v28, 3  ;;  %v1343_v29 = vrot.slane %v11865_v60, 3 }
 0x114   :  { %v11899_v48 = vpop.permute.xlu1 %8623  ;;  %v8629_v6 = vpop.permute.xlu0 %8628  ;;  %v989_v16 = vsel %vm854_vm1, %v987_v32, %v15930_v18  ;;  %v8932_v32 = vpack.i.bf16 %v631_v12, %v628_v56  ;;  %v8937_v55 = vpack.i.bf16 %v984_v34, %v981_v54  ;;  %v3050_v56 = vsel %vm3048_vm10, %v11897_v43, %v8621_v15 }
 0x115   :  { %v1339_v36 = vsel %vm1212_vm3, %v15931_v41, %v1338_v53  ;;  %v1699_v53 = vrot.slane %v11834_v46, 4  ;;  %v8631_v18 = vunpack.i.h.bf16 %v8629_v6  ;;  %v8630_v41 = vunpack.i.l.bf16 %v8629_v6 }
 0x116   :  { %8913 = vrot.lane.b32.xlu1 %v11862_v27, %s10077_s18  ;;  %v8947_v52 = vpack.i.bf16 %v1342_v17, %v1339_v36  ;;  %v1344_v12 = vsel %vm1212_vm3, %v1341_v26, %v1343_v29  ;;  %v8626_v46 = vunpack.i.h.bf16 %v11899_v48  ;;  %v15934_v54 = vrot.slane %v11627_v28, 4 }
 0x117   :  { %8918 = vrot.lane.b32.xlu0 %v11862_v27, %s10078_s19  ;;  %v1701_v17 = vrot.slane %v11865_v60, 4  ;;  %v8625_v34 = vunpack.i.l.bf16 %v11899_v48  ;;  %v1700_v26 = vsel %vm1570_vm4, %v1698_v31, %v1699_v53  ;;  %v3115_v29 = vsel %vm3113_vm11, %v3050_v56, %v8631_v18 }
 0x118   :  { %v11923_v2 = vpop.permute.xlu1 %8633  ;;  %v8639_v39 = vpop.permute.xlu0 %8638  ;;  %v1697_v37 = vsel %vm1570_vm4, %v15934_v54, %v1696_v38  ;;  %v1703_v48 = vrot.slane %v11857_v49, 4  ;;  %v2989_v38 = vsel %vm2986_vm9, %v15926_v9, %v8615_v33  ;;  %v8491_v54 = vunpack.i.h.bf16 %v11478_v35 }
 0x119   :  { %15932 = vst [vmem:[#allocation72_spill] sm:$0xff] %v11923_v2  ;;  %v8942_v2 = vpack.i.bf16 %v989_v16, %v986_v24  ;;  %v8641_v16 = vunpack.i.h.bf16 %v8639_v39  ;;  %v8640_v36 = vunpack.i.l.bf16 %v8639_v39  ;;  %v3052_v18 = vsel %vm3048_vm10, %v2989_v38, %v8626_v46  ;;  %v15938_v38 = vld [vmem:[#allocation15_spill] sm:$0xff] }
 0x11a   :  { %8923 = vrot.lane.b32.xlu1 %v11871_v0, %s10078_s19  ;;  %v8957_v33 = vpack.i.bf16 %v1700_v26, %v1697_v37  ;;  %v1702_v46 = vsel %vm1570_vm4, %v1699_v53, %v1701_v17  ;;  %v8486_v37 = vunpack.i.h.bf16 %v11441_v3  ;;  %v15935_v26 = vunpack.i.l.bf16 %v11478_v35  ;;  %v100_v53 = vld [vmem:[%s15639_s0 + $0x1b0] sm:$0xff]  ;;  %v101_v17 = vld [vmem:[%s15639_s0 + $0x1b8] sm:$0xff] }
 0x11b   :  { %8928 = vrot.lane.b32.xlu0 %v8927_v1, %s10072_s21  ;;  %v1347_v1 = vsel %vm1212_vm3, %v1345_v8, %v15933_v20  ;;  %v3114_v20 = vsel %vm3113_vm11, %v3049_v14, %v8630_v41  ;;  %v3051_v14 = vsel %vm3048_vm10, %v11893_v59, %v8625_v34  ;;  %v8500_v34 = vunpack.i.l.bf16 %v11500_v19 }
 0x11c   :  { %v8644_v42 = vpop.permute.xlu1 %8643  ;;  %v8496_v3 = vunpack.i.h.bf16 %v11468_v5  ;;  %v8505_v35 = vunpack.i.l.bf16 %v11498_v23 }
 0x11d   :  { %v11941_v6 = vpop.permute.xlu0 %8648  ;;  %v8646_v15 = vunpack.i.h.bf16 %v8644_v42  ;;  %v8645_v24 = vunpack.i.l.bf16 %v8644_v42  ;;  %v15750_v42 = vrot.slane %v11854_v30, 4 }
 0x11e   :  { %8933 = vrot.lane.b32.xlu1 %v8932_v32, %s10072_s21 }
 0x11f   :  { %8938 = vrot.lane.b32.xlu0 %v8937_v55, %s10071_s20  ;;  %v3179_v8 = vsel %vm3178_vm12, %v3114_v20, %v8645_v24  ;;  %v3180_v60 = vsel %vm3178_vm12, %v3115_v29, %v8646_v15  ;;  %v8952_v55 = vpack.i.bf16 %v1347_v1, %v1344_v12  ;;  %v3116_v15 = vsel %vm3113_vm11, %v3051_v14, %v8640_v36  ;;  %v15936_v36 = vld [vmem:[#allocation13_spill] sm:$0xff] }
 0x120   :  { %v11962_v39 = vpop.permute.xlu1 %8653  ;;  %v3243_v31 = vpack.c.bf16 %v3180_v60, %v3179_v8  ;;  %v3117_v24 = vsel %vm3113_vm11, %v3052_v18, %v8641_v16  ;;  %v1705_v59 = vsel %vm1570_vm4, %v1703_v48, %v15750_v42  ;;  %v1951_v20 = vsel %vm1928_vm5, %v15936_v36, %v15935_v26  ;;  %v102_v48 = vld [vmem:[%s15639_s0 + $0x1c0] sm:$0xff] }
 0x121   :  { %v8659_v32 = vpop.permute.xlu0 %8658  ;;  %v15937_v29 = vunpack.i.h.bf16 %v11404_v47  ;;  %v8967_v60 = vpack.i.bf16 %v1705_v59, %v1702_v46  ;;  %v15939_v47 = vunpack.i.l.bf16 %v11468_v5  ;;  %v8501_v14 = vunpack.i.h.bf16 %v11500_v19 }
 0x122   :  { %v8661_v41 = vunpack.i.h.bf16 %v8659_v32  ;;  %v8660_v56 = vunpack.i.l.bf16 %v8659_v32  ;;  %8943 = vrot.lane.b32.xlu1 %v8942_v2, %s10071_s20  ;;  %8119 = vmatprep.mubr.msk.bf16.mxu0 %vm3297_vm13, %v3243_v31  ;;  %v1952_v32 = vsel %vm1928_vm5, %v15938_v38, %v8491_v54  ;;  %v15940_v31 = vld [vmem:[#allocation16_spill] sm:$0xff]  ;;  %v8510_v18 = vunpack.i.l.bf16 %v11525_v63 }
 0x123   :  { %8948 = vrot.lane.b32.xlu0 %v8947_v52, %s10073_s26  ;;  %v2082_v8 = vsel %vm2060_vm7, %v11809_v57, %v15937_v29  ;;  %v1953_v57 = vsel %vm1928_vm5, %v15940_v31, %v15939_v47  ;;  %v8962_v5 = vpack.i.bf16 %v11803_v50, %v11663_v11  ;;  %v257_v19 = vrot.slane %v101_v17, 6 }
 0x124   :  { %v3181_v12 = vsel %vm3178_vm12, %v3116_v15, %v8660_v56  ;;  %v3182_v1 = vsel %vm3178_vm12, %v3117_v24, %v8661_v41  ;;  %v11980_v16 = vpop.permute.xlu1 %8663  ;;  %v2017_v41 = vsel %vm1994_vm6, %v1951_v20, %v8500_v34  ;;  %v256_v15 = vrot.slane %v100_v53, 6 }
 0x125   :  { %v11982_v2 = vpop.permute.xlu0 %8668  ;;  %v3244_v52 = vpack.c.bf16 %v3182_v1, %v3181_v12  ;;  %v12028_v24 = vsel %vm2126_vm8, %v2082_v8, %v8486_v37  ;;  %v259_v12 = vrot.slane %v102_v48, 6  ;;  %v15942_v1 = vld [vmem:[#allocation17_spill] sm:$0xff]  ;;  %v2019_v59 = vsel %vm1994_vm6, %v1953_v57, %v8505_v35 }
 0x126   :  { %8953 = vrot.lane.b32.xlu1 %v8952_v55, %s10073_s26  ;;  %v12018_v55 = vld [vmem:[%s15639_s0 + $0x1c8] sm:$0xff]  ;;  %15941 = vst [vmem:[#allocation13_spill] sm:$0xff] %v12028_v24  ;;  %v1954_v46 = vsel %vm1928_vm5, %v15942_v1, %v8496_v3  ;;  %v8511_v34 = vunpack.i.h.bf16 %v11525_v63  ;;  %v2018_v26 = vsel %vm1994_vm6, %v1952_v32, %v8501_v14  ;;  %v2083_v37 = vsel %vm2060_vm7, %v2017_v41, %v8510_v18 }
 0x127   :  { %8958 = vrot.lane.b32.xlu0 %v8957_v33, %s10074_s14  ;;  %8120 = vmatmul.mubr.msk.bf16.vlgmr.msra.gmra.mrb[0].mxu0 %vm3297_vm13, %v3244_v52  ;;  %v8515_v33 = vunpack.i.l.bf16 %v11521_v13  ;;  %v15749_v52 = vrot.slane %v12018_v55, 6  ;;  %v8520_v36 = vunpack.i.l.bf16 %v11544_v7  ;;  %v8972_v20 = vpack.i.bf16 %v11830_v10, %v11813_v61 }
 0x128   :  { %v12021_v56 = vpop.permute.xlu1 %8673  ;;  %v12048_v63 = vsel %vm174_vm0, %v256_v15, %v257_v19  ;;  %v12051_v29 = vsel %vm174_vm0, 0.0, %v256_v15  ;;  %v15945_v8 = vrot.slane %v11800_v21, 6  ;;  %v8506_v35 = vunpack.i.h.bf16 %v11498_v23 }
 0x129   :  { %v12023_v54 = vpop.permute.xlu0 %8678  ;;  %15943 = vst [vmem:[#allocation15_spill] sm:$0xff] %v12048_v63  ;;  %15944 = vst [vmem:[#allocation16_spill] sm:$0xff] %v12051_v29  ;;  %v12061_v48 = vsel %vm174_vm0, 0.0, %v259_v12  ;;  %v12064_v38 = vsel %vm174_vm0, %v257_v19, 0.0  ;;  %v2084_v32 = vsel %vm2060_vm7, %v2018_v26, %v8511_v34  ;;  %v8521_v47 = vunpack.i.h.bf16 %v11544_v7 }
 0x12a   :  { %8963 = vrot.lane.b32.xlu1 %v8962_v5, %s10075_s23  ;;  %v12056_v3 = vsel %vm174_vm0, %v15945_v8, 0.0  ;;  %15946 = vst [vmem:[#allocation17_spill] sm:$0xff] %v12061_v48  ;;  %v8525_v31 = vunpack.i.l.bf16 %v11537_v58  ;;  %v12075_v23 = vsel %vm174_vm0, %v259_v12, %v15749_v52  ;;  %v12078_v21 = vsel %vm2126_vm8, %v2083_v37, %v8520_v36 }
 0x12b   :  { %8968 = vrot.lane.b32.xlu0 %v8967_v60, %s10074_s14  ;;  %v2085_v60 = vsel %vm2060_vm7, %v2019_v59, %v8515_v33  ;;  %15947 = vst [vmem:[#allocation73_spill] sm:$0xff] %v12075_v23  ;;  %15948 = vst [vmem:[#allocation74_spill] sm:$0xff] %v12078_v21  ;;  %v632_v57 = vrot.slane %v12056_v3, 1  ;;  %v634_v14 = vrot.slane %v12051_v29, 1  ;;  %v635_v7 = vrot.slane %v12048_v63, 1 }
 0x12c   :  { %v12043_v53 = vpop.permute.xlu1 %8683  ;;  %v639_v5 = vrot.slane %v12061_v48, 1  ;;  %v15751_v15 = vrot.slane %v12075_v23, 1  ;;  %v990_v19 = vrot.slane %v12056_v3, 2  ;;  %v992_v33 = vrot.slane %v12051_v29, 2 }
 0x12d   :  { %v12045_v17 = vpop.permute.xlu0 %8688  ;;  %v993_v12 = vrot.slane %v12048_v63, 2  ;;  %v12094_v1 = vsel %vm1994_vm6, %v1954_v46, %v8506_v35  ;;  %v12097_v59 = vsel %vm2126_vm8, %v2084_v32, %v8521_v47  ;;  %v12100_v34 = vsel %vm2126_vm8, %v2085_v60, %v8525_v31 }
 0x12e   :  { %8973 = vrot.lane.b32.xlu1 %v8972_v20, %s10075_s23  ;;  %15949 = vst [vmem:[#allocation75_spill] sm:$0xff] %v12097_v59  ;;  %15950 = vst [vmem:[#allocation76_spill] sm:$0xff] %v12100_v34  ;;  %v8535_v26 = vunpack.i.l.bf16 %v11554_v44  ;;  %v8531_v37 = vunpack.i.h.bf16 %v11563_v4  ;;  %v12110_v46 = vpack.i.bf16 %v12078_v21, %v12028_v24  ;;  %v15951_v36 = vrot.slane %v11854_v30, 1 }
 0x12f   :  { %8978 = vrot.lane.b32.xlu0 %v11862_v27, %s10076_s27  ;;  %v637_v27 = vrot.slane %v12064_v38, 1  ;;  %v636_v8 = vsel %vm496_vm2, %v634_v14, %v635_v7  ;;  %v995_v32 = vrot.slane %v12064_v38, 2  ;;  %v641_v52 = vsel %vm496_vm2, %v639_v5, %v15751_v15  ;;  %v15953_v15 = vld [vmem:[#allocation20_spill] sm:$0xff] }
 0x130   :  { %v12083_v18 = vpop.permute.xlu1 %8693  ;;  %v633_v20 = vsel %vm496_vm2, %v15951_v36, %v632_v57  ;;  %v15952_v57 = vrot.slane %v11854_v30, 2  ;;  %v994_v36 = vsel %vm854_vm1, %v992_v33, %v993_v12  ;;  %v1348_v47 = vrot.slane %v12056_v3, 3 }
 0x131   :  { %v12085_v41 = vpop.permute.xlu0 %8698  ;;  %v638_v31 = vsel %vm496_vm2, %v635_v7, %v637_v27  ;;  %v9007_v42 = vpack.i.bf16 %v636_v8, %v633_v20  ;;  %v1350_v7 = vrot.slane %v12051_v29, 3  ;;  %v1351_v27 = vrot.slane %v12048_v63, 3 }
 0x132   :  { %8983 = vrot.lane.b32.xlu1 %v11871_v0, %s10076_s27  ;;  %v991_v14 = vsel %vm854_vm1, %v15952_v57, %v990_v19  ;;  %v8530_v5 = vunpack.i.l.bf16 %v11563_v4  ;;  %v1957_v19 = vsel %vm1928_vm5, %v15953_v15, %v8535_v26  ;;  %v8545_v33 = vunpack.i.l.bf16 %v11594_v40 }
 0x133   :  { %8988 = vrot.lane.b32.xlu0 %v11871_v0, %s10077_s18  ;;  %v997_v0 = vrot.slane %v12061_v48, 2  ;;  %v12144_v57 = vpack.i.bf16 %v12100_v34, %v12097_v59  ;;  %v9012_v8 = vpack.i.bf16 %v641_v52, %v638_v31  ;;  %v9017_v10 = vpack.i.bf16 %v994_v36, %v991_v14  ;;  %v15957_v14 = vld [vmem:[#allocation19_spill] sm:$0xff]  ;;  %v15958_v36 = vld [vmem:[#allocation18_spill] sm:$0xff] }
 0x134   :  { %v12116_v35 = vpop.permute.xlu1 %8703  ;;  %v996_v61 = vsel %vm854_vm1, %v993_v12, %v995_v32  ;;  %v15955_v50 = vrot.slane %v12075_v23, 2  ;;  %v1353_v15 = vrot.slane %v12064_v38, 3  ;;  %v1355_v26 = vrot.slane %v12061_v48, 3 }
 0x135   :  { %v12118_v60 = vpop.permute.xlu0 %8708  ;;  %v1706_v28 = vrot.slane %v12056_v3, 4  ;;  %v15956_v52 = vrot.slane %v11854_v30, 3  ;;  %v1352_v32 = vsel %vm1212_vm3, %v1350_v7, %v1351_v27  ;;  %v8516_v31 = vunpack.i.h.bf16 %v11521_v13 }
 0x136   :  { %8993 = vrot.lane.b32.xlu1 %v12110_v46, %s10077_s18  ;;  %v999_v4 = vsel %vm854_vm1, %v997_v0, %v15955_v50  ;;  %v1708_v50 = vrot.slane %v12051_v29, 4  ;;  %v1709_v0 = vrot.slane %v12048_v63, 4  ;;  %v1956_v3 = vsel %vm1928_vm5, %v15957_v14, %v8531_v37 }
 0x137   :  { %8998 = vrot.lane.b32.xlu0 %v12110_v46, %s10078_s19  ;;  %v1349_v12 = vsel %vm1212_vm3, %v15956_v52, %v1348_v47  ;;  %v1955_v49 = vsel %vm1928_vm5, %v15958_v36, %v8530_v5  ;;  %v8540_v11 = vunpack.i.l.bf16 %v11592_v25  ;;  %v2023_v47 = vsel %vm1994_vm6, %v1957_v19, %v8545_v33 }
 0x138   :  { %v12146_v43 = vpop.permute.xlu1 %8713  ;;  %v8555_v7 = vunpack.i.l.bf16 %v11640_v22  ;;  %v9022_v63 = vpack.i.bf16 %v999_v4, %v996_v61  ;;  %v1354_v13 = vsel %vm1212_vm3, %v1351_v27, %v1353_v15  ;;  %v15959_v37 = vrot.slane %v12075_v23, 3 }
 0x139   :  { %v12148_v20 = vpop.permute.xlu0 %8718  ;;  %v15960_v5 = vrot.slane %v11854_v30, 4  ;;  %v1711_v19 = vrot.slane %v12064_v38, 4  ;;  %v1713_v61 = vrot.slane %v12061_v48, 4  ;;  %v15763_v27 = vrot.slane %v12075_v23, 4 }
 0x13a   :  { %15954 = vst [vmem:[#allocation20_spill] sm:$0xff] %v12148_v20  ;;  %9003 = vrot.lane.b32.xlu1 %v12144_v57, %s10078_s19  ;;  %v9027_v20 = vpack.i.bf16 %v1352_v32, %v1349_v12  ;;  %v1357_v14 = vsel %vm1212_vm3, %v1355_v26, %v15959_v37  ;;  %v12193_v33 = vsel %vm2060_vm7, %v12094_v1, %v8516_v31  ;;  %v8551_v4 = vunpack.i.h.bf16 %v11610_v51  ;;  %v104_v1 = vld [vmem:[%s15639_s0 + $0x1d0] sm:$0xff]  ;;  %v12209_v32 = vld [vmem:[%s15639_s0 + $0x1d8] sm:$0xff] }
 0x13b   :  { %9008 = vrot.lane.b32.xlu0 %v9007_v42, %s10072_s21  ;;  %v8541_v42 = vunpack.i.h.bf16 %v11592_v25  ;;  %v1707_v36 = vsel %vm1570_vm4, %v15960_v5, %v1706_v28  ;;  %v1710_v25 = vsel %vm1570_vm4, %v1708_v50, %v1709_v0  ;;  %v8550_v28 = vunpack.i.l.bf16 %v11610_v51 }
 0x13c   :  { %v8724_v52 = vpop.permute.xlu1 %8723  ;;  %v8616_v38 = vunpack.i.h.bf16 %v11867_v62  ;;  %v9037_v50 = vpack.i.bf16 %v1710_v25, %v1707_v36  ;;  %v15962_v25 = vld [vmem:[#allocation65_spill] sm:$0xff]  ;;  %v15967_v51 = vrot.slane %v12018_v55, 6 }
 0x13d   :  { %v12176_v29 = vpop.permute.xlu0 %8728  ;;  %v2022_v15 = vsel %vm1994_vm6, %v1956_v3, %v8541_v42  ;;  %v8726_v62 = vunpack.i.h.bf16 %v8724_v52  ;;  %v8725_v31 = vunpack.i.l.bf16 %v8724_v52  ;;  %v1712_v3 = vsel %vm1570_vm4, %v1709_v0, %v1711_v19 }
 0x13e   :  { %9013 = vrot.lane.b32.xlu1 %v9012_v8, %s10072_s21  ;;  %v1715_v42 = vsel %vm1570_vm4, %v1713_v61, %v15763_v27  ;;  %v9042_v19 = vpack.i.bf16 %v12028_v24, %v15962_v25  ;;  %v15990_v25 = vld [vmem:[#allocation23_spill] sm:$0xff] }
 0x13f   :  { %9018 = vrot.lane.b32.xlu0 %v9017_v10, %s10071_s20  ;;  %v2021_v10 = vsel %vm1994_vm6, %v1955_v49, %v8540_v11  ;;  %v12213_v11 = vsel %vm2060_vm7, %v2023_v47, %v8555_v7  ;;  %v9032_v49 = vpack.i.bf16 %v1357_v14, %v1354_v13  ;;  %v12225_v47 = vsel %vm2060_vm7, %v2022_v15, %v8551_v4  ;;  %v15963_v15 = vld [vmem:[#allocation34_spill] sm:$0xff] }
 0x140   :  { %v12201_v26 = vpop.permute.xlu1 %8733  ;;  %v12222_v37 = vsel %vm2060_vm7, %v2021_v10, %v8550_v28  ;;  %v262_v7 = vrot.slane %v104_v1, 6  ;;  %v263_v13 = vrot.slane %v12209_v32, 6  ;;  %v9047_v61 = vpack.i.bf16 %v1715_v42, %v1712_v3  ;;  %v106_v28 = vld [vmem:[%s15639_s0 + $0x1e0] sm:$0xff]  ;;  %v12241_v10 = vld [vmem:[%s15639_s0 + $0x1e8] sm:$0xff] }
 0x141   :  { %v8739_v12 = vpop.permute.xlu0 %8738  ;;  %v9052_v4 = vpack.i.bf16 %v12097_v59, %v12078_v21  ;;  %v8735_v42 = vunpack.i.l.bf16 %v12201_v26 }
 0x142   :  { %9023 = vrot.lane.b32.xlu1 %v9022_v63, %s10071_s20  ;;  %v15961_v63 = vld [vmem:[#allocation30_spill] sm:$0xff]  ;;  %v8741_v14 = vunpack.i.h.bf16 %v8739_v12  ;;  %v8740_v0 = vunpack.i.l.bf16 %v8739_v12  ;;  %v15964_v12 = vld [vmem:[#allocation33_spill] sm:$0xff]  ;;  %v12254_v27 = vsel %vm174_vm0, 0.0, %v262_v7 }
 0x143   :  { %9028 = vrot.lane.b32.xlu0 %v9027_v20, %s10073_s26  ;;  %v2990_v20 = vsel %vm2986_vm9, %v15961_v63, %v8616_v38  ;;  %v2992_v38 = vsel %vm2986_vm9, %v15963_v15, %v8726_v62  ;;  %v2991_v1 = vsel %vm2986_vm9, %v15964_v12, %v8725_v31  ;;  %v12251_v63 = vsel %vm174_vm0, %v262_v7, %v263_v13 }
 0x144   :  { %v8744_v5 = vpop.permute.xlu1 %8743  ;;  %15965 = vst [vmem:[#allocation19_spill] sm:$0xff] %v12251_v63  ;;  %15966 = vst [vmem:[#allocation18_spill] sm:$0xff] %v12254_v27  ;;  %v12259_v62 = vsel %vm174_vm0, %v15967_v51, 0.0  ;;  %v3054_v31 = vsel %vm3048_vm10, %v2991_v1, %v8741_v14  ;;  %v15768_v12 = vrot.slane %v12241_v10, 6 }
 0x145   :  { %v8749_v36 = vpop.permute.xlu0 %8748  ;;  %v8746_v8 = vunpack.i.h.bf16 %v8744_v5  ;;  %v8745_v52 = vunpack.i.l.bf16 %v8744_v5  ;;  %v644_v5 = vrot.slane %v12254_v27, 1 }
 0x146   :  { %v8751_v32 = vunpack.i.h.bf16 %v8749_v36  ;;  %v8750_v3 = vunpack.i.l.bf16 %v8749_v36  ;;  %9033 = vrot.lane.b32.xlu1 %v9032_v49, %s10073_s26  ;;  %v3053_v36 = vsel %vm3048_vm10, %v2990_v20, %v8740_v0  ;;  %v642_v0 = vrot.slane %v12259_v62, 1 }
 0x147   :  { %9038 = vrot.lane.b32.xlu0 %v9037_v50, %s10074_s14  ;;  %v265_v50 = vrot.slane %v106_v28, 6  ;;  %v15968_v28 = vld [vmem:[#allocation37_spill] sm:$0xff] }
 0x148   :  { %v8754_v49 = vpop.permute.xlu1 %8753  ;;  %v3118_v7 = vsel %vm3113_vm11, %v3053_v36, %v8750_v3  ;;  %v3119_v55 = vsel %vm3113_vm11, %v3054_v31, %v8751_v32  ;;  %v2993_v1 = vsel %vm2986_vm9, %v15968_v28, %v8735_v42  ;;  %v645_v31 = vrot.slane %v12251_v63, 1 }
 0x149   :  { %v8759_v15 = vpop.permute.xlu0 %8758  ;;  %v8756_v24 = vunpack.i.h.bf16 %v8754_v49  ;;  %v8755_v51 = vunpack.i.l.bf16 %v8754_v49  ;;  %v12290_v42 = vsel %vm174_vm0, %v265_v50, %v15768_v12 }
 0x14a   :  { %v8761_v59 = vunpack.i.h.bf16 %v8759_v15  ;;  %v8760_v21 = vunpack.i.l.bf16 %v8759_v15  ;;  %9043 = vrot.lane.b32.xlu1 %v9042_v19, %s10075_s23  ;;  %v12278_v19 = vsel %vm174_vm0, 0.0, %v265_v50  ;;  %15970 = vst [vmem:[#allocation34_spill] sm:$0xff] %v12290_v42 }
 0x14b   :  { %9048 = vrot.lane.b32.xlu0 %v9047_v61, %s10074_s14  ;;  %15969 = vst [vmem:[#allocation30_spill] sm:$0xff] %v12278_v19  ;;  %v1365_v30 = vrot.slane %v12278_v19, 3 }
 0x14c   :  { %v3183_v20 = vsel %vm3178_vm12, %v3118_v7, %v8760_v21  ;;  %v3184_v14 = vsel %vm3178_vm12, %v3119_v55, %v8761_v59  ;;  %v8764_v3 = vpop.permute.xlu1 %8763  ;;  %v3055_v21 = vsel %vm3048_vm10, %v2992_v38, %v8745_v52  ;;  %v3056_v59 = vsel %vm3048_vm10, %v2993_v1, %v8746_v8  ;;  %v15971_v38 = vld [vmem:[#allocation60_spill] sm:$0xff] }
 0x14d   :  { %v12274_v36 = vpop.permute.xlu0 %8768  ;;  %v3245_v32 = vpack.c.bf16 %v3184_v14, %v3183_v20  ;;  %v8766_v61 = vunpack.i.h.bf16 %v8764_v3  ;;  %v8765_v49 = vunpack.i.l.bf16 %v8764_v3  ;;  %v3120_v15 = vsel %vm3113_vm11, %v3055_v21, %v8755_v51 }
 0x14e   :  { %v3121_v7 = vsel %vm3113_vm11, %v3056_v59, %v8756_v24  ;;  %9053 = vrot.lane.b32.xlu1 %v9052_v4, %s10075_s23  ;;  %v12293_v52 = vsel %vm174_vm0, %v263_v13, 0.0  ;;  %v8561_v8 = vunpack.i.h.bf16 %v11648_v45  ;;  %v8565_v55 = vunpack.i.l.bf16 %v15971_v38 }
 0x14f   :  { %9058 = vrot.lane.b32.xlu0 %v12110_v46, %s10076_s27  ;;  %v3185_v51 = vsel %vm3178_vm12, %v3120_v15, %v8765_v49  ;;  %v3186_v24 = vsel %vm3178_vm12, %v3121_v7, %v8766_v61  ;;  %8123 = vmatprep.mubr.msk.bf16.mxu0 %vm3297_vm13, %v3245_v32  ;;  %v15972_v46 = vunpack.i.l.bf16 %v11648_v45  ;;  %v15974_v14 = vrot.slane %v12075_v23, 1  ;;  %v15978_v15 = vld [vmem:[#allocation21_spill] sm:$0xff] }
 0x150   :  { %v12306_v50 = vpop.permute.xlu1 %8773  ;;  %v3246_v20 = vpack.c.bf16 %v3186_v24, %v3185_v51  ;;  %v647_v1 = vrot.slane %v12293_v52, 1  ;;  %v649_v3 = vrot.slane %v12278_v19, 1  ;;  %v15767_v32 = vrot.slane %v12290_v42, 1 }
 0x151   :  { %v12304_v4 = vsel %vm2126_vm8, %v12222_v37, %v15972_v46  ;;  %v12308_v13 = vpop.permute.xlu0 %8778  ;;  %v643_v28 = vsel %vm496_vm2, %v15974_v14, %v642_v0  ;;  %v646_v45 = vsel %vm496_vm2, %v644_v5, %v645_v31  ;;  %v1000_v37 = vrot.slane %v12259_v62, 2 }
 0x152   :  { %15973 = vst [vmem:[#allocation33_spill] sm:$0xff] %v12304_v4  ;;  %9063 = vrot.lane.b32.xlu1 %v12144_v57, %s10076_s27  ;;  %v1002_v21 = vrot.slane %v12254_v27, 2  ;;  %v1003_v0 = vrot.slane %v12251_v63, 2  ;;  %v15975_v59 = vunpack.i.h.bf16 %v11537_v58  ;;  %v15977_v49 = vunpack.i.h.bf16 %v11554_v44  ;;  %8124 = vmatmul.mubr.msk.bf16.gmra.mrb[4].mxu0 %vm3297_vm13, %v3246_v20 }
 0x153   :  { %9068 = vrot.lane.b32.xlu0 %v12144_v57, %s10077_s18  ;;  %v8546_v57 = vunpack.i.h.bf16 %v11594_v40  ;;  %v12338_v5 = vsel %vm2126_vm8, %v12225_v47, %v8561_v8  ;;  %v12342_v58 = vsel %vm2126_vm8, %v12213_v11, %v8565_v55  ;;  %v9087_v24 = vpack.i.bf16 %v646_v45, %v643_v28  ;;  %v15983_v45 = vld [vmem:[#allocation61_spill] sm:$0xff] }
 0x154   :  { %v12328_v61 = vsel %vm2126_vm8, %v12193_v33, %v15975_v59  ;;  %v1958_v7 = vsel %vm1928_vm5, %v15978_v15, %v15977_v49  ;;  %15979 = vst [vmem:[#allocation60_spill] sm:$0xff] %v12338_v5  ;;  %v12344_v51 = vpop.permute.xlu1 %8783  ;;  %v648_v40 = vsel %vm496_vm2, %v645_v31, %v647_v1  ;;  %v651_v47 = vsel %vm496_vm2, %v649_v3, %v15767_v32  ;;  %v15984_v49 = vld [vmem:[#allocation62_spill] sm:$0xff] }
 0x155   :  { %15976 = vst [vmem:[#allocation37_spill] sm:$0xff] %v12328_v61  ;;  %15980 = vst [vmem:[#allocation21_spill] sm:$0xff] %v12344_v51  ;;  %v12346_v33 = vpop.permute.xlu0 %8788  ;;  %v12350_v44 = vpack.i.bf16 %v12304_v4, %v12328_v61  ;;  %v1005_v8 = vrot.slane %v12293_v52, 2  ;;  %v15982_v11 = vrot.slane %v12075_v23, 2  ;;  %v1004_v46 = vsel %vm854_vm1, %v1002_v21, %v1003_v0 }
 0x156   :  { %15981 = vst [vmem:[#allocation77_spill] sm:$0xff] %v12346_v33  ;;  %v1007_v31 = vrot.slane %v12278_v19, 2  ;;  %v1358_v14 = vrot.slane %v12259_v62, 3  ;;  %v1360_v28 = vrot.slane %v12254_v27, 3  ;;  %v1361_v1 = vrot.slane %v12251_v63, 3 }
 0x157   :  { %9073 = vrot.lane.b32.xlu1 %v12350_v44, %s10077_s18  ;;  %9078 = vrot.lane.b32.xlu0 %v12350_v44, %s10078_s19  ;;  %v1001_v55 = vsel %vm854_vm1, %v15982_v11, %v1000_v37  ;;  %v2024_v3 = vsel %vm1994_vm6, %v1958_v7, %v8546_v57  ;;  %v8570_v59 = vunpack.i.l.bf16 %v15983_v45  ;;  %v8575_v15 = vunpack.i.l.bf16 %v15984_v49 }
 0x158   :  { %v12373_v32 = vpop.permute.xlu1 %8793  ;;  %v12379_v21 = vpack.i.bf16 %v12342_v58, %v12338_v5  ;;  %v9092_v11 = vpack.i.bf16 %v651_v47, %v648_v40  ;;  %v9097_v12 = vpack.i.bf16 %v1004_v46, %v1001_v55  ;;  %v1006_v20 = vsel %vm854_vm1, %v1003_v0, %v1005_v8 }
 0x159   :  { %15985 = vst [vmem:[#allocation61_spill] sm:$0xff] %v12373_v32  ;;  %v12375_v37 = vpop.permute.xlu0 %8798  ;;  %v1363_v48 = vrot.slane %v12293_v52, 3  ;;  %v15987_v7 = vrot.slane %v12290_v42, 2  ;;  %v1716_v40 = vrot.slane %v12259_v62, 4  ;;  %v15988_v47 = vrot.slane %v12075_v23, 3 }
 0x15a   :  { %15986 = vst [vmem:[#allocation62_spill] sm:$0xff] %v12375_v37  ;;  %v1362_v8 = vsel %vm1212_vm3, %v1360_v28, %v1361_v1  ;;  %v1718_v55 = vrot.slane %v12254_v27, 4  ;;  %v8556_v46 = vunpack.i.h.bf16 %v11640_v22  ;;  %v1961_v62 = vsel %vm1928_vm5, %v15990_v25, %v8575_v15 }
 0x15b   :  { %9083 = vrot.lane.b32.xlu1 %v12379_v21, %s10078_s19  ;;  %9088 = vrot.lane.b32.xlu0 %v9087_v24, %s10072_s21  ;;  %v1009_v57 = vsel %vm854_vm1, %v1007_v31, %v15987_v7  ;;  %v1359_v0 = vsel %vm1212_vm3, %v15988_v47, %v1358_v14  ;;  %v1719_v24 = vrot.slane %v12251_v63, 4  ;;  %v8571_v31 = vunpack.i.h.bf16 %v15983_v45  ;;  %v15989_v7 = vld [vmem:[#allocation22_spill] sm:$0xff]  ;;  %v15992_v14 = vld [vmem:[#allocation63_spill] sm:$0xff]  ;;  %v15993_v47 = vld [vmem:[#allocation9_spill] sm:$0xff] }
 0x15c   :  { %v1959_v32 = vsel %vm1928_vm5, %v15989_v7, %v8570_v59  ;;  %v12404_v37 = vpop.permute.xlu1 %8803  ;;  %v8581_v28 = vunpack.i.h.bf16 %v15992_v14  ;;  %v8585_v27 = vunpack.i.l.bf16 %v15993_v47  ;;  %v9102_v51 = vpack.i.bf16 %v1009_v57, %v1006_v20 }
 0x15d   :  { %v12406_v33 = vpop.permute.xlu0 %8808  ;;  %v1364_v63 = vsel %vm1212_vm3, %v1361_v1, %v1363_v48  ;;  %v8580_v22 = vunpack.i.l.bf16 %v15992_v14  ;;  %v9107_v45 = vpack.i.bf16 %v1362_v8, %v1359_v0  ;;  %v15994_v25 = vrot.slane %v12290_v42, 3 }
 0x15e   :  { %15991 = vst [vmem:[#allocation22_spill] sm:$0xff] %v12406_v33  ;;  %v15995_v15 = vrot.slane %v12075_v23, 4  ;;  %v1720_v33 = vsel %vm1570_vm4, %v1718_v55, %v1719_v24  ;;  %v1721_v20 = vrot.slane %v12293_v52, 4  ;;  %v1723_v48 = vrot.slane %v12278_v19, 4 }
 0x15f   :  { %9093 = vrot.lane.b32.xlu1 %v9092_v11, %s10072_s21  ;;  %9098 = vrot.lane.b32.xlu0 %v9097_v12, %s10071_s20  ;;  %v1367_v59 = vsel %vm1212_vm3, %v1365_v30, %v15994_v25  ;;  %v15778_v1 = vrot.slane %v12290_v42, 4  ;;  %v15996_v11 = vld [vmem:[#allocation24_spill] sm:$0xff]  ;;  %v12429_v30 = vsel %vm2060_vm7, %v2024_v3, %v8556_v46  ;;  %v12432_v8 = vsel %vm1994_vm6, %v1961_v62, %v8585_v27  ;;  %v15997_v46 = vld [vmem:[#allocation10_spill] sm:$0xff] }
 0x160   :  { %v1717_v7 = vsel %vm1570_vm4, %v15995_v15, %v1716_v40  ;;  %v1960_v12 = vsel %vm1928_vm5, %v15996_v11, %v8571_v31  ;;  %v12426_v57 = vpop.permute.xlu1 %8813  ;;  %v8736_v40 = vunpack.i.h.bf16 %v12201_v26  ;;  %v2025_v55 = vsel %vm1994_vm6, %v1959_v32, %v8580_v22  ;;  %v15998_v32 = vld [vmem:[#allocation11_spill] sm:$0xff] }
 0x161   :  { %v8819_v0 = vpop.permute.xlu0 %8818  ;;  %v9112_v31 = vpack.i.bf16 %v1367_v59, %v1364_v63  ;;  %v9117_v14 = vpack.i.bf16 %v1720_v33, %v1717_v7  ;;  %v12440_v25 = vsel %vm1994_vm6, %v1960_v12, %v8581_v28  ;;  %v8805_v3 = vunpack.i.l.bf16 %v12404_v37  ;;  %v108_v33 = vld [vmem:[%s15639_s0 + $0x1f0] sm:$0xff]  ;;  %v15999_v59 = vld [vmem:[#allocation12_spill] sm:$0xff] }
 0x162   :  { %v1722_v27 = vsel %vm1570_vm4, %v1719_v24, %v1721_v20  ;;  %v1725_v26 = vsel %vm1570_vm4, %v1723_v48, %v15778_v1  ;;  %v8820_v15 = vunpack.i.l.bf16 %v8819_v0  ;;  %v8590_v28 = vunpack.i.l.bf16 %v15997_v46  ;;  %v16000_v7 = vld [vmem:[#allocation38_spill] sm:$0xff]  ;;  %v12461_v11 = vld [vmem:[%s15639_s0 + $0x1f8] sm:$0xff] }
 0x163   :  { %9103 = vrot.lane.b32.xlu1 %v9102_v51, %s10071_s20  ;;  %9108 = vrot.lane.b32.xlu0 %v9107_v45, %s10073_s26  ;;  %v8821_v51 = vunpack.i.h.bf16 %v8819_v0  ;;  %v8600_v24 = vunpack.i.l.bf16 %v15999_v59  ;;  %v2994_v20 = vsel %vm2986_vm9, %v16000_v7, %v8736_v40  ;;  %v9122_v48 = vpack.i.bf16 %v12328_v61, %v12100_v34  ;;  %v16001_v7 = vld [vmem:[#allocation39_spill] sm:$0xff] }
 0x164   :  { %v8824_v45 = vpop.permute.xlu1 %8823  ;;  %v9127_v1 = vpack.i.bf16 %v1725_v26, %v1722_v27  ;;  %v9132_v22 = vpack.i.bf16 %v12338_v5, %v12304_v4  ;;  %v8806_v40 = vunpack.i.h.bf16 %v12404_v37  ;;  %v2995_v62 = vsel %vm2986_vm9, %v16001_v7, %v8805_v3 }
 0x165   :  { %v8829_v63 = vpop.permute.xlu0 %8828  ;;  %v268_v52 = vrot.slane %v108_v33, 6  ;;  %v8815_v61 = vunpack.i.l.bf16 %v12426_v57  ;;  %v3058_v19 = vsel %vm3048_vm10, %v2995_v62, %v8821_v51  ;;  %v8826_v27 = vunpack.i.h.bf16 %v8824_v45  ;;  %v16002_v62 = vld [vmem:[#allocation43_spill] sm:$0xff] }
 0x166   :  { %v8831_v12 = vunpack.i.h.bf16 %v8829_v63  ;;  %v8830_v0 = vunpack.i.l.bf16 %v8829_v63  ;;  %v3057_v63 = vsel %vm3048_vm10, %v2994_v20, %v8820_v15  ;;  %v8825_v26 = vunpack.i.l.bf16 %v8824_v45 }
 0x167   :  { %9113 = vrot.lane.b32.xlu1 %v9112_v31, %s10073_s26  ;;  %9118 = vrot.lane.b32.xlu0 %v9117_v14, %s10074_s14  ;;  %v269_v14 = vrot.slane %v12461_v11, 6  ;;  %v2996_v51 = vsel %vm2986_vm9, %v16002_v62, %v8806_v40  ;;  %v16003_v45 = vrot.slane %v12241_v10, 6  ;;  %v12495_v40 = vsel %vm174_vm0, 0.0, %v268_v52 }
 0x168   :  { %v8834_v34 = vpop.permute.xlu1 %8833  ;;  %v3122_v37 = vsel %vm3113_vm11, %v3057_v63, %v8830_v0  ;;  %v3123_v5 = vsel %vm3113_vm11, %v3058_v19, %v8831_v12  ;;  %v16004_v0 = vld [vmem:[#allocation42_spill] sm:$0xff]  ;;  %16006 = vst [vmem:[#allocation63_spill] sm:$0xff] %v12495_v40  ;;  %v2091_v7 = vsel %vm2060_vm7, %v2025_v55, %v8590_v28  ;;  %v16007_v28 = vunpack.i.h.bf16 %v15971_v38 }
 0x169   :  { %v8839_v31 = vpop.permute.xlu0 %8838  ;;  %v8836_v3 = vunpack.i.h.bf16 %v8834_v34  ;;  %v8835_v33 = vunpack.i.l.bf16 %v8834_v34  ;;  %v12485_v11 = vsel %vm174_vm0, %v16003_v45, 0.0  ;;  %v2997_v19 = vsel %vm2986_vm9, %v16004_v0, %v8815_v61 }
 0x16a   :  { %v8841_v23 = vunpack.i.h.bf16 %v8839_v31  ;;  %v8840_v4 = vunpack.i.l.bf16 %v8839_v31  ;;  %v3060_v10 = vsel %vm3048_vm10, %v2997_v19, %v8826_v27  ;;  %v654_v27 = vrot.slane %v12495_v40, 1 }
 0x16b   :  { %9123 = vrot.lane.b32.xlu1 %v9122_v48, %s10075_s23  ;;  %9128 = vrot.lane.b32.xlu0 %v9127_v1, %s10074_s14  ;;  %v12492_v1 = vsel %vm174_vm0, %v268_v52, %v269_v14  ;;  %v3125_v63 = vsel %vm3113_vm11, %v3060_v10, %v8836_v3  ;;  %v652_v52 = vrot.slane %v12485_v11, 1  ;;  %v8601_v62 = vunpack.i.h.bf16 %v15999_v59 }
 0x16c   :  { %v3187_v15 = vsel %vm3178_vm12, %v3122_v37, %v8840_v4  ;;  %v3188_v20 = vsel %vm3178_vm12, %v3123_v5, %v8841_v23  ;;  %v8844_v34 = vpop.permute.xlu1 %8843  ;;  %16005 = vst [vmem:[#allocation23_spill] sm:$0xff] %v12492_v1  ;;  %v3059_v23 = vsel %vm3048_vm10, %v2996_v51, %v8825_v26  ;;  %v655_v55 = vrot.slane %v12492_v1, 1 }
 0x16d   :  { %v12489_v12 = vpop.permute.xlu0 %8848  ;;  %v3247_v48 = vpack.c.bf16 %v3188_v20, %v3187_v15  ;;  %v8846_v4 = vunpack.i.h.bf16 %v8844_v34  ;;  %v8845_v5 = vunpack.i.l.bf16 %v8844_v34  ;;  %v3124_v61 = vsel %vm3113_vm11, %v3059_v23, %v8835_v33  ;;  %v16008_v15 = vld [vmem:[#allocation69_spill] sm:$0xff] }
 0x16e   :  { %v8576_v33 = vunpack.i.h.bf16 %v15984_v49  ;;  %v12524_v51 = vsel %vm2126_vm8, %v2091_v7, %v8600_v24  ;;  %v8605_v20 = vunpack.i.l.bf16 %v16008_v15  ;;  %v16009_v38 = vunpack.i.h.bf16 %v15997_v46 }
 0x16f   :  { %9133 = vrot.lane.b32.xlu1 %v9132_v22, %s10075_s23  ;;  %9138 = vrot.lane.b32.xlu0 %v12350_v44, %s10076_s27  ;;  %v3189_v31 = vsel %vm3178_vm12, %v3124_v61, %v8845_v5  ;;  %v3190_v26 = vsel %vm3178_vm12, %v3125_v63, %v8846_v4  ;;  %v12515_v22 = vsel %vm2126_vm8, %v12429_v30, %v16007_v28  ;;  %v16010_v45 = vunpack.i.l.bf16 %v15998_v32  ;;  %v16012_v4 = vld [vmem:[#allocation26_spill] sm:$0xff] }
 0x170   :  { %8127 = vmatprep.mubr.msk.bf16.mxu0 %vm3297_vm13, %v3247_v48  ;;  %v12517_v37 = vpop.permute.xlu1 %8853  ;;  %v3248_v3 = vpack.c.bf16 %v3190_v26, %v3189_v31  ;;  %v2092_v30 = vsel %vm2060_vm7, %v12440_v25, %v16009_v38  ;;  %v16011_v49 = vrot.slane %v12290_v42, 1  ;;  %v12543_v46 = vsel %vm174_vm0, %v269_v14, 0.0 }
 0x171   :  { %v12519_v44 = vpop.permute.xlu0 %8858  ;;  %v2093_v0 = vsel %vm2060_vm7, %v12432_v8, %v16010_v45  ;;  %v656_v25 = vsel %vm496_vm2, %v654_v27, %v655_v55  ;;  %v1010_v24 = vrot.slane %v12485_v11, 2  ;;  %v1012_v8 = vrot.slane %v12495_v40, 2 }
 0x172   :  { %v653_v59 = vsel %vm496_vm2, %v16011_v49, %v652_v52  ;;  %8128 = vmatmul.mubr.msk.bf16.gmra.mrb[8].mxu0 %vm3297_vm13, %v3248_v3  ;;  %v1013_v19 = vrot.slane %v12492_v1, 2  ;;  %v12556_v48 = vpack.i.bf16 %v12524_v51, %v12515_v22  ;;  %v8586_v14 = vunpack.i.h.bf16 %v15993_v47 }
 0x173   :  { %9143 = vrot.lane.b32.xlu1 %v12379_v21, %s10076_s27  ;;  %9148 = vrot.lane.b32.xlu0 %v12379_v21, %s10077_s18  ;;  %v2158_v23 = vsel %vm2126_vm8, %v2092_v30, %v8601_v62  ;;  %v2159_v10 = vsel %vm2126_vm8, %v2093_v0, %v8605_v20  ;;  %v1962_v5 = vsel %vm1928_vm5, %v16012_v4, %v8576_v33  ;;  %v657_v61 = vrot.slane %v12543_v46, 1 }
 0x174   :  { %v12550_v34 = vpop.permute.xlu1 %8863  ;;  %v9167_v7 = vpack.i.bf16 %v656_v25, %v653_v59  ;;  %v1368_v63 = vrot.slane %v12485_v11, 3  ;;  %v16013_v47 = vrot.slane %v12290_v42, 2  ;;  %v1014_v31 = vsel %vm854_vm1, %v1012_v8, %v1013_v19 }
 0x175   :  { %v12552_v21 = vpop.permute.xlu0 %8868  ;;  %v1370_v26 = vrot.slane %v12495_v40, 3  ;;  %v1371_v27 = vrot.slane %v12492_v1, 3  ;;  %v12579_v33 = vpack.i.bf16 %v2159_v10, %v2158_v23  ;;  %v2028_v62 = vsel %vm1994_vm6, %v1962_v5, %v8586_v14  ;;  %v16015_v10 = vld [vmem:[#allocation72_spill] sm:$0xff] }
 0x176   :  { %v1011_v52 = vsel %vm854_vm1, %v16013_v47, %v1010_v24  ;;  %v8596_v20 = vunpack.i.h.bf16 %v15998_v32  ;;  %v658_v38 = vsel %vm496_vm2, %v655_v55, %v657_v61  ;;  %v1015_v45 = vrot.slane %v12543_v46, 2 }
 0x177   :  { %9153 = vrot.lane.b32.xlu1 %v12556_v48, %s10077_s18  ;;  %9158 = vrot.lane.b32.xlu0 %v12556_v48, %s10078_s19  ;;  %v9172_v30 = vpack.i.bf16 %v1014_v31, %v1011_v52  ;;  %v16014_v0 = vrot.slane %v12290_v42, 3  ;;  %v1372_v59 = vsel %vm1212_vm3, %v1370_v26, %v1371_v27  ;;  %v1726_v25 = vrot.slane %v12485_v11, 4 }
 0x178   :  { %v12575_v28 = vpop.permute.xlu1 %8873  ;;  %v1728_v32 = vrot.slane %v12495_v40, 4  ;;  %v1729_v24 = vrot.slane %v12492_v1, 4  ;;  %v8606_v55 = vunpack.i.h.bf16 %v16008_v15  ;;  %v2094_v23 = vsel %vm2060_vm7, %v2028_v62, %v8596_v20 }
 0x179   :  { %v12577_v3 = vpop.permute.xlu0 %8878  ;;  %v1369_v49 = vsel %vm1212_vm3, %v16014_v0, %v1368_v63  ;;  %v8636_v4 = vunpack.i.h.bf16 %v16015_v10  ;;  %v8635_v5 = vunpack.i.l.bf16 %v16015_v10  ;;  %v1373_v61 = vrot.slane %v12543_v46, 3 }
 0x17a   :  { %v9177_v11 = vpack.i.bf16 %v1372_v59, %v1369_v49  ;;  %v16016_v63 = vrot.slane %v12290_v42, 4  ;;  %v1730_v15 = vsel %vm1570_vm4, %v1728_v32, %v1729_v24  ;;  %v8651_v52 = vunpack.i.h.bf16 %v11941_v6 }
 0x17b   :  { %9163 = vrot.lane.b32.xlu1 %v12579_v33, %s10078_s19  ;;  %9168 = vrot.lane.b32.xlu0 %v9167_v7, %s10072_s21  ;;  %v1016_v7 = vsel %vm854_vm1, %v1013_v19, %v1015_v45  ;;  %v12615_v62 = vsel %vm2126_vm8, %v2094_v23, %v8606_v55  ;;  %v8656_v20 = vunpack.i.h.bf16 %v11962_v39  ;;  %v8816_v49 = vunpack.i.h.bf16 %v12426_v57  ;;  %v16019_v55 = vld [vmem:[#allocation31_spill] sm:$0xff] }
 0x17c   :  { %v12595_v8 = vpop.permute.xlu1 %8883  ;;  %v1727_v47 = vsel %vm1570_vm4, %v16016_v63, %v1726_v25  ;;  %v1374_v25 = vsel %vm1212_vm3, %v1371_v27, %v1373_v61  ;;  %v1731_v32 = vrot.slane %v12543_v46, 4  ;;  %v1966_v23 = vsel %vm1928_vm5, %v16019_v55, %v8651_v52 }
 0x17d   :  { %v12597_v14 = vpop.permute.xlu0 %8888  ;;  %v9182_v0 = vpack.i.bf16 %v1730_v15, %v1727_v47  ;;  %v8885_v59 = vunpack.i.l.bf16 %v12595_v8  ;;  %v8671_v57 = vunpack.i.h.bf16 %v11982_v2  ;;  %v8676_v15 = vunpack.i.h.bf16 %v12021_v56 }
 0x17e   :  { %v8691_v27 = vunpack.i.h.bf16 %v12045_v17  ;;  %v8696_v46 = vunpack.i.h.bf16 %v12083_v18  ;;  %v1732_v55 = vsel %vm1570_vm4, %v1729_v24, %v1731_v32 }
 0x17f   :  { %787 = vrot.lane.b32.xlu1 %v658_v38, %s10072_s21  ;;  %9173 = vrot.lane.b32.xlu0 %v9172_v30, %s10071_s20  ;;  %v16017_v38 = vld [vmem:[#allocation28_spill] sm:$0xff]  ;;  %v16018_v30 = vld [vmem:[#allocation25_spill] sm:$0xff]  ;;  %s10080_s21 = smov 64  }
 0x180   :  { %v12612_v31 = vpop.permute.xlu1 %8893  ;;  %v1964_v19 = vsel %vm1928_vm5, %v16017_v38, %v8636_v4  ;;  %v12622_v45 = vsel %vm1928_vm5, %v16018_v30, %v8635_v5  ;;  %v16021_v30 = vld [vmem:[#allocation48_spill] sm:$0xff] }
 0x181   :  { %v8899_v26 = vpop.permute.xlu0 %8898  ;;  %v2030_v47 = vsel %vm1994_vm6, %v1964_v19, %v8656_v20  ;;  %v2999_v20 = vsel %vm2986_vm9, %v16021_v30, %v8885_v59  ;;  %v9187_v19 = vpack.i.bf16 %v12515_v22, %v12342_v58  ;;  %v8895_v10 = vunpack.i.l.bf16 %v12612_v31 }
 0x182   :  { %v8901_v4 = vunpack.i.h.bf16 %v8899_v26  ;;  %v8900_v5 = vunpack.i.l.bf16 %v8899_v26  ;;  %v16020_v26 = vld [vmem:[#allocation49_spill] sm:$0xff] }
 0x183   :  { %1145 = vrot.lane.b32.xlu1 %v1016_v7, %s10071_s20  ;;  %9178 = vrot.lane.b32.xlu0 %v9177_v11, %s10073_s26  ;;  %v2998_v38 = vsel %vm2986_vm9, %v16020_v26, %v8816_v49  ;;  %v8886_v11 = vunpack.i.h.bf16 %v12595_v8  ;;  %v8711_v8 = vunpack.i.h.bf16 %v12118_v60 }
 0x184   :  { %v8904_v63 = vpop.permute.xlu1 %8903 }
 0x185   :  { %v8909_v7 = vpop.permute.xlu0 %8908  ;;  %v8906_v40 = vunpack.i.h.bf16 %v8904_v63  ;;  %v8905_v49 = vunpack.i.l.bf16 %v8904_v63 }
 0x186   :  { %v8911_v61 = vunpack.i.h.bf16 %v8909_v7  ;;  %v8910_v52 = vunpack.i.l.bf16 %v8909_v7  ;;  %v3062_v7 = vsel %vm3048_vm10, %v2999_v20, %v8901_v4 }
 0x187   :  { %1503 = vrot.lane.b32.xlu1 %v1374_v25, %s10073_s26  ;;  %9183 = vrot.lane.b32.xlu0 %v9182_v0, %s10074_s14  ;;  %v3061_v25 = vsel %vm3048_vm10, %v2998_v38, %v8900_v5  ;;  %v9192_v5 = vpack.i.bf16 %v12615_v62, %v12524_v51  ;;  %v2032_v51 = vsel %vm1994_vm6, %v1966_v23, %v8671_v57  ;;  %s10081_s26 = smov 32  }
 0x188   :  { %v8914_v0 = vpop.permute.xlu1 %8913  ;;  %v3126_v59 = vsel %vm3113_vm11, %v3061_v25, %v8910_v52  ;;  %v3127_v22 = vsel %vm3113_vm11, %v3062_v7, %v8911_v61  ;;  %v16023_v52 = vld [vmem:[#allocation51_spill] sm:$0xff]  ;;  %v2098_v23 = vsel %vm2060_vm7, %v2032_v51, %v8691_v27  ;;  %v16030_v51 = vld [vmem:[#allocation36_spill] sm:$0xff] }
 0x189   :  { %v8919_v1 = vpop.permute.xlu0 %8918  ;;  %v8916_v30 = vunpack.i.h.bf16 %v8914_v0  ;;  %v8915_v24 = vunpack.i.l.bf16 %v8914_v0  ;;  %v3001_v61 = vsel %vm2986_vm9, %v16023_v52, %v8895_v10  ;;  %v8666_v0 = vunpack.i.h.bf16 %v11980_v16 }
 0x18a   :  { %v8921_v26 = vunpack.i.h.bf16 %v8919_v1  ;;  %v8920_v42 = vunpack.i.l.bf16 %v8919_v1  ;;  %v16022_v1 = vld [vmem:[#allocation50_spill] sm:$0xff]  ;;  %v3064_v7 = vsel %vm3048_vm10, %v3001_v61, %v8906_v40  ;;  %v8675_v10 = vunpack.i.l.bf16 %v12021_v56  ;;  %v16028_v61 = vld [vmem:[#allocation32_spill] sm:$0xff] }
 0x18b   :  { %9188 = vrot.lane.b32.xlu1 %v9187_v19, %s10075_s23  ;;  %1861 = vrot.lane.b32.xlu0 %v1732_v55, %s10074_s14  ;;  %v3000_v63 = vsel %vm2986_vm9, %v16022_v1, %v8886_v11  ;;  %v3129_v11 = vsel %vm3113_vm11, %v3064_v7, %v8916_v30  ;;  %v8701_v7 = vunpack.i.h.bf16 %v12085_v41  ;;  %s10082_s14 = smov 96  }
 0x18c   :  { %v3191_v32 = vsel %vm3178_vm12, %v3126_v59, %v8920_v42  ;;  %v3192_v4 = vsel %vm3178_vm12, %v3127_v22, %v8921_v26  ;;  %v8924_v38 = vpop.permute.xlu1 %8923  ;;  %v3063_v55 = vsel %vm3048_vm10, %v3000_v63, %v8905_v49  ;;  %v2096_v49 = vsel %vm2060_vm7, %v2030_v47, %v8676_v15 }
 0x18d   :  { %v12665_v20 = vpop.permute.xlu0 %8928  ;;  %v3249_v19 = vpack.c.bf16 %v3192_v4, %v3191_v32  ;;  %v8926_v42 = vunpack.i.h.bf16 %v8924_v38  ;;  %v8925_v25 = vunpack.i.l.bf16 %v8924_v38  ;;  %v3128_v26 = vsel %vm3113_vm11, %v3063_v55, %v8915_v24  ;;  %v16025_v32 = vld [vmem:[#allocation27_spill] sm:$0xff] }
 0x18e   :  { %v8665_v24 = vunpack.i.l.bf16 %v11980_v16  ;;  %v12689_v56 = vsel %vm2126_vm8, %v2096_v49, %v8696_v46  ;;  %v12692_v47 = vsel %vm2126_vm8, %v2098_v23, %v8711_v8  ;;  %v16024_v15 = vunpack.i.l.bf16 %v11941_v6 }
 0x18f   :  { %9193 = vrot.lane.b32.xlu1 %v9192_v5, %s10075_s23  ;;  %9198 = vrot.lane.b32.xlu0 %v12556_v48, %s10076_s27  ;;  %v3193_v40 = vsel %vm3178_vm12, %v3128_v26, %v8925_v25  ;;  %v3194_v59 = vsel %vm3178_vm12, %v3129_v11, %v8926_v42  ;;  %v8695_v48 = vunpack.i.l.bf16 %v12083_v18  ;;  %v16026_v4 = vunpack.i.l.bf16 %v11962_v39  ;;  %v16027_v18 = vld [vmem:[#allocation35_spill] sm:$0xff] }
 0x190   :  { %8131 = vmatprep.mubr.msk.bf16.mxu0 %vm3297_vm13, %v3249_v19  ;;  %v12682_v57 = vpop.permute.xlu1 %8933  ;;  %v3250_v30 = vpack.c.bf16 %v3194_v59, %v3193_v40  ;;  %v1965_v27 = vsel %vm1928_vm5, %v16025_v32, %v16024_v15  ;;  %v8670_v16 = vunpack.i.l.bf16 %v11982_v2  ;;  %v1968_v46 = vsel %vm1928_vm5, %v16027_v18, %v8666_v0  ;;  %v16029_v0 = vld [vmem:[#allocation41_spill] sm:$0xff] }
 0x191   :  { %v12684_v22 = vpop.permute.xlu0 %8938  ;;  %v2029_v5 = vsel %vm1994_vm6, %v12622_v45, %v16026_v4  ;;  %v8681_v8 = vunpack.i.h.bf16 %v12023_v54  ;;  %v8680_v39 = vunpack.i.l.bf16 %v12023_v54  ;;  %v8685_v45 = vunpack.i.l.bf16 %v12043_v53 }
 0x192   :  { %v2095_v6 = vsel %vm2060_vm7, %v2029_v5, %v8675_v10  ;;  %8132 = vmatmul.mubr.msk.bf16.gmra.mrb[12].mxu0 %vm3297_vm13, %v3250_v30  ;;  %v8690_v2 = vunpack.i.l.bf16 %v12045_v17  ;;  %v9217_v52 = vpack.i.bf16 %v12692_v47, %v15926_v9  ;;  %v1967_v38 = vsel %vm1928_vm5, %v16028_v61, %v8665_v24  ;;  %v16031_v24 = vld [vmem:[#allocation20_spill] sm:$0xff] }
 0x193   :  { %9203 = vrot.lane.b32.xlu1 %v12579_v33, %s10076_s27  ;;  %9208 = vrot.lane.b32.xlu0 %v12579_v33, %s10077_s18  ;;  %v9212_v33 = vpack.i.bf16 %v12689_v56, %v15926_v9  ;;  %v8686_v54 = vunpack.i.h.bf16 %v12043_v53  ;;  %v12727_v19 = vsel %vm2126_vm8, %v2095_v6, %v8695_v48  ;;  %v8710_v17 = vunpack.i.l.bf16 %v12118_v60 }
 0x194   :  { %v12715_v1 = vpop.permute.xlu1 %8943  ;;  %v2031_v55 = vsel %vm1994_vm6, %v1965_v27, %v8670_v16  ;;  %v8700_v42 = vunpack.i.l.bf16 %v12085_v41  ;;  %v8705_v25 = vunpack.i.l.bf16 %v12116_v35  ;;  %v1970_v53 = vsel %vm1928_vm5, %v16029_v0, %v8681_v8  ;;  %v16034_v0 = vld [vmem:[#allocation40_spill] sm:$0xff] }
 0x195   :  { %v12717_v63 = vpop.permute.xlu0 %8948  ;;  %v1969_v26 = vsel %vm1928_vm5, %v16030_v51, %v8680_v39  ;;  %v8706_v60 = vunpack.i.h.bf16 %v12116_v35  ;;  %v8715_v11 = vunpack.i.l.bf16 %v12146_v43  ;;  %v2033_v10 = vsel %vm1994_vm6, %v1967_v38, %v8685_v45  ;;  %v16035_v51 = vld [vmem:[#allocation77_spill] sm:$0xff] }
 0x196   :  { %v2097_v41 = vsel %vm2060_vm7, %v2031_v55, %v8690_v2  ;;  %v9222_v59 = vpack.i.bf16 %v12689_v56, %v12727_v19  ;;  %v9227_v23 = vpack.i.bf16 %v12727_v19, %v12615_v62  ;;  %v2034_v30 = vsel %vm1994_vm6, %v1968_v46, %v8686_v54  ;;  %v16032_v55 = vld [vmem:[#allocation21_spill] sm:$0xff] }
 0x197   :  { %9213 = vrot.lane.b32.xlu1 %v9212_v33, %s10077_s18  ;;  %9218 = vrot.lane.b32.xlu0 %v9217_v52, %s10078_s19  ;;  %v12754_v35 = vsel %vm2126_vm8, %v2097_v41, %v8710_v17  ;;  %v8721_v48 = vunpack.i.h.bf16 %v16031_v24  ;;  %v8720_v15 = vunpack.i.l.bf16 %v16031_v24  ;;  %v2035_v32 = vsel %vm1994_vm6, %v1969_v26, %v8700_v42  ;;  %v16033_v42 = vld [vmem:[#allocation45_spill] sm:$0xff] }
 0x198   :  { %v12744_v49 = vpop.permute.xlu1 %8953  ;;  %v2036_v27 = vsel %vm1994_vm6, %v1970_v53, %v8701_v7  ;;  %v2099_v4 = vsel %vm2060_vm7, %v2033_v10, %v8705_v25  ;;  %v8716_v5 = vunpack.i.h.bf16 %v12146_v43  ;;  %v2100_v16 = vsel %vm2060_vm7, %v2034_v30, %v8706_v60  ;;  %v16037_v30 = vld [vmem:[#allocation44_spill] sm:$0xff] }
 0x199   :  { %v12746_v40 = vpop.permute.xlu0 %8958  ;;  %v2101_v18 = vsel %vm2060_vm7, %v2035_v32, %v8715_v11  ;;  %v8771_v46 = vunpack.i.h.bf16 %v12274_v36  ;;  %v8770_v6 = vunpack.i.l.bf16 %v12274_v36  ;;  %v8731_v8 = vunpack.i.h.bf16 %v12176_v29 }
 0x19a   :  { %v8730_v39 = vunpack.i.l.bf16 %v12176_v29  ;;  %v9237_v43 = vpack.i.bf16 %v12692_v47, %v12754_v35  ;;  %v9232_v33 = vpack.i.bf16 %v12754_v35, %v12689_v56  ;;  %v12779_v52 = vsel %vm2126_vm8, %v2100_v16, %v8721_v48 }
 0x19b   :  { %9223 = vrot.lane.b32.xlu1 %v9222_v59, %s10075_s23  ;;  %9228 = vrot.lane.b32.xlu0 %v9227_v23, %s10076_s27  ;;  %v12782_v61 = vsel %vm2126_vm8, %v2099_v4, %v8720_v15  ;;  %v8776_v36 = vunpack.i.h.bf16 %v12306_v50  ;;  %v8775_v29 = vunpack.i.l.bf16 %v12306_v50  ;;  %v2102_v38 = vsel %vm2060_vm7, %v2036_v27, %v8716_v5  ;;  %v16036_v59 = vld [vmem:[#allocation47_spill] sm:$0xff]  ;;  %v16038_v15 = vld [vmem:[#allocation62_spill] sm:$0xff] }
 0x19c   :  { %v12770_v45 = vpop.permute.xlu1 %8963  ;;  %v8781_v54 = vunpack.i.h.bf16 %v12308_v13  ;;  %v8780_v17 = vunpack.i.l.bf16 %v12308_v13  ;;  %v8785_v7 = vunpack.i.l.bf16 %v16032_v55  ;;  %v1972_v25 = vsel %vm1928_vm5, %v16033_v42, %v8771_v46 }
 0x19d   :  { %v12772_v2 = vpop.permute.xlu0 %8968  ;;  %v1971_v53 = vsel %vm1928_vm5, %v16034_v0, %v8770_v6  ;;  %v8786_v50 = vunpack.i.h.bf16 %v16032_v55  ;;  %v8790_v26 = vunpack.i.l.bf16 %v16035_v51  ;;  %v12799_v60 = vsel %vm2126_vm8, %v2101_v18, %v8730_v39 }
 0x19e   :  { %v12802_v13 = vsel %vm2126_vm8, %v2102_v38, %v8731_v8  ;;  %v9247_v41 = vpack.i.bf16 %v12779_v52, %v12782_v61  ;;  %v1974_v23 = vsel %vm1928_vm5, %v16036_v59, %v8776_v36  ;;  %v1973_v24 = vsel %vm1928_vm5, %v16037_v30, %v8775_v29 }
 0x19f   :  { %9238 = vrot.lane.b32.xlu0 %v9237_v43, %s10077_s18  ;;  %9233 = vrot.lane.b32.xlu1 %v9232_v33, %s10076_s27  ;;  %v8791_v48 = vunpack.i.h.bf16 %v16035_v51  ;;  %v8800_v32 = vunpack.i.l.bf16 %v16038_v15  ;;  %v2037_v27 = vsel %vm1994_vm6, %v1971_v53, %v8780_v17  ;;  %v2038_v4 = vsel %vm1994_vm6, %v1972_v25, %v8781_v54  ;;  %v16039_v17 = vld [vmem:[#allocation61_spill] sm:$0xff]  ;;  %v16040_v25 = vld [vmem:[#allocation22_spill] sm:$0xff] }
 0x1a0   :  { %v12804_v11 = vpop.permute.xlu1 %8973  ;;  %v2039_v5 = vsel %vm1994_vm6, %v1973_v24, %v8785_v7  ;;  %v8801_v16 = vunpack.i.h.bf16 %v16038_v15  ;;  %v2040_v18 = vsel %vm1994_vm6, %v1974_v23, %v8786_v50  ;;  %v2103_v46 = vsel %vm2060_vm7, %v2037_v27, %v8790_v26  ;;  %v16041_v51 = vld [vmem:[#allocation57_spill] sm:$0xff] }
 0x1a1   :  { %v8979_v10 = vpop.permute.xlu0 %8978  ;;  %v8896_v6 = vunpack.i.h.bf16 %v12612_v31  ;;  %v8965_v8 = vunpack.i.l.bf16 %v12770_v45  ;;  %v12826_v38 = vpack.i.bf16 %v12802_v13, %v12799_v60  ;;  %v2104_v54 = vsel %vm2060_vm7, %v2038_v4, %v8791_v48 }
 0x1a2   :  { %v8981_v39 = vunpack.i.h.bf16 %v8979_v10  ;;  %v8980_v33 = vunpack.i.l.bf16 %v8979_v10  ;;  %v8796_v55 = vunpack.i.h.bf16 %v16039_v17  ;;  %v8795_v7 = vunpack.i.l.bf16 %v16039_v17  ;;  %v16042_v10 = vld [vmem:[#allocation56_spill] sm:$0xff]  ;;  %v16043_v17 = vld [vmem:[#allocation58_spill] sm:$0xff] }
 0x1a3   :  { %9248 = vrot.lane.b32.xlu0 %v9247_v41, %s10078_s19  ;;  %9243 = vrot.lane.b32.xlu1 %v9247_v41, %s10077_s18  ;;  %v12832_v42 = vsel %vm2126_vm8, %v2103_v46, %v8800_v32  ;;  %v12835_v31 = vsel %vm2126_vm8, %v2104_v54, %v8801_v16  ;;  %v8811_v0 = vunpack.i.h.bf16 %v16040_v25  ;;  %v3002_v26 = vsel %vm2986_vm9, %v16041_v51, %v8896_v6  ;;  %v16044_v51 = vld [vmem:[#allocation59_spill] sm:$0xff] }
 0x1a4   :  { %v8984_v36 = vpop.permute.xlu1 %8983  ;;  %v3003_v59 = vsel %vm2986_vm9, %v16042_v10, %v8965_v8  ;;  %v9267_v23 = vpack.i.bf16 %v12782_v61, %v12692_v47  ;;  %v8966_v30 = vunpack.i.h.bf16 %v12770_v45  ;;  %v8975_v24 = vunpack.i.l.bf16 %v12804_v11 }
 0x1a5   :  { %v8989_v29 = vpop.permute.xlu0 %8988  ;;  %v3066_v48 = vsel %vm3048_vm10, %v3003_v59, %v8981_v39  ;;  %v8986_v27 = vunpack.i.h.bf16 %v8984_v36  ;;  %v8985_v4 = vunpack.i.l.bf16 %v8984_v36  ;;  %v8810_v45 = vunpack.i.l.bf16 %v16040_v25 }
 0x1a6   :  { %v8991_v53 = vunpack.i.h.bf16 %v8989_v29  ;;  %v8990_v50 = vunpack.i.l.bf16 %v8989_v29  ;;  %v3004_v36 = vsel %vm2986_vm9, %v16043_v17, %v8966_v30  ;;  %v9272_v10 = vpack.i.bf16 %v12799_v60, %v12779_v52 }
 0x1a7   :  { %9258 = vrot.lane.b32.xlu0 %v9237_v43, %s10075_s23  ;;  %9253 = vrot.lane.b32.xlu1 %v12826_v38, %s10078_s19  ;;  %v3065_v43 = vsel %vm3048_vm10, %v3002_v26, %v8980_v33  ;;  %v8856_v17 = vunpack.i.h.bf16 %v12517_v37 }
 0x1a8   :  { %v8994_v15 = vpop.permute.xlu1 %8993  ;;  %v3130_v6 = vsel %vm3113_vm11, %v3065_v43, %v8990_v50  ;;  %v3131_v8 = vsel %vm3113_vm11, %v3066_v48, %v8991_v53  ;;  %v3005_v50 = vsel %vm2986_vm9, %v16044_v51, %v8975_v24  ;;  %v2105_v43 = vsel %vm2060_vm7, %v2039_v5, %v8795_v7 }
 0x1a9   :  { %v8999_v32 = vpop.permute.xlu0 %8998  ;;  %v8996_v29 = vunpack.i.h.bf16 %v8994_v15  ;;  %v8995_v54 = vunpack.i.l.bf16 %v8994_v15  ;;  %v3068_v25 = vsel %vm3048_vm10, %v3005_v50, %v8986_v27  ;;  %v2106_v24 = vsel %vm2060_vm7, %v2040_v18, %v8796_v55 }
 0x1aa   :  { %v9001_v16 = vunpack.i.h.bf16 %v8999_v32  ;;  %v9000_v46 = vunpack.i.l.bf16 %v8999_v32  ;;  %v8851_v32 = vunpack.i.h.bf16 %v12489_v12  ;;  %v8850_v5 = vunpack.i.l.bf16 %v12489_v12  ;;  %v16045_v12 = vld [vmem:[#allocation53_spill] sm:$0xff] }
 0x1ab   :  { %9268 = vrot.lane.b32.xlu0 %v9267_v23, %s10076_s27  ;;  %9263 = vrot.lane.b32.xlu1 %v9247_v41, %s10075_s23  ;;  %v3067_v41 = vsel %vm3048_vm10, %v3004_v36, %v8985_v4  ;;  %v3133_v15 = vsel %vm3113_vm11, %v3068_v25, %v8996_v29  ;;  %v12887_v18 = vsel %vm2126_vm8, %v2106_v24, %v8811_v0  ;;  %v8861_v36 = vunpack.i.h.bf16 %v12519_v44 }
 0x1ac   :  { %v3195_v39 = vsel %vm3178_vm12, %v3130_v6, %v9000_v46  ;;  %v3196_v33 = vsel %vm3178_vm12, %v3131_v8, %v9001_v16  ;;  %v9004_v26 = vpop.permute.xlu1 %9003  ;;  %v3132_v30 = vsel %vm3113_vm11, %v3067_v41, %v8995_v54  ;;  %v9287_v46 = vpack.i.bf16 %v12835_v31, %v12832_v42  ;;  %v16046_v54 = vld [vmem:[#allocation46_spill] sm:$0xff] }
 0x1ad   :  { %v12862_v53 = vpop.permute.xlu0 %9008  ;;  %v3251_v59 = vpack.c.bf16 %v3196_v33, %v3195_v39  ;;  %v9006_v23 = vunpack.i.h.bf16 %v9004_v26  ;;  %v9005_v48 = vunpack.i.l.bf16 %v9004_v26  ;;  %v12890_v55 = vsel %vm2126_vm8, %v2105_v43, %v8810_v45  ;;  %v16047_v26 = vld [vmem:[#allocation52_spill] sm:$0xff] }
 0x1ae   :  { %v8855_v8 = vunpack.i.l.bf16 %v12517_v37  ;;  %v1976_v29 = vsel %vm1928_vm5, %v16045_v12, %v8851_v32  ;;  %v1975_v39 = vsel %vm1928_vm5, %v16046_v54, %v8850_v5  ;;  %v12906_v45 = vpack.i.bf16 %v12887_v18, %v12890_v55 }
 0x1af   :  { %9278 = vrot.lane.b32.xlu0 %v12826_v38, %s10077_s18  ;;  %9273 = vrot.lane.b32.xlu1 %v9272_v10, %s10076_s27  ;;  %v3197_v4 = vsel %vm3178_vm12, %v3132_v30, %v9005_v48  ;;  %v3198_v27 = vsel %vm3178_vm12, %v3133_v15, %v9006_v23  ;;  %v8860_v51 = vunpack.i.l.bf16 %v12519_v44  ;;  %v8865_v50 = vunpack.i.l.bf16 %v12550_v34  ;;  %v16048_v15 = vld [vmem:[#allocation55_spill] sm:$0xff] }
 0x1b0   :  { %8135 = vmatprep.mubr.msk.bf16.mxu0 %vm3297_vm13, %v3251_v59  ;;  %v12880_v7 = vpop.permute.xlu1 %9013  ;;  %v3252_v6 = vpack.c.bf16 %v3198_v27, %v3197_v4  ;;  %v1977_v10 = vsel %vm1928_vm5, %v16047_v26, %v8855_v8  ;;  %v8866_v59 = vunpack.i.h.bf16 %v12550_v34  ;;  %v8871_v41 = vunpack.i.h.bf16 %v12552_v21 }
 0x1b1   :  { %v12882_v16 = vpop.permute.xlu0 %9018  ;;  %v8870_v25 = vunpack.i.l.bf16 %v12552_v21  ;;  %v8876_v37 = vunpack.i.h.bf16 %v12575_v28  ;;  %v8875_v44 = vunpack.i.l.bf16 %v12575_v28  ;;  %v8881_v23 = vunpack.i.h.bf16 %v12577_v3 }
 0x1b2   :  { %8136 = vmatmul.mubr.msk.bf16.gmra.mrb[16].mxu0 %vm3297_vm13, %v3252_v6  ;;  %v8880_v48 = vunpack.i.l.bf16 %v12577_v3  ;;  %v8891_v34 = vunpack.i.h.bf16 %v12597_v14  ;;  %v8890_v43 = vunpack.i.l.bf16 %v12597_v14  ;;  %v1978_v24 = vsel %vm1928_vm5, %v16048_v15, %v8856_v17  ;;  %v16052_v15 = vld [vmem:[#allocation71_spill] sm:$0xff] }
 0x1b3   :  { %9288 = vrot.lane.b32.xlu0 %v9287_v46, %s10078_s19  ;;  %9283 = vrot.lane.b32.xlu1 %v9287_v46, %s10077_s18  ;;  %v2041_v28 = vsel %vm1994_vm6, %v1975_v39, %v8860_v51  ;;  %v2042_v32 = vsel %vm1994_vm6, %v1976_v29, %v8861_v36  ;;  %v2043_v3 = vsel %vm1994_vm6, %v1977_v10, %v8865_v50  ;;  %v8931_v36 = vunpack.i.h.bf16 %v12665_v20 }
 0x1b4   :  { %v12900_v33 = vpop.permute.xlu1 %9023  ;;  %v2044_v4 = vsel %vm1994_vm6, %v1978_v24, %v8866_v59  ;;  %v2107_v14 = vsel %vm2060_vm7, %v2041_v28, %v8870_v25  ;;  %v2108_v27 = vsel %vm2060_vm7, %v2042_v32, %v8871_v41  ;;  %v2109_v5 = vsel %vm2060_vm7, %v2043_v3, %v8875_v44  ;;  %v16053_v28 = vld [vmem:[#allocation68_spill] sm:$0xff] }
 0x1b5   :  { %v12902_v0 = vpop.permute.xlu0 %9028  ;;  %v2110_v6 = vsel %vm2060_vm7, %v2044_v4, %v8876_v37  ;;  %v12946_v8 = vsel %vm2126_vm8, %v2107_v14, %v8880_v48  ;;  %v12949_v12 = vsel %vm2126_vm8, %v2108_v27, %v8881_v23  ;;  %v12955_v54 = vsel %vm2126_vm8, %v2109_v5, %v8890_v43  ;;  %v16050_v23 = vld [vmem:[#allocation66_spill] sm:$0xff] }
 0x1b6   :  { %v12952_v29 = vsel %vm2126_vm8, %v2110_v6, %v8891_v34  ;;  %16049 = vst [vmem:[#allocation9_spill] sm:$0xff] %v12955_v54  ;;  %v8930_v51 = vunpack.i.l.bf16 %v12665_v20  ;;  %v8936_v50 = vunpack.i.h.bf16 %v12682_v57  ;;  %v9327_v26 = vpack.i.bf16 %v12949_v12, %v12946_v8  ;;  %v16051_v34 = vld [vmem:[#allocation54_spill] sm:$0xff] }
 0x1b7   :  { %9298 = vrot.lane.b32.xlu0 %v12826_v38, %s10075_s23  ;;  %9293 = vrot.lane.b32.xlu1 %v12906_v45, %s10078_s19  ;;  %v9307_v38 = vpack.i.bf16 %v12832_v42, %v12802_v13  ;;  %v8935_v10 = vunpack.i.l.bf16 %v12682_v57  ;;  %v12974_v59 = vpack.i.bf16 %v12952_v29, %v12955_v54  ;;  %v8941_v41 = vunpack.i.h.bf16 %v12684_v22 }
 0x1b8   :  { %v12927_v30 = vpop.permute.xlu1 %9033  ;;  %v8940_v20 = vunpack.i.l.bf16 %v12684_v22  ;;  %v9347_v44 = vpack.i.bf16 %v12946_v8, %v12887_v18  ;;  %v1980_v48 = vsel %vm1928_vm5, %v16050_v23, %v8931_v36  ;;  %v1979_v57 = vsel %vm1928_vm5, %v16051_v34, %v8930_v51 }
 0x1b9   :  { %v12929_v21 = vpop.permute.xlu0 %9038  ;;  %v8951_v43 = vunpack.i.h.bf16 %v12717_v63  ;;  %v12990_v24 = vsel %vm1928_vm5, %v16052_v15, %v8936_v50  ;;  %v9352_v22 = vpack.i.bf16 %v12955_v54, %v12949_v12  ;;  %v1981_v32 = vsel %vm1928_vm5, %v16053_v28, %v8935_v10 }
 0x1ba   :  { %v8960_v3 = vunpack.i.l.bf16 %v12746_v40  ;;  %v8976_v4 = vunpack.i.h.bf16 %v12804_v11  ;;  %v2045_v14 = vsel %vm1994_vm6, %v1979_v57, %v8940_v20  ;;  %v2046_v27 = vsel %vm1994_vm6, %v1980_v48, %v8941_v41  ;;  %v16055_v57 = vld [vmem:[#allocation64_spill] sm:$0xff] }
 0x1bb   :  { %9308 = vrot.lane.b32.xlu0 %v9307_v38, %s10076_s27  ;;  %9303 = vrot.lane.b32.xlu1 %v9287_v46, %s10075_s23  ;;  %v9312_v46 = vpack.i.bf16 %v12890_v55, %v12835_v31  ;;  %v8950_v38 = vunpack.i.l.bf16 %v12717_v63  ;;  %v8946_v51 = vunpack.i.h.bf16 %v12715_v1  ;;  %v8945_v50 = vunpack.i.l.bf16 %v12715_v1 }
 0x1bc   :  { %v12957_v39 = vpop.permute.xlu1 %9043  ;;  %v2112_v23 = vsel %vm2060_vm7, %v2046_v27, %v8951_v43  ;;  %v8956_v11 = vunpack.i.h.bf16 %v12744_v49  ;;  %v8955_v34 = vunpack.i.l.bf16 %v12744_v49  ;;  %v8961_v41 = vunpack.i.h.bf16 %v12746_v40 }
 0x1bd   :  { %v12959_v17 = vpop.permute.xlu0 %9048  ;;  %v9045_v63 = vunpack.i.l.bf16 %v12957_v39  ;;  %v2111_v10 = vsel %vm2060_vm7, %v2045_v14, %v8950_v38  ;;  %v9046_v49 = vunpack.i.h.bf16 %v12957_v39 }
 0x1be   :  { %v13015_v1 = vsel %vm2126_vm8, %v2111_v10, %v8960_v3  ;;  %v13030_v39 = vsel %vm2126_vm8, %v2112_v23, %v8961_v41 }
 0x1bf   :  { %9318 = vrot.lane.b32.xlu0 %v12906_v45, %s10077_s18  ;;  %9313 = vrot.lane.b32.xlu1 %v9312_v46, %s10076_s27  ;;  %v3007_v43 = vsel %vm2986_vm9, %v16055_v57, %v9045_v63  ;;  %v16057_v57 = vld [vmem:[#allocation65_spill] sm:$0xff] }
 0x1c0   :  { %v12978_v25 = vpop.permute.xlu1 %9053 }
 0x1c1   :  { %v9059_v37 = vpop.permute.xlu0 %9058  ;;  %v9055_v38 = vunpack.i.l.bf16 %v12978_v25 }
 0x1c2   :  { %v9061_v5 = vunpack.i.h.bf16 %v9059_v37  ;;  %v9060_v6 = vunpack.i.l.bf16 %v9059_v37  ;;  %v16054_v37 = vld [vmem:[#allocation14_spill] sm:$0xff] }
 0x1c3   :  { %9328 = vrot.lane.b32.xlu0 %v9327_v26, %s10078_s19  ;;  %9323 = vrot.lane.b32.xlu1 %v9327_v26, %s10077_s18  ;;  %v3006_v48 = vsel %vm2986_vm9, %v16054_v37, %v8976_v4 }
 0x1c4   :  { %v9064_v46 = vpop.permute.xlu1 %9063  ;;  %v3069_v28 = vsel %vm3048_vm10, %v3006_v48, %v9060_v6  ;;  %v8970_v48 = vunpack.i.l.bf16 %v12772_v2 }
 0x1c5   :  { %v9069_v36 = vpop.permute.xlu0 %9068  ;;  %v9066_v40 = vunpack.i.h.bf16 %v9064_v46 }
 0x1c6   :  { %v9071_v15 = vunpack.i.h.bf16 %v9069_v36  ;;  %v9070_v20 = vunpack.i.l.bf16 %v9069_v36  ;;  %v9065_v36 = vunpack.i.l.bf16 %v9064_v46 }
 0x1c7   :  { %9338 = vrot.lane.b32.xlu0 %v12906_v45, %s10075_s23  ;;  %9333 = vrot.lane.b32.xlu1 %v12974_v59, %s10078_s19  ;;  %v3070_v45 = vsel %vm3048_vm10, %v3007_v43, %v9061_v5  ;;  %v8971_v5 = vunpack.i.h.bf16 %v12772_v2  ;;  %v3009_v43 = vsel %vm2986_vm9, %v16057_v57, %v9055_v38  ;;  %v9031_v57 = vunpack.i.h.bf16 %v12902_v0 }
 0x1c8   :  { %v3134_v54 = vsel %vm3113_vm11, %v3069_v28, %v9070_v20  ;;  %v3135_v4 = vsel %vm3113_vm11, %v3070_v45, %v9071_v15  ;;  %v16056_v20 = vld [vmem:[#allocation67_spill] sm:$0xff]  ;;  %v3072_v41 = vsel %vm3048_vm10, %v3009_v43, %v9066_v40 }
 0x1c9   :  { %v9074_v14 = vpop.permute.xlu1 %9073  ;;  %v9079_v27 = vpop.permute.xlu0 %9078  ;;  %v3008_v15 = vsel %vm2986_vm9, %v16056_v20, %v9046_v49  ;;  %v2048_v49 = vsel %vm1994_vm6, %v12990_v24, %v8946_v51  ;;  %v16059_v20 = vld [vmem:[#allocation70_spill] sm:$0xff] }
 0x1ca   :  { %v9081_v3 = vunpack.i.h.bf16 %v9079_v27  ;;  %v9080_v10 = vunpack.i.l.bf16 %v9079_v27  ;;  %v9076_v37 = vunpack.i.h.bf16 %v9074_v14  ;;  %v9075_v63 = vunpack.i.l.bf16 %v9074_v14 }
 0x1cb   :  { %9348 = vrot.lane.b32.xlu0 %v9347_v44, %s10076_s27  ;;  %9343 = vrot.lane.b32.xlu1 %v9327_v26, %s10075_s23  ;;  %v3071_v23 = vsel %vm3048_vm10, %v3008_v15, %v9065_v36  ;;  %v2047_v14 = vsel %vm1994_vm6, %v1981_v32, %v8945_v50  ;;  %v2114_v32 = vsel %vm2060_vm7, %v2048_v49, %v8956_v11  ;;  %v9011_v11 = vunpack.i.h.bf16 %v12862_v53 }
 0x1cc   :  { %v3199_v6 = vsel %vm3178_vm12, %v3134_v54, %v9080_v10  ;;  %v3200_v46 = vsel %vm3178_vm12, %v3135_v4, %v9081_v3  ;;  %v3136_v2 = vsel %vm3113_vm11, %v3071_v23, %v9075_v63  ;;  %v3137_v27 = vsel %vm3113_vm11, %v3072_v41, %v9076_v37 }
 0x1cd   :  { %v9084_v44 = vpop.permute.xlu1 %9083  ;;  %v13040_v45 = vpop.permute.xlu0 %9088  ;;  %v3253_v26 = vpack.c.bf16 %v3200_v46, %v3199_v6  ;;  %v2113_v38 = vsel %vm2060_vm7, %v2047_v14, %v8955_v34  ;;  %v13064_v24 = vsel %vm2126_vm8, %v2114_v32, %v8971_v5  ;;  %v9010_v34 = vunpack.i.l.bf16 %v12862_v53  ;;  %v16058_v46 = vld [vmem:[#allocation16_spill] sm:$0xff] }
 0x1ce   :  { %v9086_v28 = vunpack.i.h.bf16 %v9084_v44  ;;  %v9085_v54 = vunpack.i.l.bf16 %v9084_v44  ;;  %v13067_v51 = vsel %vm2126_vm8, %v2113_v38, %v8970_v48  ;;  %v9021_v5 = vunpack.i.h.bf16 %v12882_v16 }
 0x1cf   :  { %9358 = vrot.lane.b32.xlu0 %v12974_v59, %s10077_s18  ;;  %9353 = vrot.lane.b32.xlu1 %v9352_v22, %s10076_s27  ;;  %v9367_v22 = vpack.i.bf16 %v13030_v39, %v13015_v1  ;;  %v13080_v63 = vpack.i.bf16 %v13064_v24, %v13067_v51  ;;  %v9020_v6 = vunpack.i.l.bf16 %v12882_v16  ;;  %v9387_v53 = vpack.i.bf16 %v13015_v1, %v12952_v29 }
 0x1d0   :  { %v3201_v40 = vsel %vm3178_vm12, %v3136_v2, %v9085_v54  ;;  %v3202_v36 = vsel %vm3178_vm12, %v3137_v27, %v9086_v28  ;;  %8139 = vmatprep.mubr.msk.bf16.mxu0 %vm3297_vm13, %v3253_v26  ;;  %v1984_v48 = vsel %vm1928_vm5, %v16058_v46, %v9011_v11  ;;  %v1983_v15 = vsel %vm1928_vm5, %v16059_v20, %v9010_v34  ;;  %v16061_v34 = vld [vmem:[#allocation15_spill] sm:$0xff] }
 0x1d1   :  { %v13057_v50 = vpop.permute.xlu1 %9093  ;;  %v13059_v3 = vpop.permute.xlu0 %9098  ;;  %v3254_v10 = vpack.c.bf16 %v3202_v36, %v3201_v40  ;;  %v9041_v26 = vunpack.i.h.bf16 %v12929_v21  ;;  %v9040_v16 = vunpack.i.l.bf16 %v12929_v21  ;;  %v9016_v23 = vunpack.i.h.bf16 %v12880_v7 }
 0x1d2   :  { %v9015_v41 = vunpack.i.l.bf16 %v12880_v7  ;;  %v9392_v28 = vpack.i.bf16 %v13067_v51, %v13030_v39  ;;  %v2050_v54 = vsel %vm1994_vm6, %v1984_v48, %v9021_v5  ;;  %v9026_v14 = vunpack.i.h.bf16 %v12900_v33 }
 0x1d3   :  { %9368 = vrot.lane.b32.xlu0 %v9367_v22, %s10078_s19  ;;  %9363 = vrot.lane.b32.xlu1 %v9367_v22, %s10077_s18  ;;  %v9025_v2 = vunpack.i.l.bf16 %v12900_v33  ;;  %v2116_v27 = vsel %vm2060_vm7, %v2050_v54, %v9031_v57  ;;  %v9036_v7 = vunpack.i.h.bf16 %v12927_v30  ;;  %v9035_v49 = vunpack.i.l.bf16 %v12927_v30 }
 0x1d4   :  { %8140 = vmatmul.mubr.msk.bf16.gmra.mrb[20].mxu0 %vm3297_vm13, %v3254_v10  ;;  %v13124_v32 = vsel %vm2126_vm8, %v2116_v27, %v9041_v26  ;;  %v9051_v33 = vunpack.i.h.bf16 %v12959_v17  ;;  %v16060_v10 = vld [vmem:[#allocation17_spill] sm:$0xff]  ;;  %v1985_v30 = vsel %vm1928_vm5, %v16061_v34, %v9015_v41  ;;  %v9090_v5 = vunpack.i.l.bf16 %v13040_v45 }
 0x1d5   :  { %v13074_v4 = vpop.permute.xlu1 %9103  ;;  %v13076_v37 = vpop.permute.xlu0 %9108  ;;  %v1986_v11 = vsel %vm1928_vm5, %v16060_v10, %v9016_v23  ;;  %v9091_v46 = vunpack.i.h.bf16 %v13040_v45  ;;  %v9100_v45 = vunpack.i.l.bf16 %v13059_v3  ;;  %v16062_v23 = vld [vmem:[#allocation73_spill] sm:$0xff] }
 0x1d6   :  { %v1987_v41 = vsel %vm1928_vm5, %v16062_v23, %v9090_v5 }
 0x1d7   :  { %9378 = vrot.lane.b32.xlu0 %v12974_v59, %s10075_s23  ;;  %9373 = vrot.lane.b32.xlu1 %v13080_v63, %s10078_s19  ;;  %v9030_v59 = vunpack.i.l.bf16 %v12902_v0  ;;  %v2049_v0 = vsel %vm1994_vm6, %v1983_v15, %v9020_v6  ;;  %v2051_v6 = vsel %vm1994_vm6, %v1985_v30, %v9025_v2  ;;  %v2053_v10 = vsel %vm1994_vm6, %v1987_v41, %v9100_v45 }
 0x1d8   :  { %v9111_v30 = vunpack.i.h.bf16 %v13076_v37 }
 0x1d9   :  { %v13096_v43 = vpop.permute.xlu1 %9113  ;;  %v13098_v44 = vpop.permute.xlu0 %9118  ;;  %v2115_v21 = vsel %vm2060_vm7, %v2049_v0, %v9030_v59  ;;  %v16063_v0 = vld [vmem:[#allocation18_spill] sm:$0xff] }
 0x1da   :  { %v13121_v36 = vsel %vm2126_vm8, %v2115_v21, %v9040_v16  ;;  %v9056_v16 = vunpack.i.h.bf16 %v12978_v25  ;;  %v1988_v54 = vsel %vm1928_vm5, %v16063_v0, %v9091_v46  ;;  %v9121_v46 = vunpack.i.h.bf16 %v13098_v44 }
 0x1db   :  { %9388 = vrot.lane.b32.xlu0 %v9387_v53, %s10076_s27  ;;  %9383 = vrot.lane.b32.xlu1 %v9367_v22, %s10075_s23  ;;  %v9050_v22 = vunpack.i.l.bf16 %v12959_v17  ;;  %v2052_v53 = vsel %vm1994_vm6, %v1986_v11, %v9026_v14  ;;  %v2117_v17 = vsel %vm2060_vm7, %v2051_v6, %v9035_v49  ;;  %v9407_v57 = vpack.i.bf16 %v13124_v32, %v13121_v36 }
 0x1dc   :  { %v2118_v48 = vsel %vm2060_vm7, %v2052_v53, %v9036_v7  ;;  %v9110_v14 = vunpack.i.l.bf16 %v13076_v37  ;;  %v9427_v25 = vpack.i.bf16 %v13121_v36, %v13064_v24 }
 0x1dd   :  { %v13116_v38 = vpop.permute.xlu1 %9123  ;;  %v13118_v40 = vpop.permute.xlu0 %9128  ;;  %v13146_v59 = vsel %vm2126_vm8, %v2118_v48, %v9051_v33  ;;  %v13149_v26 = vsel %vm2126_vm8, %v2117_v17, %v9050_v22  ;;  %v16064_v33 = vld [vmem:[#allocation13_spill] sm:$0xff]  ;;  %v9120_v17 = vunpack.i.l.bf16 %v13098_v44  ;;  %v16065_v48 = vld [vmem:[#allocation74_spill] sm:$0xff] }
 0x1de   :  { %v9125_v2 = vunpack.i.l.bf16 %v13116_v38  ;;  %v3010_v22 = vsel %vm2986_vm9, %v16064_v33, %v9056_v16  ;;  %v9432_v11 = vpack.i.bf16 %v13149_v26, %v13124_v32  ;;  %v2119_v53 = vsel %vm2060_vm7, %v2053_v10, %v9110_v14  ;;  %v16066_v10 = vld [vmem:[#allocation75_spill] sm:$0xff] }
 0x1df   :  { %9398 = vrot.lane.b32.xlu0 %v13080_v63, %s10077_s18  ;;  %9393 = vrot.lane.b32.xlu1 %v9392_v28, %s10076_s27  ;;  %v9101_v28 = vunpack.i.h.bf16 %v13059_v3  ;;  %v13166_v3 = vpack.i.bf16 %v13146_v59, %v13149_v26  ;;  %v9126_v16 = vunpack.i.h.bf16 %v13116_v38 }
 0x1e1   :  { %v13141_v20 = vpop.permute.xlu1 %9133  ;;  %v9139_v15 = vpop.permute.xlu0 %9138  ;;  %v2054_v34 = vsel %vm1994_vm6, %v1988_v54, %v9101_v28 }
 0x1e2   :  { %v9141_v21 = vunpack.i.h.bf16 %v9139_v15  ;;  %v9140_v27 = vunpack.i.l.bf16 %v9139_v15  ;;  %v3011_v15 = vsel %vm2986_vm9, %v16065_v48, %v9125_v2  ;;  %v9135_v37 = vunpack.i.l.bf16 %v13141_v20 }
 0x1e3   :  { %9408 = vrot.lane.b32.xlu0 %v9407_v57, %s10078_s19  ;;  %9403 = vrot.lane.b32.xlu1 %v9407_v57, %s10077_s18  ;;  %v2120_v38 = vsel %vm2060_vm7, %v2054_v34, %v9111_v30 }
 0x1e4   :  { %v3074_v45 = vsel %vm3048_vm10, %v3011_v15, %v9141_v21  ;;  %v13194_v21 = vsel %vm2126_vm8, %v2119_v53, %v9120_v17 }
 0x1e5   :  { %v9144_v7 = vpop.permute.xlu1 %9143  ;;  %v9149_v49 = vpop.permute.xlu0 %9148 }
 0x1e6   :  { %v9151_v5 = vunpack.i.h.bf16 %v9149_v49  ;;  %v9150_v6 = vunpack.i.l.bf16 %v9149_v49  ;;  %v9146_v28 = vunpack.i.h.bf16 %v9144_v7  ;;  %v9145_v0 = vunpack.i.l.bf16 %v9144_v7 }
 0x1e7   :  { %9418 = vrot.lane.b32.xlu0 %v13080_v63, %s10075_s23  ;;  %9413 = vrot.lane.b32.xlu1 %v13166_v3, %s10078_s19  ;;  %v3073_v63 = vsel %vm3048_vm10, %v3010_v22, %v9140_v27  ;;  %v13199_v22 = vsel %vm2126_vm8, %v2120_v38, %v9121_v46 }
 0x1e8   :  { %v3138_v49 = vsel %vm3113_vm11, %v3073_v63, %v9150_v6  ;;  %v3139_v44 = vsel %vm3113_vm11, %v3074_v45, %v9151_v5  ;;  %v3012_v5 = vsel %vm2986_vm9, %v16066_v10, %v9126_v16  ;;  %v16067_v6 = vld [vmem:[#allocation76_spill] sm:$0xff]  ;;  %v9095_v45 = vunpack.i.l.bf16 %v13057_v50 }
 0x1e9   :  { %v9154_v23 = vpop.permute.xlu1 %9153  ;;  %v9159_v41 = vpop.permute.xlu0 %9158  ;;  %v3075_v34 = vsel %vm3048_vm10, %v3012_v5, %v9145_v0  ;;  %v9096_v16 = vunpack.i.h.bf16 %v13057_v50  ;;  %v9130_v50 = vunpack.i.l.bf16 %v13118_v40 }
 0x1ea   :  { %v9161_v54 = vunpack.i.h.bf16 %v9159_v41  ;;  %v9160_v14 = vunpack.i.l.bf16 %v9159_v41  ;;  %v9156_v33 = vunpack.i.h.bf16 %v9154_v23  ;;  %v9155_v2 = vunpack.i.l.bf16 %v9154_v23 }
 0x1eb   :  { %9428 = vrot.lane.b32.xlu0 %v9427_v25, %s10076_s27  ;;  %9423 = vrot.lane.b32.xlu1 %v9407_v57, %s10075_s23  ;;  %v3013_v25 = vsel %vm2986_vm9, %v16067_v6, %v9135_v37  ;;  %v9105_v37 = vunpack.i.l.bf16 %v13074_v4 }
 0x1ec   :  { %v3203_v27 = vsel %vm3178_vm12, %v3138_v49, %v9160_v14  ;;  %v3204_v7 = vsel %vm3178_vm12, %v3139_v44, %v9161_v54  ;;  %v3076_v30 = vsel %vm3048_vm10, %v3013_v25, %v9146_v28  ;;  %v3140_v46 = vsel %vm3113_vm11, %v3075_v34, %v9155_v2  ;;  %v16068_v44 = vld [vmem:[#allocation19_spill] sm:$0xff] }
 0x1ed   :  { %v9164_v48 = vpop.permute.xlu1 %9163  ;;  %v9169_v57 = vpop.permute.xlu0 %9168  ;;  %v3255_v15 = vpack.c.bf16 %v3204_v7, %v3203_v27  ;;  %v3141_v63 = vsel %vm3113_vm11, %v3076_v30, %v9156_v33  ;;  %v9115_v28 = vunpack.i.l.bf16 %v13096_v43  ;;  %v9447_v14 = vpack.i.bf16 %v13199_v22, %v13194_v21  ;;  %v16069_v7 = vld [vmem:[#allocation30_spill] sm:$0xff] }
 0x1ee   :  { %v9166_v53 = vunpack.i.h.bf16 %v9164_v48  ;;  %v9165_v17 = vunpack.i.l.bf16 %v9164_v48  ;;  %v1989_v33 = vsel %vm1928_vm5, %v16068_v44, %v9095_v45  ;;  %v9116_v2 = vunpack.i.h.bf16 %v13096_v43 }
 0x1ef   :  { %9438 = vrot.lane.b32.xlu0 %v13166_v3, %s10077_s18  ;;  %9433 = vrot.lane.b32.xlu1 %v9432_v11, %s10076_s27  ;;  %v9106_v11 = vunpack.i.h.bf16 %v13074_v4  ;;  %v2055_v38 = vsel %vm1994_vm6, %v1989_v33, %v9105_v37  ;;  %v9131_v27 = vunpack.i.h.bf16 %v13118_v40  ;;  %v1990_v4 = vsel %vm1928_vm5, %v16069_v7, %v9096_v16  ;;  %v13252_v16 = vld [vmem:[%s15641_s2] ss:$0 sm:$0xff]  ;;  %v16072_v33 = vld [vmem:[#allocation23_spill] sm:$0xff] }
 0x1f0   :  { %v3205_v23 = vsel %vm3178_vm12, %v3140_v46, %v9165_v17  ;;  %v3206_v41 = vsel %vm3178_vm12, %v3141_v63, %v9166_v53  ;;  %8143 = vmatprep.mubr.msk.bf16.mxu0 %vm3297_vm13, %v3255_v15  ;;  %v9170_v10 = vunpack.i.l.bf16 %v9169_v57  ;;  %v2121_v25 = vsel %vm2060_vm7, %v2055_v38, %v9115_v28  ;;  %v16070_v53 = vld [vmem:[#allocation34_spill] sm:$0xff] }
 0x1f1   :  { %v788_v0 = vpop.permute.xlu1 %787  ;;  %v13219_v54 = vpop.permute.xlu0 %9173  ;;  %v3256_v49 = vpack.c.bf16 %v3206_v41, %v3205_v23  ;;  %v2056_v43 = vsel %vm1994_vm6, %v1990_v4, %v9106_v11  ;;  %v13238_v48 = vsel %vm2126_vm8, %v2121_v25, %v9130_v50  ;;  %v9171_v30 = vunpack.i.h.bf16 %v9169_v57  ;;  %v16071_v50 = vld [vmem:[#allocation63_spill] sm:$0xff] }
 0x1f2   :  { %v2122_v15 = vsel %vm2060_vm7, %v2056_v43, %v9116_v2  ;;  %v9175_v34 = vunpack.i.l.bf16 %v13219_v54  ;;  %v1991_v17 = vsel %vm1928_vm5, %v16070_v53, %v9170_v10  ;;  %v9136_v41 = vunpack.i.h.bf16 %v13141_v20 }
 0x1f3   :  { %9448 = vrot.lane.b32.xlu0 %v9447_v14, %s10078_s19  ;;  %9443 = vrot.lane.b32.xlu1 %v9447_v14, %s10077_s18  ;;  %v2188_v40 = vsel %vm2126_vm8, %v2122_v15, %v9131_v27  ;;  %v9462_v11 = vpack.i.bf16 %v13238_v48, %v13199_v22  ;;  %v1992_v44 = vsel %vm1928_vm5, %v16071_v50, %v9171_v30  ;;  %v9176_v4 = vunpack.i.h.bf16 %v13219_v54 }
 0x1f4   :  { %8144 = vmatmul.mubr.msk.bf16.gmra.mrb[24].mxu0 %vm3297_vm13, %v3256_v49  ;;  %v9467_v57 = vpack.i.bf16 %v2188_v40, %v13238_v48  ;;  %v2057_v28 = vsel %vm1994_vm6, %v1991_v17, %v9175_v34  ;;  %v1993_v2 = vsel %vm1928_vm5, %v16072_v33, %v788_v0  ;;  %vm4756_vm5 = vcmask 261120  }
 0x1f5   :  { %v1146_v5 = vpop.permute.xlu1 %1145  ;;  %v9179_v6 = vpop.permute.xlu0 %9178 }
 0x1f6   :  { %v9180_v45 = vunpack.i.l.bf16 %v9179_v6  ;;  %v2059_v30 = vsel %vm1994_vm6, %v1993_v2, %v1146_v5  ;;  %v9181_v53 = vunpack.i.h.bf16 %v9179_v6  ;;  %v2058_v5 = vsel %vm1994_vm6, %v1992_v44, %v9176_v4 }
 0x1f7   :  { %9453 = vrot.lane.b32.xlu0 %v13166_v3, %s10075_s23  ;;  %2919 = vrot.lane.b32.xlu1 %v13238_v48, %s10078_s19  ;;  %v9457_v3 = vpack.i.bf16 %v13194_v21, %v13146_v59  ;;  %vm4774_vm6 = vcmask 523264  }
 0x1f8   :  { %v2123_v38 = vsel %vm2060_vm7, %v2057_v28, %v9180_v45 }
 0x1f9   :  { %v1504_v46 = vpop.permute.xlu1 %1503  ;;  %v9184_v63 = vpop.permute.xlu0 %9183 }
 0x1fa   :  { %v9185_v37 = vunpack.i.l.bf16 %v9184_v63  ;;  %v8121_v23 = vpop.f32.mrb[0].mxu0  ;;  %v2125_v54 = vsel %vm2060_vm7, %v2059_v30, %v1504_v46  ;;  %v9186_v45 = vunpack.i.h.bf16 %v9184_v63  ;;  %v2124_v46 = vsel %vm2060_vm7, %v2058_v5, %v9181_v53 }
 0x1fb   :  { %9458 = vrot.lane.b32.xlu0 %v9457_v3, %s10076_s27  ;;  %2365 = vrot.lane.b32.xlu1 %v13194_v21, %s10075_s23  ;;  %v3442_v14 = vadd.f32 %v8121_v23, %v13252_v16  ;;  %v3433_v49 = vpop.f32.mrb[1].mxu0  ;;  %vm4792_vm7 = vcmask 785408  }
 0x1fc   :  { %v3434_v27 = vadd.f32 %v13252_v16, %v3433_v49  ;;  %v8122_v7 = vpop.f32.mrb[2].mxu0  ;;  %v2189_v10 = vsel %vm2126_vm8, %v2123_v38, %v9185_v37  ;;  %v2190_v44 = vsel %vm2126_vm8, %v2124_v46, %v9186_v45 }
 0x1fd   :  { %v9189_v20 = vpop.permute.xlu1 %9188  ;;  %v3690_v25 = vmax.f32 %v3442_v14, 0.0  ;;  %v3445_v43 = vadd.f32 %v8122_v7, %v13252_v16  ;;  %v1862_v15 = vpop.permute.xlu0 %1861  ;;  %v9472_v50 = vpack.i.bf16 %v2189_v10, %v2188_v40 }
 0x1fe   :  { %v3436_v34 = vpop.f32.mrb[3].mxu0  ;;  %v3688_v0 = vmax.f32 %v3434_v27, 0.0  ;;  %v9191_v37 = vunpack.i.h.bf16 %v9189_v20  ;;  %v9190_v28 = vunpack.i.l.bf16 %v9189_v20  ;;  %v2191_v6 = vsel %vm2126_vm8, %v2125_v54, %v1862_v15  ;;  %v16074_v27 = vld [vmem:[#allocation60_spill] sm:$0xff]  ;;  %v16075_v20 = vld [vmem:[#allocation33_spill] sm:$0xff] }
 0x1ff   :  { %v3437_v17 = vadd.f32 %v13252_v16, %v3436_v34  ;;  %9468 = vrot.lane.b32.xlu0 %v9467_v57, %s10077_s18  ;;  %9463 = vrot.lane.b32.xlu1 %v9462_v11, %s10076_s27  ;;  %v3691_v3 = vmax.f32 %v3445_v43, 0.0  ;;  %v16073_v57 = vld [vmem:[#allocation37_spill] sm:$0xff]  ;;  %vm10084_vm8 = vmmov 0  }
 0x200   :  { %v3752_v23 = vmax.f32 %v3688_v0, %v3690_v25  ;;  %v3014_v2 = vsel %vm2986_vm9, %v16073_v57, %v9136_v41  ;;  %v3016_v40 = vsel %vm2986_vm9, %v16074_v27, %v9191_v37  ;;  %v3015_v4 = vsel %vm2986_vm9, %v16075_v20, %v9190_v28 }
 0x201   :  { %v3689_v14 = vmax.f32 %v3437_v17, 0.0  ;;  %v13279_v49 = vpop.permute.xlu1 %9193  ;;  %v9199_v33 = vpop.permute.xlu0 %9198  ;;  %v9477_v25 = vpack.i.bf16 %v2191_v6, %v2190_v44 }
 0x202   :  { %v3800_v63 = vrot.slane %v3752_v23, 1  ;;  %v9195_v15 = vunpack.i.l.bf16 %v13279_v49  ;;  %v9201_v34 = vunpack.i.h.bf16 %v9199_v33  ;;  %v9200_v30 = vunpack.i.l.bf16 %v9199_v33 }
 0x203   :  { %v3753_v38 = vmax.f32 %v3689_v14, %v3691_v3  ;;  %9473 = vrot.lane.b32.xlu0 %v9472_v50, %s10078_s19  ;;  %2748 = vrot.lane.b32.xlu1 %v2189_v10, %s10077_s18  ;;  %v9196_v3 = vunpack.i.h.bf16 %v13279_v49 }
 0x204   :  { %v3832_v7 = vmax.f32 %v3752_v23, %v3800_v63  ;;  %v3017_v57 = vsel %vm2986_vm9, %v12342_v58, %v9195_v15  ;;  %v3078_v46 = vsel %vm3048_vm10, %v3015_v4, %v9201_v34 }
 0x205   :  { %v3864_v43 = vrot.slane %v3753_v38, 1  ;;  %v9204_v41 = vpop.permute.xlu1 %9203  ;;  %v9209_v53 = vpop.permute.xlu0 %9208 }
 0x206   :  { %v3928_v0 = vrot.slane %v3832_v7, 1  ;;  %v3960_v17 = vrot.slane %v3832_v7, 2  ;;  %v9205_v54 = vunpack.i.l.bf16 %v9204_v41  ;;  %v3992_v45 = vrot.slane %v3832_v7, 3 }
 0x207   :  { %v3896_v10 = vmax.f32 %v3753_v38, %v3864_v43  ;;  %9483 = vrot.lane.b32.xlu0 %v9462_v11, %s10075_s23  ;;  %9478 = vrot.lane.b32.xlu1 %v9477_v25, %s10078_s19  ;;  %v9206_v37 = vunpack.i.h.bf16 %v9204_v41  ;;  %v9211_v14 = vunpack.i.h.bf16 %v9209_v53  ;;  %v9210_v5 = vunpack.i.l.bf16 %v9209_v53 }
 0x208   :  { %v4169_v23 = vsel %vm4168_vm14, %v3832_v7, %v3928_v0  ;;  %v3077_v11 = vsel %vm3048_vm10, %v3014_v2, %v9200_v30  ;;  %v3079_v27 = vsel %vm3048_vm10, %v3016_v40, %v9205_v54 }
 0x209   :  { %v4040_v28 = vrot.slane %v3896_v10, 4  ;;  %v9214_v6 = vpop.permute.xlu1 %9213  ;;  %v4185_v33 = vsel %vm174_vm0, %v4169_v23, %v3960_v17  ;;  %v13303_v63 = vpop.permute.xlu0 %9218  ;;  %v4072_v38 = vrot.slane %v3896_v10, 5  ;;  %v4104_v7 = vrot.slane %v3896_v10, 6 }
 0x20a   :  { %v4202_v49 = vsel %vm4201_vm15, %v4185_v33, %v3992_v45  ;;  %v13307_v44 = vunpack.i.l.bf16 %v9214_v6  ;;  %v3080_v20 = vsel %vm3048_vm10, %v3017_v57, %v9206_v37  ;;  %v13314_v2 = vunpack.i.l.bf16 %v13303_v63 }
 0x20b   :  { %9493 = vrot.lane.b32.xlu0 %v9472_v50, %s10076_s27  ;;  %9488 = vrot.lane.b32.xlu1 %v9472_v50, %s10075_s23  ;;  %v4218_v58 = vsel %vm1570_vm4, %v4202_v49, %v4040_v28  ;;  %v4136_v4 = vrot.slane %v3896_v10, 7  ;;  %v3142_v41 = vsel %vm3113_vm11, %v3077_v11, %v9210_v5  ;;  %v3143_v40 = vsel %vm3113_vm11, %v3078_v46, %v9211_v14  ;;  %v16076_v46 = vld [vmem:[#allocation29_spill] sm:$0xff] }
 0x20c   :  { %v4234_v43 = vsel %vm1212_vm3, %v4218_v58, %v4072_v38  ;;  %v3207_v30 = vsel %vm3178_vm12, %v3142_v41, %v13314_v2  ;;  %v3144_v53 = vsel %vm3113_vm11, %v3079_v27, %v13307_v44  ;;  %v3145_v0 = vsel %vm3113_vm11, %v3080_v20, %v13307_v44 }
 0x20d   :  { %v13319_v15 = vpop.permute.xlu1 %9223  ;;  %v4250_v34 = vsel %vm854_vm1, %v4234_v43, %v4104_v7  ;;  %v9229_v50 = vpop.permute.xlu0 %9228  ;;  %v3208_v54 = vsel %vm3178_vm12, %v3143_v40, %v13314_v2  ;;  %v3018_v28 = vsel %vm2986_vm9, %v15926_v9, %v9196_v3  ;;  %v3209_v14 = vsel %vm3178_vm12, %v3144_v53, %v13314_v2 }
 0x20e   :  { %v4266_v17 = vsel %vm496_vm2, %v4250_v34, %v4136_v4  ;;  %v9230_v10 = vunpack.i.l.bf16 %v9229_v50  ;;  %v9231_v37 = vunpack.i.h.bf16 %v9229_v50  ;;  %v3257_v23 = vpack.c.bf16 %v3208_v54, %v3207_v30 }
 0x20f   :  { %9503 = vrot.lane.b32.xlu0 %v9477_v25, %s10077_s18  ;;  %9498 = vrot.lane.b32.xlu1 %v9477_v25, %s10076_s27  ;;  %v4298_v45 = vrot.slane %v4266_v17, 6  ;;  %v3210_v5 = vsel %vm3178_vm12, %v3145_v0, %v13314_v2  ;;  %v9216_v57 = vunpack.i.h.bf16 %v9214_v6  ;;  %v9221_v27 = vunpack.i.h.bf16 %v13303_v63 }
 0x210   :  { %v3081_v25 = vsel %vm3048_vm10, %v16076_v46, %v9230_v10  ;;  %8147 = vmatprep.mubr.msk.bf16.mxu0 %vm3297_vm13, %v3257_v23  ;;  %v3258_v11 = vpack.c.bf16 %v3210_v5, %v3209_v14  ;;  %v9225_v20 = vunpack.i.l.bf16 %v13319_v15  ;;  %v3082_v6 = vsel %vm3048_vm10, %v16076_v46, %v9231_v37  ;;  %v16077_v37 = vld [vmem:[#allocation5_spill] sm:$0xff] }
 0x211   :  { %v9234_v33 = vpop.permute.xlu1 %9233  ;;  %v9239_v49 = vpop.permute.xlu0 %9238  ;;  %v13344_v3 = vsel %vm174_vm0, 0.0, %v4298_v45  ;;  %v13347_v58 = vsel %vm174_vm0, %v4298_v45, 0.0  ;;  %v3146_v63 = vsel %vm3113_vm11, %v3081_v25, %v9216_v57 }
 0x212   :  { %v9235_v38 = vunpack.i.l.bf16 %v9234_v33  ;;  %v9240_v7 = vunpack.i.l.bf16 %v9239_v49  ;;  %8148 = vmatmul.mubr.msk.bf16.gmra.mrb[28].mxu0 %vm3297_vm13, %v3258_v11  ;;  %v4493_v4 = vrot.slane %v13344_v3, 2  ;;  %v4494_v43 = vrot.slane %v13347_v58, 2 }
 0x213   :  { %v9236_v41 = vunpack.i.h.bf16 %v9234_v33  ;;  %v4394_v34 = vrot.slane %v13344_v3, 1  ;;  %v4395_v50 = vrot.slane %v13347_v58, 1  ;;  %v9241_v30 = vunpack.i.h.bf16 %v9239_v49  ;;  %v16078_v33 = vld [vmem:[#allocation6_spill] sm:$0xff] }
 0x214   :  { %v3147_v53 = vsel %vm3113_vm11, %v3082_v6, %v9240_v7  ;;  %v3083_v0 = vsel %vm3048_vm10, %v3018_v28, %v9235_v38  ;;  %v4495_v10 = vsel %vm854_vm1, %v4493_v4, %v4494_v43  ;;  %v4592_v46 = vrot.slane %v13344_v3, 3 }
 0x215   :  { %v13356_v40 = vpop.permute.xlu1 %9243  ;;  %v9249_v17 = vpop.permute.xlu0 %9248  ;;  %v9512_v23 = vpack.i.bf16 %v4495_v10, %v16077_v37  ;;  %v4396_v14 = vsel %vm496_vm2, %v4394_v34, %v4395_v50  ;;  %v4593_v25 = vrot.slane %v13347_v58, 3  ;;  %v3019_v28 = vsel %vm2986_vm9, %v15926_v9, %v9225_v20 }
 0x216   :  { %v9250_v54 = vunpack.i.l.bf16 %v9249_v17  ;;  %v9245_v45 = vunpack.i.l.bf16 %v13356_v40  ;;  %v9251_v5 = vunpack.i.h.bf16 %v9249_v17  ;;  %v9507_v57 = vpack.i.bf16 %v4396_v14, %v16078_v33 }
 0x217   :  { %9513 = vrot.lane.b32.xlu0 %v9512_v23, %s10080_s21  ;;  %v3211_v38 = vsel %vm3178_vm12, %v3146_v63, %v9221_v27  ;;  %v3084_v7 = vsel %vm3048_vm10, %v3019_v28, %v9236_v41  ;;  %v4594_v9 = vsel %vm1212_vm3, %v4592_v46, %v4593_v25  ;;  %v3148_v20 = vsel %vm3113_vm11, %v3083_v0, %v9241_v30  ;;  %v16079_v27 = vld [vmem:[#allocation7_spill] sm:$0xff] }
 0x218   :  { %v3212_v11 = vsel %vm3178_vm12, %v3147_v53, %v9250_v54  ;;  %9508 = vrot.lane.b32.xlu1 %v9507_v57, %s10081_s26  ;;  %v3149_v34 = vsel %vm3113_vm11, %v3084_v7, %v9245_v45  ;;  %v3213_v50 = vsel %vm3178_vm12, %v3148_v20, %v9251_v5  ;;  %v9517_v63 = vpack.i.bf16 %v4594_v9, %v16079_v27 }
 0x219   :  { %v13373_v49 = vpop.permute.xlu1 %9253  ;;  %v9259_v6 = vpop.permute.xlu0 %9258  ;;  %v3259_v43 = vpack.c.bf16 %v3212_v11, %v3211_v38  ;;  %v9226_v30 = vunpack.i.h.bf16 %v13319_v15  ;;  %v9246_v28 = vunpack.i.h.bf16 %v13356_v40 }
 0x21a   :  { %v9255_v4 = vunpack.i.l.bf16 %v13373_v49  ;;  %v9261_v45 = vunpack.i.h.bf16 %v9259_v6  ;;  %v9260_v23 = vunpack.i.l.bf16 %v9259_v6 }
 0x21b   :  { %8151 = vmatprep.mubr.msk.bf16.mxu0 %vm3297_vm13, %v3259_v43  ;;  %v3020_v46 = vsel %vm2986_vm9, %v12615_v62, %v9226_v30 }
 0x21c   :  { %v3214_v53 = vsel %vm3178_vm12, %v3149_v34, %v9255_v4  ;;  %9518 = vrot.lane.b32.xlu1 %v9517_v63, %s10082_s14  ;;  %v3022_v15 = vsel %vm2986_vm9, %v12689_v56, %v9261_v45  ;;  %v3021_v6 = vsel %vm2986_vm9, %v12727_v19, %v9260_v23  ;;  %v9256_v4 = vunpack.i.h.bf16 %v13373_v49 }
 0x21d   :  { %v13386_v41 = vpop.permute.xlu1 %9263  ;;  %v3260_v17 = vpack.c.bf16 %v3214_v53, %v3213_v50  ;;  %v9269_v10 = vpop.permute.xlu0 %9268 }
 0x21e   :  { %v9270_v0 = vunpack.i.l.bf16 %v9269_v10  ;;  %v9271_v5 = vunpack.i.h.bf16 %v9269_v10  ;;  %v9265_v57 = vunpack.i.l.bf16 %v13386_v41 }
 0x21f   :  { %8152 = vmatmul.mubr.msk.bf16.gmra.mrb[32].mxu0 %vm3297_vm13, %v3260_v17 }
 0x220   :  { %v3085_v11 = vsel %vm3048_vm10, %v3020_v46, %v9270_v0  ;;  %v3086_v62 = vsel %vm3048_vm10, %v3021_v6, %v9271_v5  ;;  %v3023_v40 = vsel %vm2986_vm9, %v12754_v35, %v9265_v57 }
 0x221   :  { %v9274_v54 = vpop.permute.xlu1 %9273  ;;  %v9279_v14 = vpop.permute.xlu0 %9278  ;;  %v3150_v53 = vsel %vm3113_vm11, %v3085_v11, %v9246_v28 }
 0x222   :  { %v9280_v25 = vunpack.i.l.bf16 %v9279_v14  ;;  %v9275_v38 = vunpack.i.l.bf16 %v9274_v54  ;;  %v9276_v43 = vunpack.i.h.bf16 %v9274_v54  ;;  %v9281_v27 = vunpack.i.h.bf16 %v9279_v14 }
 0x223   :  { %v3215_v11 = vsel %vm3178_vm12, %v3150_v53, %v9256_v4 }
 0x224   :  { %v3151_v56 = vsel %vm3113_vm11, %v3086_v62, %v9280_v25  ;;  %v3087_v49 = vsel %vm3048_vm10, %v3022_v15, %v9275_v38  ;;  %v3088_v54 = vsel %vm3048_vm10, %v3023_v40, %v9276_v43 }
 0x225   :  { %v13396_v7 = vpop.permute.xlu1 %9283  ;;  %v9289_v9 = vpop.permute.xlu0 %9288  ;;  %v3152_v38 = vsel %vm3113_vm11, %v3087_v49, %v9281_v27 }
 0x226   :  { %v9290_v20 = vunpack.i.l.bf16 %v9289_v9  ;;  %v9285_v34 = vunpack.i.l.bf16 %v13396_v7  ;;  %v8125_v50 = vpop.f32.mrb[4].mxu0  ;;  %v9291_v17 = vunpack.i.h.bf16 %v9289_v9  ;;  %v9266_v9 = vunpack.i.h.bf16 %v13386_v41 }
 0x227   :  { %v3458_v19 = vadd.f32 %v8125_v50, %v13252_v16  ;;  %v3449_v63 = vpop.f32.mrb[5].mxu0 }
 0x228   :  { %v3216_v10 = vsel %vm3178_vm12, %v3151_v56, %v9290_v20  ;;  %v3450_v30 = vadd.f32 %v13252_v16, %v3449_v63  ;;  %v8126_v35 = vpop.f32.mrb[6].mxu0  ;;  %v3153_v46 = vsel %vm3113_vm11, %v3088_v54, %v9285_v34  ;;  %v3217_v62 = vsel %vm3178_vm12, %v3152_v38, %v9291_v17 }
 0x229   :  { %v13413_v0 = vpop.permute.xlu1 %9293  ;;  %v3694_v45 = vmax.f32 %v3458_v19, 0.0  ;;  %v3461_v23 = vadd.f32 %v8126_v35, %v13252_v16  ;;  %v9299_v14 = vpop.permute.xlu0 %9298  ;;  %v3261_v43 = vpack.c.bf16 %v3216_v10, %v3215_v11  ;;  %v3024_v41 = vsel %vm2986_vm9, %v12692_v47, %v9266_v9 }
 0x22a   :  { %v9295_v5 = vunpack.i.l.bf16 %v13413_v0  ;;  %v3452_v57 = vpop.f32.mrb[7].mxu0  ;;  %v3692_v25 = vmax.f32 %v3450_v30, 0.0  ;;  %v9300_v4 = vunpack.i.l.bf16 %v9299_v14  ;;  %v9301_v63 = vunpack.i.h.bf16 %v9299_v14 }
 0x22b   :  { %v3453_v28 = vadd.f32 %v13252_v16, %v3452_v57  ;;  %v3695_v15 = vmax.f32 %v3461_v23, 0.0  ;;  %8155 = vmatprep.mubr.msk.bf16.mxu0 %vm3297_vm13, %v3261_v43  ;;  %v9286_v35 = vunpack.i.h.bf16 %v13396_v7  ;;  %v9296_v54 = vunpack.i.h.bf16 %v13413_v0 }
 0x22c   :  { %v3218_v6 = vsel %vm3178_vm12, %v3153_v46, %v9295_v5  ;;  %v3754_v40 = vmax.f32 %v3692_v25, %v3694_v45  ;;  %v3025_v14 = vsel %vm2986_vm9, %v12782_v61, %v9300_v4  ;;  %v3026_v47 = vsel %vm2986_vm9, %v12779_v52, %v9301_v63 }
 0x22d   :  { %v3693_v20 = vmax.f32 %v3453_v28, 0.0  ;;  %v13425_v50 = vpop.permute.xlu1 %9303  ;;  %v9309_v34 = vpop.permute.xlu0 %9308  ;;  %v3262_v56 = vpack.c.bf16 %v3218_v6, %v3217_v62 }
 0x22e   :  { %v3801_v19 = vrot.slane %v3754_v40, 1  ;;  %v9310_v27 = vunpack.i.l.bf16 %v9309_v34  ;;  %v9311_v49 = vunpack.i.h.bf16 %v9309_v34  ;;  %v9305_v11 = vunpack.i.l.bf16 %v13425_v50 }
 0x22f   :  { %v3755_v53 = vmax.f32 %v3693_v20, %v3695_v15  ;;  %8156 = vmatmul.mubr.msk.bf16.gmra.mrb[36].mxu0 %vm3297_vm13, %v3262_v56 }
 0x230   :  { %v3833_v17 = vmax.f32 %v3754_v40, %v3801_v19  ;;  %v3089_v45 = vsel %vm3048_vm10, %v3024_v41, %v9310_v27  ;;  %v3090_v28 = vsel %vm3048_vm10, %v3025_v14, %v9311_v49 }
 0x231   :  { %v3865_v10 = vrot.slane %v3755_v53, 1  ;;  %v9314_v30 = vpop.permute.xlu1 %9313  ;;  %v9319_v23 = vpop.permute.xlu0 %9318  ;;  %v3154_v6 = vsel %vm3113_vm11, %v3089_v45, %v9286_v35 }
 0x232   :  { %v9315_v5 = vunpack.i.l.bf16 %v9314_v30  ;;  %v3929_v57 = vrot.slane %v3833_v17, 1  ;;  %v3961_v46 = vrot.slane %v3833_v17, 2  ;;  %v9320_v7 = vunpack.i.l.bf16 %v9319_v23 }
 0x233   :  { %v3897_v25 = vmax.f32 %v3755_v53, %v3865_v10  ;;  %v3993_v38 = vrot.slane %v3833_v17, 3  ;;  %v9321_v61 = vunpack.i.h.bf16 %v9319_v23  ;;  %v9316_v62 = vunpack.i.h.bf16 %v9314_v30 }
 0x234   :  { %v4170_v0 = vsel %vm4168_vm14, %v3833_v17, %v3929_v57  ;;  %v3091_v40 = vsel %vm3048_vm10, %v3026_v47, %v9315_v5  ;;  %v3155_v53 = vsel %vm3113_vm11, %v3090_v28, %v9320_v7  ;;  %v3027_v17 = vsel %vm2986_vm9, %v12799_v60, %v9305_v11 }
 0x235   :  { %v4041_v15 = vrot.slane %v3897_v25, 4  ;;  %v13442_v43 = vpop.permute.xlu1 %9323  ;;  %v4186_v9 = vsel %vm174_vm0, %v4170_v0, %v3961_v46  ;;  %v9329_v52 = vpop.permute.xlu0 %9328  ;;  %v4073_v34 = vrot.slane %v3897_v25, 5  ;;  %v4105_v56 = vrot.slane %v3897_v25, 6 }
 0x236   :  { %v4203_v20 = vsel %vm4201_vm15, %v4186_v9, %v3993_v38  ;;  %v9330_v19 = vunpack.i.l.bf16 %v9329_v52  ;;  %v9331_v27 = vunpack.i.h.bf16 %v9329_v52  ;;  %v9325_v63 = vunpack.i.l.bf16 %v13442_v43 }
 0x237   :  { %v4219_v4 = vsel %vm1570_vm4, %v4203_v20, %v4041_v15  ;;  %v4137_v49 = vrot.slane %v3897_v25, 7  ;;  %v3092_v45 = vsel %vm3048_vm10, %v3027_v17, %v9316_v62  ;;  %v3219_v57 = vsel %vm3178_vm12, %v3154_v6, %v9296_v54 }
 0x238   :  { %v4235_v41 = vsel %vm1212_vm3, %v4219_v4, %v4073_v34  ;;  %v3220_v10 = vsel %vm3178_vm12, %v3155_v53, %v9330_v19  ;;  %v3156_v14 = vsel %vm3113_vm11, %v3091_v40, %v9321_v61  ;;  %v3157_v25 = vsel %vm3113_vm11, %v3092_v45, %v9325_v63 }
 0x239   :  { %v13454_v30 = vpop.permute.xlu1 %9333  ;;  %v4251_v35 = vsel %vm854_vm1, %v4235_v41, %v4105_v56  ;;  %v9339_v23 = vpop.permute.xlu0 %9338  ;;  %v3263_v60 = vpack.c.bf16 %v3220_v10, %v3219_v57  ;;  %v3221_v47 = vsel %vm3178_vm12, %v3156_v14, %v9331_v27  ;;  %v9306_v54 = vunpack.i.h.bf16 %v13425_v50 }
 0x23a   :  { %v9335_v5 = vunpack.i.l.bf16 %v13454_v30  ;;  %v4267_v46 = vsel %vm496_vm2, %v4251_v35, %v4137_v49  ;;  %v9341_v0 = vunpack.i.h.bf16 %v9339_v23  ;;  %v9340_v15 = vunpack.i.l.bf16 %v9339_v23 }
 0x23b   :  { %8159 = vmatprep.mubr.msk.bf16.mxu0 %vm3297_vm13, %v3263_v60  ;;  %v4299_v61 = vrot.slane %v4267_v46, 6  ;;  %v3028_v20 = vsel %vm2986_vm9, %v12802_v13, %v9306_v54  ;;  %v9326_v34 = vunpack.i.h.bf16 %v13442_v43  ;;  %v9336_v56 = vunpack.i.h.bf16 %v13454_v30 }
 0x23c   :  { %v3222_v28 = vsel %vm3178_vm12, %v3157_v25, %v9335_v5  ;;  %v3030_v50 = vsel %vm2986_vm9, %v12835_v31, %v9341_v0  ;;  %v3029_v4 = vsel %vm2986_vm9, %v12832_v42, %v9340_v15 }
 0x23d   :  { %v13466_v11 = vpop.permute.xlu1 %9343  ;;  %v3264_v7 = vpack.c.bf16 %v3222_v28, %v3221_v47  ;;  %v9349_v38 = vpop.permute.xlu0 %9348  ;;  %v13484_v43 = vsel %vm174_vm0, 0.0, %v4299_v61  ;;  %v13487_v17 = vsel %vm174_vm0, %v4299_v61, 0.0 }
 0x23e   :  { %v9350_v6 = vunpack.i.l.bf16 %v9349_v38  ;;  %v9351_v40 = vunpack.i.h.bf16 %v9349_v38  ;;  %v9345_v52 = vunpack.i.l.bf16 %v13466_v11  ;;  %v9346_v49 = vunpack.i.h.bf16 %v13466_v11 }
 0x23f   :  { %8160 = vmatmul.mubr.msk.bf16.gmra.mrb[40].mxu0 %vm3297_vm13, %v3264_v7 }
 0x240   :  { %v3093_v53 = vsel %vm3048_vm10, %v3028_v20, %v9350_v6  ;;  %v3094_v31 = vsel %vm3048_vm10, %v3029_v4, %v9351_v40  ;;  %v3031_v42 = vsel %vm2986_vm9, %v12890_v55, %v9345_v52 }
 0x241   :  { %v9354_v9 = vpop.permute.xlu1 %9353  ;;  %v9359_v62 = vpop.permute.xlu0 %9358  ;;  %v3158_v45 = vsel %vm3113_vm11, %v3093_v53, %v9326_v34 }
 0x242   :  { %v9360_v19 = vunpack.i.l.bf16 %v9359_v62  ;;  %v9355_v27 = vunpack.i.l.bf16 %v9354_v9  ;;  %v9356_v41 = vunpack.i.h.bf16 %v9354_v9  ;;  %v9361_v23 = vunpack.i.h.bf16 %v9359_v62 }
 0x243   :  { %v3223_v62 = vsel %vm3178_vm12, %v3158_v45, %v9336_v56  ;;  %v4397_v56 = vrot.slane %v13484_v43, 1 }
 0x244   :  { %v3159_v5 = vsel %vm3113_vm11, %v3094_v31, %v9360_v19  ;;  %v3095_v14 = vsel %vm3048_vm10, %v3030_v50, %v9355_v27  ;;  %v3096_v11 = vsel %vm3048_vm10, %v3031_v42, %v9356_v41  ;;  %v3032_v27 = vsel %vm2986_vm9, %v12887_v18, %v9346_v49 }
 0x245   :  { %v13480_v63 = vpop.permute.xlu1 %9363  ;;  %v9369_v13 = vpop.permute.xlu0 %9368  ;;  %v3160_v40 = vsel %vm3113_vm11, %v3095_v14, %v9361_v23  ;;  %v4398_v31 = vrot.slane %v13487_v17, 1  ;;  %v4497_v18 = vrot.slane %v13487_v17, 2  ;;  %v4595_v14 = vrot.slane %v13484_v43, 3 }
 0x246   :  { %v9370_v10 = vunpack.i.l.bf16 %v9369_v13  ;;  %v9365_v30 = vunpack.i.l.bf16 %v13480_v63  ;;  %v8129_v35 = vpop.f32.mrb[8].mxu0  ;;  %v9371_v25 = vunpack.i.h.bf16 %v9369_v13 }
 0x247   :  { %v3474_v57 = vadd.f32 %v8129_v35, %v13252_v16  ;;  %v3465_v46 = vpop.f32.mrb[9].mxu0 }
 0x248   :  { %v3224_v60 = vsel %vm3178_vm12, %v3159_v5, %v9370_v10  ;;  %v3466_v47 = vadd.f32 %v13252_v16, %v3465_v46  ;;  %v8130_v55 = vpop.f32.mrb[10].mxu0  ;;  %v3161_v6 = vsel %vm3113_vm11, %v3096_v11, %v9365_v30  ;;  %v3225_v19 = vsel %vm3178_vm12, %v3160_v40, %v9371_v25 }
 0x249   :  { %v13499_v28 = vpop.permute.xlu1 %9373  ;;  %v3698_v7 = vmax.f32 %v3474_v57, 0.0  ;;  %v3477_v38 = vadd.f32 %v8130_v55, %v13252_v16  ;;  %v9379_v54 = vpop.permute.xlu0 %9378  ;;  %v3265_v34 = vpack.c.bf16 %v3224_v60, %v3223_v62  ;;  %v4496_v5 = vrot.slane %v13484_v43, 2 }
 0x24a   :  { %v9375_v0 = vunpack.i.l.bf16 %v13499_v28  ;;  %v3468_v15 = vpop.f32.mrb[11].mxu0  ;;  %v3696_v9 = vmax.f32 %v3466_v47, 0.0  ;;  %v9380_v10 = vunpack.i.l.bf16 %v9379_v54  ;;  %v9381_v45 = vunpack.i.h.bf16 %v9379_v54 }
 0x24b   :  { %v3469_v61 = vadd.f32 %v13252_v16, %v3468_v15  ;;  %v3699_v52 = vmax.f32 %v3477_v38, 0.0  ;;  %8163 = vmatprep.mubr.msk.bf16.mxu0 %vm3297_vm13, %v3265_v34  ;;  %v4596_v25 = vrot.slane %v13487_v17, 3  ;;  %v9366_v60 = vunpack.i.h.bf16 %v13480_v63 }
 0x24c   :  { %v3226_v20 = vsel %vm3178_vm12, %v3161_v6, %v9375_v0  ;;  %v3756_v50 = vmax.f32 %v3696_v9, %v3698_v7  ;;  %v9376_v47 = vunpack.i.h.bf16 %v13499_v28  ;;  %v3033_v0 = vsel %vm2986_vm9, %v12946_v8, %v9380_v10 }
 0x24d   :  { %v3697_v4 = vmax.f32 %v3469_v61, 0.0  ;;  %v13510_v53 = vpop.permute.xlu1 %9383  ;;  %v9389_v41 = vpop.permute.xlu0 %9388  ;;  %v3266_v13 = vpack.c.bf16 %v3226_v20, %v3225_v19  ;;  %v3034_v6 = vsel %vm2986_vm9, %v12949_v12, %v9381_v45 }
 0x24e   :  { %v3802_v42 = vrot.slane %v3756_v50, 1  ;;  %v9390_v35 = vunpack.i.l.bf16 %v9389_v41  ;;  %v9391_v23 = vunpack.i.h.bf16 %v9389_v41  ;;  %v9385_v61 = vunpack.i.l.bf16 %v13510_v53 }
 0x24f   :  { %v3757_v30 = vmax.f32 %v3697_v4, %v3699_v52  ;;  %8164 = vmatmul.mubr.msk.bf16.gmra.mrb[44].mxu0 %vm3297_vm13, %v3266_v13 }
 0x250   :  { %v3834_v49 = vmax.f32 %v3756_v50, %v3802_v42  ;;  %v3097_v55 = vsel %vm3048_vm10, %v3032_v27, %v9390_v35  ;;  %v3098_v9 = vsel %vm3048_vm10, %v3033_v0, %v9391_v23 }
 0x251   :  { %v3866_v57 = vrot.slane %v3757_v30, 1  ;;  %v9394_v46 = vpop.permute.xlu1 %9393  ;;  %v9399_v11 = vpop.permute.xlu0 %9398  ;;  %v3162_v52 = vsel %vm3113_vm11, %v3097_v55, %v9366_v60 }
 0x252   :  { %v9395_v7 = vunpack.i.l.bf16 %v9394_v46  ;;  %v3930_v38 = vrot.slane %v3834_v49, 1  ;;  %v3962_v54 = vrot.slane %v3834_v49, 2  ;;  %v9400_v63 = vunpack.i.l.bf16 %v9399_v11 }
 0x253   :  { %v3898_v15 = vmax.f32 %v3757_v30, %v3866_v57  ;;  %v3994_v62 = vrot.slane %v3834_v49, 3  ;;  %v9401_v8 = vunpack.i.h.bf16 %v9399_v11  ;;  %v9396_v19 = vunpack.i.h.bf16 %v9394_v46 }
 0x254   :  { %v4171_v28 = vsel %vm4168_vm14, %v3834_v49, %v3930_v38  ;;  %v3099_v50 = vsel %vm3048_vm10, %v3034_v6, %v9395_v7  ;;  %v3163_v10 = vsel %vm3113_vm11, %v3098_v9, %v9400_v63  ;;  %v16080_v49 = vld [vmem:[#allocation9_spill] sm:$0xff]  ;;  %v9386_v63 = vunpack.i.h.bf16 %v13510_v53 }
 0x255   :  { %v4042_v40 = vrot.slane %v3898_v15, 4  ;;  %v13533_v20 = vpop.permute.xlu1 %9403  ;;  %v4187_v34 = vsel %vm174_vm0, %v4171_v28, %v3962_v54  ;;  %v9409_v12 = vpop.permute.xlu0 %9408  ;;  %v4074_v27 = vrot.slane %v3898_v15, 5  ;;  %v4106_v41 = vrot.slane %v3898_v15, 6 }
 0x256   :  { %v4204_v4 = vsel %vm4201_vm15, %v4187_v34, %v3994_v62  ;;  %v9410_v13 = vunpack.i.l.bf16 %v9409_v12  ;;  %v9411_v30 = vunpack.i.h.bf16 %v9409_v12  ;;  %v9405_v35 = vunpack.i.l.bf16 %v13533_v20 }
 0x257   :  { %v4220_v42 = vsel %vm1570_vm4, %v4204_v4, %v4042_v40  ;;  %v4138_v45 = vrot.slane %v3898_v15, 7  ;;  %v3035_v57 = vsel %vm2986_vm9, %v16080_v49, %v9385_v61  ;;  %v3227_v54 = vsel %vm3178_vm12, %v3162_v52, %v9376_v47 }
 0x258   :  { %v4236_v23 = vsel %vm1212_vm3, %v4220_v42, %v4074_v27  ;;  %v3228_v46 = vsel %vm3178_vm12, %v3163_v10, %v9410_v13  ;;  %v3100_v11 = vsel %vm3048_vm10, %v3035_v57, %v9396_v19  ;;  %v3164_v15 = vsel %vm3113_vm11, %v3099_v50, %v9401_v8 }
 0x259   :  { %v13545_v60 = vpop.permute.xlu1 %9413  ;;  %v4252_v55 = vsel %vm854_vm1, %v4236_v23, %v4106_v41  ;;  %v9419_v7 = vpop.permute.xlu0 %9418  ;;  %v3165_v6 = vsel %vm3113_vm11, %v3100_v11, %v9405_v35  ;;  %v3267_v9 = vpack.c.bf16 %v3228_v46, %v3227_v54  ;;  %v3229_v62 = vsel %vm3178_vm12, %v3164_v15, %v9411_v30 }
 0x25a   :  { %v9415_v38 = vunpack.i.l.bf16 %v13545_v60  ;;  %v4268_v0 = vsel %vm496_vm2, %v4252_v55, %v4138_v45  ;;  %v4399_v53 = vsel %vm496_vm2, %v4397_v56, %v4398_v31  ;;  %v4498_v19 = vsel %vm854_vm1, %v4496_v5, %v4497_v18 }
 0x25b   :  { %v4300_v61 = vrot.slane %v4268_v0, 6  ;;  %8167 = vmatprep.mubr.msk.bf16.mxu0 %vm3297_vm13, %v3267_v9  ;;  %v4597_v27 = vsel %vm1212_vm3, %v4595_v14, %v4596_v25  ;;  %v3036_v56 = vsel %vm2986_vm9, %v12952_v29, %v9386_v63  ;;  %v9421_v31 = vunpack.i.h.bf16 %v9419_v7 }
 0x25c   :  { %v3230_v28 = vsel %vm3178_vm12, %v3165_v6, %v9415_v38  ;;  %v9406_v18 = vunpack.i.h.bf16 %v13533_v20  ;;  %v9420_v13 = vunpack.i.l.bf16 %v9419_v7  ;;  %v9416_v54 = vunpack.i.h.bf16 %v13545_v60 }
 0x25d   :  { %v13558_v40 = vpop.permute.xlu1 %9423  ;;  %v3268_v34 = vpack.c.bf16 %v3230_v28, %v3229_v62  ;;  %v9429_v47 = vpop.permute.xlu0 %9428  ;;  %v13561_v52 = vsel %vm174_vm0, 0.0, %v4300_v61  ;;  %v13564_v8 = vsel %vm174_vm0, %v4300_v61, 0.0  ;;  %v3038_v20 = vsel %vm2986_vm9, %v13030_v39, %v9421_v31 }
 0x25e   :  { %v9430_v50 = vunpack.i.l.bf16 %v9429_v47  ;;  %v4400_v12 = vrot.slane %v13561_v52, 1  ;;  %v4401_v4 = vrot.slane %v13564_v8, 1  ;;  %v4499_v41 = vrot.slane %v13561_v52, 2 }
 0x25f   :  { %8168 = vmatmul.mubr.msk.bf16.gmra.mrb[48].mxu0 %vm3297_vm13, %v3268_v34  ;;  %v4500_v5 = vrot.slane %v13564_v8, 2  ;;  %v4598_v30 = vrot.slane %v13561_v52, 3  ;;  %v9431_v35 = vunpack.i.h.bf16 %v9429_v47  ;;  %v9425_v45 = vunpack.i.l.bf16 %v13558_v40 }
 0x260   :  { %v4402_v10 = vsel %vm496_vm2, %v4400_v12, %v4401_v4  ;;  %v3101_v29 = vsel %vm3048_vm10, %v3036_v56, %v9430_v50  ;;  %v4599_v46 = vrot.slane %v13564_v8, 3  ;;  %v3037_v38 = vsel %vm2986_vm9, %v13015_v1, %v9420_v13 }
 0x261   :  { %v9434_v42 = vpop.permute.xlu1 %9433  ;;  %v9439_v14 = vpop.permute.xlu0 %9438  ;;  %v9522_v23 = vpack.i.bf16 %v4402_v10, %v4399_v53  ;;  %v4501_v57 = vsel %vm854_vm1, %v4499_v41, %v4500_v5  ;;  %v3166_v9 = vsel %vm3113_vm11, %v3101_v29, %v9406_v18  ;;  %v3039_v39 = vsel %vm2986_vm9, %v13067_v51, %v9425_v45 }
 0x262   :  { %v9435_v25 = vunpack.i.l.bf16 %v9434_v42  ;;  %v9436_v49 = vunpack.i.h.bf16 %v9434_v42  ;;  %v9441_v55 = vunpack.i.h.bf16 %v9439_v14  ;;  %v9440_v11 = vunpack.i.l.bf16 %v9439_v14 }
 0x263   :  { %9523 = vrot.lane.b32.xlu0 %v9522_v23, %s10081_s26  ;;  %v9527_v7 = vpack.i.bf16 %v4501_v57, %v4498_v19  ;;  %v4600_v6 = vsel %vm1212_vm3, %v4598_v30, %v4599_v46  ;;  %v3102_v1 = vsel %vm3048_vm10, %v3037_v38, %v9431_v35  ;;  %v3231_v5 = vsel %vm3178_vm12, %v3166_v9, %v9416_v54 }
 0x264   :  { %v3103_v0 = vsel %vm3048_vm10, %v3038_v20, %v9435_v25  ;;  %v9532_v62 = vpack.i.bf16 %v4600_v6, %v4597_v27  ;;  %v3104_v47 = vsel %vm3048_vm10, %v3039_v39, %v9436_v49  ;;  %v3167_v53 = vsel %vm3113_vm11, %v3102_v1, %v9440_v11 }
 0x265   :  { %v13602_v15 = vpop.permute.xlu1 %9443  ;;  %9528 = vrot.lane.b32.xlu1 %v9527_v7, %s10080_s21  ;;  %v9449_v61 = vpop.permute.xlu0 %9448  ;;  %v3168_v51 = vsel %vm3113_vm11, %v3103_v0, %v9441_v55  ;;  %v9426_v57 = vunpack.i.h.bf16 %v13558_v40 }
 0x266   :  { %v9445_v63 = vunpack.i.l.bf16 %v13602_v15  ;;  %v9451_v60 = vunpack.i.h.bf16 %v9449_v61  ;;  %v9450_v28 = vunpack.i.l.bf16 %v9449_v61  ;;  %v8133_v34 = vpop.f32.mrb[12].mxu0  ;;  %v9446_v39 = vunpack.i.h.bf16 %v13602_v15 }
 0x267   :  { %v3490_v19 = vadd.f32 %v8133_v34, %v13252_v16  ;;  %v3481_v50 = vpop.f32.mrb[13].mxu0  ;;  %9533 = vrot.lane.b32.xlu0 %v9532_v62, %s10082_s14 }
 0x268   :  { %v3169_v12 = vsel %vm3113_vm11, %v3104_v47, %v9445_v63  ;;  %v3232_v4 = vsel %vm3178_vm12, %v3167_v53, %v9450_v28  ;;  %v3482_v27 = vadd.f32 %v13252_v16, %v3481_v50  ;;  %v8134_v56 = vpop.f32.mrb[14].mxu0  ;;  %v3233_v41 = vsel %vm3178_vm12, %v3168_v51, %v9451_v60 }
 0x269   :  { %v2920_v31 = vpop.permute.xlu1 %2919  ;;  %v3702_v18 = vmax.f32 %v3490_v19, 0.0  ;;  %v3493_v13 = vadd.f32 %v8134_v56, %v13252_v16  ;;  %v9454_v42 = vpop.permute.xlu0 %9453  ;;  %v3269_v35 = vpack.c.bf16 %v3232_v4, %v3231_v5 }
 0x26a   :  { %v3234_v10 = vsel %vm3178_vm12, %v3169_v12, %v2920_v31  ;;  %v3484_v30 = vpop.f32.mrb[15].mxu0  ;;  %v3700_v45 = vmax.f32 %v3482_v27, 0.0  ;;  %v9456_v11 = vunpack.i.h.bf16 %v9454_v42  ;;  %v9455_v7 = vunpack.i.l.bf16 %v9454_v42 }
 0x26b   :  { %v3270_v14 = vpack.c.bf16 %v3234_v10, %v3233_v41  ;;  %v3703_v25 = vmax.f32 %v3493_v13, 0.0  ;;  %v3485_v23 = vadd.f32 %v13252_v16, %v3484_v30  ;;  %8171 = vmatprep.mubr.msk.bf16.mxu0 %vm3297_vm13, %v3269_v35  ;;  %v3040_v16 = vsel %vm2986_vm9, %v13064_v24, %v9426_v57 }
 0x26c   :  { %v3758_v29 = vmax.f32 %v3700_v45, %v3702_v18  ;;  %v3042_v60 = vsel %vm2986_vm9, %v13124_v32, %v9456_v11  ;;  %v3041_v34 = vsel %vm2986_vm9, %v13121_v36, %v9455_v7 }
 0x26d   :  { %v2366_v49 = vpop.permute.xlu1 %2365  ;;  %8172 = vmatmul.mubr.msk.bf16.gmra.mrb[52].mxu0 %vm3297_vm13, %v3270_v14  ;;  %v3701_v46 = vmax.f32 %v3485_v23, 0.0  ;;  %v9459_v20 = vpop.permute.xlu0 %9458 }
 0x26e   :  { %v3803_v55 = vrot.slane %v3758_v29, 1  ;;  %v9461_v0 = vunpack.i.h.bf16 %v9459_v20  ;;  %v9460_v6 = vunpack.i.l.bf16 %v9459_v20  ;;  %v3043_v53 = vsel %vm2986_vm9, %v13149_v26, %v2366_v49 }
 0x26f   :  { %v3759_v38 = vmax.f32 %v3701_v46, %v3703_v25 }
 0x270   :  { %v3835_v54 = vmax.f32 %v3758_v29, %v3803_v55  ;;  %v3105_v50 = vsel %vm3048_vm10, %v3040_v16, %v9460_v6  ;;  %v3106_v51 = vsel %vm3048_vm10, %v3041_v34, %v9461_v0 }
 0x271   :  { %v9464_v9 = vpop.permute.xlu1 %9463  ;;  %v3867_v61 = vrot.slane %v3759_v38, 1  ;;  %v9469_v63 = vpop.permute.xlu0 %9468  ;;  %v3170_v45 = vsel %vm3113_vm11, %v3105_v50, %v9446_v39 }
 0x272   :  { %v9465_v62 = vunpack.i.l.bf16 %v9464_v9  ;;  %v3931_v1 = vrot.slane %v3835_v54, 1  ;;  %v3963_v40 = vrot.slane %v3835_v54, 2  ;;  %v9466_v28 = vunpack.i.h.bf16 %v9464_v9 }
 0x273   :  { %v3899_v47 = vmax.f32 %v3759_v38, %v3867_v61  ;;  %v9470_v19 = vunpack.i.l.bf16 %v9469_v63  ;;  %v3995_v24 = vrot.slane %v3835_v54, 3  ;;  %v9471_v27 = vunpack.i.h.bf16 %v9469_v63 }
 0x274   :  { %v4172_v15 = vsel %vm4168_vm14, %v3835_v54, %v3931_v1  ;;  %v3107_v56 = vsel %vm3048_vm10, %v3042_v60, %v9465_v62  ;;  %v3108_v5 = vsel %vm3048_vm10, %v3043_v53, %v9466_v28 }
 0x275   :  { %v2749_v12 = vpop.permute.xlu1 %2748  ;;  %v4188_v4 = vsel %vm174_vm0, %v4172_v15, %v3963_v40  ;;  %v4043_v32 = vrot.slane %v3899_v47, 4  ;;  %v9474_v36 = vpop.permute.xlu0 %9473  ;;  %v4075_v41 = vrot.slane %v3899_v47, 5  ;;  %v4107_v18 = vrot.slane %v3899_v47, 6 }
 0x276   :  { %v4205_v31 = vsel %vm4201_vm15, %v4188_v4, %v3995_v24  ;;  %v9476_v26 = vunpack.i.h.bf16 %v9474_v36  ;;  %v3171_v42 = vsel %vm3113_vm11, %v3106_v51, %v9470_v19  ;;  %v9475_v10 = vunpack.i.l.bf16 %v9474_v36 }
 0x277   :  { %v4221_v13 = vsel %vm1570_vm4, %v4205_v31, %v4043_v32  ;;  %v4139_v30 = vrot.slane %v3899_v47, 7  ;;  %v3173_v11 = vsel %vm3113_vm11, %v3108_v5, %v2749_v12  ;;  %v3172_v7 = vsel %vm3113_vm11, %v3107_v56, %v9471_v27 }
 0x278   :  { %v4237_v35 = vsel %vm1212_vm3, %v4221_v13, %v4075_v41  ;;  %v3236_v14 = vsel %vm3178_vm12, %v3171_v42, %v9476_v26  ;;  %v3235_v29 = vsel %vm3178_vm12, %v3170_v45, %v9475_v10 }
 0x279   :  { %v9479_v25 = vpop.permute.xlu1 %9478  ;;  %v4253_v23 = vsel %vm854_vm1, %v4237_v35, %v4107_v18  ;;  %v9484_v49 = vpop.permute.xlu0 %9483  ;;  %v3271_v55 = vpack.c.bf16 %v3236_v14, %v3235_v29  ;;  %v13688_v18 = vld [vmem:[%s15641_s2] ss:$0 sm:$0xff] }
 0x27a   :  { %v9481_v57 = vunpack.i.h.bf16 %v9479_v25  ;;  %v9480_v46 = vunpack.i.l.bf16 %v9479_v25  ;;  %v13651_v20 = vsel %vm496_vm2, %v4253_v23, %v4139_v30  ;;  %v9486_v9 = vunpack.i.h.bf16 %v9484_v49 }
 0x27b   :  { %8175 = vmatprep.mubr.msk.bf16.mxu0 %vm3297_vm13, %v3271_v55  ;;  %v9485_v16 = vunpack.i.l.bf16 %v9484_v49 }
 0x27c   :  { %v3237_v38 = vsel %vm3178_vm12, %v3172_v7, %v9480_v46  ;;  %v3238_v54 = vsel %vm3178_vm12, %v3173_v11, %v9481_v57  ;;  %v3045_v60 = vsel %vm2986_vm9, %v13194_v21, %v9486_v9  ;;  %v4301_v9 = vrot.slane %v13651_v20, 6 }
 0x27d   :  { %v3272_v0 = vpack.c.bf16 %v3238_v54, %v3237_v38  ;;  %v9489_v6 = vpop.permute.xlu1 %9488  ;;  %v9494_v39 = vpop.permute.xlu0 %9493  ;;  %v3044_v28 = vsel %vm2986_vm9, %v13146_v59, %v9485_v16 }
 0x27e   :  { %v9491_v61 = vunpack.i.h.bf16 %v9489_v6  ;;  %v9490_v63 = vunpack.i.l.bf16 %v9489_v6  ;;  %v9496_v62 = vunpack.i.h.bf16 %v9494_v39  ;;  %v9495_v1 = vunpack.i.l.bf16 %v9494_v39 }
 0x27f   :  { %8176 = vmatmul.mubr.msk.bf16.gmra.mrb[56].mxu0 %vm3297_vm13, %v3272_v0 }
 0x280   :  { %v3047_v19 = vsel %vm2986_vm9, %v13238_v48, %v9491_v61  ;;  %v3046_v24 = vsel %vm2986_vm9, %v13199_v22, %v9490_v63  ;;  %v3109_v51 = vsel %vm3048_vm10, %v3044_v28, %v9495_v1  ;;  %v3110_v12 = vsel %vm3048_vm10, %v3045_v60, %v9496_v62 }
 0x281   :  { %v9499_v40 = vpop.permute.xlu1 %9498  ;;  %v9504_v34 = vpop.permute.xlu0 %9503  ;;  %v13704_v28 = vsel %vm174_vm0, 0.0, %v4301_v9  ;;  %vm7518_vm9 = vcmask 74752  }
 0x282   :  { %v9501_v47 = vunpack.i.h.bf16 %v9499_v40  ;;  %v9500_v53 = vunpack.i.l.bf16 %v9499_v40  ;;  %v9506_v15 = vunpack.i.h.bf16 %v9504_v34  ;;  %v9505_v50 = vunpack.i.l.bf16 %v9504_v34 }
 0x283   :  { %v13707_v34 = vsel %vm174_vm0, %v4301_v9, 0.0 }
 0x284   :  { %v3111_v21 = vsel %vm3048_vm10, %v3046_v24, %v9500_v53  ;;  %v3112_v4 = vsel %vm3048_vm10, %v3047_v19, %v9501_v47  ;;  %v3174_v59 = vsel %vm3113_vm11, %v3109_v51, %v9505_v50  ;;  %v3175_v32 = vsel %vm3113_vm11, %v3110_v12, %v9506_v15 }
 0x285   :  { %v3176_v48 = vsel %vm3113_vm11, %v3111_v21, %v13307_v44  ;;  %v3177_v22 = vsel %vm3113_vm11, %v3112_v4, %v13307_v44  ;;  %v3239_v27 = vsel %vm3178_vm12, %v3174_v59, %v13314_v2  ;;  %v3240_v56 = vsel %vm3178_vm12, %v3175_v32, %v13314_v2  ;;  %v8137_v41 = vpop.f32.mrb[16].mxu0 }
 0x286   :  { %v3241_v36 = vsel %vm3178_vm12, %v3176_v48, %v13314_v2  ;;  %v3242_v31 = vsel %vm3178_vm12, %v3177_v22, %v13314_v2  ;;  %v3273_v26 = vpack.c.bf16 %v3240_v56, %v3239_v27  ;;  %v3506_v44 = vadd.f32 %v13688_v18, %v8137_v41  ;;  %v3497_v13 = vpop.f32.mrb[17].mxu0 }
 0x287   :  { %v3274_v5 = vpack.c.bf16 %v3242_v31, %v3241_v36  ;;  %v3498_v42 = vadd.f32 %v13688_v18, %v3497_v13  ;;  %v8138_v10 = vpop.f32.mrb[18].mxu0  ;;  %v4502_v53 = vrot.slane %v13704_v28, 2  ;;  %v4503_v19 = vrot.slane %v13707_v34, 2 }
 0x288   :  { %8179 = vmatprep.mubr.msk.bf16.mxu0 %vm3297_vm13, %v3273_v26  ;;  %v3706_v30 = vmax.f32 %v3506_v44, 0.0  ;;  %v3509_v35 = vadd.f32 %v13688_v18, %v8138_v10  ;;  %v3500_v2 = vpop.f32.mrb[19].mxu0  ;;  %v4403_v24 = vrot.slane %v13704_v28, 1  ;;  %v4404_v15 = vrot.slane %v13707_v34, 1 }
 0x289   :  { %8180 = vmatmul.mubr.msk.bf16.gmra.mrb[60].mxu0 %vm3297_vm13, %v3274_v5  ;;  %v3704_v45 = vmax.f32 %v3498_v42, 0.0  ;;  %v3501_v14 = vadd.f32 %v13688_v18, %v3500_v2  ;;  %v4601_v12 = vrot.slane %v13704_v28, 3  ;;  %v4602_v21 = vrot.slane %v13707_v34, 3 }
 0x28a   :  { %v3707_v25 = vmax.f32 %v3509_v35, 0.0  ;;  %v4504_v56 = vsel %vm854_vm1, %v4502_v53, %v4503_v19  ;;  %v4405_v31 = vsel %vm496_vm2, %v4403_v24, %v4404_v15 }
 0x28b   :  { %v3760_v23 = vmax.f32 %v3704_v45, %v3706_v30  ;;  %v3705_v29 = vmax.f32 %v3501_v14, 0.0  ;;  %v4603_v44 = vsel %vm1212_vm3, %v4601_v12, %v4602_v21 }
 0x28d   :  { %v3804_v49 = vrot.slane %v3760_v23, 1  ;;  %v3761_v57 = vmax.f32 %v3705_v29, %v3707_v25 }
 0x28f   :  { %v3836_v46 = vmax.f32 %v3760_v23, %v3804_v49  ;;  %v3868_v55 = vrot.slane %v3761_v57, 1 }
 0x291   :  { %v3932_v11 = vrot.slane %v3836_v46, 1  ;;  %v3964_v7 = vrot.slane %v3836_v46, 2  ;;  %v3900_v38 = vmax.f32 %v3761_v57, %v3868_v55  ;;  %v3996_v54 = vrot.slane %v3836_v46, 3 }
 0x293   :  { %v4173_v0 = vsel %vm4168_vm14, %v3836_v46, %v3932_v11  ;;  %v4044_v6 = vrot.slane %v3900_v38, 4  ;;  %v4076_v61 = vrot.slane %v3900_v38, 5  ;;  %v4108_v63 = vrot.slane %v3900_v38, 6 }
 0x294   :  { %v4189_v16 = vsel %vm174_vm0, %v4173_v0, %v3964_v7  ;;  %v4140_v1 = vrot.slane %v3900_v38, 7 }
 0x295   :  { %v4206_v39 = vsel %vm4201_vm15, %v4189_v16, %v3996_v54 }
 0x296   :  { %v4222_v62 = vsel %vm1570_vm4, %v4206_v39, %v4044_v6 }
 0x297   :  { %v4238_v40 = vsel %vm1212_vm3, %v4222_v62, %v4076_v61 }
 0x298   :  { %v4254_v60 = vsel %vm854_vm1, %v4238_v40, %v4108_v63 }
 0x299   :  { %v4270_v20 = vsel %vm496_vm2, %v4254_v60, %v4140_v1 }
 0x29a   :  { %v4302_v47 = vrot.slane %v4270_v20, 6 }
 0x29c   :  { %v13715_v50 = vsel %vm174_vm0, 0.0, %v4302_v47  ;;  %v13718_v51 = vsel %vm174_vm0, %v4302_v47, 0.0 }
 0x29d   :  { %v4505_v4 = vrot.slane %v13715_v50, 2  ;;  %v4506_v59 = vrot.slane %v13718_v51, 2  ;;  %v4406_v32 = vrot.slane %v13715_v50, 1  ;;  %v4407_v48 = vrot.slane %v13718_v51, 1 }
 0x29e   :  { %v4604_v22 = vrot.slane %v13715_v50, 3  ;;  %v4605_v27 = vrot.slane %v13718_v51, 3 }
 0x29f   :  { %v4507_v36 = vsel %vm854_vm1, %v4505_v4, %v4506_v59  ;;  %v4408_v41 = vsel %vm496_vm2, %v4406_v32, %v4407_v48 }
 0x2a0   :  { %v9542_v26 = vpack.i.bf16 %v4507_v36, %v4504_v56  ;;  %v9537_v5 = vpack.i.bf16 %v4408_v41, %v4405_v31  ;;  %v4606_v13 = vsel %vm1212_vm3, %v4604_v22, %v4605_v27  ;;  %v13752_v41 = vpop.permute.xlu1 %9508 }
 0x2a1   :  { %v9547_v42 = vpack.i.bf16 %v4606_v13, %v4603_v44 }
 0x2a2   :  { %9543 = vrot.lane.b32.xlu0 %v9542_v26, %s10080_s21  ;;  %9538 = vrot.lane.b32.xlu1 %v9537_v5, %s10081_s26 }
 0x2a6   :  { %9548 = vrot.lane.b32.xlu1 %v9547_v42, %s10082_s14  ;;  %v13754_v42 = vpop.permute.xlu0 %9513 }
 0x2a7   :  { %v8141_v10 = vpop.f32.mrb[20].mxu0 }
 0x2a8   :  { %v3522_v30 = vadd.f32 %v13688_v18, %v8141_v10  ;;  %v3513_v35 = vpop.f32.mrb[21].mxu0 }
 0x2a9   :  { %v3514_v2 = vadd.f32 %v13688_v18, %v3513_v35  ;;  %v8142_v45 = vpop.f32.mrb[22].mxu0 }
 0x2aa   :  { %v3710_v14 = vmax.f32 %v3522_v30, 0.0  ;;  %v3525_v25 = vadd.f32 %v13688_v18, %v8142_v45  ;;  %v3516_v23 = vpop.f32.mrb[23].mxu0 }
 0x2ab   :  { %v3708_v29 = vmax.f32 %v3514_v2, 0.0  ;;  %v3517_v49 = vadd.f32 %v13688_v18, %v3516_v23  ;;  %v13756_v2 = vpop.permute.xlu1 %9518 }
 0x2ac   :  { %v3711_v57 = vmax.f32 %v3525_v25, 0.0 }
 0x2ad   :  { %v3762_v46 = vmax.f32 %v3708_v29, %v3710_v14  ;;  %v3709_v55 = vmax.f32 %v3517_v49, 0.0 }
 0x2af   :  { %v3805_v11 = vrot.slane %v3762_v46, 1  ;;  %v3763_v7 = vmax.f32 %v3709_v55, %v3711_v57 }
 0x2b1   :  { %v3837_v38 = vmax.f32 %v3762_v46, %v3805_v11  ;;  %v3869_v54 = vrot.slane %v3763_v7, 1 }
 0x2b3   :  { %v3933_v0 = vrot.slane %v3837_v38, 1  ;;  %v3965_v6 = vrot.slane %v3837_v38, 2  ;;  %v3901_v9 = vmax.f32 %v3763_v7, %v3869_v54  ;;  %v3997_v16 = vrot.slane %v3837_v38, 3 }
 0x2b5   :  { %v4174_v39 = vsel %vm4168_vm14, %v3837_v38, %v3933_v0  ;;  %v4045_v61 = vrot.slane %v3901_v9, 4  ;;  %v4077_v1 = vrot.slane %v3901_v9, 5  ;;  %v4109_v40 = vrot.slane %v3901_v9, 6 }
 0x2b6   :  { %v4190_v63 = vsel %vm174_vm0, %v4174_v39, %v3965_v6  ;;  %v4141_v20 = vrot.slane %v3901_v9, 7 }
 0x2b7   :  { %v4207_v62 = vsel %vm4201_vm15, %v4190_v63, %v3997_v16 }
 0x2b8   :  { %v4223_v60 = vsel %vm1570_vm4, %v4207_v62, %v4045_v61 }
 0x2b9   :  { %v4239_v47 = vsel %vm1212_vm3, %v4223_v60, %v4077_v1 }
 0x2ba   :  { %v4255_v53 = vsel %vm854_vm1, %v4239_v47, %v4109_v40 }
 0x2bb   :  { %v4271_v19 = vsel %vm496_vm2, %v4255_v53, %v4141_v20 }
 0x2bc   :  { %v4303_v45 = vrot.slane %v4271_v19, 6 }
 0x2be   :  { %v13771_v9 = vsel %vm174_vm0, 0.0, %v4303_v45  ;;  %v13778_v63 = vsel %vm174_vm0, %v4303_v45, 0.0 }
 0x2bf   :  { %v4409_v20 = vrot.slane %v13771_v9, 1  ;;  %v4410_v53 = vrot.slane %v13778_v63, 1  ;;  %v4508_v19 = vrot.slane %v13771_v9, 2 }
 0x2c7   :  { %v8145_v24 = vpop.f32.mrb[24].mxu0 }
 0x2c8   :  { %v3538_v15 = vadd.f32 %v13688_v18, %v8145_v24  ;;  %v3529_v12 = vpop.f32.mrb[25].mxu0  ;;  %v4509_v24 = vrot.slane %v13778_v63, 2 }
 0x2c9   :  { %v3530_v21 = vadd.f32 %v13688_v18, %v3529_v12  ;;  %v8146_v4 = vpop.f32.mrb[26].mxu0 }
 0x2ca   :  { %v3714_v59 = vmax.f32 %v3538_v15, 0.0  ;;  %v3541_v32 = vadd.f32 %v13688_v18, %v8146_v4  ;;  %v3532_v48 = vpop.f32.mrb[27].mxu0  ;;  %v4608_v4 = vrot.slane %v13778_v63, 3 }
 0x2cb   :  { %v3712_v22 = vmax.f32 %v3530_v21, 0.0  ;;  %v3533_v27 = vadd.f32 %v13688_v18, %v3532_v48  ;;  %v4607_v21 = vrot.slane %v13771_v9, 3 }
 0x2cc   :  { %v3715_v56 = vmax.f32 %v3541_v32, 0.0 }
 0x2cd   :  { %v3764_v36 = vmax.f32 %v3712_v22, %v3714_v59  ;;  %v3713_v31 = vmax.f32 %v3533_v27, 0.0 }
 0x2cf   :  { %v3806_v26 = vrot.slane %v3764_v36, 1  ;;  %v3765_v5 = vmax.f32 %v3713_v31, %v3715_v56 }
 0x2d1   :  { %v3838_v44 = vmax.f32 %v3764_v36, %v3806_v26  ;;  %v3870_v13 = vrot.slane %v3765_v5, 1  ;;  %v4411_v36 = vsel %vm496_vm2, %v4409_v20, %v4410_v53  ;;  %v4510_v26 = vsel %vm854_vm1, %v4508_v19, %v4509_v24 }
 0x2d3   :  { %v3934_v10 = vrot.slane %v3838_v44, 1  ;;  %v3966_v30 = vrot.slane %v3838_v44, 2  ;;  %v3902_v35 = vmax.f32 %v3765_v5, %v3870_v13  ;;  %v3998_v14 = vrot.slane %v3838_v44, 3 }
 0x2d5   :  { %v4175_v25 = vsel %vm4168_vm14, %v3838_v44, %v3934_v10  ;;  %v4046_v23 = vrot.slane %v3902_v35, 4  ;;  %v13760_v49 = vpop.permute.xlu0 %9523  ;;  %v4078_v46 = vrot.slane %v3902_v35, 5  ;;  %v4110_v11 = vrot.slane %v3902_v35, 6 }
 0x2d6   :  { %v4191_v29 = vsel %vm174_vm0, %v4175_v25, %v3966_v30  ;;  %v9525_v55 = vunpack.i.l.bf16 %v13760_v49  ;;  %v4142_v54 = vrot.slane %v3902_v35, 7  ;;  %v4609_v10 = vsel %vm1212_vm3, %v4607_v21, %v4608_v4 }
 0x2d7   :  { %v4208_v57 = vsel %vm4201_vm15, %v4191_v29, %v3998_v14  ;;  %v13765_v38 = vpop.permute.xlu1 %9528 }
 0x2d8   :  { %v4224_v7 = vsel %vm1570_vm4, %v4208_v57, %v4046_v23  ;;  %v4759_v6 = vsel %vm4756_vm5, %v13484_v43, %v9525_v55  ;;  %v9530_v39 = vunpack.i.l.bf16 %v13765_v38 }
 0x2d9   :  { %v4240_v0 = vsel %vm1212_vm3, %v4224_v7, %v4078_v46  ;;  %v13775_v61 = vpop.permute.xlu0 %9533 }
 0x2da   :  { %v4256_v16 = vsel %vm854_vm1, %v4240_v0, %v4110_v11  ;;  %v9535_v1 = vunpack.i.l.bf16 %v13775_v61  ;;  %v4777_v60 = vsel %vm4774_vm6, %v4759_v6, %v9530_v39 }
 0x2db   :  { %v4272_v62 = vsel %vm496_vm2, %v4256_v16, %v4142_v54 }
 0x2dc   :  { %v4304_v40 = vrot.slane %v4272_v62, 6  ;;  %v13785_v47 = vsel %vm4792_vm7, %v4777_v60, %v9535_v1 }
 0x2de   :  { %v13791_v15 = vsel %vm174_vm0, 0.0, %v4304_v40  ;;  %v13794_v12 = vsel %vm174_vm0, %v4304_v40, 0.0 }
 0x2df   :  { %v4412_v59 = vrot.slane %v13791_v15, 1  ;;  %v4413_v32 = vrot.slane %v13794_v12, 1  ;;  %v4511_v48 = vrot.slane %v13791_v15, 2  ;;  %v4512_v22 = vrot.slane %v13794_v12, 2 }
 0x2e0   :  { %v4610_v27 = vrot.slane %v13791_v15, 3  ;;  %v4611_v56 = vrot.slane %v13794_v12, 3 }
 0x2e1   :  { %v4414_v31 = vsel %vm496_vm2, %v4412_v59, %v4413_v32  ;;  %v4513_v5 = vsel %vm854_vm1, %v4511_v48, %v4512_v22 }
 0x2e2   :  { %v9552_v44 = vpack.i.bf16 %v4414_v31, %v4411_v36  ;;  %v9557_v13 = vpack.i.bf16 %v4513_v5, %v4510_v26  ;;  %v4612_v30 = vsel %vm1212_vm3, %v4610_v27, %v4611_v56 }
 0x2e3   :  { %v9562_v35 = vpack.i.bf16 %v4612_v30, %v4609_v10 }
 0x2e4   :  { %9553 = vrot.lane.b32.xlu0 %v9552_v44, %s10081_s26  ;;  %9558 = vrot.lane.b32.xlu1 %v9557_v13, %s10080_s21 }
 0x2e5   :  { %v8149_v45 = vpop.f32.mrb[28].mxu0 }
 0x2e6   :  { %v3554_v14 = vadd.f32 %v13688_v18, %v8149_v45  ;;  %v3545_v25 = vpop.f32.mrb[29].mxu0 }
 0x2e7   :  { %v3546_v23 = vadd.f32 %v13688_v18, %v3545_v25  ;;  %v8150_v29 = vpop.f32.mrb[30].mxu0 }
 0x2e8   :  { %9563 = vrot.lane.b32.xlu0 %v9562_v35, %s10082_s14  ;;  %v3718_v57 = vmax.f32 %v3554_v14, 0.0  ;;  %v3557_v46 = vadd.f32 %v13688_v18, %v8150_v29  ;;  %v3548_v55 = vpop.f32.mrb[31].mxu0 }
 0x2e9   :  { %v3716_v11 = vmax.f32 %v3546_v23, 0.0  ;;  %v3549_v7 = vadd.f32 %v13688_v18, %v3548_v55 }
 0x2ea   :  { %v3719_v54 = vmax.f32 %v3557_v46, 0.0 }
 0x2eb   :  { %v3766_v0 = vmax.f32 %v3716_v11, %v3718_v57  ;;  %v3717_v6 = vmax.f32 %v3549_v7, 0.0 }
 0x2ed   :  { %v3807_v16 = vrot.slane %v3766_v0, 1  ;;  %v3767_v39 = vmax.f32 %v3717_v6, %v3719_v54 }
 0x2ef   :  { %v3839_v62 = vmax.f32 %v3766_v0, %v3807_v16  ;;  %v3871_v1 = vrot.slane %v3767_v39, 1 }
 0x2f1   :  { %v3935_v60 = vrot.slane %v3839_v62, 1  ;;  %v3967_v20 = vrot.slane %v3839_v62, 2  ;;  %v3903_v53 = vmax.f32 %v3767_v39, %v3871_v1  ;;  %v3999_v59 = vrot.slane %v3839_v62, 3 }
 0x2f2   :  { %v8153_v40 = vpop.f32.mrb[32].mxu0 }
 0x2f3   :  { %v3561_v19 = vpop.f32.mrb[33].mxu0  ;;  %v3570_v24 = vadd.f32 %v13688_v18, %v8153_v40  ;;  %v4176_v32 = vsel %vm4168_vm14, %v3839_v62, %v3935_v60  ;;  %v4047_v48 = vrot.slane %v3903_v53, 4  ;;  %v4079_v26 = vrot.slane %v3903_v53, 5 }
 0x2f4   :  { %v3562_v21 = vadd.f32 %v13688_v18, %v3561_v19  ;;  %v8154_v4 = vpop.f32.mrb[34].mxu0  ;;  %v4192_v27 = vsel %vm174_vm0, %v4176_v32, %v3967_v20  ;;  %v4111_v13 = vrot.slane %v3903_v53, 6  ;;  %v4143_v35 = vrot.slane %v3903_v53, 7 }
 0x2f5   :  { %v3564_v22 = vpop.f32.mrb[35].mxu0  ;;  %v3722_v56 = vmax.f32 %v3570_v24, 0.0  ;;  %v4209_v31 = vsel %vm4201_vm15, %v4192_v27, %v3999_v59  ;;  %v3573_v5 = vadd.f32 %v13688_v18, %v8154_v4 }
 0x2f6   :  { %v3720_v36 = vmax.f32 %v3562_v21, 0.0  ;;  %v3565_v44 = vadd.f32 %v13688_v18, %v3564_v22  ;;  %v4225_v10 = vsel %vm1570_vm4, %v4209_v31, %v4047_v48 }
 0x2f7   :  { %v4241_v45 = vsel %vm1212_vm3, %v4225_v10, %v4079_v26  ;;  %v3723_v14 = vmax.f32 %v3573_v5, 0.0 }
 0x2f8   :  { %v3768_v30 = vmax.f32 %v3720_v36, %v3722_v56  ;;  %v3721_v25 = vmax.f32 %v3565_v44, 0.0  ;;  %v4257_v23 = vsel %vm854_vm1, %v4241_v45, %v4111_v13  ;;  %v9526_v44 = vunpack.i.h.bf16 %v13760_v49 }
 0x2f9   :  { %v13828_v57 = vsel %vm496_vm2, %v4257_v23, %v4143_v35  ;;  %v9531_v45 = vunpack.i.h.bf16 %v13765_v38 }
 0x2fa   :  { %v3808_v29 = vrot.slane %v3768_v30, 1  ;;  %v3769_v46 = vmax.f32 %v3721_v25, %v3723_v14  ;;  %v4760_v25 = vsel %vm4756_vm5, %v13561_v52, %v9526_v44 }
 0x2fc   :  { %v3840_v55 = vmax.f32 %v3768_v30, %v3808_v29  ;;  %v3872_v11 = vrot.slane %v3769_v46, 1 }
 0x2fe   :  { %v3936_v7 = vrot.slane %v3840_v55, 1  ;;  %v3968_v54 = vrot.slane %v3840_v55, 2  ;;  %v3904_v0 = vmax.f32 %v3769_v46, %v3872_v11  ;;  %v4000_v6 = vrot.slane %v3840_v55, 3 }
 0x2ff   :  { %v9536_v46 = vunpack.i.h.bf16 %v13775_v61 }
 0x300   :  { %v4177_v16 = vsel %vm4168_vm14, %v3840_v55, %v3936_v7  ;;  %v4048_v62 = vrot.slane %v3904_v0, 4  ;;  %v4080_v40 = vrot.slane %v3904_v0, 5  ;;  %v4112_v60 = vrot.slane %v3904_v0, 6 }
 0x301   :  { %v4193_v39 = vsel %vm174_vm0, %v4177_v16, %v3968_v54  ;;  %v4144_v19 = vrot.slane %v3904_v0, 7  ;;  %v4778_v54 = vsel %vm4774_vm6, %v4760_v25, %v9531_v45 }
 0x302   :  { %v4210_v1 = vsel %vm4201_vm15, %v4193_v39, %v4000_v6  ;;  %v8157_v53 = vpop.f32.mrb[36].mxu0  ;;  %v13855_v39 = vsel %vm4792_vm7, %v4778_v54, %v9536_v46 }
 0x303   :  { %v4226_v20 = vsel %vm1570_vm4, %v4210_v1, %v4048_v62  ;;  %v3586_v21 = vadd.f32 %v13688_v18, %v8157_v53  ;;  %v3577_v4 = vpop.f32.mrb[37].mxu0 }
 0x304   :  { %v4242_v24 = vsel %vm1212_vm3, %v4226_v20, %v4080_v40  ;;  %v3578_v32 = vadd.f32 %v13688_v18, %v3577_v4  ;;  %v8158_v48 = vpop.f32.mrb[38].mxu0 }
 0x305   :  { %v4258_v59 = vsel %vm854_vm1, %v4242_v24, %v4112_v60  ;;  %v3726_v27 = vmax.f32 %v3586_v21, 0.0  ;;  %v3589_v56 = vadd.f32 %v13688_v18, %v8158_v48  ;;  %v3580_v36 = vpop.f32.mrb[39].mxu0 }
 0x306   :  { %v4274_v22 = vsel %vm496_vm2, %v4258_v59, %v4144_v19  ;;  %v3724_v31 = vmax.f32 %v3578_v32, 0.0  ;;  %v3581_v26 = vadd.f32 %v13688_v18, %v3580_v36 }
 0x307   :  { %v3727_v5 = vmax.f32 %v3589_v56, 0.0  ;;  %v4306_v14 = vrot.slane %v4274_v22, 6 }
 0x308   :  { %v3770_v13 = vmax.f32 %v3724_v31, %v3726_v27  ;;  %v3725_v10 = vmax.f32 %v3581_v26, 0.0 }
 0x309   :  { %v13848_v49 = vsel %vm174_vm0, 0.0, %v4306_v14  ;;  %v13852_v16 = vsel %vm174_vm0, %v4306_v14, 0.0 }
 0x30a   :  { %v3809_v30 = vrot.slane %v3770_v13, 1  ;;  %v3771_v35 = vmax.f32 %v3725_v10, %v3727_v5  ;;  %v4517_v53 = vrot.slane %v13848_v49, 2  ;;  %v4518_v59 = vrot.slane %v13852_v16, 2 }
 0x30c   :  { %v3841_v23 = vmax.f32 %v3770_v13, %v3809_v30  ;;  %v3873_v29 = vrot.slane %v3771_v35, 1  ;;  %v4418_v13 = vrot.slane %v13848_v49, 1 }
 0x30e   :  { %v3937_v55 = vrot.slane %v3841_v23, 1  ;;  %v3969_v11 = vrot.slane %v3841_v23, 2  ;;  %v3905_v7 = vmax.f32 %v3771_v35, %v3873_v29  ;;  %v4001_v0 = vrot.slane %v3841_v23, 3 }
 0x310   :  { %v4178_v6 = vsel %vm4168_vm14, %v3841_v23, %v3937_v55  ;;  %v4049_v38 = vrot.slane %v3905_v7, 4  ;;  %v4081_v40 = vrot.slane %v3905_v7, 5  ;;  %v4113_v19 = vrot.slane %v3905_v7, 6 }
 0x311   :  { %v4194_v61 = vsel %vm174_vm0, %v4178_v6, %v3969_v11  ;;  %v4145_v32 = vrot.slane %v3905_v7, 7  ;;  %v4419_v55 = vrot.slane %v13852_v16, 1  ;;  %v4616_v11 = vrot.slane %v13848_v49, 3 }
 0x312   :  { %v8161_v62 = vpop.f32.mrb[40].mxu0  ;;  %v4211_v1 = vsel %vm4201_vm15, %v4194_v61, %v4001_v0  ;;  %v4617_v7 = vrot.slane %v13852_v16, 3 }
 0x313   :  { %v3602_v60 = vadd.f32 %v13688_v18, %v8161_v62  ;;  %v3593_v20 = vpop.f32.mrb[41].mxu0  ;;  %v4227_v24 = vsel %vm1570_vm4, %v4211_v1, %v4049_v38 }
 0x314   :  { %v3594_v21 = vadd.f32 %v13688_v18, %v3593_v20  ;;  %v8162_v4 = vpop.f32.mrb[42].mxu0  ;;  %v4243_v48 = vsel %vm1212_vm3, %v4227_v24, %v4081_v40  ;;  %v9544_v5 = vpop.permute.xlu0 %9543 }
 0x315   :  { %v3730_v22 = vmax.f32 %v3602_v60, 0.0  ;;  %v3605_v27 = vadd.f32 %v13688_v18, %v8162_v4  ;;  %v3596_v56 = vpop.f32.mrb[43].mxu0  ;;  %v4259_v36 = vsel %vm854_vm1, %v4243_v48, %v4113_v19  ;;  %v9539_v44 = vpop.permute.xlu1 %9538  ;;  %v9546_v35 = vunpack.i.h.bf16 %v9544_v5 }
 0x316   :  { %v3728_v31 = vmax.f32 %v3594_v21, 0.0  ;;  %v3597_v26 = vadd.f32 %v13688_v18, %v3596_v56  ;;  %v4275_v10 = vsel %vm496_vm2, %v4259_v36, %v4145_v32  ;;  %v9545_v45 = vunpack.i.l.bf16 %v9544_v5 }
 0x317   :  { %v3731_v30 = vmax.f32 %v3605_v27, 0.0  ;;  %v4307_v14 = vrot.slane %v4275_v10, 6  ;;  %v9541_v29 = vunpack.i.h.bf16 %v9539_v44  ;;  %v9540_v46 = vunpack.i.l.bf16 %v9539_v44 }
 0x318   :  { %v3772_v25 = vmax.f32 %v3728_v31, %v3730_v22  ;;  %v3729_v23 = vmax.f32 %v3597_v26, 0.0  ;;  %v4519_v31 = vsel %vm854_vm1, %v4517_v53, %v4518_v59 }
 0x319   :  { %v4762_v6 = vsel %vm4756_vm5, %v13715_v50, %v9541_v29  ;;  %v9549_v38 = vpop.permute.xlu1 %9548  ;;  %v13876_v61 = vsel %vm174_vm0, 0.0, %v4307_v14  ;;  %v4761_v62 = vsel %vm4756_vm5, %v13704_v28, %v9540_v46  ;;  %v13883_v21 = vsel %vm174_vm0, %v4307_v14, 0.0 }
 0x31a   :  { %v3810_v54 = vrot.slane %v3772_v25, 1  ;;  %v3773_v0 = vmax.f32 %v3729_v23, %v3731_v30  ;;  %v9551_v1 = vunpack.i.h.bf16 %v9549_v38  ;;  %v9550_v40 = vunpack.i.l.bf16 %v9549_v38 }
 0x31b   :  { %v4780_v60 = vsel %vm4774_vm6, %v4762_v6, %v9546_v35  ;;  %v4779_v24 = vsel %vm4774_vm6, %v4761_v62, %v9545_v45  ;;  %v4520_v48 = vrot.slane %v13876_v61, 2  ;;  %v4521_v22 = vrot.slane %v13883_v21, 2 }
 0x31c   :  { %v3842_v20 = vmax.f32 %v3772_v25, %v3810_v54  ;;  %v3874_v19 = vrot.slane %v3773_v0, 1  ;;  %v13886_v4 = vsel %vm4792_vm7, %v4779_v24, %v9550_v40  ;;  %v13889_v32 = vsel %vm4792_vm7, %v4780_v60, %v9551_v1 }
 0x31d   :  { %v4522_v26 = vsel %vm854_vm1, %v4520_v48, %v4521_v22  ;;  %v4421_v5 = vrot.slane %v13876_v61, 1  ;;  %v4422_v44 = vrot.slane %v13883_v21, 1  ;;  %v13899_v10 = vpack.c.bf16 %v13886_v4, %v13855_v39 }
 0x31e   :  { %v3938_v27 = vrot.slane %v3842_v20, 1  ;;  %v3970_v56 = vrot.slane %v3842_v20, 2  ;;  %v3906_v36 = vmax.f32 %v3773_v0, %v3874_v19  ;;  %v4002_v30 = vrot.slane %v3842_v20, 3 }
 0x31f   :  { %v4420_v14 = vsel %vm496_vm2, %v4418_v13, %v4419_v55  ;;  %v9572_v53 = vpack.i.bf16 %v4522_v26, %v4519_v31  ;;  %v4423_v59 = vsel %vm496_vm2, %v4421_v5, %v4422_v44  ;;  %5898 = vmatprep.mubr.bf16.mxu0 %v13899_v10  ;;  %v4619_v54 = vrot.slane %v13876_v61, 3 }
 0x320   :  { %v4179_v35 = vsel %vm4168_vm14, %v3842_v20, %v3938_v27  ;;  %v4050_v45 = vrot.slane %v3906_v36, 4  ;;  %v4082_v23 = vrot.slane %v3906_v36, 5  ;;  %v9567_v46 = vpack.i.bf16 %v4423_v59, %v4420_v14 }
 0x321   :  { %v4195_v25 = vsel %vm174_vm0, %v4179_v35, %v3970_v56  ;;  %v4620_v0 = vrot.slane %v13883_v21, 3  ;;  %v4114_v6 = vrot.slane %v3906_v36, 6  ;;  %9573 = vrot.lane.b32.xlu0 %v9572_v53, %s10080_s21  ;;  %v4618_v55 = vsel %vm1212_vm3, %v4616_v11, %v4617_v7 }
 0x322   :  { %v4212_v29 = vsel %vm4201_vm15, %v4195_v25, %v4002_v30  ;;  %v8165_v13 = vpop.f32.mrb[44].mxu0  ;;  %v4146_v62 = vrot.slane %v3906_v36, 7  ;;  %9568 = vrot.lane.b32.xlu1 %v9567_v46, %s10081_s26 }
 0x323   :  { %v4228_v38 = vsel %vm1570_vm4, %v4212_v29, %v4050_v45  ;;  %v3618_v40 = vadd.f32 %v13688_v18, %v8165_v13  ;;  %v3609_v60 = vpop.f32.mrb[45].mxu0  ;;  %v4621_v20 = vsel %vm1212_vm3, %v4619_v54, %v4620_v0 }
 0x324   :  { %v4244_v1 = vsel %vm1212_vm3, %v4228_v38, %v4082_v23  ;;  %v3610_v24 = vadd.f32 %v13688_v18, %v3609_v60  ;;  %v9577_v48 = vpack.i.bf16 %v4621_v20, %v4618_v55  ;;  %v8166_v22 = vpop.f32.mrb[46].mxu0 }
 0x325   :  { %v4260_v19 = vsel %vm854_vm1, %v4244_v1, %v4114_v6  ;;  %v3734_v56 = vmax.f32 %v3618_v40, 0.0  ;;  %v3621_v11 = vadd.f32 %v13688_v18, %v8166_v22  ;;  %v3612_v7 = vpop.f32.mrb[47].mxu0 }
 0x326   :  { %v4276_v27 = vsel %vm496_vm2, %v4260_v19, %v4146_v62  ;;  %v3732_v36 = vmax.f32 %v3610_v24, 0.0  ;;  %v3613_v31 = vadd.f32 %v13688_v18, %v3612_v7  ;;  %9578 = vrot.lane.b32.xlu1 %v9577_v48, %s10082_s14 }
 0x327   :  { %v3735_v26 = vmax.f32 %v3621_v11, 0.0  ;;  %v4308_v25 = vrot.slane %v4276_v27, 6 }
 0x328   :  { %v3774_v5 = vmax.f32 %v3732_v36, %v3734_v56  ;;  %v3733_v44 = vmax.f32 %v3613_v31, 0.0 }
 0x329   :  { %v13927_v1 = vsel %vm174_vm0, 0.0, %v4308_v25  ;;  %v13932_v24 = vsel %vm174_vm0, %v4308_v25, 0.0 }
 0x32a   :  { %v3811_v30 = vrot.slane %v3774_v5, 1  ;;  %v3775_v35 = vmax.f32 %v3733_v44, %v3735_v26  ;;  %16081 = vst [vmem:[#allocation24_spill] sm:$0xff] %v13932_v24  ;;  %v4424_v44 = vrot.slane %v13927_v1, 1  ;;  %v4523_v25 = vrot.slane %v13927_v1, 2 }
 0x32c   :  { %v3843_v45 = vmax.f32 %v3774_v5, %v3811_v30  ;;  %v3875_v14 = vrot.slane %v3775_v35, 1 }
 0x32e   :  { %v3939_v23 = vrot.slane %v3843_v45, 1  ;;  %v3971_v53 = vrot.slane %v3843_v45, 2  ;;  %v3907_v59 = vmax.f32 %v3775_v35, %v3875_v14  ;;  %v4003_v29 = vrot.slane %v3843_v45, 3 }
 0x32f   :  { %v4425_v14 = vrot.slane %v13932_v24, 1 }
 0x330   :  { %v4180_v46 = vsel %vm4168_vm14, %v3843_v45, %v3939_v23  ;;  %v4051_v54 = vrot.slane %v3907_v59, 4  ;;  %v4083_v13 = vrot.slane %v3907_v59, 5  ;;  %v4115_v40 = vrot.slane %v3907_v59, 6 }
 0x331   :  { %v4196_v0 = vsel %vm174_vm0, %v4180_v46, %v3971_v53  ;;  %v4147_v48 = vrot.slane %v3907_v59, 7  ;;  %v4524_v23 = vrot.slane %v13932_v24, 2  ;;  %v4622_v53 = vrot.slane %v13927_v1, 3 }
 0x332   :  { %v8169_v6 = vpop.f32.mrb[48].mxu0  ;;  %v4213_v38 = vsel %vm4201_vm15, %v4196_v0, %v4003_v29  ;;  %v4623_v59 = vrot.slane %v13932_v24, 3 }
 0x333   :  { %v3634_v55 = vadd.f32 %v13688_v18, %v8169_v6  ;;  %v3625_v62 = vpop.f32.mrb[49].mxu0  ;;  %v4229_v60 = vsel %vm1570_vm4, %v4213_v38, %v4051_v54 }
 0x334   :  { %v3626_v20 = vadd.f32 %v13688_v18, %v3625_v62  ;;  %v8170_v19 = vpop.f32.mrb[50].mxu0  ;;  %v4245_v22 = vsel %vm1212_vm3, %v4229_v60, %v4083_v13 }
 0x335   :  { %v3738_v27 = vmax.f32 %v3634_v55, 0.0  ;;  %v3637_v56 = vadd.f32 %v13688_v18, %v8170_v19  ;;  %v3628_v11 = vpop.f32.mrb[51].mxu0  ;;  %v4261_v7 = vsel %vm854_vm1, %v4245_v22, %v4115_v40  ;;  %v4426_v19 = vsel %vm496_vm2, %v4424_v44, %v4425_v14 }
 0x336   :  { %v3736_v36 = vmax.f32 %v3626_v20, 0.0  ;;  %v3629_v31 = vadd.f32 %v13688_v18, %v3628_v11  ;;  %v4277_v26 = vsel %vm496_vm2, %v4261_v7, %v4147_v48  ;;  %v4525_v7 = vsel %vm854_vm1, %v4523_v25, %v4524_v23 }
 0x337   :  { %v3739_v5 = vmax.f32 %v3637_v56, 0.0  ;;  %v4309_v30 = vrot.slane %v4277_v26, 6  ;;  %v4624_v44 = vsel %vm1212_vm3, %v4622_v53, %v4623_v59 }
 0x338   :  { %v3776_v35 = vmax.f32 %v3736_v36, %v3738_v27  ;;  %v3737_v45 = vmax.f32 %v3629_v31, 0.0 }
 0x339   :  { %v13946_v54 = vsel %vm174_vm0, 0.0, %v4309_v30  ;;  %v13949_v0 = vsel %vm174_vm0, %v4309_v30, 0.0 }
 0x33a   :  { %v3812_v29 = vrot.slane %v3776_v35, 1  ;;  %v3777_v46 = vmax.f32 %v3737_v45, %v3739_v5  ;;  %16082 = vst [vmem:[#allocation10_spill] sm:$0xff] %v13949_v0  ;;  %v4427_v6 = vrot.slane %v13946_v54, 1  ;;  %v4428_v38 = vrot.slane %v13949_v0, 1 }
 0x33b   :  { %v4526_v13 = vrot.slane %v13946_v54, 2  ;;  %v4527_v55 = vrot.slane %v13949_v0, 2  ;;  %v4625_v60 = vrot.slane %v13946_v54, 3  ;;  %v4626_v20 = vrot.slane %v13949_v0, 3 }
 0x33c   :  { %v3844_v62 = vmax.f32 %v3776_v35, %v3812_v29  ;;  %v3876_v40 = vrot.slane %v3777_v46, 1  ;;  %v4429_v48 = vsel %vm496_vm2, %v4427_v6, %v4428_v38 }
 0x33d   :  { %v4528_v22 = vsel %vm854_vm1, %v4526_v13, %v4527_v55  ;;  %v9582_v36 = vpack.i.bf16 %v4429_v48, %v4426_v19  ;;  %v4627_v26 = vsel %vm1212_vm3, %v4625_v60, %v4626_v20 }
 0x33e   :  { %v3940_v27 = vrot.slane %v3844_v62, 1  ;;  %v3972_v56 = vrot.slane %v3844_v62, 2  ;;  %v3908_v11 = vmax.f32 %v3777_v46, %v3876_v40  ;;  %v9587_v31 = vpack.i.bf16 %v4528_v22, %v4525_v7 }
 0x33f   :  { %v4004_v5 = vrot.slane %v3844_v62, 3  ;;  %9583 = vrot.lane.b32.xlu0 %v9582_v36, %s10081_s26  ;;  %v9592_v23 = vpack.i.bf16 %v4627_v26, %v4624_v44 }
 0x340   :  { %v4181_v30 = vsel %vm4168_vm14, %v3844_v62, %v3940_v27  ;;  %v4052_v35 = vrot.slane %v3908_v11, 4  ;;  %v8173_v45 = vpop.f32.mrb[52].mxu0  ;;  %9588 = vrot.lane.b32.xlu1 %v9587_v31, %s10080_s21  ;;  %v4084_v6 = vrot.slane %v3908_v11, 5  ;;  %v4116_v55 = vrot.slane %v3908_v11, 6 }
 0x341   :  { %v4197_v14 = vsel %vm174_vm0, %v4181_v30, %v3972_v56  ;;  %v3650_v29 = vadd.f32 %v13688_v18, %v8173_v45  ;;  %v3641_v25 = vpop.f32.mrb[53].mxu0  ;;  %v4148_v60 = vrot.slane %v3908_v11, 7  ;;  %v9914_v11 = vld [vmem:[%s15642_s3 + $0x40] sm:$0xff]  }
 0x342   :  { %v4214_v46 = vsel %vm4201_vm15, %v4197_v14, %v4004_v5  ;;  %v3642_v38 = vadd.f32 %v13688_v18, %v3641_v25  ;;  %v8174_v13 = vpop.f32.mrb[54].mxu0  ;;  %v9915_v5 = vld [vmem:[%s15642_s3] sm:$0xff]   ;;  %7767 = vmatprep.subr.bf16.mxu1 %v9914_v11 }
 0x343   :  { %v4230_v62 = vsel %vm1570_vm4, %v4214_v46, %v4052_v35  ;;  %v3742_v53 = vmax.f32 %v3650_v29, 0.0  ;;  %v3653_v59 = vadd.f32 %v13688_v18, %v8174_v13  ;;  %v3644_v40 = vpop.f32.mrb[55].mxu0  ;;  %9593 = vrot.lane.b32.xlu0 %v9592_v23, %s10082_s14  ;;  %7768 = vmatpush3.bf16.msra.mxu1 %v9915_v5 }
 0x344   :  { %v4246_v20 = vsel %vm1212_vm3, %v4230_v62, %v4084_v6  ;;  %v3740_v19 = vmax.f32 %v3642_v38, 0.0  ;;  %v3645_v48 = vadd.f32 %v13688_v18, %v3644_v40  ;;  %v4305_v40 = vrot.slane %v13828_v57, 6 }
 0x345   :  { %v4262_v22 = vsel %vm854_vm1, %v4246_v20, %v4116_v55  ;;  %v3743_v27 = vmax.f32 %v3653_v59, 0.0  ;;  %v9511_v55 = vunpack.i.h.bf16 %v13752_v41 }
 0x346   :  { %v4278_v56 = vsel %vm496_vm2, %v4262_v22, %v4148_v60  ;;  %v3778_v7 = vmax.f32 %v3740_v19, %v3742_v53  ;;  %v3741_v36 = vmax.f32 %v3645_v48, 0.0  ;;  %v9510_v22 = vunpack.i.l.bf16 %v13752_v41 }
 0x347   :  { %v4310_v6 = vrot.slane %v4278_v56, 6  ;;  %v14005_v5 = vsel %vm4756_vm5, %v13344_v3, %v9511_v55 }
 0x348   :  { %v3813_v31 = vrot.slane %v3778_v7, 1  ;;  %v3779_v26 = vmax.f32 %v3741_v36, %v3743_v27 }
 0x349   :  { %v13998_v57 = vsel %vm174_vm0, 0.0, %v4310_v6  ;;  %v14001_v11 = vsel %vm174_vm0, %v4310_v6, 0.0 }
 0x34a   :  { %v3845_v30 = vmax.f32 %v3778_v7, %v3813_v31  ;;  %v3877_v35 = vrot.slane %v3779_v26, 1  ;;  %16083 = vst [vmem:[#allocation11_spill] sm:$0xff] %v14001_v11  ;;  %v4530_v6 = vrot.slane %v14001_v11, 2 }
 0x34c   :  { %v3941_v45 = vrot.slane %v3845_v30, 1  ;;  %v3973_v44 = vrot.slane %v3845_v30, 2  ;;  %v3909_v14 = vmax.f32 %v3779_v26, %v3877_v35  ;;  %v4005_v29 = vrot.slane %v3845_v30, 3 }
 0x34e   :  { %v4182_v25 = vsel %vm4168_vm14, %v3845_v30, %v3941_v45  ;;  %v4053_v23 = vrot.slane %v3909_v14, 4  ;;  %v4085_v13 = vrot.slane %v3909_v14, 5  ;;  %v4117_v62 = vrot.slane %v3909_v14, 6 }
 0x34f   :  { %v4198_v46 = vsel %vm174_vm0, %v4182_v25, %v3973_v44  ;;  %v4149_v60 = vrot.slane %v3909_v14, 7  ;;  %v14013_v25 = vsel %vm174_vm0, %v4305_v40, 0.0 }
 0x350   :  { %v4215_v38 = vsel %vm4201_vm15, %v4198_v46, %v4005_v29  ;;  %v14010_v29 = vsel %vm174_vm0, 0.0, %v4305_v40  ;;  %v4529_v46 = vrot.slane %v13998_v57, 2 }
 0x351   :  { %v4231_v53 = vsel %vm1570_vm4, %v4215_v38, %v4053_v23  ;;  %v4430_v38 = vrot.slane %v13998_v57, 1 }
 0x352   :  { %v4247_v20 = vsel %vm1212_vm3, %v4231_v53, %v4085_v13  ;;  %v8177_v19 = vpop.f32.mrb[56].mxu0 }
 0x353   :  { %v4263_v27 = vsel %vm854_vm1, %v4247_v20, %v4117_v62  ;;  %v3666_v56 = vadd.f32 %v13688_v18, %v8177_v19  ;;  %v3657_v7 = vpop.f32.mrb[57].mxu0  ;;  %v4629_v20 = vrot.slane %v14001_v11, 3  ;;  %v9916_v19 = vld [vmem:[%s15642_s3 + $0x48] sm:$0xff]  }
 0x354   :  { %v4279_v36 = vsel %vm496_vm2, %v4263_v27, %v4149_v60  ;;  %v3658_v31 = vadd.f32 %v13688_v18, %v3657_v7  ;;  %v8178_v26 = vpop.f32.mrb[58].mxu0  ;;  %v4628_v60 = vrot.slane %v13998_v57, 3  ;;  %v9917_v27 = vld [vmem:[%s15642_s3 + $0x8] sm:$0xff]   ;;  %7769 = vmatprep.subr.bf16.mxu1 %v9916_v19 }
 0x355   :  { %v4311_v41 = vrot.slane %v4279_v36, 6  ;;  %v3746_v30 = vmax.f32 %v3666_v56, 0.0  ;;  %v3669_v35 = vadd.f32 %v13688_v18, %v8178_v26  ;;  %v3660_v45 = vpop.f32.mrb[59].mxu0  ;;  %v14035_v56 = vsel %vm4756_vm5, 0.0, %v9510_v22  ;;  %7770 = vmatpush3.bf16.msra.mxu1 %v9917_v27 }
 0x356   :  { %v3744_v44 = vmax.f32 %v3658_v31, 0.0  ;;  %v3661_v14 = vadd.f32 %v13688_v18, %v3660_v45  ;;  %v4431_v18 = vrot.slane %v14001_v11, 1 }
 0x357   :  { %v3747_v23 = vmax.f32 %v3669_v35, 0.0  ;;  %v14019_v62 = vsel %vm174_vm0, 0.0, %v4311_v41  ;;  %v14023_v53 = vsel %vm174_vm0, %v4311_v41, 0.0 }
 0x358   :  { %v3780_v13 = vmax.f32 %v3744_v44, %v3746_v30  ;;  %v3745_v55 = vmax.f32 %v3661_v14, 0.0  ;;  %16084 = vst [vmem:[#allocation12_spill] sm:$0xff] %v14023_v53  ;;  %v4532_v40 = vrot.slane %v14019_v62, 2  ;;  %v4533_v26 = vrot.slane %v14023_v53, 2 }
 0x359   :  { %v4433_v41 = vrot.slane %v14019_v62, 1  ;;  %v4531_v14 = vsel %vm854_vm1, %v4529_v46, %v4530_v6  ;;  %v4434_v22 = vrot.slane %v14023_v53, 1  ;;  %v4631_v30 = vrot.slane %v14019_v62, 3  ;;  %v9919_v46 = vld [vmem:[%s15642_s3 + $0x10] sm:$0xff]   ;;  %v9920_v6 = vld [vmem:[%s15642_s3 + $0x58] sm:$0xff]  }
 0x35a   :  { %v3814_v36 = vrot.slane %v3780_v13, 1  ;;  %v3781_v31 = vmax.f32 %v3745_v55, %v3747_v23  ;;  %v4534_v7 = vsel %vm854_vm1, %v4532_v40, %v4533_v26  ;;  %v4432_v23 = vsel %vm496_vm2, %v4430_v38, %v4431_v18 }
 0x35b   :  { %v14047_v55 = vsel %vm1212_vm3, %v4628_v60, %v4629_v20  ;;  %v4632_v60 = vrot.slane %v14023_v53, 3  ;;  %v10045_v20 = vld [vmem:[%s15641_s2] ss:$0 sm:$0xff]  ;;  %v9602_v26 = vpack.i.bf16 %v4534_v7, %v4531_v14  ;;  %v4435_v35 = vsel %vm496_vm2, %v4433_v41, %v4434_v22 }
 0x35c   :  { %v3846_v45 = vmax.f32 %v3780_v13, %v3814_v36  ;;  %v3878_v44 = vrot.slane %v3781_v31, 1  ;;  %v8181_v59 = vpop.f32.mrb[60].mxu0  ;;  %v9918_v13 = vld [vmem:[%s15642_s3 + $0x50] sm:$0xff]   ;;  %v9922_v41 = vld [vmem:[%s15642_s3 + $0x60] sm:$0xff]   ;;  %v9597_v14 = vpack.i.bf16 %v4435_v35, %v4432_v23  ;;  %v14093_v35 = vpop.permute.xlu0 %9553 }
 0x35d   :  { %v3673_v18 = vpop.f32.mrb[61].mxu0  ;;  %v3682_v27 = vadd.f32 %v10045_v20, %v8181_v59  ;;  %7771 = vmatprep.subr.bf16.mxu1 %v9918_v13  ;;  %9603 = vrot.lane.b32.xlu0 %v9602_v26, %s10080_s21 }
 0x35e   :  { %v3942_v40 = vrot.slane %v3846_v45, 1  ;;  %v3974_v19 = vrot.slane %v3846_v45, 2  ;;  %v3910_v38 = vmax.f32 %v3781_v31, %v3878_v44  ;;  %v3674_v36 = vadd.f32 %v10045_v20, %v3673_v18  ;;  %v8182_v48 = vpop.f32.mrb[62].mxu0  ;;  %7772 = vmatpush3.bf16.msra.mxu1 %v9919_v46  ;;  %v9921_v44 = vld [vmem:[%s15642_s3 + $0x18] sm:$0xff]   ;;  %9598 = vrot.lane.b32.xlu1 %v9597_v14, %s10081_s26 }
 0x35f   :  { %v4006_v37 = vrot.slane %v3846_v45, 3  ;;  %v3676_v31 = vpop.f32.mrb[63].mxu0  ;;  %v3750_v18 = vmax.f32 %v3682_v27, 0.0  ;;  %7773 = vmatprep.subr.bf16.mxu1 %v9920_v6  ;;  %v3685_v22 = vadd.f32 %v10045_v20, %v8182_v48  ;;  %v16085_v48 = vunpack.i.l.bf16 %v13754_v42 }
 0x360   :  { %v4183_v33 = vsel %vm4168_vm14, %v3846_v45, %v3942_v40  ;;  %v4054_v11 = vrot.slane %v3910_v38, 4  ;;  %v4086_v0 = vrot.slane %v3910_v38, 5  ;;  %v4118_v59 = vrot.slane %v3910_v38, 6 }
 0x361   :  { %v4199_v53 = vsel %vm174_vm0, %v4183_v33, %v3974_v19  ;;  %v3748_v7 = vmax.f32 %v3674_v36, 0.0  ;;  %v3677_v13 = vadd.f32 %v10045_v20, %v3676_v31  ;;  %v4150_v46 = vrot.slane %v3910_v38, 7 }
 0x362   :  { %v4216_v45 = vsel %vm4201_vm15, %v4199_v53, %v4006_v37  ;;  %v4633_v33 = vsel %vm1212_vm3, %v4631_v30, %v4632_v60  ;;  %v3751_v6 = vmax.f32 %v3685_v22, 0.0  ;;  %7774 = vmatpush3.bf16.msra.mxu1 %v9921_v44  ;;  %v9923_v37 = vld [vmem:[%s15642_s3 + $0x20] sm:$0xff]   ;;  %v16086_v53 = vunpack.i.h.bf16 %v13754_v42  ;;  %v14105_v60 = vpop.permute.xlu1 %9558 }
 0x363   :  { %v4232_v40 = vsel %vm1570_vm4, %v4216_v45, %v4054_v11  ;;  %v3782_v24 = vmax.f32 %v3748_v7, %v3750_v18  ;;  %v3749_v27 = vmax.f32 %v3677_v13, 0.0  ;;  %v9607_v36 = vpack.i.bf16 %v4633_v33, %v14047_v55  ;;  %7775 = vmatprep.subr.bf16.mxu1 %v9922_v41  ;;  %v9924_v55 = vld [vmem:[%s15642_s3 + $0x68] sm:$0xff]   ;;  %v9926_v33 = vld [vmem:[%s15642_s3 + $0x70] sm:$0xff]  }
 0x364   :  { %v4248_v19 = vsel %vm1212_vm3, %v4232_v40, %v4086_v0  ;;  %v4775_v11 = vsel %vm4774_vm6, %v14035_v56, %v16085_v48  ;;  %v14090_v0 = vsel %vm4774_vm6, %v14005_v5, %v16086_v53  ;;  %v9521_v38 = vunpack.i.h.bf16 %v13756_v2 }
 0x365   :  { %v4264_v30 = vsel %vm854_vm1, %v4248_v19, %v4118_v59  ;;  %v3815_v23 = vrot.slane %v3782_v24, 1  ;;  %v16087_v56 = vunpack.i.l.bf16 %v13756_v2  ;;  %v3783_v20 = vmax.f32 %v3749_v27, %v3751_v6  ;;  %9608 = vrot.lane.b32.xlu1 %v9607_v36, %s10082_s14 }
 0x366   :  { %v4280_v5 = vsel %vm496_vm2, %v4264_v30, %v4150_v46  ;;  %v4613_v44 = vrot.slane %v14010_v29, 3  ;;  %v4614_v59 = vrot.slane %v14013_v25, 3  ;;  %v9556_v18 = vunpack.i.h.bf16 %v14093_v35  ;;  %7776 = vmatpush3.bf16.msra.mxu1 %v9923_v37  ;;  %v9564_v30 = vpop.permute.xlu0 %9563 }
 0x367   :  { %v14102_v42 = vsel %vm4792_vm7, %v4775_v11, %v16087_v56  ;;  %v4312_v26 = vrot.slane %v4280_v5, 6  ;;  %v3847_v31 = vmax.f32 %v3782_v24, %v3815_v23  ;;  %v9555_v7 = vunpack.i.l.bf16 %v14093_v35  ;;  %v9925_v24 = vld [vmem:[%s15642_s3 + $0x28] sm:$0xff]   ;;  %7777 = vmatprep.subr.bf16.mxu1 %v9924_v55 }
 0x368   :  { %v3879_v41 = vrot.slane %v3783_v20, 1  ;;  %v16088_v2 = vrot.slane %v14013_v25, 2  ;;  %v16089_v45 = vrot.slane %v14010_v29, 2  ;;  %v9560_v22 = vunpack.i.l.bf16 %v14105_v60 }
 0x369   :  { %v3943_v13 = vrot.slane %v3847_v31, 1  ;;  %v3975_v46 = vrot.slane %v3847_v31, 2  ;;  %v14122_v40 = vsel %vm174_vm0, 0.0, %v4312_v26  ;;  %v14128_v6 = vsel %vm174_vm0, %v4312_v26, 0.0 }
 0x36a   :  { %v4516_v14 = vsel %vm854_vm1, %v16089_v45, %v16088_v2  ;;  %v3911_v19 = vmax.f32 %v3783_v20, %v3879_v41  ;;  %v4535_v27 = vrot.slane %v14122_v40, 2  ;;  %v4436_v36 = vrot.slane %v14122_v40, 1  ;;  %7778 = vmatpush3.bf16.msra.mxu1 %v9925_v24  ;;  %v9928_v24 = vld [vmem:[%s15642_s3 + $0x78] sm:$0xff]  }
 0x36b   :  { %v4007_v37 = vrot.slane %v3847_v31, 3  ;;  %v4184_v48 = vsel %vm4168_vm14, %v3847_v31, %v3943_v13  ;;  %v4536_v11 = vrot.slane %v14128_v6, 2  ;;  %v4437_v53 = vrot.slane %v14128_v6, 1  ;;  %7779 = vmatprep.subr.bf16.mxu1 %v9926_v33  ;;  %v9927_v31 = vld [vmem:[%s15642_s3 + $0x30] sm:$0xff]  }
 0x36c   :  { %v4200_v35 = vsel %vm174_vm0, %v4184_v48, %v3975_v46  ;;  %v4055_v23 = vrot.slane %v3911_v19, 4  ;;  %v4087_v55 = vrot.slane %v3911_v19, 5  ;;  %v4634_v56 = vrot.slane %v14122_v40, 3 }
 0x36d   :  { %v4217_v5 = vsel %vm4201_vm15, %v4200_v35, %v4007_v37  ;;  %v4119_v20 = vrot.slane %v3911_v19, 6  ;;  %v4537_v26 = vsel %vm854_vm1, %v4535_v27, %v4536_v11  ;;  %v4438_v41 = vsel %vm496_vm2, %v4436_v36, %v4437_v53 }
 0x36e   :  { %v4233_v2 = vsel %vm1570_vm4, %v4217_v5, %v4055_v23  ;;  %v9617_v45 = vpack.i.bf16 %v4516_v14, %v4537_v26  ;;  %v9612_v13 = vpack.i.bf16 %v14102_v42, %v4438_v41  ;;  %v4635_v46 = vrot.slane %v14128_v6, 3  ;;  %7780 = vmatpush3.bf16.msra.mxu1 %v9927_v31 }
 0x36f   :  { %v4763_v27 = vsel %vm4756_vm5, %v13771_v9, %v9555_v7  ;;  %v9565_v36 = vunpack.i.l.bf16 %v9564_v30  ;;  %v4151_v33 = vrot.slane %v3911_v19, 7  ;;  %v4249_v37 = vsel %vm1212_vm3, %v4233_v2, %v4087_v55  ;;  %v9929_v19 = vld [vmem:[%s15642_s3 + $0x38] sm:$0xff]   ;;  %7781 = vmatprep.subr.bf16.mxu1 %v9928_v24 }
 0x370   :  { %v4265_v48 = vsel %vm854_vm1, %v4249_v37, %v4119_v20  ;;  %9618 = vrot.lane.b32.xlu1 %v9617_v45, %s10080_s21  ;;  %9613 = vrot.lane.b32.xlu0 %v9612_v13, %s10081_s26  ;;  %v4615_v14 = vsel %vm1212_vm3, %v4613_v44, %v4614_v59  ;;  %v4636_v11 = vsel %vm1212_vm3, %v4634_v56, %v4635_v46  ;;  %v9561_v23 = vunpack.i.h.bf16 %v14105_v60 }
 0x371   :  { %v14159_v53 = vsel %vm4792_vm7, %v14090_v0, %v9521_v38  ;;  %v4281_v7 = vsel %vm496_vm2, %v4265_v48, %v4151_v33  ;;  %v9622_v35 = vpack.i.bf16 %v4615_v14, %v4636_v11  ;;  %v4781_v55 = vsel %vm4774_vm6, %v4763_v27, %v9560_v22 }
 0x372   :  { %v9627_v44 = vpack.i.bf16 %v13785_v47, %v14159_v53  ;;  %v4764_v0 = vsel %vm4756_vm5, %v13791_v15, %v9556_v18  ;;  %v9566_v38 = vunpack.i.h.bf16 %v9564_v30  ;;  %v14172_v59 = vsel %vm4792_vm7, %v4781_v55, %v9565_v36  ;;  %7782 = vmatpush3.bf16.msra.mxu1 %v9929_v19 }
 0x373   :  { %v4415_v56 = vrot.slane %v14010_v29, 1  ;;  %v4416_v60 = vrot.slane %v14013_v25, 1  ;;  %v4782_v22 = vsel %vm4774_vm6, %v4764_v0, %v9561_v23  ;;  %v14181_v5 = vpack.i.bf16 %v14172_v59, %v13889_v32 }
 0x374   :  { %9628 = vrot.lane.b32.xlu1 %v9627_v44, %s10081_s26  ;;  %9623 = vrot.lane.b32.xlu0 %v9622_v35, %s10082_s14  ;;  %v14185_v18 = vpack.i.bf16 %v13886_v4, %v13855_v39  ;;  %v14188_v30 = vsel %vm4792_vm7, %v4782_v22, %v9566_v38  ;;  %v4313_v41 = vrot.slane %v4281_v7, 6  ;;  %v4715_v48 = vrot.slane %v13848_v49, 4 }
 0x375   :  { %v4417_v20 = vsel %vm496_vm2, %v4415_v56, %v4416_v60  ;;  %v4716_v14 = vrot.slane %v13852_v16, 4 }
 0x376   :  { %v9642_v26 = vpack.i.bf16 %v4417_v20, %v14188_v30  ;;  %v14198_v27 = vsel %vm174_vm0, 0.0, %v4313_v41  ;;  %v14201_v36 = vsel %vm174_vm0, %v4313_v41, 0.0 }
 0x377   :  { %v4538_v19 = vrot.slane %v14198_v27, 2  ;;  %v4539_v23 = vrot.slane %v14201_v36, 2 }
 0x378   :  { %9638 = vrot.lane.b32.xlu1 %v14181_v5, %s10081_s26  ;;  %9633 = vrot.lane.b32.xlu0 %v14185_v18, %s10081_s26 }
 0x379   :  { %v4540_v60 = vsel %vm854_vm1, %v4538_v19, %v4539_v23 }
 0x37a   :  { %v9652_v20 = vpack.i.bf16 %v14159_v53, %v4540_v60  ;;  %v9931_v60 = vld [vmem:[%s15642_s3 + $0x100] sm:$0xff]  }
 0x37c   :  { %9643 = vrot.lane.b32.xlu0 %v9642_v26, %s10081_s26 }
 0x393   :  { %v9574_v31 = vpop.permute.xlu0 %9573 }
 0x394   :  { %v9569_v2 = vpop.permute.xlu1 %9568  ;;  %v9576_v46 = vunpack.i.h.bf16 %v9574_v31  ;;  %v9575_v24 = vunpack.i.l.bf16 %v9574_v31 }
 0x395   :  { %v9571_v45 = vunpack.i.h.bf16 %v9569_v2  ;;  %v9570_v13 = vunpack.i.l.bf16 %v9569_v2 }
 0x397   :  { %v4767_v33 = vsel %vm4756_vm5, %v13876_v61, %v9571_v45  ;;  %v4766_v37 = vsel %vm4756_vm5, %v13848_v49, %v9570_v13  ;;  %v14220_v49 = vsel %vm1570_vm4, %v4715_v48, %v4716_v14  ;;  %v4637_v14 = vrot.slane %v14198_v27, 3 }
 0x398   :  { %v9579_v11 = vpop.permute.xlu1 %9578  ;;  %v4784_v55 = vsel %vm4774_vm6, %v4766_v37, %v9575_v24  ;;  %v4785_v44 = vsel %vm4774_vm6, %v4767_v33, %v9576_v46 }
 0x399   :  { %v9581_v7 = vunpack.i.h.bf16 %v9579_v11  ;;  %v9580_v35 = vunpack.i.l.bf16 %v9579_v11  ;;  %v4638_v11 = vrot.slane %v14201_v36, 3 }
 0x39b   :  { %v14214_v0 = vsel %vm4792_vm7, %v4784_v55, %v9580_v35  ;;  %v14217_v38 = vsel %vm4792_vm7, %v4785_v44, %v9581_v7  ;;  %v4639_v44 = vsel %vm1212_vm3, %v4637_v14, %v4638_v11 }
 0x39c   :  { %v9647_v16 = vpack.i.bf16 %v14217_v38, %v14214_v0 }
 0x39e   :  { %9648 = vrot.lane.b32.xlu1 %v9647_v16, %s10081_s26  ;;  %v9930_v16 = vld [vmem:[%s15642_s3 + $0x140] sm:$0xff]  }
 0x39f   :  { %7895 = vmatprep.subr.bf16.mxu0 %v9930_v16  ;;  %v4691_v16 = vrot.slane %v13344_v3, 4 }
 0x3a0   :  { %7896 = vmatpush3.bf16.msra.mxu0 %v9931_v60  ;;  %v4692_v60 = vrot.slane %v13347_v58, 4 }
 0x3a2   :  { %9653 = vrot.lane.b32.xlu1 %v9652_v20, %s10080_s21  ;;  %v4693_v3 = vsel %vm1570_vm4, %v4691_v16, %v4692_v60 }
 0x3a3   :  { %v9672_v58 = vpack.i.bf16 %v13785_v47, %v4693_v3 }
 0x3b1   :  { %v9584_v26 = vpop.permute.xlu0 %9583 }
 0x3b2   :  { %v9589_v41 = vpop.permute.xlu1 %9588  ;;  %v9586_v31 = vunpack.i.h.bf16 %v9584_v26  ;;  %v9585_v2 = vunpack.i.l.bf16 %v9584_v26  ;;  %v4694_v26 = vrot.slane %v13484_v43, 4  ;;  %v9932_v43 = vld [vmem:[%s15642_s3 + $0xc0] sm:$0xff]  }
 0x3b3   :  { %v9591_v45 = vunpack.i.h.bf16 %v9589_v41  ;;  %v9590_v13 = vunpack.i.l.bf16 %v9589_v41  ;;  %v4695_v41 = vrot.slane %v13487_v17, 4  ;;  %7831 = vmatprep.subr.bf16.mxu1 %v9932_v43 }
 0x3b4   :  { %v4769_v46 = vsel %vm4756_vm5, %v13946_v54, %v9586_v31  ;;  %v4768_v24 = vsel %vm4756_vm5, %v13927_v1, %v9585_v2  ;;  %v9662_v31 = vpack.i.bf16 %v13785_v47, %v4639_v44 }
 0x3b5   :  { %v9594_v33 = vpop.permute.xlu0 %9593  ;;  %v4787_v7 = vsel %vm4774_vm6, %v4769_v46, %v9591_v45  ;;  %v4786_v35 = vsel %vm4774_vm6, %v4768_v24, %v9590_v13  ;;  %v14265_v2 = vsel %vm1570_vm4, %v4694_v26, %v4695_v41  ;;  %v9938_v41 = vld [vmem:[%s15642_s3 + $0x148] sm:$0xff]  }
 0x3b6   :  { %v9596_v37 = vunpack.i.h.bf16 %v9594_v33  ;;  %v9595_v48 = vunpack.i.l.bf16 %v9594_v33  ;;  %v9677_v45 = vpack.i.bf16 %v13855_v39, %v14265_v2  ;;  %7897 = vmatprep.subr.bf16.mxu0 %v9938_v41  ;;  %v4700_v41 = vrot.slane %v13704_v28, 4  ;;  %v9946_v28 = vld [vmem:[%s15642_s3 + $0x150] sm:$0xff]  }
 0x3b8   :  { %v14241_v19 = vsel %vm4792_vm7, %v4786_v35, %v9595_v48  ;;  %v14244_v23 = vsel %vm4792_vm7, %v4787_v7, %v9596_v37 }
 0x3b9   :  { %v9657_v55 = vpack.i.bf16 %v14244_v23, %v14241_v19  ;;  %v14257_v20 = vpack.c.bf16 %v14244_v23, %v14241_v19 }
 0x3bb   :  { %9658 = vrot.lane.b32.xlu0 %v9657_v55, %s10081_s26 }
 0x3bf   :  { %9663 = vrot.lane.b32.xlu0 %v9662_v31, %s10082_s14 }
 0x3c3   :  { %9678 = vrot.lane.b32.xlu0 %v9677_v45, %s10080_s21  ;;  %v9939_v45 = vld [vmem:[%s15642_s3 + $0x108] sm:$0xff]  }
 0x3c4   :  { %7898 = vmatpush3.bf16.msra.mxu0 %v9939_v45 }
 0x3c5   :  { %7899 = vmatprep.subr.bf16.mxu0 %v9946_v28 }
 0x3c7   :  { %9688 = vrot.lane.b32.xlu0 %v14185_v18, %s10082_s14 }
 0x3cf   :  { %v9604_v17 = vpop.permute.xlu0 %9603 }
 0x3d0   :  { %v9599_v13 = vpop.permute.xlu1 %9598  ;;  %v9606_v33 = vunpack.i.h.bf16 %v9604_v17  ;;  %v9605_v37 = vunpack.i.l.bf16 %v9604_v17 }
 0x3d1   :  { %v9601_v46 = vunpack.i.h.bf16 %v9599_v13  ;;  %v9600_v24 = vunpack.i.l.bf16 %v9599_v13 }
 0x3d3   :  { %v4771_v48 = vsel %vm4756_vm5, %v14019_v62, %v9601_v46  ;;  %v4770_v39 = vsel %vm4756_vm5, %v13998_v57, %v9600_v24  ;;  %v4697_v46 = vrot.slane %v13561_v52, 4 }
 0x3d4   :  { %v4788_v7 = vsel %vm4774_vm6, %v4770_v39, %v9605_v37  ;;  %v4789_v35 = vsel %vm4774_vm6, %v4771_v48, %v9606_v33  ;;  %v4698_v33 = vrot.slane %v13564_v8, 4  ;;  %v4439_v37 = vrot.slane %v14198_v27, 1 }
 0x3d5   :  { %v4440_v48 = vrot.slane %v14201_v36, 1 }
 0x3d6   :  { %v14327_v8 = vsel %vm1570_vm4, %v4697_v46, %v4698_v33 }
 0x3d7   :  { %v9609_v14 = vpop.permute.xlu1 %9608 }
 0x3d8   :  { %v9611_v11 = vunpack.i.h.bf16 %v9609_v14  ;;  %v9610_v18 = vunpack.i.l.bf16 %v9609_v14 }
 0x3da   :  { %v14282_v55 = vsel %vm4792_vm7, %v4788_v7, %v9610_v18  ;;  %v14285_v44 = vsel %vm4792_vm7, %v4789_v35, %v9611_v11  ;;  %v16090_v11 = vld [vmem:[#allocation8_spill] sm:$0xff] }
 0x3db   :  { %v9667_v26 = vpack.i.bf16 %v14285_v44, %v14282_v55  ;;  %v14296_v31 = vpack.c.bf16 %v14285_v44, %v14282_v55  ;;  %v9682_v18 = vpack.i.bf16 %v4693_v3, %v16090_v11 }
 0x3dd   :  { %9668 = vrot.lane.b32.xlu1 %v9667_v26, %s10081_s26  ;;  %v4441_v26 = vsel %vm496_vm2, %v4439_v37, %v4440_v48 }
 0x3e1   :  { %9673 = vrot.lane.b32.xlu1 %v9672_v58, %s10080_s21 }
 0x3e2   :  { %v14304_v43 = vpop.permute.xlu1 %9618  ;;  %v14306_v17 = vpop.permute.xlu0 %9613 }
 0x3e3   :  { %v9615_v13 = vunpack.i.l.bf16 %v14306_v17  ;;  %v9620_v24 = vunpack.i.l.bf16 %v14304_v43  ;;  %v15794_v39 = vunpack.i.h.bf16 %v14306_v17 }
 0x3e5   :  { %v4772_v14 = vsel %vm4756_vm5, %v14122_v40, %v9615_v13  ;;  %9683 = vrot.lane.b32.xlu1 %v9682_v18, %s10081_s26  ;;  %v14340_v13 = vsel %vm4756_vm5, %v16090_v11, %v15794_v39  ;;  %v4701_v18 = vrot.slane %v13707_v34, 4  ;;  %v4703_v34 = vrot.slane %v13715_v50, 4  ;;  %v9948_v50 = vld [vmem:[%s15642_s3 + $0x110] sm:$0xff]  }
 0x3e6   :  { %v14319_v7 = vpop.permute.xlu1 %9628  ;;  %v14321_v52 = vpop.permute.xlu0 %9623  ;;  %v4790_v60 = vsel %vm4774_vm6, %v4772_v14, %v9620_v24  ;;  %v9692_v24 = vpack.i.bf16 %v13886_v4, %v14327_v8  ;;  %v9934_v4 = vld [vmem:[%s15642_s3 + $0xc8] sm:$0xff]   ;;  %7900 = vmatpush3.bf16.msra.mxu0 %v9948_v50  ;;  %v4706_v50 = vrot.slane %v13771_v9, 4  ;;  %v9937_v9 = vld [vmem:[%s15642_s3 + $0x90] sm:$0xff]  }
 0x3e7   :  { %v15793_v35 = vunpack.i.l.bf16 %v14319_v7  ;;  %v9625_v16 = vunpack.i.l.bf16 %v14321_v52  ;;  %v15796_v45 = vunpack.i.h.bf16 %v14319_v7 }
 0x3e9   :  { %v14334_v58 = vsel %vm4792_vm7, %v4790_v60, %v9625_v16  ;;  %v5150_v46 = vsel %vm4756_vm5, %v16090_v11, %v15793_v35  ;;  %v9933_v16 = vld [vmem:[%s15642_s3 + $0x80] sm:$0xff]   ;;  %v14364_v35 = vpack.c.bf16 %v14102_v42, %v14102_v42  ;;  %9693 = vrot.lane.b32.xlu1 %v9692_v24, %s10080_s21  ;;  %v5151_v22 = vsel %vm4756_vm5, %v4693_v3, %v15796_v45  ;;  %v9935_v3 = vld [vmem:[%s15642_s3 + $0x88] sm:$0xff]  }
 0x3ea   :  { %v14351_v33 = vpop.permute.xlu1 %9638  ;;  %v14353_v37 = vpop.permute.xlu0 %9633  ;;  %v5197_v48 = vpack.c.bf16 %v5150_v46, %v14340_v13  ;;  %v9697_v14 = vpack.i.bf16 %v4441_v26, %v14334_v58  ;;  %v4704_v26 = vrot.slane %v13718_v51, 4  ;;  %v9707_v51 = vpack.i.bf16 %v14327_v8, %v14265_v2 }
 0x3eb   :  { %v15795_v60 = vunpack.i.l.bf16 %v14353_v37  ;;  %v15797_v46 = vunpack.i.l.bf16 %v14351_v33  ;;  %v9636_v39 = vunpack.i.h.bf16 %v14353_v37 }
 0x3ec   :  { %5704 = vmatprep.mubr.bf16.mxu1 %v5197_v48  ;;  %9698 = vrot.lane.b32.xlu0 %v9697_v14, %s10081_s26  ;;  %v14391_v48 = vsel %vm1570_vm4, %v4700_v41, %v4701_v18  ;;  %v9936_v41 = vld [vmem:[%s15642_s3 + $0xd0] sm:$0xff]   ;;  %v9621_v18 = vunpack.i.h.bf16 %v14304_v43 }
 0x3ed   :  { %5705 = vmatmul.mubr.bf16.vlgmr.msra.gmra.mrb[0].mxu1 %v14364_v35  ;;  %v5152_v28 = vsel %vm4756_vm5, %v14265_v2, %v15795_v60  ;;  %v9950_v60 = vld [vmem:[%s15642_s3 + $0x158] sm:$0xff]   ;;  %v9702_v56 = vpack.i.bf16 %v13889_v32, %v14391_v48  ;;  %9708 = vrot.lane.b32.xlu1 %v9707_v51, %s10081_s26  ;;  %v5154_v43 = vsel %vm4756_vm5, %v14391_v48, %v15797_v46  ;;  %v4707_v51 = vrot.slane %v13778_v63, 4 }
 0x3ee   :  { %v14388_v24 = vpop.permute.xlu0 %9643  ;;  %v5204_v14 = vpack.c.bf16 %v5152_v28, %v5151_v22  ;;  %7832 = vmatpush3.bf16.msra.mxu1 %v9933_v16  ;;  %v9952_v22 = vld [vmem:[%s15642_s3 + $0x118] sm:$0xff]   ;;  %v14411_v16 = vsel %vm1570_vm4, %v4703_v34, %v4704_v26  ;;  %v5153_v28 = vsel %vm4756_vm5, %v14327_v8, %v9636_v39  ;;  %7901 = vmatprep.subr.bf16.mxu0 %v9950_v60  ;;  %v9954_v34 = vld [vmem:[%s15642_s3 + $0x160] sm:$0xff]   ;;  %v9626_v60 = vunpack.i.h.bf16 %v14321_v52 }
 0x3ef   :  { %v9646_v45 = vunpack.i.h.bf16 %v14388_v24  ;;  %7833 = vmatprep.subr.bf16.mxu1 %v9934_v4  ;;  %v5203_v26 = vpack.c.bf16 %v13785_v47, %v14159_v53  ;;  %v4710_v46 = vrot.slane %v13794_v12, 4  ;;  %7902 = vmatpush3.bf16.msra.mxu0 %v9952_v22  ;;  %v5210_v63 = vpack.c.bf16 %v5154_v43, %v5153_v28  ;;  %v9955_v12 = vld [vmem:[%s15642_s3 + $0x120] sm:$0xff]   ;;  %v9956_v53 = vld [vmem:[%s15642_s3 + $0x168] sm:$0xff]  }
 0x3f0   :  { %5712 = vmatprep.mubr.bf16.mxu1 %v5204_v14  ;;  %9703 = vrot.lane.b32.xlu0 %v9702_v56, %s10080_s21  ;;  %v9717_v56 = vpack.i.bf16 %v14172_v59, %v14411_v16  ;;  %v4709_v14 = vrot.slane %v13791_v15, 4  ;;  %v9645_v47 = vunpack.i.l.bf16 %v14388_v24  ;;  %v9727_v52 = vpack.i.bf16 %v14411_v16, %v14391_v48  ;;  %v9942_v28 = vld [vmem:[%s15642_s3 + $0xe0] sm:$0xff]  }
 0x3f1   :  { %v4765_v4 = vsel %vm4756_vm5, %v14010_v29, %v9646_v45  ;;  %7903 = vmatprep.subr.bf16.mxu0 %v9954_v34  ;;  %v9958_v34 = vld [vmem:[%s15642_s3 + $0x170] sm:$0xff]  }
 0x3f2   :  { %v4783_v45 = vsel %vm4774_vm6, %v4765_v4, %v9621_v18  ;;  %7834 = vmatpush3.bf16.msra.mxu1 %v9935_v3  ;;  %v9940_v18 = vld [vmem:[%s15642_s3 + $0xd8] sm:$0xff]   ;;  %9718 = vrot.lane.b32.xlu1 %v9717_v56, %s10080_s21  ;;  %v14459_v3 = vsel %vm1570_vm4, %v4706_v50, %v4707_v51  ;;  %v14466_v22 = vsel %vm1570_vm4, %v4709_v14, %v4710_v46  ;;  %v9957_v50 = vld [vmem:[%s15642_s3 + $0x128] sm:$0xff]   ;;  %v4712_v56 = vrot.slane %v14010_v29, 4 }
 0x3f3   :  { %7835 = vmatprep.subr.bf16.mxu1 %v9936_v41  ;;  %v14448_v15 = vsel %vm4792_vm7, %v4783_v45, %v9626_v60  ;;  %v9641_v41 = vunpack.i.h.bf16 %v14351_v33  ;;  %v9722_v4 = vpack.i.bf16 %v14188_v30, %v14459_v3  ;;  %7904 = vmatpush3.bf16.msra.mxu0 %v9955_v12  ;;  %v5156_v46 = vsel %vm4756_vm5, %v14459_v3, %v9645_v47  ;;  %v9944_v29 = vld [vmem:[%s15642_s3 + $0xe8] sm:$0xff]   ;;  %v9960_v14 = vld [vmem:[%s15642_s3 + $0x178] sm:$0xff]  }
 0x3f4   :  { %9713 = vrot.lane.b32.xlu0 %v14181_v5, %s10082_s14  ;;  %v9941_v5 = vld [vmem:[%s15642_s3 + $0x98] sm:$0xff]   ;;  %v9737_v43 = vpack.i.bf16 %v14448_v15, %v14466_v22  ;;  %7905 = vmatprep.subr.bf16.mxu0 %v9956_v53  ;;  %v4713_v45 = vrot.slane %v14013_v25, 4  ;;  %v9732_v51 = vpack.i.bf16 %v14448_v15, %v14188_v30  ;;  %v9959_v25 = vld [vmem:[%s15642_s3 + $0x130] sm:$0xff]   ;;  %v9945_v12 = vld [vmem:[%s15642_s3 + $0xa8] sm:$0xff]  }
 0x3f5   :  { %5713 = vmatmul.mubr.bf16.gmra.mrb[4].mxu1 %v5203_v26  ;;  %v9943_v26 = vld [vmem:[%s15642_s3 + $0xa0] sm:$0xff]  }
 0x3f6   :  { %5720 = vmatprep.mubr.bf16.mxu1 %v5210_v63  ;;  %7836 = vmatpush3.bf16.msra.mxu1 %v9937_v9  ;;  %v5155_v9 = vsel %vm4756_vm5, %v14411_v16, %v9641_v41  ;;  %v14513_v63 = vsel %vm1570_vm4, %v4712_v56, %v4713_v45  ;;  %v9777_v45 = vpack.i.bf16 %v14391_v48, %v14241_v19 }
 0x3f7   :  { %7837 = vmatprep.subr.bf16.mxu1 %v9940_v18  ;;  %9728 = vrot.lane.b32.xlu1 %v9727_v52, %s10081_s26  ;;  %v5216_v60 = vpack.c.bf16 %v5156_v46, %v5155_v9  ;;  %v9747_v18 = vpack.i.bf16 %v14466_v22, %v14459_v3  ;;  %v9742_v53 = vpack.i.bf16 %v14214_v0, %v14513_v63  ;;  %v9961_v52 = vld [vmem:[%s15642_s3 + $0x138] sm:$0xff]   ;;  %v16093_v9 = vld [vmem:[#allocation10_spill] sm:$0xff] }
 0x3f8   :  { %9723 = vrot.lane.b32.xlu0 %v9722_v4, %s10080_s21  ;;  %7906 = vmatpush3.bf16.msra.mxu0 %v9957_v50  ;;  %v4719_v4 = vrot.slane %v13883_v21, 4  ;;  %v9752_v46 = vpack.i.bf16 %v14265_v2, %v14102_v42  ;;  %v14539_v50 = vpack.c.bf16 %v14172_v59, %v13889_v32  ;;  %v9953_v32 = vld [vmem:[%s15642_s3 + $0xb8] sm:$0xff]   ;;  %v16091_v59 = vpack.i.bf16 %v14217_v38, %v14220_v49 }
 0x3f9   :  { %7907 = vmatprep.subr.bf16.mxu0 %v9958_v34  ;;  %v4721_v2 = vrot.slane %v13927_v1, 4  ;;  %v16092_v34 = vld [vmem:[#allocation24_spill] sm:$0xff] }
 0x3fa   :  { %7838 = vmatpush3.bf16.msra.mxu1 %v9941_v5  ;;  %v4718_v5 = vrot.slane %v13876_v61, 4  ;;  %v9951_v61 = vld [vmem:[%s15642_s3 + $0xf8] sm:$0xff]   ;;  %v4722_v56 = vrot.slane %v16092_v34, 4 }
 0x3fb   :  { %7839 = vmatprep.subr.bf16.mxu1 %v9942_v28  ;;  %9738 = vrot.lane.b32.xlu1 %v9737_v43, %s10080_s21  ;;  %v9757_v28 = vpack.i.bf16 %v14217_v38, %v14327_v8  ;;  %v9949_v43 = vld [vmem:[%s15642_s3 + $0xb0] sm:$0xff]  }
 0x3fc   :  { %9733 = vrot.lane.b32.xlu0 %v9732_v51, %s10082_s14  ;;  %7908 = vmatpush3.bf16.msra.mxu0 %v9959_v25  ;;  %v14546_v21 = vsel %vm1570_vm4, %v4718_v5, %v4719_v4  ;;  %v4724_v51 = vrot.slane %v13946_v54, 4  ;;  %v14570_v25 = vsel %vm1570_vm4, %v4721_v2, %v4722_v56  ;;  %v9807_v5 = vpack.i.bf16 %v14285_v44, %v14466_v22 }
 0x3fd   :  { %5721 = vmatmul.mubr.bf16.gmra.mrb[8].mxu1 %v13899_v10  ;;  %v9947_v10 = vld [vmem:[%s15642_s3 + $0xf0] sm:$0xff]   ;;  %7909 = vmatprep.subr.bf16.mxu0 %v9960_v14  ;;  %v9767_v42 = vpack.i.bf16 %v14241_v19, %v14546_v21  ;;  %v9787_v1 = vpack.i.bf16 %v14244_v23, %v14570_v25 }
 0x3fe   :  { %5728 = vmatprep.mubr.bf16.mxu1 %v5216_v60  ;;  %7840 = vmatpush3.bf16.msra.mxu1 %v9943_v26  ;;  %v9772_v26 = vpack.i.bf16 %v14546_v21, %v14220_v49  ;;  %v9782_v60 = vpack.i.bf16 %v14244_v23, %v14411_v16 }
 0x3ff   :  { %7841 = vmatprep.subr.bf16.mxu1 %v9944_v29  ;;  %9748 = vrot.lane.b32.xlu1 %v9747_v18, %s10081_s26  ;;  %v4725_v29 = vrot.slane %v16093_v9, 4  ;;  %v16096_v9 = vpack.c.bf16 %v14217_v38, %v14214_v0 }
 0x400   :  { %9743 = vrot.lane.b32.xlu0 %v9742_v53, %s10080_s21  ;;  %7910 = vmatpush3.bf16.msra.mxu0 %v9961_v52  ;;  %v4730_v53 = vrot.slane %v14019_v62, 4 }
 0x401   :  { %v14576_v19 = vsel %vm1570_vm4, %v4724_v51, %v4725_v29 }
 0x402   :  { %7842 = vmatpush3.bf16.msra.mxu1 %v9945_v12  ;;  %v9797_v14 = vpack.i.bf16 %v14576_v19, %v14570_v25  ;;  %v9792_v12 = vpack.i.bf16 %v14282_v55, %v14576_v19 }
 0x403   :  { %7843 = vmatprep.subr.bf16.mxu1 %v9947_v10  ;;  %9758 = vrot.lane.b32.xlu1 %v9757_v28, %s10082_s14  ;;  %v16094_v10 = vld [vmem:[#allocation12_spill] sm:$0xff]  ;;  %v4727_v28 = vrot.slane %v13998_v57, 4 }
 0x404   :  { %9753 = vrot.lane.b32.xlu0 %v9752_v46, %s10082_s14  ;;  %v4731_v52 = vrot.slane %v16094_v10, 4 }
 0x405   :  { %5729 = vmatmul.mubr.bf16.gmra.mrb[12].mxu1 %v14539_v50 }
 0x406   :  { %7844 = vmatpush3.bf16.msra.mxu1 %v9949_v43  ;;  %v16095_v43 = vld [vmem:[#allocation11_spill] sm:$0xff]  ;;  %v14607_v62 = vsel %vm1570_vm4, %v4730_v53, %v4731_v52 }
 0x407   :  { %7845 = vmatprep.subr.bf16.mxu1 %v9951_v61  ;;  %9768 = vrot.lane.b32.xlu1 %v9767_v42, %s10080_s21  ;;  %v4728_v46 = vrot.slane %v16095_v43, 4  ;;  %v9802_v61 = vpack.i.bf16 %v14459_v3, %v14282_v55  ;;  %v9822_v55 = vpack.i.bf16 %v14513_v63, %v14334_v58 }
 0x408   :  { %9763 = vrot.lane.b32.xlu0 %v16091_v59, %s10080_s21  ;;  %v4737_v59 = vrot.slane %v14201_v36, 4 }
 0x409   :  { %v14613_v57 = vsel %vm1570_vm4, %v4727_v28, %v4728_v46 }
 0x40a   :  { %7846 = vmatpush3.bf16.msra.mxu1 %v9953_v32  ;;  %v9812_v42 = vpack.i.bf16 %v14285_v44, %v14613_v57  ;;  %v14624_v32 = vld [vmem:[%s15642_s3 + $0x180] sm:$0xff]   ;;  %v4736_v44 = vrot.slane %v14198_v27, 4 }
 0x40b   :  { %9778 = vrot.lane.b32.xlu1 %v9777_v45, %s10082_s14  ;;  %8183 = vmatprep.subr.bf16.mxu1 %v14624_v32 }
 0x40c   :  { %9773 = vrot.lane.b32.xlu0 %v9772_v26, %s10081_s26  ;;  %v14635_v2 = vsel %vm1570_vm4, %v4736_v44, %v4737_v59 }
 0x40f   :  { %9788 = vrot.lane.b32.xlu1 %v9787_v1, %s10080_s21 }
 0x410   :  { %9783 = vrot.lane.b32.xlu0 %v9782_v60, %s10082_s14  ;;  %v14582_v54 = vpop.permute.xlu1 %9648 }
 0x411   :  { %v15806_v18 = vunpack.i.l.bf16 %v14582_v54  ;;  %v15800_v34 = vunpack.i.h.bf16 %v14582_v54 }
 0x413   :  { %9798 = vrot.lane.b32.xlu1 %v9797_v14, %s10081_s26  ;;  %v5157_v23 = vsel %vm4756_vm5, %v16090_v11, %v15806_v18  ;;  %v5158_v36 = vsel %vm4756_vm5, %v14220_v49, %v15800_v34  ;;  %v16097_v34 = vunpack.i.h.bf16 %v14306_v17 }
 0x414   :  { %9793 = vrot.lane.b32.xlu0 %v9792_v12, %s10080_s21  ;;  %v5221_v4 = vpack.c.bf16 %v5157_v23, %v14340_v13  ;;  %v9817_v13 = vpack.i.bf16 %v14334_v58, %v14607_v62  ;;  %v9654_v29 = vpop.permute.xlu1 %9653 }
 0x415   :  { %v9656_v28 = vunpack.i.h.bf16 %v9654_v29 }
 0x416   :  { %5736 = vmatprep.mubr.bf16.mxu1 %v5221_v4 }
 0x417   :  { %9808 = vrot.lane.b32.xlu1 %v9807_v5, %s10082_s14  ;;  %5737 = vmatmul.mubr.bf16.gmra.mrb[16].mxu1 %v14364_v35 }
 0x418   :  { %9803 = vrot.lane.b32.xlu0 %v9802_v61, %s10082_s14 }
 0x41b   :  { %9818 = vrot.lane.b32.xlu1 %v9817_v13, %s10080_s21 }
 0x41c   :  { %9813 = vrot.lane.b32.xlu0 %v9812_v42, %s10080_s21 }
 0x41f   :  { %9823 = vrot.lane.b32.xlu1 %v9822_v55, %s10082_s14  ;;  %v4733_v55 = vrot.slane %v14122_v40, 4 }
 0x420   :  { %4875 = vrot.lane.b32.xlu0 %v14613_v57, %s10081_s26 }
 0x424   :  { %5074 = vrot.lane.b32.xlu0 %v16090_v11, %s10082_s14 }
 0x428   :  { %4994 = vrot.lane.b32.xlu0 %v14635_v2, %s10080_s21 }
 0x42d   :  { %v14640_v56 = vpop.permute.xlu0 %9658 }
 0x42e   :  { %v15802_v45 = vunpack.i.l.bf16 %v14640_v56  ;;  %v15798_v60 = vunpack.i.h.bf16 %v14640_v56 }
 0x430   :  { %v5159_v26 = vsel %vm4756_vm5, %v14546_v21, %v15802_v45  ;;  %v5160_v23 = vsel %vm4756_vm5, %v14570_v25, %v15798_v60 }
 0x431   :  { %v5228_v51 = vpack.c.bf16 %v5159_v26, %v5158_v36  ;;  %v14654_v1 = vpop.permute.xlu0 %9663  ;;  %v9655_v26 = vunpack.i.l.bf16 %v9654_v29 }
 0x432   :  { %v9666_v44 = vunpack.i.h.bf16 %v14654_v1 }
 0x433   :  { %5744 = vmatprep.mubr.bf16.mxu1 %v5228_v51  ;;  %v4734_v51 = vrot.slane %v14128_v6, 4 }
 0x434   :  { %5745 = vmatmul.mubr.bf16.gmra.mrb[20].mxu1 %v16096_v9 }
 0x435   :  { %v14660_v12 = vpop.permute.xlu0 %9678 }
 0x436   :  { %v9680_v43 = vunpack.i.l.bf16 %v14660_v12  ;;  %v9681_v17 = vunpack.i.h.bf16 %v14660_v12 }
 0x439   :  { %v14671_v4 = vpop.permute.xlu0 %9688 }
 0x43a   :  { %v9690_v59 = vunpack.i.l.bf16 %v14671_v4 }
 0x44f   :  { %v14657_v14 = vpop.permute.xlu1 %9668 }
 0x450   :  { %v15799_v49 = vunpack.i.l.bf16 %v14657_v14  ;;  %v15801_v46 = vunpack.i.h.bf16 %v14657_v14 }
 0x452   :  { %v5161_v0 = vsel %vm4756_vm5, %v14576_v19, %v15799_v49  ;;  %v5162_v29 = vsel %vm4756_vm5, %v14613_v57, %v15801_v46 }
 0x453   :  { %v9674_v38 = vpop.permute.xlu1 %9673  ;;  %v5234_v53 = vpack.c.bf16 %v5161_v0, %v5160_v23  ;;  %v9665_v0 = vunpack.i.l.bf16 %v14654_v1 }
 0x454   :  { %v9676_v10 = vunpack.i.h.bf16 %v9674_v38  ;;  %v9675_v52 = vunpack.i.l.bf16 %v9674_v38 }
 0x455   :  { %5752 = vmatprep.mubr.bf16.mxu1 %v5234_v53 }
 0x456   :  { %5753 = vmatmul.mubr.bf16.gmra.mrb[24].mxu1 %v14257_v20  ;;  %v4996_v61 = vsel %vm4774_vm6, %v9656_v28, %v9675_v52  ;;  %v4997_v13 = vsel %vm4774_vm6, %v9676_v10, %v9680_v43 }
 0x457   :  { %v9684_v5 = vpop.permute.xlu1 %9683  ;;  %v5180_v40 = vsel %vm4792_vm7, %v4996_v61, %v9666_v44  ;;  %v5181_v53 = vsel %vm4792_vm7, %v4997_v13, %v9690_v59 }
 0x458   :  { %v9685_v38 = vunpack.i.l.bf16 %v9684_v5  ;;  %v9686_v52 = vunpack.i.h.bf16 %v9684_v5  ;;  %v14708_v5 = vsel %vm1570_vm4, %v4733_v55, %v4734_v51  ;;  %vm6960_vm4 = vcmask 1041409  }
 0x45a   :  { %v14716_v46 = vsel %vm4756_vm5, %v16097_v34, %v9685_v38 }
 0x45b   :  { %v14677_v42 = vpop.permute.xlu1 %9693  ;;  %v5164_v38 = vsel %vm4774_vm6, %v14716_v46, %v9656_v28 }
 0x45c   :  { %v9695_v45 = vunpack.i.l.bf16 %v14677_v42  ;;  %v9696_v34 = vunpack.i.h.bf16 %v14677_v42 }
 0x45e   :  { %v14682_v36 = vpop.permute.xlu0 %9698  ;;  %v4998_v42 = vsel %vm4774_vm6, %v9681_v17, %v9695_v45 }
 0x45f   :  { %v9701_v9 = vunpack.i.h.bf16 %v14682_v36  ;;  %v15803_v23 = vunpack.i.l.bf16 %v14682_v36  ;;  %v9709_v43 = vpop.permute.xlu1 %9708 }
 0x461   :  { %v4773_v6 = vsel %vm4756_vm5, %v14198_v27, %v9701_v9  ;;  %v5163_v60 = vsel %vm4756_vm5, %v14607_v62, %v15803_v23  ;;  %v5199_v9 = vpack.c.bf16 %v5181_v53, %v5180_v40  ;;  %v9832_v53 = vpack.i.bf16 %v14708_v5, %v14607_v62 }
 0x462   :  { %v14704_v61 = vpop.permute.xlu0 %9703  ;;  %v4791_v49 = vsel %vm4774_vm6, %v4773_v6, %v9655_v26  ;;  %v5240_v13 = vpack.c.bf16 %v5163_v60, %v5162_v29  ;;  %v15805_v29 = vunpack.i.h.bf16 %v14671_v4 }
 0x463   :  { %v14711_v27 = vsel %vm4792_vm7, %v4791_v49, %v9665_v0  ;;  %v9705_v23 = vunpack.i.l.bf16 %v14704_v61  ;;  %v16098_v49 = vunpack.i.l.bf16 %v14319_v7  ;;  %v9842_v0 = vpack.i.bf16 %v14613_v57, %v14576_v19 }
 0x464   :  { %5100 = vrot.lane.b32.xlu0 %v14711_v27, %s10082_s14  ;;  %v9827_v60 = vpack.i.bf16 %v14711_v27, %v14708_v5  ;;  %5760 = vmatprep.mubr.bf16.mxu1 %v5240_v13  ;;  %v14727_v26 = vpop.permute.xlu1 %9718  ;;  %v9711_v13 = vunpack.i.h.bf16 %v9709_v43  ;;  %v5182_v45 = vsel %vm4792_vm7, %v4998_v42, %v15805_v29 }
 0x465   :  { %v4886_v55 = vsel %vm4756_vm5, %v16098_v49, %v9686_v52  ;;  %5761 = vmatmul.mubr.bf16.gmra.mrb[28].mxu1 %v14296_v31  ;;  %v9710_v52 = vunpack.i.l.bf16 %v9709_v43  ;;  %v4999_v6 = vsel %vm4774_vm6, %v9696_v34, %v9705_v23  ;;  %v16099_v23 = vunpack.i.h.bf16 %v14319_v7 }
 0x466   :  { %v14732_v51 = vpop.permute.xlu0 %9713  ;;  %9828 = vrot.lane.b32.xlu1 %v9827_v60, %s10080_s21  ;;  %5801 = vmatprep.mubr.bf16.mxu1 %v5199_v9  ;;  %v5165_v12 = vsel %vm4774_vm6, %v4886_v55, %v9676_v10  ;;  %v9837_v55 = vpack.i.bf16 %v14570_v25, %v14546_v21 }
 0x467   :  { %v15804_v40 = vunpack.i.l.bf16 %v14732_v51  ;;  %v5198_v10 = vpack.c.bf16 %v5165_v12, %v5164_v38  ;;  %v4887_v49 = vsel %vm4756_vm5, %v16099_v23, %v9710_v52  ;;  %v9963_v38 = vld [vmem:[%s15642_s3 + $0x188] sm:$0xff]   ;;  %v16100_v12 = vunpack.i.l.bf16 %v14353_v37 }
 0x468   :  { %9843 = vrot.lane.b32.xlu0 %v9842_v0, %s10082_s14  ;;  %v9721_v52 = vunpack.i.h.bf16 %v14727_v26  ;;  %v9716_v21 = vunpack.i.h.bf16 %v14732_v51 }
 0x469   :  { %v9729_v9 = vpop.permute.xlu1 %9728  ;;  %v5183_v28 = vsel %vm4792_vm7, %v4999_v6, %v15804_v40  ;;  %v4888_v42 = vsel %vm4756_vm5, %v16100_v12, %v9711_v13  ;;  %v9706_v6 = vunpack.i.h.bf16 %v14704_v61  ;;  %v9720_v13 = vunpack.i.l.bf16 %v14727_v26 }
 0x46a   :  { %v14750_v60 = vpop.permute.xlu0 %9723  ;;  %9833 = vrot.lane.b32.xlu1 %v9832_v53, %s10081_s26  ;;  %v5206_v0 = vpack.c.bf16 %v5183_v28, %v5182_v45  ;;  %v5166_v45 = vsel %vm4774_vm6, %v4887_v49, %v9681_v17  ;;  %v5167_v61 = vsel %vm4774_vm6, %v4888_v42, %v9696_v34  ;;  %v9731_v40 = vunpack.i.h.bf16 %v9729_v9 }
 0x46b   :  { %v9725_v43 = vunpack.i.l.bf16 %v14750_v60  ;;  %v16101_v49 = vunpack.i.l.bf16 %v14351_v33 }
 0x46c   :  { %5102 = vrot.lane.b32.xlu0 %v14635_v2, %s10082_s14 }
 0x46d   :  { %v14770_v7 = vpop.permute.xlu1 %9738  ;;  %5802 = vmatmul.mubr.bf16.vlgmr.msra.gmra.mrb[32].mxu1 %v5198_v10  ;;  %v9730_v10 = vunpack.i.l.bf16 %v9729_v9  ;;  %v5001_v12 = vsel %vm4774_vm6, %v9721_v52, %v9725_v43  ;;  %v4890_v43 = vsel %vm4756_vm5, %v16101_v49, %v9731_v40 }
 0x46e   :  { %v14774_v23 = vpop.permute.xlu0 %9733  ;;  %9838 = vrot.lane.b32.xlu1 %v9837_v55, %s10082_s14  ;;  %5809 = vmatprep.mubr.bf16.mxu1 %v5206_v0  ;;  %v5000_v0 = vsel %vm4774_vm6, %v9706_v6, %v9720_v13  ;;  %v9740_v40 = vunpack.i.l.bf16 %v14770_v7 }
 0x46f   :  { %v9735_v28 = vunpack.i.l.bf16 %v14774_v23  ;;  %8184 = vmatpush3.bf16.msra.mxu1 %v14624_v32  ;;  %v5205_v32 = vpack.c.bf16 %v5167_v61, %v5166_v45  ;;  %v5184_v26 = vsel %vm4792_vm7, %v5000_v0, %v9716_v21  ;;  %v4889_v17 = vsel %vm4756_vm5, %v9636_v39, %v9730_v10 }
 0x470   :  { %8185 = vmatprep.subr.bf16.mxu1 %v9963_v38  ;;  %v9726_v45 = vunpack.i.h.bf16 %v14750_v60  ;;  %v9736_v39 = vunpack.i.h.bf16 %v14774_v23  ;;  %v5169_v0 = vsel %vm4774_vm6, %v4890_v43, %v9721_v52 }
 0x471   :  { %v9749_v29 = vpop.permute.xlu1 %9748  ;;  %v5185_v55 = vsel %vm4792_vm7, %v5001_v12, %v9735_v28  ;;  %v5168_v12 = vsel %vm4774_vm6, %v4889_v17, %v9706_v6 }
 0x472   :  { %v14788_v18 = vpop.permute.xlu0 %9743  ;;  %9848 = vrot.lane.b32.xlu1 %v9832_v53, %s10082_s14  ;;  %v5212_v9 = vpack.c.bf16 %v5185_v55, %v5184_v26  ;;  %v9741_v53 = vunpack.i.h.bf16 %v14770_v7  ;;  %v9751_v61 = vunpack.i.h.bf16 %v9749_v29  ;;  %v5002_v7 = vsel %vm4774_vm6, %v9726_v45, %v9740_v40 }
 0x473   :  { %8186 = vmatpush3.bf16.msra.mxu1 %v9963_v38  ;;  %v9745_v34 = vunpack.i.l.bf16 %v14788_v18  ;;  %v9746_v43 = vunpack.i.h.bf16 %v14788_v18 }
 0x475   :  { %v14801_v42 = vpop.permute.xlu1 %9758  ;;  %5810 = vmatmul.mubr.bf16.gmra.mrb[36].mxu1 %v5205_v32  ;;  %v5003_v55 = vsel %vm4774_vm6, %v9741_v53, %v9745_v34  ;;  %v9750_v32 = vunpack.i.l.bf16 %v9749_v29  ;;  %v5211_v29 = vpack.c.bf16 %v5169_v0, %v5168_v12 }
 0x476   :  { %v9760_v38 = vunpack.i.l.bf16 %v14801_v42  ;;  %v9754_v13 = vpop.permute.xlu0 %9753  ;;  %5817 = vmatprep.mubr.bf16.mxu1 %v5212_v9 }
 0x477   :  { %v9756_v37 = vunpack.i.h.bf16 %v9754_v13  ;;  %v14807_v10 = vunpack.i.l.bf16 %v9754_v13  ;;  %v4891_v13 = vsel %vm4756_vm5, %v9641_v41, %v9750_v32 }
 0x478   :  { %v5105_v60 = vsel %vm4792_vm7, %v9690_v59, %v9760_v38  ;;  %v5186_v59 = vsel %vm4792_vm7, %v5002_v7, %v9736_v39  ;;  %v4892_v38 = vsel %vm4756_vm5, %v9645_v47, %v9751_v61  ;;  %v5170_v47 = vsel %vm4774_vm6, %v4891_v13, %v9726_v45 }
 0x479   :  { %v14816_v26 = vpop.permute.xlu1 %9768  ;;  %v5104_v9 = vsel %vm4792_vm7, %v9666_v44, %v9756_v37  ;;  %v5187_v6 = vsel %vm4792_vm7, %v5003_v55, %v14807_v10  ;;  %v9761_v55 = vunpack.i.h.bf16 %v14801_v42  ;;  %v5171_v33 = vsel %vm4774_vm6, %v4892_v38, %v9741_v53 }
 0x47a   :  { %v5200_v17 = vpack.c.bf16 %v5105_v60, %v5104_v9  ;;  %v9764_v34 = vpop.permute.xlu0 %9763  ;;  %v9770_v1 = vunpack.i.l.bf16 %v14816_v26  ;;  %v5218_v44 = vpack.c.bf16 %v5187_v6, %v5186_v59  ;;  %v5217_v6 = vpack.c.bf16 %v5171_v33, %v5170_v47 }
 0x47b   :  { %v9766_v49 = vunpack.i.h.bf16 %v9764_v34  ;;  %v9765_v52 = vunpack.i.l.bf16 %v9764_v34  ;;  %v16102_v53 = vunpack.i.l.bf16 %v14582_v54  ;;  %v16103_v34 = vunpack.i.h.bf16 %v14671_v4 }
 0x47c   :  { %5899 = vmatmul.mubr.bf16.vlgmr.msra.gmra.mrb[64].mxu0 %v5200_v17  ;;  %v5214_v13 = vpack.c.bf16 %v14448_v15, %v14188_v30  ;;  %v9771_v47 = vunpack.i.h.bf16 %v14816_v26  ;;  %v5172_v30 = vsel %vm4774_vm6, %v14716_v46, %v9746_v43 }
 0x47d   :  { %v14835_v37 = vpop.permute.xlu1 %9778  ;;  %5818 = vmatmul.mubr.bf16.gmra.mrb[40].mxu1 %v5211_v29  ;;  %5906 = vmatprep.mubr.bf16.mxu0 %v14539_v50  ;;  %v5005_v12 = vsel %vm4774_vm6, %v9766_v49, %v9770_v1  ;;  %v5004_v18 = vsel %vm4774_vm6, %v9746_v43, %v9765_v52  ;;  %v16104_v29 = vunpack.i.l.bf16 %v14732_v51 }
 0x47e   :  { %v9774_v40 = vpop.permute.xlu0 %9773  ;;  %5825 = vmatprep.mubr.bf16.mxu1 %v5218_v44  ;;  %v9780_v24 = vunpack.i.l.bf16 %v14835_v37  ;;  %v9781_v41 = vunpack.i.h.bf16 %v14835_v37  ;;  %v5188_v50 = vsel %vm4792_vm7, %v5004_v18, %v9761_v55 }
 0x47f   :  { %v9775_v0 = vunpack.i.l.bf16 %v9774_v40 }
 0x480   :  { %v5189_v32 = vsel %vm4792_vm7, %v5005_v12, %v9780_v24  ;;  %v5106_v52 = vsel %vm4792_vm7, %v16103_v34, %v9781_v41 }
 0x481   :  { %v9789_v61 = vpop.permute.xlu1 %9788  ;;  %v5223_v45 = vpack.c.bf16 %v5189_v32, %v5188_v50  ;;  %v4893_v7 = vsel %vm4756_vm5, %v16102_v53, %v9775_v0  ;;  %v9776_v50 = vunpack.i.h.bf16 %v9774_v40 }
 0x482   :  { %v14851_v60 = vpop.permute.xlu0 %9783  ;;  %v9790_v38 = vunpack.i.l.bf16 %v9789_v61  ;;  %v5173_v4 = vsel %vm4774_vm6, %v4893_v7, %v9766_v49  ;;  %v9791_v0 = vunpack.i.h.bf16 %v9789_v61  ;;  %v16105_v61 = vunpack.i.l.bf16 %v14640_v56 }
 0x483   :  { %v9785_v9 = vunpack.i.l.bf16 %v14851_v60  ;;  %v9786_v12 = vunpack.i.h.bf16 %v14851_v60 }
 0x484   :  { %v5006_v15 = vsel %vm4774_vm6, %v9771_v47, %v9790_v38 }
 0x485   :  { %v14857_v17 = vpop.permute.xlu1 %9798  ;;  %5826 = vmatmul.mubr.bf16.gmra.mrb[44].mxu1 %v5217_v6  ;;  %v5107_v59 = vsel %vm4792_vm7, %v16104_v29, %v9785_v9  ;;  %v5222_v6 = vpack.c.bf16 %v5173_v4, %v5172_v30  ;;  %v5190_v40 = vsel %vm4792_vm7, %v5006_v15, %v9786_v12 }
 0x486   :  { %v14865_v1 = vpop.permute.xlu0 %9793  ;;  %5833 = vmatprep.mubr.bf16.mxu1 %v5223_v45  ;;  %v5207_v44 = vpack.c.bf16 %v5107_v59, %v5106_v52  ;;  %v9800_v33 = vunpack.i.l.bf16 %v14857_v17  ;;  %v16106_v52 = vunpack.i.h.bf16 %v14582_v54 }
 0x487   :  { %v9795_v18 = vunpack.i.l.bf16 %v14865_v1 }
 0x488   :  { %5907 = vmatmul.mubr.bf16.gmra.mrb[68].mxu0 %v5207_v44  ;;  %v4895_v53 = vsel %vm4756_vm5, %v16105_v61, %v9800_v33  ;;  %v4894_v29 = vsel %vm4756_vm5, %v16106_v52, %v9776_v50  ;;  %v16108_v52 = vunpack.i.h.bf16 %v14640_v56 }
 0x489   :  { %v14874_v41 = vpop.permute.xlu1 %9808  ;;  %5914 = vmatprep.mubr.bf16.mxu0 %v5214_v13  ;;  %v5007_v45 = vsel %vm4774_vm6, %v9791_v0, %v9795_v18  ;;  %v9796_v13 = vunpack.i.h.bf16 %v14865_v1  ;;  %v5174_v30 = vsel %vm4774_vm6, %v4894_v29, %v9771_v47 }
 0x48a   :  { %v9810_v32 = vunpack.i.l.bf16 %v14874_v41  ;;  %v14877_v9 = vpop.permute.xlu0 %9803  ;;  %v9811_v51 = vunpack.i.h.bf16 %v14874_v41  ;;  %v5233_v41 = vpack.c.bf16 %v14607_v62, %v14613_v57 }
 0x48b   :  { %v9806_v49 = vunpack.i.h.bf16 %v14877_v9  ;;  %v9805_v26 = vunpack.i.l.bf16 %v14877_v9  ;;  %v5238_v9 = vpack.c.bf16 %v14711_v27, %v14334_v58 }
 0x48c   :  { %v5109_v34 = vsel %vm4792_vm7, %v9735_v28, %v9810_v32 }
 0x48d   :  { %v14891_v7 = vpop.permute.xlu1 %9818  ;;  %5834 = vmatmul.mubr.bf16.gmra.mrb[48].mxu1 %v5222_v6  ;;  %v5191_v46 = vsel %vm4792_vm7, %v5007_v45, %v9805_v26  ;;  %v5108_v43 = vsel %vm4792_vm7, %v9716_v21, %v9806_v49  ;;  %v5175_v21 = vsel %vm4774_vm6, %v4895_v53, %v9791_v0  ;;  %v9801_v45 = vunpack.i.h.bf16 %v14857_v17 }
 0x48e   :  { %v9814_v59 = vpop.permute.xlu0 %9813  ;;  %v5230_v44 = vpack.c.bf16 %v5191_v46, %v5190_v40  ;;  %v5213_v38 = vpack.c.bf16 %v5109_v34, %v5108_v43  ;;  %v9820_v18 = vunpack.i.l.bf16 %v14891_v7  ;;  %v5229_v0 = vpack.c.bf16 %v5175_v21, %v5174_v30 }
 0x48f   :  { %v9816_v4 = vunpack.i.h.bf16 %v9814_v59  ;;  %v9815_v33 = vunpack.i.l.bf16 %v9814_v59  ;;  %v16107_v40 = vunpack.i.l.bf16 %v14657_v14  ;;  %v4896_v29 = vsel %vm4756_vm5, %v16108_v52, %v9801_v45 }
 0x490   :  { %5841 = vmatprep.mubr.bf16.mxu1 %v5230_v44  ;;  %5915 = vmatmul.mubr.bf16.gmra.mrb[72].mxu0 %v5213_v38  ;;  %v5176_v59 = vsel %vm4774_vm6, %v4896_v29, %v9796_v13 }
 0x491   :  { %v14909_v28 = vpop.permute.xlu1 %9823  ;;  %v5009_v54 = vsel %vm4774_vm6, %v9816_v4, %v9820_v18  ;;  %v5008_v50 = vsel %vm4774_vm6, %v9796_v13, %v9815_v33  ;;  %5922 = vmatprep.mubr.bf16.mxu0 %v14364_v35 }
 0x492   :  { %v9825_v1 = vunpack.i.l.bf16 %v14909_v28  ;;  %v4876_v32 = vpop.permute.xlu0 %4875  ;;  %v5192_v15 = vsel %vm4792_vm7, %v5008_v50, %v9811_v51  ;;  %v9826_v49 = vunpack.i.h.bf16 %v14909_v28 }
 0x493   :  { %v4897_v61 = vsel %vm4756_vm5, %v16107_v40, %v4876_v32 }
 0x494   :  { %v5193_v6 = vsel %vm4792_vm7, %v5009_v54, %v9825_v1  ;;  %v5110_v46 = vsel %vm4792_vm7, %v9736_v39, %v9826_v49  ;;  %v5177_v34 = vsel %vm4774_vm6, %v4897_v61, %v9816_v4 }
 0x495   :  { %5842 = vmatmul.mubr.bf16.gmra.mrb[52].mxu1 %v5229_v0  ;;  %v5236_v53 = vpack.c.bf16 %v5193_v6, %v5192_v15  ;;  %v5235_v23 = vpack.c.bf16 %v5177_v34, %v5176_v59 }
 0x496   :  { %v5075_v47 = vpop.permute.xlu0 %5074 }
 0x497   :  { %v14932_v43 = vsel %vm4792_vm7, %v14807_v10, %v5075_v47  ;;  %5849 = vmatprep.mubr.bf16.mxu1 %v5236_v53  ;;  %v9821_v47 = vunpack.i.h.bf16 %v14891_v7 }
 0x498   :  { %v5219_v17 = vpack.c.bf16 %v14932_v43, %v5110_v46 }
 0x49a   :  { %5923 = vmatmul.mubr.bf16.gmra.mrb[76].mxu0 %v5219_v17  ;;  %v4995_v45 = vpop.permute.xlu0 %4994 }
 0x49b   :  { %5930 = vmatprep.mubr.bf16.mxu0 %v14257_v20 }
 0x49d   :  { %5850 = vmatmul.mubr.bf16.gmra.mrb[56].mxu1 %v5235_v23 }
 0x4c0   :  { %v7783_v39 = vpop.f32.mrb[0].mxu1 }
 0x4c1   :  { %v7784_v44 = vpop.f32.mrb[1].mxu1 }
 0x4c2   :  { %v14941_v38 = vadd.f32 %v7784_v44, %v7783_v39  ;;  %v7786_v18 = vpop.f32.mrb[2].mxu1 }
 0x4c3   :  { %v7787_v33 = vpop.f32.mrb[3].mxu1 }
 0x4c4   :  { %v14943_v4 = vadd.f32 %v7787_v33, %v7786_v18 }
 0x4c8   :  { %v7789_v21 = vpop.f32.mrb[4].mxu1 }
 0x4c9   :  { %v7790_v54 = vpop.f32.mrb[5].mxu1 }
 0x4ca   :  { %v14945_v56 = vadd.f32 %v7790_v54, %v7789_v21  ;;  %v7792_v50 = vpop.f32.mrb[6].mxu1 }
 0x4cb   :  { %v7793_v32 = vpop.f32.mrb[7].mxu1 }
 0x4cc   :  { %v14947_v30 = vadd.f32 %v7793_v32, %v7792_v50  ;;  %v16109_v32 = vunpack.i.h.bf16 %v14657_v14 }
 0x4d0   :  { %v7795_v13 = vpop.f32.mrb[8].mxu1 }
 0x4d1   :  { %v7796_v20 = vpop.f32.mrb[9].mxu1 }
 0x4d2   :  { %v14949_v15 = vadd.f32 %v7796_v20, %v7795_v13  ;;  %v7798_v49 = vpop.f32.mrb[10].mxu1  ;;  %v16110_v20 = vunpack.i.l.bf16 %v14682_v36 }
 0x4d3   :  { %v7799_v0 = vpop.f32.mrb[11].mxu1 }
 0x4d4   :  { %v14951_v6 = vadd.f32 %v7799_v0, %v7798_v49 }
 0x4d6   :  { %v5101_v59 = vpop.permute.xlu0 %5100 }
 0x4d8   :  { %v7801_v40 = vpop.f32.mrb[12].mxu1  ;;  %v9829_v61 = vpop.permute.xlu1 %9828 }
 0x4d9   :  { %v7802_v53 = vpop.f32.mrb[13].mxu1  ;;  %v9831_v46 = vunpack.i.h.bf16 %v9829_v61  ;;  %v9830_v34 = vunpack.i.l.bf16 %v9829_v61 }
 0x4da   :  { %v14954_v17 = vadd.f32 %v7802_v53, %v7801_v40  ;;  %v7804_v52 = vpop.f32.mrb[14].mxu1 }
 0x4db   :  { %v7805_v29 = vpop.f32.mrb[15].mxu1  ;;  %v5011_v23 = vsel %vm4774_vm6, %v9831_v46, %v4995_v45  ;;  %v5010_v39 = vsel %vm4774_vm6, %v9821_v47, %v9830_v34  ;;  %v9844_v34 = vpop.permute.xlu0 %9843 }
 0x4dc   :  { %v14958_v44 = vadd.f32 %v7805_v29, %v7804_v52  ;;  %v9834_v18 = vpop.permute.xlu1 %9833  ;;  %v5194_v33 = vsel %vm4792_vm7, %v5010_v39, %v5101_v59  ;;  %v5195_v21 = vsel %vm4792_vm7, %v5011_v23, %v14807_v10  ;;  %v5202_v52 = vpack.c.bf16 %v14391_v48, %v14327_v8 }
 0x4dd   :  { %v9836_v7 = vunpack.i.h.bf16 %v9834_v18  ;;  %v9835_v54 = vunpack.i.l.bf16 %v9834_v18  ;;  %v5242_v50 = vpack.c.bf16 %v5195_v21, %v5194_v33  ;;  %v9845_v29 = vunpack.i.l.bf16 %v9844_v34 }
 0x4de   :  { %v5209_v8 = vpack.c.bf16 %v14459_v3, %v14411_v16  ;;  %v5226_v33 = vpack.c.bf16 %v14576_v19, %v14570_v25 }
 0x4df   :  { %v4898_v13 = vsel %vm4756_vm5, %v16109_v32, %v9835_v54  ;;  %v4899_v49 = vsel %vm4756_vm5, %v16110_v20, %v9836_v7  ;;  %5857 = vmatprep.mubr.bf16.mxu1 %v5242_v50  ;;  %v5114_v48 = vsel %vm4792_vm7, %v9786_v12, %v9845_v29  ;;  %v5103_v27 = vpop.permute.xlu0 %5102 }
 0x4e0   :  { %v9839_v0 = vpop.permute.xlu1 %9838  ;;  %v5178_v45 = vsel %vm4774_vm6, %v4898_v13, %v9821_v47  ;;  %v5179_v40 = vsel %vm4774_vm6, %v4899_v49, %v9831_v46  ;;  %v9846_v46 = vunpack.i.h.bf16 %v9844_v34 }
 0x4e1   :  { %v9841_v61 = vunpack.i.h.bf16 %v9839_v0  ;;  %v9840_v53 = vunpack.i.l.bf16 %v9839_v0  ;;  %v5241_v10 = vpack.c.bf16 %v5179_v40, %v5178_v45  ;;  %v15036_v0 = vld [vmem:[%s15643_s4] ss:$0 sm:$0xff] }
 0x4e2   :  { %v5115_v42 = vsel %vm4792_vm7, %v9805_v26, %v9846_v46 }
 0x4e3   :  { %5858 = vmatmul.mubr.bf16.gmra.mrb[60].mxu1 %v5241_v10  ;;  %v5112_v14 = vsel %vm4792_vm7, %v9761_v55, %v9840_v53  ;;  %v5113_v36 = vsel %vm4792_vm7, %v9780_v24, %v9841_v61  ;;  %v5215_v55 = vpack.c.bf16 %v14513_v63, %v14466_v22  ;;  %v5220_v22 = vpack.c.bf16 %v16090_v11, %v16090_v11 }
 0x4e4   :  { %8187 = vmatprep.mubr.msk.bf16.mxu1 %vm4756_vm5, %v5202_v52  ;;  %v5224_v47 = vpack.c.bf16 %v5113_v36, %v5112_v14  ;;  %v9849_v37 = vpop.permute.xlu1 %9848  ;;  %v5118_v11 = vsel %vm4792_vm7, %v5101_v59, %v5103_v27  ;;  %v5707_v61 = vadd.f32 %v14941_v38, %v15036_v0  ;;  %v5710_v52 = vadd.f32 %v14943_v4, %v15036_v0 }
 0x4e5   :  { %v9851_v16 = vunpack.i.h.bf16 %v9849_v37  ;;  %v9850_v3 = vunpack.i.l.bf16 %v9849_v37  ;;  %v5243_v25 = vpack.c.bf16 %v14932_v43, %v5118_v11  ;;  %v5718_v38 = vadd.f32 %v14947_v30, %v15036_v0 }
 0x4e6   :  { %5931 = vmatmul.mubr.bf16.gmra.mrb[80].mxu0 %v5224_v47  ;;  %v5726_v30 = vadd.f32 %v14951_v6, %v15036_v0 }
 0x4e7   :  { %5938 = vmatprep.mubr.bf16.mxu0 %v14296_v31  ;;  %v5231_v31 = vpack.c.bf16 %v5115_v42, %v5114_v48  ;;  %v5116_v63 = vsel %vm4792_vm7, %v9811_v51, %v9850_v3  ;;  %v5117_v18 = vsel %vm4792_vm7, %v9825_v1, %v9851_v16  ;;  %v5239_v51 = vpack.c.bf16 %v14635_v2, %v14708_v5 }
 0x4e8   :  { %v5237_v58 = vpack.c.bf16 %v5117_v18, %v5116_v63 }
 0x4ea   :  { %v7807_v24 = vpop.f32.mrb[16].mxu1 }
 0x4eb   :  { %8188 = vmatmul.mubr.msk.bf16.vlgmr.msra.gmra.mrb[64].mxu1 %vm4756_vm5, %v5209_v8  ;;  %v7808_v23 = vpop.f32.mrb[17].mxu1  ;;  %v5715_v8 = vadd.f32 %v14945_v56, %v15036_v0 }
 0x4ec   :  { %8191 = vmatprep.mubr.msk.bf16.mxu1 %vm4756_vm5, %v5215_v55  ;;  %v14993_v60 = vadd.f32 %v7808_v23, %v7807_v24  ;;  %v7810_v12 = vpop.f32.mrb[18].mxu1 }
 0x4ed   :  { %v7811_v26 = vpop.f32.mrb[19].mxu1 }
 0x4ee   :  { %5939 = vmatmul.mubr.bf16.gmra.mrb[84].mxu0 %v5231_v31  ;;  %v14997_v39 = vadd.f32 %v7811_v26, %v7810_v12  ;;  %v5723_v26 = vadd.f32 %v14949_v15, %v15036_v0  ;;  %v5731_v15 = vadd.f32 %v14954_v17, %v15036_v0 }
 0x4ef   :  { %5946 = vmatprep.mubr.bf16.mxu0 %v5238_v9 }
 0x4f3   :  { %8192 = vmatmul.mubr.msk.bf16.gmra.mrb[68].mxu1 %vm4756_vm5, %v5220_v22 }
 0x4f4   :  { %8195 = vmatprep.mubr.msk.bf16.mxu1 %vm4756_vm5, %v5226_v33 }
 0x4f6   :  { %5947 = vmatmul.mubr.bf16.gmra.mrb[88].mxu0 %v5237_v58 }
 0x4f7   :  { %5954 = vmatprep.mubr.bf16.mxu0 %v14364_v35 }
 0x4fb   :  { %8196 = vmatmul.mubr.msk.bf16.gmra.mrb[72].mxu1 %vm4756_vm5, %v5233_v41 }
 0x4fc   :  { %8199 = vmatprep.mubr.msk.bf16.mxu1 %vm4756_vm5, %v5239_v51 }
 0x4fe   :  { %5955 = vmatmul.mubr.bf16.gmra.mrb[92].mxu0 %v5243_v25 }
 0x503   :  { %8200 = vmatmul.mubr.msk.bf16.gmra.mrb[76].mxu1 %vm4756_vm5, %v5220_v22 }
 0x507   :  { %v7813_v19 = vpop.f32.mrb[20].mxu1 }
 0x508   :  { %v7814_v28 = vpop.f32.mrb[21].mxu1 }
 0x509   :  { %v15021_v35 = vadd.f32 %v7814_v28, %v7813_v19  ;;  %v7816_v1 = vpop.f32.mrb[22].mxu1 }
 0x50a   :  { %v7817_v59 = vpop.f32.mrb[23].mxu1 }
 0x50b   :  { %v15023_v21 = vadd.f32 %v7817_v59, %v7816_v1 }
 0x529   :  { %v7819_v62 = vpop.f32.mrb[24].mxu1 }
 0x52a   :  { %v7820_v57 = vpop.f32.mrb[25].mxu1 }
 0x52b   :  { %v15025_v2 = vadd.f32 %v7820_v57, %v7819_v62  ;;  %v7822_v5 = vpop.f32.mrb[26].mxu1  ;;  %v5734_v57 = vadd.f32 %v14958_v44, %v15036_v0 }
 0x52c   :  { %v7823_v7 = vpop.f32.mrb[27].mxu1 }
 0x52d   :  { %v15027_v43 = vadd.f32 %v7823_v7, %v7822_v5 }
 0x538   :  { %v7825_v54 = vpop.f32.mrb[28].mxu1 }
 0x539   :  { %v7826_v50 = vpop.f32.mrb[29].mxu1 }
 0x53a   :  { %v15029_v32 = vadd.f32 %v7826_v50, %v7825_v54  ;;  %v7828_v13 = vpop.f32.mrb[30].mxu1 }
 0x53b   :  { %v7829_v20 = vpop.f32.mrb[31].mxu1 }
 0x53c   :  { %v15031_v49 = vadd.f32 %v7829_v20, %v7828_v13 }
 0x540   :  { %v7847_v45 = vpop.f32.mrb[32].mxu1 }
 0x541   :  { %v7848_v40 = vpop.f32.mrb[33].mxu1 }
 0x542   :  { %v7849_v53 = vadd.f32 %v7848_v40, %v7847_v45  ;;  %v7850_v10 = vpop.f32.mrb[34].mxu1 }
 0x543   :  { %v7851_v34 = vpop.f32.mrb[35].mxu1 }
 0x544   :  { %v5804_v14 = vadd.f32 %v7849_v53, %v5707_v61  ;;  %v7852_v36 = vadd.f32 %v7851_v34, %v7850_v10  ;;  %v5739_v10 = vadd.f32 %v14993_v60, %v15036_v0 }
 0x546   :  { %v5807_v47 = vadd.f32 %v7852_v36, %v5710_v52  ;;  %v5742_v36 = vadd.f32 %v14997_v39, %v15036_v0 }
 0x548   :  { %v7853_v46 = vpop.f32.mrb[36].mxu1 }
 0x549   :  { %v7854_v29 = vpop.f32.mrb[37].mxu1 }
 0x54a   :  { %v7855_v48 = vadd.f32 %v7854_v29, %v7853_v46  ;;  %v7856_v42 = vpop.f32.mrb[38].mxu1 }
 0x54b   :  { %v7857_v37 = vpop.f32.mrb[39].mxu1 }
 0x54c   :  { %v5812_v55 = vadd.f32 %v7855_v48, %v5715_v8  ;;  %v7858_v24 = vadd.f32 %v7857_v37, %v7856_v42 }
 0x54e   :  { %v5815_v23 = vadd.f32 %v7858_v24, %v5718_v38 }
 0x54f   :  { %v7911_v31 = vpop.f32.mrb[64].mxu0 }
 0x550   :  { %v7859_v16 = vpop.f32.mrb[40].mxu1  ;;  %v7912_v4 = vpop.f32.mrb[65].mxu0 }
 0x551   :  { %v7913_v3 = vadd.f32 %v7912_v4, %v7911_v31  ;;  %v7860_v12 = vpop.f32.mrb[41].mxu1  ;;  %v7914_v9 = vpop.f32.mrb[66].mxu0  ;;  %v5747_v31 = vadd.f32 %v15021_v35, %v15036_v0  ;;  %v5755_v35 = vadd.f32 %v15025_v2, %v15036_v0 }
 0x552   :  { %v7861_v22 = vadd.f32 %v7860_v12, %v7859_v16  ;;  %v7862_v56 = vpop.f32.mrb[42].mxu1  ;;  %v7915_v63 = vpop.f32.mrb[67].mxu0 }
 0x553   :  { %v7916_v18 = vadd.f32 %v7915_v63, %v7914_v9  ;;  %v7863_v33 = vpop.f32.mrb[43].mxu1  ;;  %v15048_v58 = vadd.f32 %v7913_v3, %v5804_v14  ;;  %v5750_v3 = vadd.f32 %v15023_v21, %v15036_v0  ;;  %v5758_v21 = vadd.f32 %v15027_v43, %v15036_v0 }
 0x554   :  { %v5820_v27 = vadd.f32 %v7861_v22, %v5723_v26  ;;  %v7864_v11 = vadd.f32 %v7863_v33, %v7862_v56 }
 0x555   :  { %v15052_v41 = vadd.f32 %v7916_v18, %v5807_v47 }
 0x556   :  { %v5823_v51 = vadd.f32 %v7864_v11, %v5726_v30 }
 0x558   :  { %v7865_v25 = vpop.f32.mrb[44].mxu1 }
 0x559   :  { %v7866_v19 = vpop.f32.mrb[45].mxu1 }
 0x55a   :  { %v7867_v28 = vadd.f32 %v7866_v19, %v7865_v25  ;;  %v7868_v1 = vpop.f32.mrb[46].mxu1 }
 0x55b   :  { %v7869_v59 = vpop.f32.mrb[47].mxu1  ;;  %v7917_v62 = vpop.f32.mrb[68].mxu0 }
 0x55c   :  { %v5828_v5 = vadd.f32 %v7867_v28, %v5731_v15  ;;  %v7870_v7 = vadd.f32 %v7869_v59, %v7868_v1  ;;  %v7918_v6 = vpop.f32.mrb[69].mxu0 }
 0x55d   :  { %v7919_v54 = vadd.f32 %v7918_v6, %v7917_v62  ;;  %v7920_v50 = vpop.f32.mrb[70].mxu0 }
 0x55e   :  { %v5831_v13 = vadd.f32 %v7870_v7, %v5734_v57  ;;  %v7921_v20 = vpop.f32.mrb[71].mxu0 }
 0x55f   :  { %v7922_v45 = vadd.f32 %v7921_v20, %v7920_v50  ;;  %v15058_v40 = vadd.f32 %v7919_v54, %v5812_v55 }
 0x560   :  { %v7871_v61 = vpop.f32.mrb[48].mxu1 }
 0x561   :  { %v7872_v53 = vpop.f32.mrb[49].mxu1  ;;  %v15060_v17 = vadd.f32 %v7922_v45, %v5815_v23 }
 0x562   :  { %v7873_v34 = vadd.f32 %v7872_v53, %v7871_v61  ;;  %v7874_v52 = vpop.f32.mrb[50].mxu1 }
 0x563   :  { %v7875_v44 = vpop.f32.mrb[51].mxu1  ;;  %v7923_v14 = vpop.f32.mrb[72].mxu0 }
 0x564   :  { %v5836_v47 = vadd.f32 %v7873_v34, %v5739_v10  ;;  %v7876_v46 = vadd.f32 %v7875_v44, %v7874_v52  ;;  %v7924_v29 = vpop.f32.mrb[73].mxu0 }
 0x565   :  { %v7925_v8 = vadd.f32 %v7924_v29, %v7923_v14  ;;  %v7926_v48 = vpop.f32.mrb[74].mxu0 }
 0x566   :  { %v5839_v42 = vadd.f32 %v7876_v46, %v5742_v36  ;;  %v7927_v37 = vpop.f32.mrb[75].mxu0 }
 0x567   :  { %v7928_v38 = vadd.f32 %v7927_v37, %v7926_v48  ;;  %v15066_v55 = vadd.f32 %v7925_v8, %v5820_v27 }
 0x568   :  { %v7877_v24 = vpop.f32.mrb[52].mxu1 }
 0x569   :  { %v7878_v23 = vpop.f32.mrb[53].mxu1  ;;  %v15068_v60 = vadd.f32 %v7928_v38, %v5823_v51 }
 0x56a   :  { %v7879_v16 = vadd.f32 %v7878_v23, %v7877_v24  ;;  %v7880_v4 = vpop.f32.mrb[54].mxu1 }
 0x56b   :  { %v7881_v39 = vpop.f32.mrb[55].mxu1 }
 0x56c   :  { %v5844_v12 = vadd.f32 %v7879_v16, %v5747_v31  ;;  %v7882_v9 = vadd.f32 %v7881_v39, %v7880_v4 }
 0x56d   :  { %v7929_v26 = vpop.f32.mrb[76].mxu0 }
 0x56e   :  { %v5847_v22 = vadd.f32 %v7882_v9, %v5750_v3  ;;  %v7930_v56 = vpop.f32.mrb[77].mxu0 }
 0x56f   :  { %v7931_v63 = vadd.f32 %v7930_v56, %v7929_v26  ;;  %v7932_v18 = vpop.f32.mrb[78].mxu0 }
 0x570   :  { %v7883_v33 = vpop.f32.mrb[56].mxu1  ;;  %v7933_v30 = vpop.f32.mrb[79].mxu0 }
 0x571   :  { %v7934_v27 = vadd.f32 %v7933_v30, %v7932_v18  ;;  %v7884_v11 = vpop.f32.mrb[57].mxu1  ;;  %v5925_v51 = vadd.f32 %v7931_v63, %v5828_v5  ;;  %v5763_v5 = vadd.f32 %v15029_v32, %v15036_v0 }
 0x572   :  { %v7885_v25 = vadd.f32 %v7884_v11, %v7883_v33  ;;  %v7886_v19 = vpop.f32.mrb[58].mxu1 }
 0x573   :  { %v7887_v15 = vpop.f32.mrb[59].mxu1  ;;  %v5928_v28 = vadd.f32 %v7934_v27, %v5831_v13  ;;  %v5766_v13 = vadd.f32 %v15031_v49, %v15036_v0 }
 0x574   :  { %v15078_v1 = vadd.f32 %v7885_v25, %v5755_v35  ;;  %v7888_v59 = vadd.f32 %v7887_v15, %v7886_v19 }
 0x576   :  { %v15080_v62 = vadd.f32 %v7888_v59, %v5758_v21 }
 0x5b6   :  { %v7889_v57 = vpop.f32.mrb[60].mxu1 }
 0x5b7   :  { %v7890_v7 = vpop.f32.mrb[61].mxu1 }
 0x5b8   :  { %v7891_v6 = vadd.f32 %v7890_v7, %v7889_v57  ;;  %v7892_v54 = vpop.f32.mrb[62].mxu1 }
 0x5b9   :  { %v7893_v2 = vpop.f32.mrb[63].mxu1  ;;  %v7935_v50 = vpop.f32.mrb[80].mxu0 }
 0x5ba   :  { %v15086_v20 = vadd.f32 %v7891_v6, %v5763_v5  ;;  %v7894_v43 = vadd.f32 %v7893_v2, %v7892_v54  ;;  %v7936_v45 = vpop.f32.mrb[81].mxu0 }
 0x5bb   :  { %v7937_v61 = vadd.f32 %v7936_v45, %v7935_v50  ;;  %v7938_v53 = vpop.f32.mrb[82].mxu0 }
 0x5bc   :  { %v15088_v10 = vadd.f32 %v7894_v43, %v5766_v13  ;;  %v7939_v34 = vpop.f32.mrb[83].mxu0 }
 0x5bd   :  { %v7940_v52 = vadd.f32 %v7939_v34, %v7938_v53  ;;  %v15090_v44 = vadd.f32 %v7937_v61, %v5836_v47 }
 0x5be   :  { %v8189_v32 = vpop.f32.mrb[64].mxu1 }
 0x5bf   :  { %v6006_v14 = vadd.f32 %v8189_v32, %v15058_v40  ;;  %v5997_v36 = vpop.f32.mrb[65].mxu1  ;;  %v15093_v46 = vadd.f32 %v7940_v52, %v5839_v42 }
 0x5c0   :  { %v5998_v49 = vadd.f32 %v5997_v36, %v15048_v58  ;;  %v8190_v0 = vpop.f32.mrb[66].mxu1 }
 0x5c1   :  { %v6009_v29 = vadd.f32 %v8190_v0, %v15060_v17  ;;  %v7941_v8 = vpop.f32.mrb[84].mxu0  ;;  %v6000_v48 = vpop.f32.mrb[67].mxu1  ;;  %v6062_v24 = vmax.f32 %v6006_v14, 0.0 }
 0x5c2   :  { %v6001_v37 = vadd.f32 %v6000_v48, %v15052_v41  ;;  %v7942_v38 = vpop.f32.mrb[85].mxu0  ;;  %v6060_v16 = vmax.f32 %v5998_v49, 0.0 }
 0x5c3   :  { %v6063_v23 = vmax.f32 %v6009_v29, 0.0  ;;  %v7943_v47 = vadd.f32 %v7942_v38, %v7941_v8  ;;  %v7944_v31 = vpop.f32.mrb[86].mxu0 }
 0x5c4   :  { %v6061_v4 = vmax.f32 %v6001_v37, 0.0  ;;  %v7945_v40 = vpop.f32.mrb[87].mxu0 }
 0x5c5   :  { %v6077_v39 = vmax.f32 %v6062_v24, %v6063_v23  ;;  %v7946_v42 = vadd.f32 %v7945_v40, %v7944_v31  ;;  %v5941_v3 = vadd.f32 %v7943_v47, %v5844_v12 }
 0x5c6   :  { %v6076_v9 = vmax.f32 %v6060_v16, %v6061_v4  ;;  %v8193_v58 = vpop.f32.mrb[68].mxu1 }
 0x5c7   :  { %v6093_v26 = vrot.slane %v6077_v39, 1  ;;  %v6022_v56 = vadd.f32 %v8193_v58, %v5925_v51  ;;  %v6013_v17 = vpop.f32.mrb[69].mxu1  ;;  %v5944_v63 = vadd.f32 %v7946_v42, %v5847_v22 }
 0x5c8   :  { %v6092_v18 = vrot.slane %v6076_v9, 1  ;;  %v6014_v41 = vadd.f32 %v6013_v17, %v15066_v55  ;;  %v8194_v33 = vpop.f32.mrb[70].mxu1 }
 0x5c9   :  { %v6109_v30 = vmax.f32 %v6077_v39, %v6093_v26  ;;  %v6025_v27 = vadd.f32 %v8194_v33, %v5928_v28  ;;  %v7947_v11 = vpop.f32.mrb[88].mxu0  ;;  %v6016_v35 = vpop.f32.mrb[71].mxu1  ;;  %v6066_v19 = vmax.f32 %v6022_v56, 0.0 }
 0x5ca   :  { %v6108_v25 = vmax.f32 %v6076_v9, %v6092_v18  ;;  %v6017_v15 = vadd.f32 %v6016_v35, %v15068_v60  ;;  %v7948_v21 = vpop.f32.mrb[89].mxu0  ;;  %v6064_v57 = vmax.f32 %v6014_v41, 0.0 }
 0x5cb   :  { %v6125_v12 = vrot.slane %v6109_v30, 1  ;;  %v6141_v59 = vrot.slane %v6109_v30, 2  ;;  %v6067_v7 = vmax.f32 %v6025_v27, 0.0  ;;  %v7950_v51 = vpop.f32.mrb[90].mxu0  ;;  %v6157_v5 = vrot.slane %v6109_v30, 3 }
 0x5cc   :  { %v6124_v22 = vrot.slane %v6108_v25, 1  ;;  %v6140_v6 = vrot.slane %v6108_v25, 2  ;;  %v6065_v54 = vmax.f32 %v6017_v15, 0.0  ;;  %v7951_v55 = vpop.f32.mrb[91].mxu0  ;;  %v7949_v50 = vadd.f32 %v7948_v21, %v7947_v11 }
 0x5cd   :  { %v6173_v2 = vsel %vm4168_vm14, %v6109_v30, %v6125_v12  ;;  %v6079_v28 = vmax.f32 %v6066_v19, %v6067_v7  ;;  %v7952_v13 = vadd.f32 %v7951_v55, %v7950_v51  ;;  %v6156_v45 = vrot.slane %v6108_v25, 3 }
 0x5ce   :  { %v6181_v43 = vsel %vm174_vm0, %v6173_v2, %v6141_v59  ;;  %v6172_v60 = vsel %vm4168_vm14, %v6108_v25, %v6124_v22  ;;  %v6078_v61 = vmax.f32 %v6064_v57, %v6065_v54  ;;  %v8197_v53 = vpop.f32.mrb[72].mxu1  ;;  %v5949_v42 = vadd.f32 %v7949_v50, %v15078_v1 }
 0x5cf   :  { %v15104_v34 = vsel %vm4201_vm15, %v6181_v43, %v6157_v5  ;;  %v6180_v52 = vsel %vm174_vm0, %v6172_v60, %v6140_v6  ;;  %v6095_v32 = vrot.slane %v6079_v28, 1  ;;  %v6038_v14 = vadd.f32 %v8197_v53, %v5941_v3  ;;  %v6029_v36 = vpop.f32.mrb[73].mxu1 }
 0x5d0   :  { %v6205_v49 = vrot.slane %v15104_v34, 7  ;;  %v6188_v0 = vsel %vm4201_vm15, %v6180_v52, %v6156_v45  ;;  %v6094_v29 = vrot.slane %v6078_v61, 1  ;;  %v6030_v8 = vadd.f32 %v6029_v36, %v15090_v44  ;;  %v8198_v48 = vpop.f32.mrb[74].mxu1 }
 0x5d1   :  { %v6204_v37 = vrot.slane %v6188_v0, 7  ;;  %v6111_v38 = vmax.f32 %v6079_v28, %v6095_v32  ;;  %v6070_v24 = vmax.f32 %v6038_v14, 0.0  ;;  %v6041_v23 = vadd.f32 %v8198_v48, %v5944_v63  ;;  %v7953_v47 = vpop.f32.mrb[92].mxu0  ;;  %v6032_v31 = vpop.f32.mrb[75].mxu1 }
 0x5d2   :  { %v6110_v16 = vmax.f32 %v6078_v61, %v6094_v29  ;;  %v6068_v4 = vmax.f32 %v6030_v8, 0.0  ;;  %v6033_v40 = vadd.f32 %v6032_v31, %v15093_v46  ;;  %v7954_v39 = vpop.f32.mrb[93].mxu0  ;;  %v5952_v19 = vadd.f32 %v7952_v13, %v15080_v62 }
 0x5d3   :  { %v6127_v3 = vrot.slane %v6111_v38, 1  ;;  %v6143_v9 = vrot.slane %v6111_v38, 2  ;;  %v6159_v58 = vrot.slane %v6111_v38, 3  ;;  %v6071_v26 = vmax.f32 %v6041_v23, 0.0  ;;  %v7956_v56 = vpop.f32.mrb[94].mxu0 }
 0x5d4   :  { %v6126_v44 = vrot.slane %v6110_v16, 1  ;;  %v6142_v17 = vrot.slane %v6110_v16, 2  ;;  %v6158_v18 = vrot.slane %v6110_v16, 3  ;;  %v6069_v41 = vmax.f32 %v6033_v40, 0.0  ;;  %v7957_v33 = vpop.f32.mrb[95].mxu0 }
 0x5d5   :  { %v6175_v63 = vsel %vm4168_vm14, %v6111_v38, %v6127_v3  ;;  %v6081_v30 = vmax.f32 %v6070_v24, %v6071_v26  ;;  %v7955_v27 = vadd.f32 %v7954_v39, %v7953_v47  ;;  %v7958_v11 = vadd.f32 %v7957_v33, %v7956_v56  ;;  %v16111_v3 = vld [vmem:[#allocation6_spill] sm:$0xff] }
 0x5d6   :  { %v6183_v46 = vsel %vm174_vm0, %v6175_v63, %v6143_v9  ;;  %v6174_v35 = vsel %vm4168_vm14, %v6110_v16, %v6126_v44  ;;  %v6080_v1 = vmax.f32 %v6068_v4, %v6069_v41  ;;  %v8201_v25 = vpop.f32.mrb[76].mxu1  ;;  %v6220_v45 = vsel %vm4168_vm14, 0.0, %v6204_v37 }
 0x5d7   :  { %v6191_v15 = vsel %vm4201_vm15, %v6183_v46, %v6159_v58  ;;  %v6182_v21 = vsel %vm174_vm0, %v6174_v35, %v6142_v17  ;;  %v6097_v12 = vrot.slane %v6081_v30, 1  ;;  %v5957_v59 = vadd.f32 %v7955_v27, %v15086_v20  ;;  %v6045_v57 = vpop.f32.mrb[77].mxu1 }
 0x5d8   :  { %v6207_v7 = vrot.slane %v6191_v15, 7  ;;  %v6190_v51 = vsel %vm4201_vm15, %v6182_v21, %v6158_v18  ;;  %v6096_v5 = vrot.slane %v6080_v1, 1  ;;  %v6046_v22 = vadd.f32 %v6045_v57, %v5949_v42  ;;  %v8202_v6 = vpop.f32.mrb[78].mxu1 }
 0x5d9   :  { %v6206_v54 = vrot.slane %v6190_v51, 7  ;;  %v6113_v55 = vmax.f32 %v6081_v30, %v6097_v12  ;;  %v6054_v2 = vadd.f32 %v8201_v25, %v5957_v59  ;;  %v5960_v28 = vadd.f32 %v7958_v11, %v15088_v10  ;;  %v6048_v62 = vpop.f32.mrb[79].mxu1 }
 0x5da   :  { %v6112_v50 = vmax.f32 %v6080_v1, %v6096_v5  ;;  %v6072_v13 = vmax.f32 %v6046_v22, 0.0  ;;  %v6049_v43 = vadd.f32 %v6048_v62, %v5952_v19  ;;  %v6221_v10 = vsel %vm4168_vm14, 0.0, %v6205_v49 }
 0x5db   :  { %v6129_v60 = vrot.slane %v6113_v55, 1  ;;  %v6145_v20 = vrot.slane %v6113_v55, 2  ;;  %v6161_v61 = vrot.slane %v6113_v55, 3  ;;  %v6074_v53 = vmax.f32 %v6054_v2, 0.0 }
 0x5dc   :  { %v6128_v52 = vrot.slane %v6112_v50, 1  ;;  %v6144_v32 = vrot.slane %v6112_v50, 2  ;;  %v6160_v14 = vrot.slane %v6112_v50, 3  ;;  %v6057_v36 = vadd.f32 %v8202_v6, %v5960_v28 }
 0x5dd   :  { %v6177_v0 = vsel %vm4168_vm14, %v6113_v55, %v6129_v60  ;;  %v6073_v29 = vmax.f32 %v6049_v43, 0.0  ;;  %v15127_v8 = vsel %vm1212_vm3, %v6220_v45, 0.0  ;;  %v15132_v24 = vsel %vm1212_vm3, %v6221_v10, 0.0 }
 0x5de   :  { %v6185_v48 = vsel %vm174_vm0, %v6177_v0, %v6145_v20  ;;  %v6176_v37 = vsel %vm4168_vm14, %v6112_v50, %v6128_v52  ;;  %v6075_v38 = vmax.f32 %v6057_v36, 0.0  ;;  %v6244_v34 = vrot.slane %v15127_v8, 1 }
 0x5df   :  { %v6193_v23 = vsel %vm4201_vm15, %v6185_v48, %v6161_v61  ;;  %v6184_v47 = vsel %vm174_vm0, %v6176_v37, %v6144_v32  ;;  %v6082_v31 = vmax.f32 %v6072_v13, %v6073_v29  ;;  %v6246_v40 = vrot.slane %v15132_v24, 1  ;;  %v16112_v37 = vld [vmem:[#allocation5_spill] sm:$0xff] }
 0x5e0   :  { %v6209_v16 = vrot.slane %v6193_v23, 7  ;;  %v6192_v49 = vsel %vm4201_vm15, %v6184_v47, %v6160_v14  ;;  %v6083_v4 = vmax.f32 %v6074_v53, %v6075_v38  ;;  %v6245_v9 = vsel %vm496_vm2, %v6244_v34, %v16111_v3  ;;  %v9964_v34 = vld [vmem:[%s15644_s5 + $0xc0] sm:$0xff]  }
 0x5e1   :  { %v6208_v39 = vrot.slane %v6192_v49, 7  ;;  %v6098_v42 = vrot.slane %v6082_v31, 1  ;;  %v6222_v58 = vsel %vm4168_vm14, 0.0, %v6206_v54  ;;  %v6247_v56 = vsel %vm496_vm2, %v6246_v40, %v16111_v3  ;;  %v9966_v49 = vld [vmem:[%s15644_s5 + $0xc8] sm:$0xff]   ;;  %8009 = vmatprep.subr.bf16.mxu0 %v9964_v34  ;;  %v9971_v40 = vld [vmem:[%s15644_s5] sm:$0xff]  }
 0x5e2   :  { %v6099_v26 = vrot.slane %v6083_v4, 1  ;;  %v6223_v44 = vsel %vm4168_vm14, 0.0, %v6207_v7  ;;  %v15146_v17 = vsel %vm1212_vm3, %v6222_v58, 0.0  ;;  %v9852_v41 = vpack.i.bf16 %v6247_v56, %v6245_v9 }
 0x5e3   :  { %v6114_v18 = vmax.f32 %v6082_v31, %v6098_v42  ;;  %v15149_v33 = vsel %vm1212_vm3, %v6223_v44, 0.0  ;;  %v6248_v63 = vrot.slane %v15146_v17, 1  ;;  %v6224_v11 = vsel %vm4168_vm14, 0.0, %v6208_v39  ;;  %v9972_v39 = vld [vmem:[%s15644_s5 + $0x48] sm:$0xff]   ;;  %v9968_v44 = vld [vmem:[%s15644_s5 + $0xd0] sm:$0xff]  }
 0x5e4   :  { %v6115_v30 = vmax.f32 %v6083_v4, %v6099_v26  ;;  %v6250_v27 = vrot.slane %v15149_v33, 1  ;;  %v6225_v46 = vsel %vm4168_vm14, 0.0, %v6209_v16  ;;  %9853 = vrot.lane.b32.xlu1 %v9852_v41, %s10080_s21  ;;  %v15162_v51 = vsel %vm1212_vm3, %v6224_v11, 0.0  ;;  %v9965_v16 = vld [vmem:[%s15644_s5 + $0x80] sm:$0xff]   ;;  %v9976_v41 = vld [vmem:[%s15644_s5 + $0x50] sm:$0xff]  }
 0x5e5   :  { %v6130_v35 = vrot.slane %v6114_v18, 1  ;;  %v6146_v1 = vrot.slane %v6114_v18, 2  ;;  %v6162_v25 = vrot.slane %v6114_v18, 3  ;;  %v6249_v19 = vsel %vm496_vm2, %v6248_v63, %v16111_v3  ;;  %v9970_v4 = vld [vmem:[%s15644_s5 + $0x40] sm:$0xff]   ;;  %8010 = vmatpush3.bf16.msra.mxu0 %v9965_v16 }
 0x5e6   :  { %v6131_v15 = vrot.slane %v6115_v30, 1  ;;  %v6147_v21 = vrot.slane %v6115_v30, 2  ;;  %v6163_v12 = vrot.slane %v6115_v30, 3  ;;  %v6251_v59 = vsel %vm496_vm2, %v6250_v27, %v16111_v3  ;;  %8011 = vmatprep.subr.bf16.mxu0 %v9966_v49  ;;  %7969 = vmatprep.subr.bf16.mxu1 %v9970_v4 }
 0x5e7   :  { %v6178_v57 = vsel %vm4168_vm14, %v6114_v18, %v6130_v35  ;;  %v9857_v7 = vpack.i.bf16 %v6251_v59, %v6249_v19  ;;  %v15165_v5 = vsel %vm1212_vm3, %v6225_v46, 0.0  ;;  %v6252_v54 = vrot.slane %v15162_v51, 1  ;;  %7970 = vmatpush3.bf16.msra.mxu1 %v9971_v40  ;;  %v9973_v18 = vld [vmem:[%s15644_s5 + $0x8] sm:$0xff]   ;;  %v9974_v46 = vld [vmem:[%s15644_s5 + $0xd8] sm:$0xff]   ;;  %v9977_v35 = vld [vmem:[%s15644_s5 + $0x10] sm:$0xff]  }
 0x5e8   :  { %v6179_v22 = vsel %vm4168_vm14, %v6115_v30, %v6131_v15  ;;  %v6186_v6 = vsel %vm174_vm0, %v6178_v57, %v6146_v1  ;;  %v6254_v55 = vrot.slane %v15165_v5, 1  ;;  %v6287_v10 = vrot.slane %v15127_v8, 2  ;;  %7971 = vmatprep.subr.bf16.mxu1 %v9972_v39  ;;  %v9969_v30 = vld [vmem:[%s15644_s5 + $0x90] sm:$0xff]   ;;  %v9978_v1 = vld [vmem:[%s15644_s5 + $0x58] sm:$0xff]   ;;  %v9980_v15 = vld [vmem:[%s15644_s5 + $0xe0] sm:$0xff]  }
 0x5e9   :  { %v6187_v2 = vsel %vm174_vm0, %v6179_v22, %v6147_v21  ;;  %v6194_v28 = vsel %vm4201_vm15, %v6186_v6, %v6162_v25  ;;  %9858 = vrot.lane.b32.xlu0 %v9857_v7, %s10080_s21  ;;  %v6253_v13 = vsel %vm496_vm2, %v6252_v54, %v16111_v3  ;;  %v6289_v48 = vrot.slane %v15132_v24, 2  ;;  %v9975_v19 = vld [vmem:[%s15644_s5 + $0x98] sm:$0xff]   ;;  %v9981_v59 = vld [vmem:[%s15644_s5 + $0xa0] sm:$0xff]   ;;  %v9985_v57 = vld [vmem:[%s15644_s5 + $0xe8] sm:$0xff]  }
 0x5ea   :  { %v6195_v62 = vsel %vm4201_vm15, %v6187_v2, %v6163_v12  ;;  %v6210_v50 = vrot.slane %v6194_v28, 7  ;;  %v6255_v43 = vsel %vm496_vm2, %v6254_v55, %v16111_v3  ;;  %v15199_v38 = vsel %vm854_vm1, %v6287_v10, %v16112_v37  ;;  %v9979_v21 = vld [vmem:[%s15644_s5 + $0x18] sm:$0xff]   ;;  %v9982_v12 = vld [vmem:[%s15644_s5 + $0x60] sm:$0xff]   ;;  %v9984_v22 = vld [vmem:[%s15644_s5 + $0x68] sm:$0xff]  }
 0x5eb   :  { %v6211_v45 = vrot.slane %v6195_v62, 7  ;;  %v9862_v60 = vpack.i.bf16 %v6255_v43, %v6253_v13  ;;  %v15203_v23 = vsel %vm854_vm1, %v6289_v48, %v16112_v37  ;;  %v6291_v47 = vrot.slane %v15146_v17, 2  ;;  %7972 = vmatpush3.bf16.msra.mxu1 %v9973_v18  ;;  %v9983_v7 = vld [vmem:[%s15644_s5 + $0x20] sm:$0xff]   ;;  %v9987_v6 = vld [vmem:[%s15644_s5 + $0xa8] sm:$0xff]   ;;  %v9989_v54 = vld [vmem:[%s15644_s5 + $0xf0] sm:$0xff]  }
 0x5ec   :  { %v6226_v20 = vsel %vm4168_vm14, 0.0, %v6210_v50  ;;  %v6293_v31 = vrot.slane %v15149_v33, 2  ;;  %v9882_v42 = vpack.i.bf16 %v15203_v23, %v15199_v38  ;;  %v6295_v26 = vrot.slane %v15162_v51, 2  ;;  %7973 = vmatprep.subr.bf16.mxu1 %v9976_v41  ;;  %v9986_v55 = vld [vmem:[%s15644_s5 + $0x28] sm:$0xff]   ;;  %v9988_v2 = vld [vmem:[%s15644_s5 + $0x70] sm:$0xff]   ;;  %v9992_v50 = vld [vmem:[%s15644_s5 + $0x78] sm:$0xff]  }
 0x5ed   :  { %9863 = vrot.lane.b32.xlu1 %v9862_v60, %s10080_s21  ;;  %v6227_v61 = vsel %vm4168_vm14, 0.0, %v6211_v45  ;;  %v15183_v53 = vsel %vm1212_vm3, %v6226_v20, 0.0  ;;  %v15234_v9 = vsel %vm854_vm1, %v6291_v47, %v16112_v37  ;;  %v6297_v56 = vrot.slane %v15165_v5, 2  ;;  %v9991_v28 = vld [vmem:[%s15644_s5 + $0xb0] sm:$0xff]   ;;  %v9993_v13 = vld [vmem:[%s15644_s5 + $0xf8] sm:$0xff]   ;;  %v15335_v60 = vld [vmem:[%s15644_s5 + $0x100] sm:$0xff]  }
 0x5ee   :  { %v15186_v52 = vsel %vm1212_vm3, %v6227_v61, 0.0  ;;  %v6256_v32 = vrot.slane %v15183_v53, 1  ;;  %v15238_v58 = vsel %vm854_vm1, %v6293_v31, %v16112_v37  ;;  %v15259_v27 = vsel %vm854_vm1, %v6295_v26, %v16112_v37  ;;  %v9990_v62 = vld [vmem:[%s15644_s5 + $0x30] sm:$0xff]   ;;  %v9994_v43 = vld [vmem:[%s15644_s5 + $0x38] sm:$0xff]   ;;  %vm15385_vm0 = vmneg %vm4774_vm6 }
 0x5ef   :  { %v6258_v14 = vrot.slane %v15186_v52, 1  ;;  %v9892_v63 = vpack.i.bf16 %v15238_v58, %v15234_v9  ;;  %v15263_v11 = vsel %vm854_vm1, %v6297_v56, %v16112_v37  ;;  %7974 = vmatpush3.bf16.msra.mxu1 %v9977_v35  ;;  %v9995_v45 = vld [vmem:[%s15644_s5 + $0xb8] sm:$0xff]   ;;  %v6301_v26 = vrot.slane %v15186_v52, 2 }
 0x5f0   :  { %v6257_v36 = vsel %vm496_vm2, %v6256_v32, %v16111_v3  ;;  %v9902_v25 = vpack.i.bf16 %v15263_v11, %v15259_v27  ;;  %7975 = vmatprep.subr.bf16.mxu1 %v9978_v1 }
 0x5f1   :  { %v6259_v0 = vsel %vm496_vm2, %v6258_v14, %v16111_v3  ;;  %v15376_v41 = vsel %vm854_vm1, %v6301_v26, %v16112_v37 }
 0x5f2   :  { %v9867_v29 = vpack.i.bf16 %v6259_v0, %v6257_v36 }
 0x5f3   :  { %7976 = vmatpush3.bf16.msra.mxu1 %v9979_v21 }
 0x5f4   :  { %9868 = vrot.lane.b32.xlu0 %v9867_v29, %s10080_s21  ;;  %7977 = vmatprep.subr.bf16.mxu1 %v9982_v12 }
 0x5f7   :  { %7978 = vmatpush3.bf16.msra.mxu1 %v9983_v7  ;;  %v10014_v7 = vld [vmem:[%s15646_s7 + $0x18] sm:$0xff]  }
 0x5f8   :  { %6260 = vrot.lane.b32.xlu0 %v16111_v3, %s10080_s21  ;;  %v9967_v3 = vld [vmem:[%s15644_s5 + $0x88] sm:$0xff]   ;;  %7979 = vmatprep.subr.bf16.mxu1 %v9984_v22 }
 0x5f9   :  { %8012 = vmatpush3.bf16.msra.mxu0 %v9967_v3  ;;  %v6299_v3 = vrot.slane %v15183_v53, 2 }
 0x5fa   :  { %8013 = vmatprep.subr.bf16.mxu0 %v9968_v44 }
 0x5fb   :  { %7980 = vmatpush3.bf16.msra.mxu1 %v9986_v55  ;;  %v15372_v18 = vsel %vm854_vm1, %v6299_v3, %v16112_v37  ;;  %vm10083_vm1 = vmmov 1   ;;  %v10018_v55 = vld [vmem:[%s15646_s7 + $0x20] sm:$0xff]  }
 0x5fc   :  { %9883 = vrot.lane.b32.xlu0 %v9882_v42, %s10080_s21  ;;  %7981 = vmatprep.subr.bf16.mxu1 %v9988_v2  ;;  %vm15397_vm2 = vmpackc.low %vm10083_vm1, %vm15385_vm0 }
 0x5fd   :  { %8014 = vmatpush3.bf16.msra.mxu0 %v9969_v30  ;;  %vm15404_vm3 = vmpackc.low %vm15385_vm0, %vm10083_vm1 }
 0x5fe   :  { %8015 = vmatprep.subr.bf16.mxu0 %v9974_v46 }
 0x5ff   :  { %7982 = vmatpush3.bf16.msra.mxu1 %v9990_v62 }
 0x600   :  { %9893 = vrot.lane.b32.xlu0 %v9892_v63, %s10080_s21  ;;  %7983 = vmatprep.subr.bf16.mxu1 %v9992_v50 }
 0x601   :  { %8016 = vmatpush3.bf16.msra.mxu0 %v9975_v19 }
 0x602   :  { %8017 = vmatprep.subr.bf16.mxu0 %v9980_v15 }
 0x603   :  { %7984 = vmatpush3.bf16.msra.mxu1 %v9994_v43 }
 0x604   :  { %9903 = vrot.lane.b32.xlu0 %v9902_v25, %s10080_s21  ;;  %8203 = vmatprep.subr.bf16.mxu1 %v15335_v60 }
 0x605   :  { %8018 = vmatpush3.bf16.msra.mxu0 %v9981_v59 }
 0x606   :  { %8019 = vmatprep.subr.bf16.mxu0 %v9985_v57 }
 0x609   :  { %8020 = vmatpush3.bf16.msra.mxu0 %v9987_v6 }
 0x60a   :  { %8021 = vmatprep.subr.bf16.mxu0 %v9989_v54 }
 0x60d   :  { %8022 = vmatpush3.bf16.msra.mxu0 %v9991_v28 }
 0x60e   :  { %8023 = vmatprep.subr.bf16.mxu0 %v9993_v13  ;;  %v9997_v13 = vld [vmem:[%s15644_s5 + $0x108] sm:$0xff]  }
 0x611   :  { %8024 = vmatpush3.bf16.msra.mxu0 %v9995_v45 }
 0x656   :  { %v9854_v20 = vpop.permute.xlu1 %9853 }
 0x657   :  { %v9856_v61 = vunpack.i.h.bf16 %v9854_v20  ;;  %v9855_v32 = vunpack.i.l.bf16 %v9854_v20 }
 0x659   :  { %v6314_v14 = vsel %vm4774_vm6, %v15132_v24, %v9856_v61  ;;  %v6313_v36 = vsel %vm4774_vm6, %v15127_v8, %v9855_v32 }
 0x65a   :  { %v9872_v0 = vpack.i.bf16 %v6314_v14, %v6313_v36 }
 0x65b   :  { %v9859_v29 = vpop.permute.xlu0 %9858 }
 0x65c   :  { %v9861_v10 = vunpack.i.h.bf16 %v9859_v29  ;;  %v9860_v48 = vunpack.i.l.bf16 %v9859_v29  ;;  %9873 = vrot.lane.b32.xlu1 %v9872_v0, %s10080_s21 }
 0x65e   :  { %v6316_v47 = vsel %vm4774_vm6, %v15149_v33, %v9861_v10  ;;  %v6315_v31 = vsel %vm4774_vm6, %v15146_v17, %v9860_v48  ;;  %v9998_v10 = vld [vmem:[%s15644_s5 + $0x110] sm:$0xff]  }
 0x65f   :  { %v9877_v34 = vpack.i.bf16 %v6316_v47, %v6315_v31  ;;  %v15347_v16 = vpack.c.bf16 %v6315_v31, %v6314_v14  ;;  %v9864_v49 = vpop.permute.xlu1 %9863 }
 0x660   :  { %v9866_v24 = vunpack.i.h.bf16 %v9864_v49  ;;  %v9865_v4 = vunpack.i.l.bf16 %v9864_v49 }
 0x661   :  { %6815 = vmatprep.mubr.bf16.mxu0 %v15347_v16  ;;  %9878 = vrot.lane.b32.xlu1 %v9877_v34, %s10080_s21 }
 0x662   :  { %v6318_v8 = vsel %vm4774_vm6, %v15165_v5, %v9866_v24  ;;  %v15355_v40 = vsel %vm4774_vm6, %v15162_v51, %v9865_v4  ;;  %v9999_v4 = vld [vmem:[%s15644_s5 + $0x118] sm:$0xff]  }
 0x663   :  { %v9887_v33 = vpack.i.bf16 %v6318_v8, %v15355_v40 }
 0x665   :  { %9888 = vrot.lane.b32.xlu1 %v9887_v33, %s10080_s21 }
 0x666   :  { %v9869_v17 = vpop.permute.xlu0 %9868 }
 0x667   :  { %v9871_v39 = vunpack.i.h.bf16 %v9869_v17  ;;  %v9870_v42 = vunpack.i.l.bf16 %v9869_v17 }
 0x669   :  { %v15363_v56 = vsel %vm4774_vm6, %v15186_v52, %v9871_v39  ;;  %v6319_v5 = vsel %vm4774_vm6, %v15183_v53, %v9870_v42  ;;  %v9907_v52 = vpack.i.bf16 %v15376_v41, %v15372_v18 }
 0x66a   :  { %v9897_v51 = vpack.i.bf16 %v15363_v56, %v6319_v5  ;;  %v15368_v44 = vpack.c.bf16 %v6319_v5, %v6318_v8  ;;  %v15382_v53 = vpop.permute.xlu0 %6260 }
 0x66b   :  { %v7667_v22 = vpack.c.bf16 %v6313_v36, %v15382_v53 }
 0x66c   :  { %9898 = vrot.lane.b32.xlu1 %v9897_v51, %s10080_s21 }
 0x66e   :  { %v9884_v63 = vpop.permute.xlu0 %9883 }
 0x66f   :  { %v9886_v35 = vunpack.i.h.bf16 %v9884_v63  ;;  %v9885_v1 = vunpack.i.l.bf16 %v9884_v63  ;;  %v7671_v63 = vpack.c.bf16 %v15355_v40, %v15382_v53  ;;  %v6401_v40 = vpack.c.bf16 %v16112_v37, %v15238_v58  ;;  %v10002_v58 = vld [vmem:[%s15646_s7] sm:$0xff]  }
 0x670   :  { %9908 = vrot.lane.b32.xlu1 %v9907_v52, %s10080_s21 }
 0x672   :  { %v9894_v15 = vpop.permute.xlu0 %9893 }
 0x673   :  { %v9895_v28 = vunpack.i.l.bf16 %v9894_v15  ;;  %v9896_v43 = vunpack.i.h.bf16 %v9894_v15  ;;  %v10009_v15 = vld [vmem:[%s15646_s7 + $0xd0] sm:$0xff]  }
 0x676   :  { %v9904_v48 = vpop.permute.xlu0 %9903 }
 0x677   :  { %v9906_v49 = vunpack.i.h.bf16 %v9904_v48  ;;  %v9905_v24 = vunpack.i.l.bf16 %v9904_v48 }
 0x6ce   :  { %v9874_v30 = vpop.permute.xlu1 %9873 }
 0x6cf   :  { %v9876_v25 = vunpack.i.h.bf16 %v9874_v30  ;;  %v9875_v19 = vunpack.i.l.bf16 %v9874_v30  ;;  %v7679_v30 = vpack.c.bf16 %v15382_v53, %v15363_v56  ;;  %v6406_v56 = vpack.c.bf16 %v15372_v18, %v15263_v11 }
 0x6d1   :  { %v6362_v21 = vsel %vm4774_vm6, %v9876_v25, %v9886_v35  ;;  %v6361_v12 = vsel %vm4774_vm6, %v9875_v19, %v9885_v1  ;;  %v6385_v59 = vsel %vm4774_vm6, %v16112_v37, %v9875_v19  ;;  %v6386_v57 = vsel %vm4774_vm6, %v15199_v38, %v9876_v25  ;;  %v10008_v19 = vld [vmem:[%s15646_s7 + $0x50] sm:$0xff]  }
 0x6d2   :  { %v6395_v6 = vpack.c.bf16 %v6362_v21, %v6361_v12  ;;  %v6394_v54 = vpack.c.bf16 %v6386_v57, %v6385_v59  ;;  %v7675_v38 = vpack.c.bf16 %v15382_v53, %v6316_v47  ;;  %v6397_v25 = vpack.c.bf16 %v15234_v9, %v15203_v23  ;;  %v10010_v21 = vld [vmem:[%s15646_s7 + $0x10] sm:$0xff]   ;;  %v10012_v59 = vld [vmem:[%s15646_s7 + $0x58] sm:$0xff]  }
 0x6d3   :  { %v9879_v2 = vpop.permute.xlu1 %9878  ;;  %v6410_v53 = vpack.c.bf16 %v16112_v37, %v15376_v41  ;;  %v10007_v41 = vld [vmem:[%s15646_s7 + $0x88] sm:$0xff]   ;;  %v10011_v12 = vld [vmem:[%s15646_s7 + $0x90] sm:$0xff]   ;;  %v10013_v57 = vld [vmem:[%s15646_s7 + $0xd8] sm:$0xff]  }
 0x6d4   :  { %v9881_v62 = vunpack.i.h.bf16 %v9879_v2  ;;  %v9880_v50 = vunpack.i.l.bf16 %v9879_v2  ;;  %6750 = vmatprep.mubr.bf16.mxu1 %v6394_v54  ;;  %6816 = vmatmul.mubr.bf16.vlgmr.msra.gmra.mrb[96].mxu0 %v6395_v6  ;;  %v10016_v6 = vld [vmem:[%s15646_s7 + $0x60] sm:$0xff]  }
 0x6d5   :  { %7668 = vmatmul.mubr.msk.bf16.vlgmr.msra.gmra.mrb[80].mxu1 %vm15397_vm2, %v7667_v22  ;;  %7676 = vmatprep.mubr.msk.bf16.mxu0 %vm15404_vm3, %v7675_v38  ;;  %v10015_v22 = vld [vmem:[%s15646_s7 + $0x98] sm:$0xff]   ;;  %v10017_v54 = vld [vmem:[%s15646_s7 + $0xe0] sm:$0xff]   ;;  %v10020_v38 = vld [vmem:[%s15646_s7 + $0x68] sm:$0xff]  }
 0x6d6   :  { %v6387_v45 = vsel %vm4774_vm6, %v15203_v23, %v9880_v50  ;;  %v6388_v20 = vsel %vm4774_vm6, %v15234_v9, %v9881_v62  ;;  %v6363_v61 = vsel %vm4774_vm6, %v9880_v50, %v9895_v28  ;;  %8204 = vmatpush3.bf16.msra.mxu1 %v15335_v60  ;;  %v6364_v14 = vsel %vm4774_vm6, %v9881_v62, %v9896_v43  ;;  %v10000_v23 = vld [vmem:[%s15646_s7 + $0x40] sm:$0xff]   ;;  %v10021_v28 = vld [vmem:[%s15646_s7 + $0xe8] sm:$0xff]   ;;  %v10025_v43 = vld [vmem:[%s15646_s7 + $0xf0] sm:$0xff]  }
 0x6d7   :  { %v6398_v32 = vpack.c.bf16 %v6388_v20, %v6387_v45  ;;  %v9889_v36 = vpop.permute.xlu1 %9888  ;;  %8205 = vmatprep.subr.bf16.mxu1 %v9997_v13  ;;  %v6399_v47 = vpack.c.bf16 %v6364_v14, %v6363_v61  ;;  %v10001_v9 = vld [vmem:[%s15646_s7 + $0xc0] sm:$0xff]   ;;  %8057 = vmatprep.subr.bf16.mxu0 %v10000_v23  ;;  %v10022_v62 = vld [vmem:[%s15646_s7 + $0x28] sm:$0xff]   ;;  %v10026_v45 = vld [vmem:[%s15646_s7 + $0x30] sm:$0xff]  }
 0x6d8   :  { %v9891_v0 = vunpack.i.h.bf16 %v9889_v36  ;;  %v9890_v29 = vunpack.i.l.bf16 %v9889_v36  ;;  %8058 = vmatpush3.bf16.msra.mxu0 %v10002_v58  ;;  %v10019_v2 = vld [vmem:[%s15646_s7 + $0xa0] sm:$0xff]   ;;  %v10023_v50 = vld [vmem:[%s15646_s7 + $0xa8] sm:$0xff]   ;;  %v10027_v20 = vld [vmem:[%s15646_s7 + $0xb0] sm:$0xff]  }
 0x6d9   :  { %6758 = vmatprep.mubr.bf16.mxu1 %v6398_v32  ;;  %v10028_v61 = vld [vmem:[%s15646_s7 + $0x78] sm:$0xff]  }
 0x6da   :  { %v6389_v31 = vsel %vm4774_vm6, %v16112_v37, %v9890_v29  ;;  %v6390_v60 = vsel %vm4774_vm6, %v15259_v27, %v9891_v0  ;;  %8206 = vmatpush3.bf16.msra.mxu1 %v9997_v13  ;;  %v6365_v8 = vsel %vm4774_vm6, %v9890_v29, %v9905_v24  ;;  %v6366_v33 = vsel %vm4774_vm6, %v9891_v0, %v9906_v49  ;;  %v10004_v37 = vld [vmem:[%s15646_s7 + $0x48] sm:$0xff]   ;;  %v10024_v13 = vld [vmem:[%s15646_s7 + $0x70] sm:$0xff]   ;;  %v10029_v32 = vld [vmem:[%s15646_s7 + $0xf8] sm:$0xff]  }
 0x6db   :  { %v6403_v34 = vpack.c.bf16 %v6390_v60, %v6389_v31  ;;  %8207 = vmatprep.subr.bf16.mxu1 %v9998_v10  ;;  %v6404_v42 = vpack.c.bf16 %v6366_v33, %v6365_v8  ;;  %8059 = vmatprep.subr.bf16.mxu0 %v10004_v37  ;;  %v10030_v14 = vld [vmem:[%s15646_s7 + $0x38] sm:$0xff]   ;;  %v16119_v0 = vmov 0.0   ;;  %v7628_v31 = vld [vmem:[%s15645_s6] ss:$0 sm:$0xff] }
 0x6dc   :  { %6824 = vmatmul.mubr.bf16.gmra.mrb[100].mxu0 %v6399_v47  ;;  %v10031_v36 = vld [vmem:[%s15646_s7 + $0xb8] sm:$0xff]  }
 0x6dd   :  { %6759 = vmatmul.mubr.bf16.gmra.mrb[84].mxu1 %v15347_v16  ;;  %6831 = vmatprep.mubr.bf16.mxu0 %v15368_v44 }
 0x6de   :  { %v9899_v17 = vpop.permute.xlu1 %9898  ;;  %6766 = vmatprep.mubr.bf16.mxu1 %v6403_v34  ;;  %8208 = vmatpush3.bf16.msra.mxu1 %v9998_v10 }
 0x6df   :  { %v9901_v27 = vunpack.i.h.bf16 %v9899_v17  ;;  %v9900_v39 = vunpack.i.l.bf16 %v9899_v17  ;;  %8209 = vmatprep.subr.bf16.mxu1 %v9999_v4 }
 0x6e1   :  { %v6391_v3 = vsel %vm4774_vm6, %v15263_v11, %v9900_v39  ;;  %v6392_v26 = vsel %vm4774_vm6, %v15372_v18, %v9901_v27  ;;  %v10003_v11 = vld [vmem:[%s15646_s7 + $0x80] sm:$0xff]   ;;  %v10006_v18 = vld [vmem:[%s15646_s7 + $0x8] sm:$0xff]  }
 0x6e2   :  { %v9909_v16 = vpop.permute.xlu1 %9908  ;;  %v6407_v52 = vpack.c.bf16 %v6392_v26, %v6391_v3  ;;  %8210 = vmatpush3.bf16.msra.mxu1 %v9999_v4  ;;  %8060 = vmatpush3.bf16.msra.mxu0 %v10006_v18 }
 0x6e3   :  { %v9911_v5 = vunpack.i.h.bf16 %v9909_v16  ;;  %v9910_v51 = vunpack.i.l.bf16 %v9909_v16  ;;  %8079 = vmatprep.subr.bf16.mxu1 %v10001_v9  ;;  %8061 = vmatprep.subr.bf16.mxu0 %v10008_v19 }
 0x6e4   :  { %6832 = vmatmul.mubr.bf16.gmra.mrb[104].mxu0 %v6404_v42 }
 0x6e5   :  { %7672 = vmatmul.mubr.msk.bf16.gmra.mrb[88].mxu1 %vm15397_vm2, %v7671_v63  ;;  %7680 = vmatprep.mubr.msk.bf16.mxu0 %vm15404_vm3, %v7679_v30  ;;  %v6367_v46 = vsel %vm4774_vm6, %v9900_v39, %v9910_v51  ;;  %v6368_v35 = vsel %vm4774_vm6, %v9901_v27, %v9911_v5 }
 0x6e6   :  { %6774 = vmatprep.mubr.bf16.mxu1 %v6407_v52  ;;  %v6408_v1 = vpack.c.bf16 %v6368_v35, %v6367_v46  ;;  %8062 = vmatpush3.bf16.msra.mxu0 %v10010_v21 }
 0x6e7   :  { %8063 = vmatprep.subr.bf16.mxu0 %v10012_v59 }
 0x6ea   :  { %8064 = vmatpush3.bf16.msra.mxu0 %v10014_v7 }
 0x6eb   :  { %8065 = vmatprep.subr.bf16.mxu0 %v10016_v6 }
 0x6ec   :  { %6840 = vmatmul.mubr.bf16.gmra.mrb[108].mxu0 %v6408_v1 }
 0x6ed   :  { %6775 = vmatmul.mubr.bf16.gmra.mrb[92].mxu1 %v15368_v44  ;;  %v10005_v44 = vld [vmem:[%s15646_s7 + $0xc8] sm:$0xff]  }
 0x6ee   :  { %8211 = vmatprep.mubr.msk.bf16.mxu1 %vm4774_vm6, %v6397_v25  ;;  %8066 = vmatpush3.bf16.msra.mxu0 %v10018_v55 }
 0x6ef   :  { %8067 = vmatprep.subr.bf16.mxu0 %v10020_v38 }
 0x6f2   :  { %8068 = vmatpush3.bf16.msra.mxu0 %v10022_v62 }
 0x6f3   :  { %8069 = vmatprep.subr.bf16.mxu0 %v10024_v13 }
 0x6f5   :  { %8212 = vmatmul.mubr.msk.bf16.vlgmr.msra.gmra.mrb[96].mxu1 %vm4774_vm6, %v6401_v40 }
 0x6f6   :  { %8215 = vmatprep.mubr.msk.bf16.mxu1 %vm4774_vm6, %v6406_v56  ;;  %8080 = vmatpush3.bf16.msra.mxu1 %v10003_v11 }
 0x6f7   :  { %8081 = vmatprep.subr.bf16.mxu1 %v10005_v44  ;;  %8070 = vmatpush3.bf16.msra.mxu0 %v10026_v45 }
 0x6f8   :  { %8071 = vmatprep.subr.bf16.mxu0 %v10028_v61 }
 0x6fa   :  { %8082 = vmatpush3.bf16.msra.mxu1 %v10007_v41 }
 0x6fb   :  { %8083 = vmatprep.subr.bf16.mxu1 %v10009_v15  ;;  %8072 = vmatpush3.bf16.msra.mxu0 %v10030_v14 }
 0x6fc   :  { %8219 = vmatprep.subr.bf16.mxu0 %v16119_v0 }
 0x6fd   :  { %8216 = vmatmul.mubr.msk.bf16.gmra.mrb[100].mxu1 %vm4774_vm6, %v6410_v53 }
 0x6fe   :  { %8084 = vmatpush3.bf16.msra.mxu1 %v10011_v12 }
 0x6ff   :  { %8085 = vmatprep.subr.bf16.mxu1 %v10013_v57 }
 0x702   :  { %8086 = vmatpush3.bf16.msra.mxu1 %v10015_v22 }
 0x703   :  { %8087 = vmatprep.subr.bf16.mxu1 %v10017_v54 }
 0x706   :  { %8088 = vmatpush3.bf16.msra.mxu1 %v10019_v2 }
 0x707   :  { %8089 = vmatprep.subr.bf16.mxu1 %v10021_v28 }
 0x70a   :  { %8090 = vmatpush3.bf16.msra.mxu1 %v10023_v50 }
 0x70b   :  { %8091 = vmatprep.subr.bf16.mxu1 %v10025_v43 }
 0x70e   :  { %8092 = vmatpush3.bf16.msra.mxu1 %v10027_v20 }
 0x70f   :  { %8093 = vmatprep.subr.bf16.mxu1 %v10029_v32 }
 0x712   :  { %8094 = vmatpush3.bf16.msra.mxu1 %v10031_v36 }
 0x713   :  { %8239 = vmatprep.subr.bf16.mxu1 %v16119_v0 }
 0x7a7   :  { %v8025_v29 = vpop.f32.mrb[96].mxu0 }
 0x7a8   :  { %v7985_v10 = vpop.f32.mrb[80].mxu1  ;;  %v8026_v48 = vpop.f32.mrb[97].mxu0 }
 0x7a9   :  { %v8027_v47 = vadd.f32 %v8026_v48, %v8025_v29  ;;  %v7986_v60 = vpop.f32.mrb[81].mxu1  ;;  %v8028_v34 = vpop.f32.mrb[98].mxu0 }
 0x7aa   :  { %v7987_v49 = vadd.f32 %v7986_v60, %v7985_v10  ;;  %v7988_v24 = vpop.f32.mrb[82].mxu1  ;;  %v8029_v4 = vpop.f32.mrb[99].mxu0 }
 0x7ab   :  { %v8030_v8 = vadd.f32 %v8029_v4, %v8028_v34  ;;  %v7989_v33 = vpop.f32.mrb[83].mxu1 }
 0x7ac   :  { %v6753_v17 = vadd.f32 %v7987_v49, %v7628_v31  ;;  %v7990_v27 = vadd.f32 %v7989_v33, %v7988_v24 }
 0x7ae   :  { %v6756_v39 = vadd.f32 %v7990_v27, %v7628_v31  ;;  %v6818_v42 = vadd.f32 %v8027_v47, %v6753_v17 }
 0x7af   :  { %v8031_v3 = vpop.f32.mrb[100].mxu0 }
 0x7b0   :  { %v7991_v26 = vpop.f32.mrb[84].mxu1  ;;  %v8032_v16 = vpop.f32.mrb[101].mxu0  ;;  %v6821_v5 = vadd.f32 %v8030_v8, %v6756_v39 }
 0x7b1   :  { %v8033_v51 = vadd.f32 %v8032_v16, %v8031_v3  ;;  %v7992_v52 = vpop.f32.mrb[85].mxu1  ;;  %v8034_v63 = vpop.f32.mrb[102].mxu0 }
 0x7b2   :  { %v7993_v30 = vadd.f32 %v7992_v52, %v7991_v26  ;;  %v7994_v46 = vpop.f32.mrb[86].mxu1  ;;  %v8035_v35 = vpop.f32.mrb[103].mxu0 }
 0x7b3   :  { %v8036_v1 = vadd.f32 %v8035_v35, %v8034_v63  ;;  %v7995_v25 = vpop.f32.mrb[87].mxu1 }
 0x7b4   :  { %v6761_v40 = vadd.f32 %v7993_v30, %v7628_v31  ;;  %v7996_v56 = vadd.f32 %v7995_v25, %v7994_v46 }
 0x7b6   :  { %v6764_v53 = vadd.f32 %v7996_v56, %v7628_v31  ;;  %v6826_v23 = vadd.f32 %v8033_v51, %v6761_v40 }
 0x7b7   :  { %v8037_v9 = vpop.f32.mrb[104].mxu0 }
 0x7b8   :  { %v7997_v58 = vpop.f32.mrb[88].mxu1  ;;  %v8038_v11 = vpop.f32.mrb[105].mxu0  ;;  %v6829_v37 = vadd.f32 %v8036_v1, %v6764_v53 }
 0x7b9   :  { %v8039_v44 = vadd.f32 %v8038_v11, %v8037_v9  ;;  %v7998_v18 = vpop.f32.mrb[89].mxu1  ;;  %v8040_v41 = vpop.f32.mrb[106].mxu0 }
 0x7ba   :  { %v7999_v19 = vadd.f32 %v7998_v18, %v7997_v58  ;;  %v8000_v15 = vpop.f32.mrb[90].mxu1  ;;  %v8041_v21 = vpop.f32.mrb[107].mxu0 }
 0x7bb   :  { %v8042_v12 = vadd.f32 %v8041_v21, %v8040_v41  ;;  %v8001_v59 = vpop.f32.mrb[91].mxu1 }
 0x7bc   :  { %v6769_v57 = vadd.f32 %v7999_v19, %v7628_v31  ;;  %v8002_v7 = vadd.f32 %v8001_v59, %v8000_v15 }
 0x7be   :  { %v6772_v22 = vadd.f32 %v8002_v7, %v7628_v31  ;;  %v6834_v6 = vadd.f32 %v8039_v44, %v6769_v57 }
 0x7bf   :  { %v8043_v54 = vpop.f32.mrb[108].mxu0 }
 0x7c0   :  { %v8003_v55 = vpop.f32.mrb[92].mxu1  ;;  %v8044_v2 = vpop.f32.mrb[109].mxu0  ;;  %v6837_v38 = vadd.f32 %v8042_v12, %v6772_v22 }
 0x7c1   :  { %v8004_v28 = vpop.f32.mrb[93].mxu1  ;;  %v8045_v62 = vadd.f32 %v8044_v2, %v8043_v54  ;;  %v8046_v50 = vpop.f32.mrb[110].mxu0 }
 0x7c2   :  { %v8005_v13 = vadd.f32 %v8004_v28, %v8003_v55  ;;  %v8006_v43 = vpop.f32.mrb[94].mxu1  ;;  %v8047_v45 = vpop.f32.mrb[111].mxu0 }
 0x7c3   :  { %v8007_v20 = vpop.f32.mrb[95].mxu1  ;;  %v8048_v61 = vadd.f32 %v8047_v45, %v8046_v50  ;;  %v10032_v45 = vld [vmem:[%s15648_s9] sm:$0xff]  }
 0x7c4   :  { %v6777_v32 = vadd.f32 %v8005_v13, %v7628_v31  ;;  %v8008_v14 = vadd.f32 %v8007_v20, %v8006_v43 }
 0x7c6   :  { %v6780_v36 = vadd.f32 %v8008_v14, %v7628_v31  ;;  %v6842_v29 = vadd.f32 %v8045_v62, %v6777_v32  ;;  %v10034_v32 = vld [vmem:[%s15648_s9 + $0x10] sm:$0xff]   ;;  %v10035_v14 = vld [vmem:[%s15648_s9 + $0x18] sm:$0xff]  }
 0x7c8   :  { %v8213_v10 = vpop.f32.mrb[96].mxu1  ;;  %v6845_v48 = vadd.f32 %v8048_v61, %v6780_v36  ;;  %v10033_v61 = vld [vmem:[%s15648_s9 + $0x8] sm:$0xff]   ;;  %v10036_v36 = vld [vmem:[%s15648_s9 + $0x20] sm:$0xff]  }
 0x7c9   :  { %v6891_v47 = vadd.f32 %v8213_v10, %v6826_v23  ;;  %v6882_v60 = vpop.f32.mrb[97].mxu1  ;;  %v10038_v10 = vld [vmem:[%s15648_s9 + $0x30] sm:$0xff]  }
 0x7ca   :  { %v6883_v34 = vadd.f32 %v6882_v60, %v6818_v42  ;;  %v8214_v49 = vpop.f32.mrb[98].mxu1  ;;  %v10039_v60 = vld [vmem:[%s15648_s9 + $0x38] sm:$0xff]  }
 0x7cb   :  { %v6894_v24 = vadd.f32 %v8214_v49, %v6829_v37  ;;  %v6885_v4 = vpop.f32.mrb[99].mxu1  ;;  %v6915_v33 = vmax.f32 %v6891_v47, 0.0  ;;  %v10041_v47 = vld [vmem:[%s15650_s11 + $0x8] sm:$0xff]  }
 0x7cc   :  { %v6886_v8 = vadd.f32 %v6885_v4, %v6821_v5  ;;  %v6913_v27 = vmax.f32 %v6883_v34, 0.0 }
 0x7cd   :  { %v6916_v17 = vmax.f32 %v6894_v24, 0.0 }
 0x7ce   :  { %v6914_v39 = vmax.f32 %v6886_v8, 0.0  ;;  %v7685_v8 = vld [vmem:[%s15647_s8] ss:$0 sm:$0xff] }
 0x7cf   :  { %v6922_v3 = vmax.f32 %v6915_v33, %v6916_v17 }
 0x7d0   :  { %v6921_v26 = vmax.f32 %v6913_v27, %v6914_v39  ;;  %v8217_v16 = vpop.f32.mrb[100].mxu1 }
 0x7d1   :  { %v6930_v51 = vrot.slane %v6922_v3, 1  ;;  %v6907_v52 = vadd.f32 %v8217_v16, %v6842_v29  ;;  %v6898_v31 = vpop.f32.mrb[101].mxu1  ;;  %v10037_v29 = vld [vmem:[%s15648_s9 + $0x28] sm:$0xff]  }
 0x7d2   :  { %v6929_v63 = vrot.slane %v6921_v26, 1  ;;  %v6899_v30 = vadd.f32 %v6898_v31, %v6834_v6  ;;  %v8218_v46 = vpop.f32.mrb[102].mxu1 }
 0x7d3   :  { %v6938_v35 = vmax.f32 %v6922_v3, %v6930_v51  ;;  %v6910_v1 = vadd.f32 %v8218_v46, %v6845_v48  ;;  %v6901_v42 = vpop.f32.mrb[103].mxu1  ;;  %v6919_v56 = vmax.f32 %v6907_v52, 0.0  ;;  %v10040_v48 = vld [vmem:[%s15650_s11] sm:$0xff]  }
 0x7d4   :  { %v6937_v25 = vmax.f32 %v6921_v26, %v6929_v63  ;;  %v6902_v40 = vadd.f32 %v6901_v42, %v6837_v38  ;;  %v6917_v53 = vmax.f32 %v6899_v30, 0.0  ;;  %v10042_v63 = vld [vmem:[%s15650_s11 + $0x10] sm:$0xff]   ;;  %v10043_v30 = vld [vmem:[%s15650_s11 + $0x18] sm:$0xff]   ;;  %v7718_v46 = vld [vmem:[%s15649_s10] ss:$0 sm:$0xff]  ;;  %s10085_s11 = smov [#allocation2]  }
 0x7d5   :  { %v6920_v5 = vmax.f32 %v6910_v1, 0.0  ;;  %v6946_v9 = vrot.slane %v6938_v35, 1  ;;  %s7526_s22 = sshll.u32 %s10085_s11, 4  ;;  %s7527_s22 = int_to_ptr.vmem [resolvable:$true] %s7526_s22 }
 0x7d6   :  { %v6918_v23 = vmax.f32 %v6902_v40, 0.0  ;;  %v6945_v11 = vrot.slane %v6937_v25, 1  ;;  %s10046_s10 = scalar_lea.vmem %s7527_s22, 32  ;;  %p10051_p1 = scmp.lt.s32.totalorder %s7527_s22, %s7527_s22 }
 0x7d7   :  { %v6924_v58 = vmax.f32 %v6919_v56, %v6920_v5  ;;  %v6954_v41 = vsel %vm4168_vm14, %v6938_v35, %v6946_v9  ;;  %p10047_p0 = scmp.ne.s32.totalorder %s7527_s22, %s10046_s10  ;;  %p10052_p2 = scmp.lt.s32.totalorder %s10046_s10, %s10046_s10 }
 0x7d8   :  { %v6923_v37 = vmax.f32 %v6917_v53, %v6918_v23  ;;  %v6953_v15 = vsel %vm4168_vm14, %v6937_v25, %v6945_v11  ;;  %v6971_v57 = vrot.slane %v6954_v41, 1  ;;  %v7727_v53 = vld [vmem:[%s15651_s12] ss:$0 sm:$0xff] }
 0x7d9   :  { %v6932_v44 = vrot.slane %v6924_v58, 1  ;;  %v6963_v22 = vrot.slane %v6953_v15, 1  ;;  %p10053_p3 = por %p10052_p2, %p10051_p1 }
 0x7da   :  { %v6931_v18 = vrot.slane %v6923_v37, 1 }
 0x7db   :  { %v6940_v19 = vmax.f32 %v6924_v58, %v6932_v44  ;;  %p10054_p4 = pnand %p10053_p3, %p10047_p0 }
 0x7dc   :  { %v6939_v21 = vmax.f32 %v6923_v37, %v6931_v18 }
 0x7dd   :  { %v6948_v12 = vrot.slane %v6940_v19, 1 }
 0x7de   :  { %v6947_v59 = vrot.slane %v6939_v21, 1 }
 0x7df   :  { %v6956_v7 = vsel %vm4168_vm14, %v6940_v19, %v6948_v12 }
 0x7e0   :  { %v6968_v6 = vrot.slane %v6956_v7, 7  ;;  %v6972_v54 = vsel %vm6960_vm4, %v6956_v7, %v6971_v57  ;;  %v6955_v55 = vsel %vm4168_vm14, %v6939_v21, %v6947_v59 }
 0x7e1   :  { %v6977_v2 = vpack.c.bf16 %v6972_v54, %v6972_v54  ;;  %v6959_v38 = vrot.slane %v6955_v55, 7  ;;  %v6964_v28 = vsel %vm6960_vm4, %v6955_v55, %v6963_v22 }
 0x7e2   :  { %v6969_v62 = vsel %vm6960_vm4, %v6968_v6, %v6954_v41  ;;  %v6975_v50 = vpack.c.bf16 %v6964_v28, %v6964_v28 }
 0x7e3   :  { %7313 = vmatprep.mubr.bf16.mxu1 %v6977_v2  ;;  %v6961_v13 = vsel %vm6960_vm4, %v6959_v38, %v6953_v15  ;;  %v6976_v43 = vpack.c.bf16 %v6969_v62, %v6969_v62 }
 0x7e4   :  { %7273 = vmatprep.mubr.bf16.mxu0 %v6975_v50  ;;  %v6974_v20 = vpack.c.bf16 %v6961_v13, %v6961_v13 }
 0x7e5   :  { %7314 = vmatmul.mubr.bf16.vlgmr.msra.gmra.mrb[104].mxu1 %v6976_v43 }
 0x7e6   :  { %7274 = vmatmul.mubr.bf16.vlgmr.msra.gmra.mrb[112].mxu0 %v6974_v20  ;;  %8247 = vmatprep.mubr.msk.bf16.mxu1 %vm10084_vm8, %v16119_v0 }
 0x7e7   :  { %8220 = vmatpush3.bf16.msra.mxu0 %v10032_v45  ;;  %8235 = vmatprep.mubr.msk.bf16.mxu0 %vm10084_vm8, %v16119_v0 }
 0x7e8   :  { %8221 = vmatprep.subr.bf16.mxu0 %v16119_v0  ;;  %8240 = vmatpush3.bf16.msra.mxu1 %v10040_v48 }
 0x7e9   :  { %8241 = vmatprep.subr.bf16.mxu1 %v16119_v0 }
 0x7eb   :  { %8222 = vmatpush3.bf16.msra.mxu0 %v10033_v61 }
 0x7ec   :  { %8223 = vmatprep.subr.bf16.mxu0 %v16119_v0  ;;  %8242 = vmatpush3.bf16.msra.mxu1 %v10041_v47 }
 0x7ed   :  { %8243 = vmatprep.subr.bf16.mxu1 %v16119_v0 }
 0x7ef   :  { %8224 = vmatpush3.bf16.msra.mxu0 %v10034_v32 }
 0x7f0   :  { %8225 = vmatprep.subr.bf16.mxu0 %v16119_v0  ;;  %8244 = vmatpush3.bf16.msra.mxu1 %v10042_v63 }
 0x7f1   :  { %8245 = vmatprep.subr.bf16.mxu1 %v16119_v0 }
 0x7f3   :  { %8226 = vmatpush3.bf16.msra.mxu0 %v10035_v14 }
 0x7f4   :  { %8227 = vmatprep.subr.bf16.mxu0 %v16119_v0  ;;  %8246 = vmatpush3.bf16.msra.mxu1 %v10043_v30 }
 0x7f7   :  { %8228 = vmatpush3.bf16.msra.mxu0 %v10036_v36 }
 0x7f8   :  { %8229 = vmatprep.subr.bf16.mxu0 %v16119_v0 }
 0x7fb   :  { %8230 = vmatpush3.bf16.msra.mxu0 %v10037_v29 }
 0x7fc   :  { %8231 = vmatprep.subr.bf16.mxu0 %v16119_v0 }
 0x7ff   :  { %8232 = vmatpush3.bf16.msra.mxu0 %v10038_v10 }
 0x800   :  { %8233 = vmatprep.subr.bf16.mxu0 %v16119_v0 }
 0x803   :  { %8234 = vmatpush3.bf16.msra.mxu0 %v10039_v60 }
 0x8b8   :  { %v8095_v34 = vpop.f32.mrb[104].mxu1 }
 0x8b9   :  { %v8073_v49 = vpop.f32.mrb[112].mxu0  ;;  %v8096_v24 = vpop.f32.mrb[105].mxu1 }
 0x8ba   :  { %v8097_v4 = vadd.f32 %v8096_v24, %v8095_v34  ;;  %v8074_v33 = vpop.f32.mrb[113].mxu0  ;;  %v8098_v17 = vpop.f32.mrb[106].mxu1 }
 0x8bb   :  { %v8075_v27 = vadd.f32 %v8074_v33, %v8073_v49  ;;  %v8076_v39 = vpop.f32.mrb[114].mxu0  ;;  %v8099_v3 = vpop.f32.mrb[107].mxu1 }
 0x8bc   :  { %v8077_v26 = vpop.f32.mrb[115].mxu0 }
 0x8bd   :  { %v7276_v16 = vadd.f32 %v8075_v27, %v7685_v8 }
 0x8bf   :  { %v7316_v51 = vadd.f32 %v8097_v4, %v7276_v16 }
 0x8c1   :  { %v7321_v52 = vmax.f32 %v7316_v51, 0.0 }
 0x8c3   :  { %v7322_v31 = vpack.c.bf16 %v7321_v52, %v7321_v52 }
 0x8c5   :  { %8236 = vmatmul.mubr.bf16.vlgmr.msra.gmra.mrb[116].mxu0 %v7322_v31 }
 0x998   :  { %v7428_v35 = vpop.f32.mrb[116].mxu0 }
 0x999   :  { %v7429_v1 = vadd.f32 %v7718_v46, %v7428_v35  ;;  %v8237_v42 = vpop.f32.mrb[117].mxu0 }
 0x99a   :  { %v7431_v25 = vpop.f32.mrb[118].mxu0 }
 0x99b   :  { %v7434_v40 = vmax.f32 %v7429_v1, 0.0  ;;  %v8238_v56 = vpop.f32.mrb[119].mxu0 }
 0x99d   :  { %v7435_v5 = vpack.c.bf16 %v7434_v40, %v7434_v40 }
 0x99f   :  { %8248 = vmatmul.mubr.msk.bf16.vlgmr.msra.gmra.mrb[108].mxu1 %vm4774_vm6, %v7435_v5 }
 0xa72   :  { %v7512_v0 = vpop.f32.mrb[108].mxu1 }
 0xa73   :  { %v7513_v23 = vadd.f32 %v7727_v53, %v7512_v0  ;;  %v8249_v9 = vpop.f32.mrb[109].mxu1 }
 0xa74   :  { %v7515_v58 = vpop.f32.mrb[110].mxu1 }
 0xa75   :  { %v8250_v11 = vpop.f32.mrb[111].mxu1  ;;  %7519 = vst.msk [vmem:[#allocation2] sm:$0x3] %vm7518_vm9, %v7513_v23 }
 0xa76   :  { %10057 = shalt.err (!%p10054_p4)
}
 0xa77   :  { %s10058_s12 = scalar_lea.hbm %s15652_s13, 32 }
 0xa78   :  { %p10059_p5 = scmp.ne.s32.totalorder %s15652_s13, %s10058_s12  ;;  %p10062_p6 = scmp.lt.u32.totalorder %s10058_s12, %s15652_s13 }
 0xa7a   :  { %p10064_p7 = pnand %p10062_p6, %p10059_p5 }
 0xa7c   :  { %10067 = shalt.err (!%p10064_p7)
}
 0xa7d   :  { %7529 = dma.vmem_to_hbm [thread:$0]  %s7527_s22, 32, %s15652_s13, [#allocation3]  }
 0xa7e   :  { %10068 = dma.done.wait [#allocation3], 32  }
 0xa7f   :  { %10069 = vsyncadd [#allocation3], 4294967264 }
 0xa80   :  { %7533 = vsyncpa [#allocation3], 1 }

</bundles_post_ra>
